<compile_context>
chip_gen: v5e
topology: v5e:2x2
jax: 0.10.0
libtpu: 0.0.40
codegen_flags: <defaults>
</compile_context>

<pallas_src>
import math
import functools

import jax
import jax.numpy as jnp
from jax import lax
from jax.experimental import pallas as pl
from jax.experimental.pallas import tpu as pltpu

F32 = jnp.float32
_VMEM = pl.BlockSpec(memory_space=pltpu.MemorySpace.VMEM)


# ----------------------------------------------------------------------------
# In-kernel helpers (trace-time only)
# ----------------------------------------------------------------------------
def _mm(a, b):
    return jnp.dot(a, b, preferred_element_type=jnp.float32)


def _softmax(x):
    m = jnp.max(x, axis=-1, keepdims=True)
    e = jnp.exp(x - m)
    s = jnp.sum(e, axis=-1, keepdims=True)
    return e * pl.reciprocal(s, approx=True)


def _ln(x, w, b, eps):
    u = jnp.mean(x, axis=-1, keepdims=True)
    xc = x - u
    s = jnp.mean(xc * xc, axis=-1, keepdims=True)
    return xc * lax.rsqrt(s + eps) * w + b


# ----------------------------------------------------------------------------
# Kernel 1: fused bidirectional GRU (final hidden states only)
# ----------------------------------------------------------------------------
def _bigru_kernel(x_ref, wif_ref, whf_ref, bif_ref, bhf_ref,
                  wib_ref, whb_ref, bib_ref, bhb_ref, o_ref):
    L, Bsz, _ = x_ref.shape
    Hd = whf_ref.shape[0]
    wif, whf, bif, bhf = wif_ref[...], whf_ref[...], bif_ref[...], bhf_ref[...]
    wib, whb, bib, bhb = wib_ref[...], whb_ref[...], bib_ref[...], bhb_ref[...]

    def cell(x_t, h, wi, wh, bi, bh):
        gi = _mm(x_t, wi) + bi
        gh = _mm(h, wh) + bh
        r = jax.nn.sigmoid(gi[:, :Hd] + gh[:, :Hd])
        z = jax.nn.sigmoid(gi[:, Hd:2 * Hd] + gh[:, Hd:2 * Hd])
        n = jnp.tanh(gi[:, 2 * Hd:] + r * gh[:, 2 * Hd:])
        return (1.0 - z) * n + z * h

    hf = jnp.zeros((Bsz, Hd), jnp.float32)
    hb = jnp.zeros((Bsz, Hd), jnp.float32)
    for t in range(L):                       # tiny static trip-count, unrolled
        hf = cell(x_ref[t], hf, wif, whf, bif, bhf)
        hb = cell(x_ref[L - 1 - t], hb, wib, whb, bib, bhb)
    o_ref[...] = hf + hb


def _gru_call(nodes_tm, p):
    L, Bsz, _ = nodes_tm.shape
    Hd = p['gru_w_hh_f'].shape[0]
    return pl.pallas_call(
        _bigru_kernel,
        out_shape=jax.ShapeDtypeStruct((Bsz, Hd), F32),
        in_specs=[_VMEM] * 9,
        out_specs=_VMEM,
    )(nodes_tm, p['gru_w_ih_f'], p['gru_w_hh_f'], p['gru_b_ih_f'], p['gru_b_hh_f'],
      p['gru_w_ih_b'], p['gru_w_hh_b'], p['gru_b_ih_b'], p['gru_b_hh_b'])


# ----------------------------------------------------------------------------
# Kernel 2: SelfAttention embedding + G_T block (+ add_norm) fully fused
# ----------------------------------------------------------------------------
def _gt_block_kernel(nodes_ref, bias_ref,
                     gfc_ref, gfcT_ref, tfc_ref, tfcT_ref,
                     wg_ref, bg_ref, wt_ref, bt_ref,
                     tdw_ref, tdb_ref, tlw_ref, tlb_ref,
                     gdw_ref, gdb_ref, glw_ref, glb_ref,
                     nw_ref, nb_ref,
                     g_out_ref, t_out_ref, *, heads):
    B, N, H = nodes_ref.shape
    ah = 2 * H                     # all_head_size of the G_T attention
    qk = ah // heads               # query/key head size
    vd = H // heads                # value head size (out_size // heads)
    scale = 1.0 / math.sqrt(qk)

    gfc, gfcT = gfc_ref[...], gfcT_ref[...]
    tfc, tfcT = tfc_ref[...], tfcT_ref[...]
    wg, bg = wg_ref[...], bg_ref[...]
    wt, bt = wt_ref[...], bt_ref[...]

    for b in range(B):
        x = nodes_ref[b]                       # (N, H)
        bias = bias_ref[b]                     # (1, N), 0 / -10000 per key

        # SelfAttention embedding (softmax over the feature dim, as in reference)
        hg = _mm(_softmax(_mm(x, gfcT)), gfc)
        ht = _mm(_softmax(_mm(x, tfcT)), tfc)
        g_in = hg + x
        t_in = ht + x

        # fused projections: G-stream -> [q | k_T | v_T], T-stream -> [k | q_T | v]
        pg = _mm(g_in, wg) + bg                # (N, 2*ah + H)
        pt = _mm(t_in, wt) + bt
        q, kT, vT = pg[:, :ah], pg[:, ah:2 * ah], pg[:, 2 * ah:]
        k, qT, v = pt[:, :ah], pt[:, ah:2 * ah], pt[:, 2 * ah:]

        ctx_g, ctx_t = [], []
        for h in range(heads):
            sqk = slice(h * qk, (h + 1) * qk)
            sv = slice(h * vd, (h + 1) * vd)
            pg_h = _softmax(_mm(q[:, sqk], k[:, sqk].T) * scale + bias)
            pt_h = _softmax(_mm(qT[:, sqk], kT[:, sqk].T) * scale + bias)
            ctx_g.append(_mm(pg_h, v[:, sv]))
            ctx_t.append(_mm(pt_h, vT[:, sv]))
        ctx_g = jnp.concatenate(ctx_g, axis=-1)      # (N, H)
        ctx_t = jnp.concatenate(ctx_t, axis=-1)

        # SelfOutput (dense + residual + LN eps=1e-12), then DAMT add_norm LN (1e-5)
        h_t = _ln(_mm(ctx_t, tdw_ref[...]) + tdb_ref[...] + t_in,
                  tlw_ref[...], tlb_ref[...], 1e-12)
        h_g = _ln(_mm(ctx_g, gdw_ref[...]) + gdb_ref[...] + g_in,
                  glw_ref[...], glb_ref[...], 1e-12)
        g_out_ref[b] = _ln(h_g + x, nw_ref[...], nb_ref[...], 1e-5)
        t_out_ref[b] = _ln(h_t + x, nw_ref[...], nb_ref[...], 1e-5)


def _gt_call(nodes, gt_bias, p):
    B, N, H = nodes.shape
    sd = jax.ShapeDtypeStruct((B, N, H), F32)
    return pl.pallas_call(
        functools.partial(_gt_block_kernel, heads=4),   # fixed 4 heads in reference
        out_shape=(sd, sd),
        in_specs=[_VMEM] * 20,
        out_specs=(_VMEM, _VMEM),
    )(nodes, gt_bias,
      p['G_fc_w'], p['G_fc_wT'], p['T_fc_w'], p['T_fc_wT'],
      p['gt_wg'], p['gt_bg'], p['gt_wt'], p['gt_bt'],
      p['T_out_dense_w'], p['T_out_dense_b'], p['T_out_ln_w'], p['T_out_ln_b'],
      p['G_out_dense_w'], p['G_out_dense_b'], p['G_out_ln_w'], p['G_out_ln_b'],
      p['norm_w'], p['norm_b'])


# ----------------------------------------------------------------------------
# Kernel 3: one StructureAwareAttention layer fully fused
# ----------------------------------------------------------------------------
def _gnn_kernel(nodes_ref, bias_ref, paths_ref,
                wqkv_ref, bqkv_ref, plnw_ref, plnb_ref,
                wskv_ref, bskv_ref,
                wo_ref, bo_ref, nw_ref, nb_ref,
                out_ref, *, heads):
    B, N, H = nodes_ref.shape
    hd = H // heads
    scale = hd ** -0.5

    wqkv, bqkv = wqkv_ref[...], bqkv_ref[...]
    plnw, plnb = plnw_ref[...], plnb_ref[...]
    wskv, bskv = wskv_ref[...], bskv_ref[...]

    for b in range(B):
        x = nodes_ref[b]                        # (N, H)
        bias = bias_ref[b]                      # (1, N), 0 / -1e9 per key
        qkv = _mm(x, wqkv) + bqkv               # (N, 3H)
        q = qkv[:, :H] * scale
        k = qkv[:, H:2 * H]
        v = qkv[:, 2 * H:]

        pth_b = paths_ref[b]                    # (N, N, PH)
        sk_list, skT_list, sv_list = [], [], []
        for i in range(N):
            pn_i = _ln(pth_b[i], plnw, plnb, 1e-5)          # (N, PH)
            skv_i = _mm(pn_i, wskv) + bskv                   # (N, 2*hd)
            sk_i = skv_i[:, :hd]
            sv_i = skv_i[:, hd:]
            sk_list.append(sk_i)
            skT_list.append(sk_i.T)
            sv_list.append(sv_i)

        heads_out = []
        for h in range(heads):
            qh = q[:, h * hd:(h + 1) * hd]
            kh = k[:, h * hd:(h + 1) * hd]
            vh = v[:, h * hd:(h + 1) * hd]
            w = _mm(qh, kh.T)                                # (N, N)
            ws = jnp.concatenate(
                [_mm(qh[i:i + 1, :], skT_list[i]) for i in range(N)], axis=0)
            w = _softmax(w + ws + bias)
            ctx = _mm(w, vh)                                 # (N, hd)
            cs = jnp.concatenate(
                [_mm(w[i:i + 1, :], sv_list[i]) for i in range(N)], axis=0)
            heads_out.append(ctx + cs)
        out = jnp.concatenate(heads_out, axis=-1)            # (N, H)
        out = jnp.maximum(_mm(out, wo_ref[...]) + bo_ref[...], 0.0)   # ReLU
        out_ref[b] = _ln(x + out, nw_ref[...], nb_ref[...], 1e-5)


def _gnn_call(nodes, bias, paths4, p, heads):
    B, N, H = nodes.shape
    return pl.pallas_call(
        functools.partial(_gnn_kernel, heads=heads),
        out_shape=jax.ShapeDtypeStruct((B, N, H), F32),
        in_specs=[_VMEM] * 13,
        out_specs=_VMEM,
    )(nodes, bias, paths4,
      p['gnn_wqkv'], p['gnn_bqkv'], p['gnn_pathln_w'], p['gnn_pathln_b'],
      p['gnn_wskv'], p['gnn_bskv'],
      p['gnn_o_w'], p['gnn_o_b'], p['gnn_norm_w'], p['gnn_norm_b'])


# ----------------------------------------------------------------------------
# Kernel 4: fused PathUpdateModel (r|z as one matmul; gates in-kernel)
# ----------------------------------------------------------------------------
def _path_update_kernel(cat_ref, hx_ref, wrz_ref, brz_ref, wc_ref, bc_ref,
                        wu_ref, bu_ref, out_ref):
    PH = hx_ref.shape[-1]
    cat = cat_ref[...]                     # (R, 2H)
    hx = hx_ref[...]                       # (R, PH)
    rz_in = jnp.concatenate([cat, hx], axis=-1)
    rz = jax.nn.sigmoid(_mm(rz_in, wrz_ref[...]) + brz_ref[...])   # (R, 2*PH)
    r = rz[:, :PH]
    z = rz[:, PH:]
    u = jnp.tanh(_mm(cat, wc_ref[...]) + bc_ref[...]
                 + r * (_mm(hx, wu_ref[...]) + bu_ref[...]))
    out_ref[...] = z * hx + (1.0 - z) * u


def _path_update_call(cat_flat, hx_flat, p):
    R, PH = hx_flat.shape
    return pl.pallas_call(
        _path_update_kernel,
        out_shape=jax.ShapeDtypeStruct((R, PH), F32),
        in_specs=[_VMEM] * 8,
        out_specs=_VMEM,
    )(cat_flat, hx_flat, p['pu_wrz'], p['pu_brz'], p['pu_c_w'], p['pu_c_b'],
      p['pu_u_w'], p['pu_u_b'])


# ----------------------------------------------------------------------------
# Host-side glue (embedding gathers, pairwise node features)
# ----------------------------------------------------------------------------
def path_embedding(speakers, turns, p, valid_dist):
    B, N, _ = speakers.shape
    sp = p['emb_speaker'][speakers]
    tu = p['emb_turn'][turns]
    idx = jnp.arange(N)
    pool = idx[None, :] - idx[:, None]
    pool = jnp.clip(pool, -valid_dist - 1, valid_dist + 1) + valid_dist + 1
    pos = p['emb_position'][pool]
    pos = jnp.broadcast_to(pos[None], (B, N, N, pos.shape[-1]))
    return jnp.concatenate([sp, tu, pos], axis=-1)


def _build_cat_nodes(nodes):
    B, N, H = nodes.shape
    ni = jnp.broadcast_to(nodes[:, None, :, :], (B, N, N, H))   # [b,i,j] = nodes[b,j]
    cat = jnp.concatenate([ni, jnp.swapaxes(ni, 1, 2)], axis=-1)
    return cat.reshape(B * N * N, 2 * H)


# ----------------------------------------------------------------------------
# DAMT forward (jitted core: one XLA program containing 10 fused pallas_calls)
# ----------------------------------------------------------------------------
@functools.partial(jax.jit, static_argnames=('num_layers', 'num_heads', 'valid_dist'))
def _damt_core(params, texts, pad_sep, edu_nums, speakers, turns,
               *, num_layers, num_heads, valid_dist):
    p = params
    B = texts.shape[0]
    H = p['root'].shape[0]
    PH = p['pu_u_w'].shape[0]
    node_num = pad_sep.shape[1] + 1

    # TODO(synk): external pretrained_model (e.g. BERT) replaced by a
    # deterministic token-embedding table standing in for its output.
    sentences = p['pretrained_emb'][texts]                    # (B, L, H)
    sent = sentences[jnp.arange(B)[:, None], pad_sep]         # fetch_sep_rep
    root = jnp.broadcast_to(p['root'][None, None, :], (B, 1, H))
    nodes = jnp.concatenate([root, sent], axis=1)             # (B, node_num, H)

    # Fused bidirectional GRU -> summed final hidden state
    dialog_hx_t = _gru_call(jnp.swapaxes(nodes, 0, 1), p)[None]   # (1, B, H//2)

    valid = jnp.arange(node_num)[None, :] < (edu_nums + 1)[:, None]
    gt_bias = ((1.0 - valid.astype(F32)) * -10000.0)[:, None, :]      # (B,1,N)
    gnn_bias = jnp.where(valid, 0.0, -1e9).astype(F32)[:, None, :]    # (B,1,N)

    # SelfAttention emb + G_T block + add_norm, one kernel
    G_nodes, T_nodes = _gt_call(nodes, gt_bias, p)

    const_flat = path_embedding(speakers, turns, p, valid_dist).reshape(-1, PH)

    def branch(start_nodes):
        cur = start_nodes
        struct_flat = jnp.zeros_like(const_flat)
        for _ in range(num_layers):
            paths4 = (struct_flat + const_flat).reshape(B, node_num, node_num, PH)
            cur = _gnn_call(cur, gnn_bias, paths4, p, num_heads)
            struct_flat = _path_update_call(_build_cat_nodes(cur), struct_flat, p)
        return struct_flat.reshape(B, node_num, node_num, PH)

    sp_g = branch(G_nodes)
    predicted_path = jnp.concatenate([sp_g, jnp.swapaxes(sp_g, 1, 2)], axis=-1)
    G_nodes_out = jnp.mean(sp_g, axis=-2)

    sp_t = branch(T_nodes)
    T_nodes_out = jnp.mean(sp_t, axis=-2)

    return T_nodes_out, dialog_hx_t, predicted_path, G_nodes_out


def damt_forward(params, texts, sep_index_list, lengths, edu_nums,
                 speakers, turns, cfg):
    del lengths  # unused in the reference forward
    edu_num = max(len(a) for a in sep_index_list)
    pad_sep = jnp.asarray(
        [list(a) + [a[-1]] * (edu_num - len(a)) for a in sep_index_list], jnp.int32)
    return _damt_core(params, texts, pad_sep, edu_nums, speakers, turns,
                      num_layers=cfg['num_layers'], num_heads=cfg['num_heads'],
                      valid_dist=cfg['valid_dist'])


# ----------------------------------------------------------------------------
# Parameter init (same layout/semantics as before) + one-time fusion prep
# ----------------------------------------------------------------------------
def init_params(key, cfg):
    H = cfg['hidden_size']
    PH = cfg['path_hidden_size']
    heads = cfg['num_heads']
    Hd = H // 2
    ah = 2 * H
    keys = iter(jax.random.split(key, 96))

    def nrm(shape, scale=0.05):
        return jax.random.normal(next(keys), shape, dtype=F32) * scale

    p = {}
    p['pretrained_emb'] = nrm((cfg['vocab_size'], H))
    p['root'] = jnp.zeros((H,), F32)

    for d in ('f', 'b'):
        p[f'gru_w_ih_{d}'] = nrm((H, 3 * Hd))
        p[f'gru_w_hh_{d}'] = nrm((Hd, 3 * Hd))
        p[f'gru_b_ih_{d}'] = nrm((3 * Hd,))
        p[f'gru_b_hh_{d}'] = nrm((3 * Hd,))

    p['G_fc_w'] = nrm((H, H))   # PyTorch (out, in) layout
    p['T_fc_w'] = nrm((H, H))

    for name in ('q', 'qT', 'k', 'kT'):
        p[f'att_{name}_w'] = nrm((H, ah))
        p[f'att_{name}_b'] = nrm((ah,))
    for name in ('v', 'vT'):
        p[f'att_{name}_w'] = nrm((H, H))
        p[f'att_{name}_b'] = nrm((H,))

    for pre in ('G_out_', 'T_out_'):
        p[pre + 'dense_w'] = nrm((H, H))
        p[pre + 'dense_b'] = nrm((H,))
        p[pre + 'ln_w'] = jnp.ones((H,), F32)
        p[pre + 'ln_b'] = jnp.zeros((H,), F32)

    p['norm_w'] = jnp.ones((H,), F32)
    p['norm_b'] = jnp.zeros((H,), F32)

    p['emb_speaker'] = nrm((2, PH // 4))
    p['emb_turn'] = nrm((2, PH // 4))
    p['emb_position'] = nrm((cfg['valid_dist'] * 2 + 3, PH // 2))

    p['pu_r_w'] = nrm((2 * H + PH, PH)); p['pu_r_b'] = nrm((PH,))
    p['pu_z_w'] = nrm((2 * H + PH, PH)); p['pu_z_b'] = nrm((PH,))
    p['pu_c_w'] = nrm((2 * H, PH));      p['pu_c_b'] = nrm((PH,))
    p['pu_u_w'] = nrm((PH, PH));         p['pu_u_b'] = nrm((PH,))

    for name in ('q', 'k', 'v', 'o'):
        p[f'gnn_{name}_w'] = nrm((H, H))
        p[f'gnn_{name}_b'] = nrm((H,))
    p['gnn_sk_w'] = nrm((PH, H // heads)); p['gnn_sk_b'] = nrm((H // heads,))
    p['gnn_sv_w'] = nrm((PH, H // heads)); p['gnn_sv_b'] = nrm((H // heads,))
    p['gnn_norm_w'] = jnp.ones((H,), F32); p['gnn_norm_b'] = jnp.zeros((H,), F32)
    p['gnn_pathln_w'] = jnp.ones((PH,), F32); p['gnn_pathln_b'] = jnp.zeros((PH,), F32)
    return p


def prepare_params(p):
    """One-time (outside the jitted forward) weight fusion / layout prep."""
    q = dict(p)

    def row(a):
        return a.reshape(1, -1).astype(F32)

    # GRU biases as 2-D rows
    for d in ('f', 'b'):
        q[f'gru_b_ih_{d}'] = row(p[f'gru_b_ih_{d}'])
        q[f'gru_b_hh_{d}'] = row(p[f'gru_b_hh_{d}'])

    # SelfAttention embedding matrices (PyTorch (out,in)) and their transposes
    q['G_fc_wT'] = p['G_fc_w'].T
    q['T_fc_wT'] = p['T_fc_w'].T

    # Fused G_T attention projections: G-stream [q|kT|vT], T-stream [k|qT|v]
    q['gt_wg'] = jnp.concatenate([p['att_q_w'], p['att_kT_w'], p['att_vT_w']], axis=1)
    q['gt_bg'] = row(jnp.concatenate([p['att_q_b'], p['att_kT_b'], p['att_vT_b']]))
    q['gt_wt'] = jnp.concatenate([p['att_k_w'], p['att_qT_w'], p['att_v_w']], axis=1)
    q['gt_bt'] = row(jnp.concatenate([p['att_k_b'], p['att_qT_b'], p['att_v_b']]))
    for pre in ('G_out_', 'T_out_'):
        q[pre + 'dense_b'] = row(p[pre + 'dense_b'])
        q[pre + 'ln_w'] = row(p[pre + 'ln_w'])
        q[pre + 'ln_b'] = row(p[pre + 'ln_b'])
    q['norm_w'] = row(p['norm_w'])
    q['norm_b'] = row(p['norm_b'])

    # Fused GNN projections
    q['gnn_wqkv'] = jnp.concatenate([p['gnn_q_w'], p['gnn_k_w'], p['gnn_v_w']], axis=1)
    q['gnn_bqkv'] = row(jnp.concatenate([p['gnn_q_b'], p['gnn_k_b'], p['gnn_v_b']]))
    q['gnn_wskv'] = jnp.concatenate([p['gnn_sk_w'], p['gnn_sv_w']], axis=1)
    q['gnn_bskv'] = row(jnp.concatenate([p['gnn_sk_b'], p['gnn_sv_b']]))
    q['gnn_o_b'] = row(p['gnn_o_b'])
    q['gnn_norm_w'] = row(p['gnn_norm_w'])
    q['gnn_norm_b'] = row(p['gnn_norm_b'])
    q['gnn_pathln_w'] = row(p['gnn_pathln_w'])
    q['gnn_pathln_b'] = row(p['gnn_pathln_b'])

    # Fused path-update r|z
    q['pu_wrz'] = jnp.concatenate([p['pu_r_w'], p['pu_z_w']], axis=1)
    q['pu_brz'] = row(jnp.concatenate([p['pu_r_b'], p['pu_z_b']]))
    q['pu_c_b'] = row(p['pu_c_b'])
    q['pu_u_b'] = row(p['pu_u_b'])
    return q


if __name__ == "__main__":
    cfg = dict(hidden_size=32, path_hidden_size=16, num_heads=4, valid_dist=4,
               num_layers=2, dropout=0.1, relation_type_num=5, add_norm=True,
               vocab_size=50)
    key = jax.random.PRNGKey(0)
    pkey, tkey, skey, ukey = jax.random.split(key, 4)
    params = prepare_params(init_params(pkey, cfg))

    B, L = 2, 16
    texts = jax.random.randint(tkey, (B, L), 0, cfg['vocab_size'], dtype=jnp.int32)
    sep_index_list = [[3, 7, 11], [2, 5, 9, 13]]
    lengths = jnp.array([12, 14], jnp.int32)
    edu_nums = jnp.array([3, 4], jnp.int32)
    node_num = max(len(a) for a in sep_index_list) + 1       # 5
    speakers = jax.random.randint(skey, (B, node_num, node_num), 0, 2, dtype=jnp.int32)
    turns = jax.random.randint(ukey, (B, node_num, node_num), 0, 2, dtype=jnp.int32)

    T_nodes, dialog_hx, predicted_path, G_nodes = damt_forward(
        params, texts, sep_index_list, lengths, edu_nums, speakers, turns, cfg)
    jax.block_until_ready((T_nodes, dialog_hx, predicted_path, G_nodes))

    assert T_nodes.shape == (B, node_num, cfg['path_hidden_size'])
    assert dialog_hx.shape == (1, B, cfg['hidden_size'] // 2)
    assert predicted_path.shape == (B, node_num, node_num, 2 * cfg['path_hidden_size'])
    assert G_nodes.shape == (B, node_num, cfg['path_hidden_size'])
    print("KERNEL_OK")
</pallas_src>

<mosaic_0001>
module attributes {stable_mosaic.version = 11 : i64} {
  func.func @_bigru_kernel(%arg0: memref<5x2x32xf32, #tpu.memory_space<vmem>>, %arg1: memref<32x48xf32, #tpu.memory_space<vmem>>, %arg2: memref<16x48xf32, #tpu.memory_space<vmem>>, %arg3: memref<1x48xf32, #tpu.memory_space<vmem>>, %arg4: memref<1x48xf32, #tpu.memory_space<vmem>>, %arg5: memref<32x48xf32, #tpu.memory_space<vmem>>, %arg6: memref<16x48xf32, #tpu.memory_space<vmem>>, %arg7: memref<1x48xf32, #tpu.memory_space<vmem>>, %arg8: memref<1x48xf32, #tpu.memory_space<vmem>>, %arg9: memref<2x16xf32, #tpu.memory_space<vmem>>) attributes {dimension_semantics = [], scalar_prefetch = 0 : i64, scratch_operands = 0 : i64, tpu.core_type = #tpu.core_type<tc>} {
    %c0 = arith.constant 0 : index
    %c0_0 = arith.constant 0 : index
    %0 = vector.load %arg1[%c0, %c0_0] : memref<32x48xf32, #tpu.memory_space<vmem>>, vector<32x48xf32>
    %c0_1 = arith.constant 0 : index
    %c0_2 = arith.constant 0 : index
    %1 = vector.load %arg2[%c0_1, %c0_2] : memref<16x48xf32, #tpu.memory_space<vmem>>, vector<16x48xf32>
    %c0_3 = arith.constant 0 : index
    %c0_4 = arith.constant 0 : index
    %2 = vector.load %arg3[%c0_3, %c0_4] : memref<1x48xf32, #tpu.memory_space<vmem>>, vector<1x48xf32>
    %c0_5 = arith.constant 0 : index
    %c0_6 = arith.constant 0 : index
    %3 = vector.load %arg4[%c0_5, %c0_6] : memref<1x48xf32, #tpu.memory_space<vmem>>, vector<1x48xf32>
    %c0_7 = arith.constant 0 : index
    %c0_8 = arith.constant 0 : index
    %4 = vector.load %arg5[%c0_7, %c0_8] : memref<32x48xf32, #tpu.memory_space<vmem>>, vector<32x48xf32>
    %c0_9 = arith.constant 0 : index
    %c0_10 = arith.constant 0 : index
    %5 = vector.load %arg6[%c0_9, %c0_10] : memref<16x48xf32, #tpu.memory_space<vmem>>, vector<16x48xf32>
    %c0_11 = arith.constant 0 : index
    %c0_12 = arith.constant 0 : index
    %6 = vector.load %arg7[%c0_11, %c0_12] : memref<1x48xf32, #tpu.memory_space<vmem>>, vector<1x48xf32>
    %c0_13 = arith.constant 0 : index
    %c0_14 = arith.constant 0 : index
    %7 = vector.load %arg8[%c0_13, %c0_14] : memref<1x48xf32, #tpu.memory_space<vmem>>, vector<1x48xf32>
    %cst = arith.constant 0.000000e+00 : f32
    %8 = vector.broadcast %cst : f32 to vector<2x16xf32>
    %cst_15 = arith.constant 0.000000e+00 : f32
    %9 = vector.broadcast %cst_15 : f32 to vector<2x16xf32>
    %c0_16 = arith.constant 0 : index
    %c0_17 = arith.constant 0 : index
    %c0_18 = arith.constant 0 : index
    %10 = vector.load %arg0[%c0_16, %c0_17, %c0_18] : memref<5x2x32xf32, #tpu.memory_space<vmem>>, vector<1x2x32xf32>
    %11 = vector.shape_cast %10 : vector<1x2x32xf32> to vector<2x32xf32>
    %cst_19 = arith.constant dense<0.000000e+00> : vector<2x48xf32>
    %12 = tpu.matmul %11, %0, %cst_19 {dimension_numbers = #tpu.dot_dimension_numbers<[1], [0], [0], [1], [0, 0, 1, 1], [], []>} : vector<2x32xf32>, vector<32x48xf32>, vector<2x48xf32> -> vector<2x48xf32>
    %13 = vector.broadcast %2 : vector<1x48xf32> to vector<2x48xf32>
    %14 = arith.addf %12, %13 : vector<2x48xf32>
    %cst_20 = arith.constant dense<0.000000e+00> : vector<2x48xf32>
    %15 = tpu.matmul %8, %1, %cst_20 {dimension_numbers = #tpu.dot_dimension_numbers<[1], [0], [0], [1], [0, 0, 1, 1], [], []>} : vector<2x16xf32>, vector<16x48xf32>, vector<2x48xf32> -> vector<2x48xf32>
    %16 = vector.broadcast %3 : vector<1x48xf32> to vector<2x48xf32>
    %17 = arith.addf %15, %16 : vector<2x48xf32>
    %18 = vector.extract_strided_slice %14 {offsets = [0, 0], sizes = [2, 16], strides = [1, 1]} : vector<2x48xf32> to vector<2x16xf32>
    %19 = vector.extract_strided_slice %17 {offsets = [0, 0], sizes = [2, 16], strides = [1, 1]} : vector<2x48xf32> to vector<2x16xf32>
    %20 = arith.addf %18, %19 : vector<2x16xf32>
    %21 = arith.negf %20 : vector<2x16xf32>
    %22 = math.exp %21 : vector<2x16xf32>
    %cst_21 = arith.constant 1.000000e+00 : f32
    %23 = vector.broadcast %cst_21 : f32 to vector<2x16xf32>
    %24 = arith.addf %23, %22 : vector<2x16xf32>
    %25 = arith.divf %23, %24 : vector<2x16xf32>
    %26 = vector.extract_strided_slice %14 {offsets = [0, 16], sizes = [2, 16], strides = [1, 1]} : vector<2x48xf32> to vector<2x16xf32>
    %27 = vector.extract_strided_slice %17 {offsets = [0, 16], sizes = [2, 16], strides = [1, 1]} : vector<2x48xf32> to vector<2x16xf32>
    %28 = arith.addf %26, %27 : vector<2x16xf32>
    %29 = arith.negf %28 : vector<2x16xf32>
    %30 = math.exp %29 : vector<2x16xf32>
    %cst_22 = arith.constant 1.000000e+00 : f32
    %31 = vector.broadcast %cst_22 : f32 to vector<2x16xf32>
    %32 = arith.addf %31, %30 : vector<2x16xf32>
    %33 = arith.divf %31, %32 : vector<2x16xf32>
    %34 = vector.extract_strided_slice %14 {offsets = [0, 32], sizes = [2, 16], strides = [1, 1]} : vector<2x48xf32> to vector<2x16xf32>
    %35 = vector.extract_strided_slice %17 {offsets = [0, 32], sizes = [2, 16], strides = [1, 1]} : vector<2x48xf32> to vector<2x16xf32>
    %36 = arith.mulf %25, %35 : vector<2x16xf32>
    %37 = arith.addf %34, %36 : vector<2x16xf32>
    %38 = math.tanh %37 : vector<2x16xf32>
    %cst_23 = arith.constant 1.000000e+00 : f32
    %39 = vector.broadcast %cst_23 : f32 to vector<2x16xf32>
    %40 = arith.subf %39, %33 : vector<2x16xf32>
    %41 = arith.mulf %40, %38 : vector<2x16xf32>
    %42 = arith.mulf %33, %8 : vector<2x16xf32>
    %43 = arith.addf %41, %42 : vector<2x16xf32>
    %c4 = arith.constant 4 : index
    %c0_24 = arith.constant 0 : index
    %c0_25 = arith.constant 0 : index
    %44 = vector.load %arg0[%c4, %c0_24, %c0_25] : memref<5x2x32xf32, #tpu.memory_space<vmem>>, vector<1x2x32xf32>
    %45 = vector.shape_cast %44 : vector<1x2x32xf32> to vector<2x32xf32>
    %cst_26 = arith.constant dense<0.000000e+00> : vector<2x48xf32>
    %46 = tpu.matmul %45, %4, %cst_26 {dimension_numbers = #tpu.dot_dimension_numbers<[1], [0], [0], [1], [0, 0, 1, 1], [], []>} : vector<2x32xf32>, vector<32x48xf32>, vector<2x48xf32> -> vector<2x48xf32>
    %47 = vector.broadcast %6 : vector<1x48xf32> to vector<2x48xf32>
    %48 = arith.addf %46, %47 : vector<2x48xf32>
    %cst_27 = arith.constant dense<0.000000e+00> : vector<2x48xf32>
    %49 = tpu.matmul %9, %5, %cst_27 {dimension_numbers = #tpu.dot_dimension_numbers<[1], [0], [0], [1], [0, 0, 1, 1], [], []>} : vector<2x16xf32>, vector<16x48xf32>, vector<2x48xf32> -> vector<2x48xf32>
    %50 = vector.broadcast %7 : vector<1x48xf32> to vector<2x48xf32>
    %51 = arith.addf %49, %50 : vector<2x48xf32>
    %52 = vector.extract_strided_slice %48 {offsets = [0, 0], sizes = [2, 16], strides = [1, 1]} : vector<2x48xf32> to vector<2x16xf32>
    %53 = vector.extract_strided_slice %51 {offsets = [0, 0], sizes = [2, 16], strides = [1, 1]} : vector<2x48xf32> to vector<2x16xf32>
    %54 = arith.addf %52, %53 : vector<2x16xf32>
    %55 = arith.negf %54 : vector<2x16xf32>
    %56 = math.exp %55 : vector<2x16xf32>
    %cst_28 = arith.constant 1.000000e+00 : f32
    %57 = vector.broadcast %cst_28 : f32 to vector<2x16xf32>
    %58 = arith.addf %57, %56 : vector<2x16xf32>
    %59 = arith.divf %57, %58 : vector<2x16xf32>
    %60 = vector.extract_strided_slice %48 {offsets = [0, 16], sizes = [2, 16], strides = [1, 1]} : vector<2x48xf32> to vector<2x16xf32>
    %61 = vector.extract_strided_slice %51 {offsets = [0, 16], sizes = [2, 16], strides = [1, 1]} : vector<2x48xf32> to vector<2x16xf32>
    %62 = arith.addf %60, %61 : vector<2x16xf32>
    %63 = arith.negf %62 : vector<2x16xf32>
    %64 = math.exp %63 : vector<2x16xf32>
    %cst_29 = arith.constant 1.000000e+00 : f32
    %65 = vector.broadcast %cst_29 : f32 to vector<2x16xf32>
    %66 = arith.addf %65, %64 : vector<2x16xf32>
    %67 = arith.divf %65, %66 : vector<2x16xf32>
    %68 = vector.extract_strided_slice %48 {offsets = [0, 32], sizes = [2, 16], strides = [1, 1]} : vector<2x48xf32> to vector<2x16xf32>
    %69 = vector.extract_strided_slice %51 {offsets = [0, 32], sizes = [2, 16], strides = [1, 1]} : vector<2x48xf32> to vector<2x16xf32>
    %70 = arith.mulf %59, %69 : vector<2x16xf32>
    %71 = arith.addf %68, %70 : vector<2x16xf32>
    %72 = math.tanh %71 : vector<2x16xf32>
    %cst_30 = arith.constant 1.000000e+00 : f32
    %73 = vector.broadcast %cst_30 : f32 to vector<2x16xf32>
    %74 = arith.subf %73, %67 : vector<2x16xf32>
    %75 = arith.mulf %74, %72 : vector<2x16xf32>
    %76 = arith.mulf %67, %9 : vector<2x16xf32>
    %77 = arith.addf %75, %76 : vector<2x16xf32>
    %c1 = arith.constant 1 : index
    %c0_31 = arith.constant 0 : index
    %c0_32 = arith.constant 0 : index
    %78 = vector.load %arg0[%c1, %c0_31, %c0_32] : memref<5x2x32xf32, #tpu.memory_space<vmem>>, vector<1x2x32xf32>
    %79 = vector.shape_cast %78 : vector<1x2x32xf32> to vector<2x32xf32>
    %cst_33 = arith.constant dense<0.000000e+00> : vector<2x48xf32>
    %80 = tpu.matmul %79, %0, %cst_33 {dimension_numbers = #tpu.dot_dimension_numbers<[1], [0], [0], [1], [0, 0, 1, 1], [], []>} : vector<2x32xf32>, vector<32x48xf32>, vector<2x48xf32> -> vector<2x48xf32>
    %81 = vector.broadcast %2 : vector<1x48xf32> to vector<2x48xf32>
    %82 = arith.addf %80, %81 : vector<2x48xf32>
    %cst_34 = arith.constant dense<0.000000e+00> : vector<2x48xf32>
    %83 = tpu.matmul %43, %1, %cst_34 {dimension_numbers = #tpu.dot_dimension_numbers<[1], [0], [0], [1], [0, 0, 1, 1], [], []>} : vector<2x16xf32>, vector<16x48xf32>, vector<2x48xf32> -> vector<2x48xf32>
    %84 = vector.broadcast %3 : vector<1x48xf32> to vector<2x48xf32>
    %85 = arith.addf %83, %84 : vector<2x48xf32>
    %86 = vector.extract_strided_slice %82 {offsets = [0, 0], sizes = [2, 16], strides = [1, 1]} : vector<2x48xf32> to vector<2x16xf32>
    %87 = vector.extract_strided_slice %85 {offsets = [0, 0], sizes = [2, 16], strides = [1, 1]} : vector<2x48xf32> to vector<2x16xf32>
    %88 = arith.addf %86, %87 : vector<2x16xf32>
    %89 = arith.negf %88 : vector<2x16xf32>
    %90 = math.exp %89 : vector<2x16xf32>
    %cst_35 = arith.constant 1.000000e+00 : f32
    %91 = vector.broadcast %cst_35 : f32 to vector<2x16xf32>
    %92 = arith.addf %91, %90 : vector<2x16xf32>
    %93 = arith.divf %91, %92 : vector<2x16xf32>
    %94 = vector.extract_strided_slice %82 {offsets = [0, 16], sizes = [2, 16], strides = [1, 1]} : vector<2x48xf32> to vector<2x16xf32>
    %95 = vector.extract_strided_slice %85 {offsets = [0, 16], sizes = [2, 16], strides = [1, 1]} : vector<2x48xf32> to vector<2x16xf32>
    %96 = arith.addf %94, %95 : vector<2x16xf32>
    %97 = arith.negf %96 : vector<2x16xf32>
    %98 = math.exp %97 : vector<2x16xf32>
    %cst_36 = arith.constant 1.000000e+00 : f32
    %99 = vector.broadcast %cst_36 : f32 to vector<2x16xf32>
    %100 = arith.addf %99, %98 : vector<2x16xf32>
    %101 = arith.divf %99, %100 : vector<2x16xf32>
    %102 = vector.extract_strided_slice %82 {offsets = [0, 32], sizes = [2, 16], strides = [1, 1]} : vector<2x48xf32> to vector<2x16xf32>
    %103 = vector.extract_strided_slice %85 {offsets = [0, 32], sizes = [2, 16], strides = [1, 1]} : vector<2x48xf32> to vector<2x16xf32>
    %104 = arith.mulf %93, %103 : vector<2x16xf32>
    %105 = arith.addf %102, %104 : vector<2x16xf32>
    %106 = math.tanh %105 : vector<2x16xf32>
    %cst_37 = arith.constant 1.000000e+00 : f32
    %107 = vector.broadcast %cst_37 : f32 to vector<2x16xf32>
    %108 = arith.subf %107, %101 : vector<2x16xf32>
    %109 = arith.mulf %108, %106 : vector<2x16xf32>
    %110 = arith.mulf %101, %43 : vector<2x16xf32>
    %111 = arith.addf %109, %110 : vector<2x16xf32>
    %c3 = arith.constant 3 : index
    %c0_38 = arith.constant 0 : index
    %c0_39 = arith.constant 0 : index
    %112 = vector.load %arg0[%c3, %c0_38, %c0_39] : memref<5x2x32xf32, #tpu.memory_space<vmem>>, vector<1x2x32xf32>
    %113 = vector.shape_cast %112 : vector<1x2x32xf32> to vector<2x32xf32>
    %cst_40 = arith.constant dense<0.000000e+00> : vector<2x48xf32>
    %114 = tpu.matmul %113, %4, %cst_40 {dimension_numbers = #tpu.dot_dimension_numbers<[1], [0], [0], [1], [0, 0, 1, 1], [], []>} : vector<2x32xf32>, vector<32x48xf32>, vector<2x48xf32> -> vector<2x48xf32>
    %115 = vector.broadcast %6 : vector<1x48xf32> to vector<2x48xf32>
    %116 = arith.addf %114, %115 : vector<2x48xf32>
    %cst_41 = arith.constant dense<0.000000e+00> : vector<2x48xf32>
    %117 = tpu.matmul %77, %5, %cst_41 {dimension_numbers = #tpu.dot_dimension_numbers<[1], [0], [0], [1], [0, 0, 1, 1], [], []>} : vector<2x16xf32>, vector<16x48xf32>, vector<2x48xf32> -> vector<2x48xf32>
    %118 = vector.broadcast %7 : vector<1x48xf32> to vector<2x48xf32>
    %119 = arith.addf %117, %118 : vector<2x48xf32>
    %120 = vector.extract_strided_slice %116 {offsets = [0, 0], sizes = [2, 16], strides = [1, 1]} : vector<2x48xf32> to vector<2x16xf32>
    %121 = vector.extract_strided_slice %119 {offsets = [0, 0], sizes = [2, 16], strides = [1, 1]} : vector<2x48xf32> to vector<2x16xf32>
    %122 = arith.addf %120, %121 : vector<2x16xf32>
    %123 = arith.negf %122 : vector<2x16xf32>
    %124 = math.exp %123 : vector<2x16xf32>
    %cst_42 = arith.constant 1.000000e+00 : f32
    %125 = vector.broadcast %cst_42 : f32 to vector<2x16xf32>
    %126 = arith.addf %125, %124 : vector<2x16xf32>
    %127 = arith.divf %125, %126 : vector<2x16xf32>
    %128 = vector.extract_strided_slice %116 {offsets = [0, 16], sizes = [2, 16], strides = [1, 1]} : vector<2x48xf32> to vector<2x16xf32>
    %129 = vector.extract_strided_slice %119 {offsets = [0, 16], sizes = [2, 16], strides = [1, 1]} : vector<2x48xf32> to vector<2x16xf32>
    %130 = arith.addf %128, %129 : vector<2x16xf32>
    %131 = arith.negf %130 : vector<2x16xf32>
    %132 = math.exp %131 : vector<2x16xf32>
    %cst_43 = arith.constant 1.000000e+00 : f32
    %133 = vector.broadcast %cst_43 : f32 to vector<2x16xf32>
    %134 = arith.addf %133, %132 : vector<2x16xf32>
    %135 = arith.divf %133, %134 : vector<2x16xf32>
    %136 = vector.extract_strided_slice %116 {offsets = [0, 32], sizes = [2, 16], strides = [1, 1]} : vector<2x48xf32> to vector<2x16xf32>
    %137 = vector.extract_strided_slice %119 {offsets = [0, 32], sizes = [2, 16], strides = [1, 1]} : vector<2x48xf32> to vector<2x16xf32>
    %138 = arith.mulf %127, %137 : vector<2x16xf32>
    %139 = arith.addf %136, %138 : vector<2x16xf32>
    %140 = math.tanh %139 : vector<2x16xf32>
    %cst_44 = arith.constant 1.000000e+00 : f32
    %141 = vector.broadcast %cst_44 : f32 to vector<2x16xf32>
    %142 = arith.subf %141, %135 : vector<2x16xf32>
    %143 = arith.mulf %142, %140 : vector<2x16xf32>
    %144 = arith.mulf %135, %77 : vector<2x16xf32>
    %145 = arith.addf %143, %144 : vector<2x16xf32>
    %c2 = arith.constant 2 : index
    %c0_45 = arith.constant 0 : index
    %c0_46 = arith.constant 0 : index
    %146 = vector.load %arg0[%c2, %c0_45, %c0_46] : memref<5x2x32xf32, #tpu.memory_space<vmem>>, vector<1x2x32xf32>
    %147 = vector.shape_cast %146 : vector<1x2x32xf32> to vector<2x32xf32>
    %cst_47 = arith.constant dense<0.000000e+00> : vector<2x48xf32>
    %148 = tpu.matmul %147, %0, %cst_47 {dimension_numbers = #tpu.dot_dimension_numbers<[1], [0], [0], [1], [0, 0, 1, 1], [], []>} : vector<2x32xf32>, vector<32x48xf32>, vector<2x48xf32> -> vector<2x48xf32>
    %149 = vector.broadcast %2 : vector<1x48xf32> to vector<2x48xf32>
    %150 = arith.addf %148, %149 : vector<2x48xf32>
    %cst_48 = arith.constant dense<0.000000e+00> : vector<2x48xf32>
    %151 = tpu.matmul %111, %1, %cst_48 {dimension_numbers = #tpu.dot_dimension_numbers<[1], [0], [0], [1], [0, 0, 1, 1], [], []>} : vector<2x16xf32>, vector<16x48xf32>, vector<2x48xf32> -> vector<2x48xf32>
    %152 = vector.broadcast %3 : vector<1x48xf32> to vector<2x48xf32>
    %153 = arith.addf %151, %152 : vector<2x48xf32>
    %154 = vector.extract_strided_slice %150 {offsets = [0, 0], sizes = [2, 16], strides = [1, 1]} : vector<2x48xf32> to vector<2x16xf32>
    %155 = vector.extract_strided_slice %153 {offsets = [0, 0], sizes = [2, 16], strides = [1, 1]} : vector<2x48xf32> to vector<2x16xf32>
    %156 = arith.addf %154, %155 : vector<2x16xf32>
    %157 = arith.negf %156 : vector<2x16xf32>
    %158 = math.exp %157 : vector<2x16xf32>
    %cst_49 = arith.constant 1.000000e+00 : f32
    %159 = vector.broadcast %cst_49 : f32 to vector<2x16xf32>
    %160 = arith.addf %159, %158 : vector<2x16xf32>
    %161 = arith.divf %159, %160 : vector<2x16xf32>
    %162 = vector.extract_strided_slice %150 {offsets = [0, 16], sizes = [2, 16], strides = [1, 1]} : vector<2x48xf32> to vector<2x16xf32>
    %163 = vector.extract_strided_slice %153 {offsets = [0, 16], sizes = [2, 16], strides = [1, 1]} : vector<2x48xf32> to vector<2x16xf32>
    %164 = arith.addf %162, %163 : vector<2x16xf32>
    %165 = arith.negf %164 : vector<2x16xf32>
    %166 = math.exp %165 : vector<2x16xf32>
    %cst_50 = arith.constant 1.000000e+00 : f32
    %167 = vector.broadcast %cst_50 : f32 to vector<2x16xf32>
    %168 = arith.addf %167, %166 : vector<2x16xf32>
    %169 = arith.divf %167, %168 : vector<2x16xf32>
    %170 = vector.extract_strided_slice %150 {offsets = [0, 32], sizes = [2, 16], strides = [1, 1]} : vector<2x48xf32> to vector<2x16xf32>
    %171 = vector.extract_strided_slice %153 {offsets = [0, 32], sizes = [2, 16], strides = [1, 1]} : vector<2x48xf32> to vector<2x16xf32>
    %172 = arith.mulf %161, %171 : vector<2x16xf32>
    %173 = arith.addf %170, %172 : vector<2x16xf32>
    %174 = math.tanh %173 : vector<2x16xf32>
    %cst_51 = arith.constant 1.000000e+00 : f32
    %175 = vector.broadcast %cst_51 : f32 to vector<2x16xf32>
    %176 = arith.subf %175, %169 : vector<2x16xf32>
    %177 = arith.mulf %176, %174 : vector<2x16xf32>
    %178 = arith.mulf %169, %111 : vector<2x16xf32>
    %179 = arith.addf %177, %178 : vector<2x16xf32>
    %c2_52 = arith.constant 2 : index
    %c0_53 = arith.constant 0 : index
    %c0_54 = arith.constant 0 : index
    %180 = vector.load %arg0[%c2_52, %c0_53, %c0_54] : memref<5x2x32xf32, #tpu.memory_space<vmem>>, vector<1x2x32xf32>
    %181 = vector.shape_cast %180 : vector<1x2x32xf32> to vector<2x32xf32>
    %cst_55 = arith.constant dense<0.000000e+00> : vector<2x48xf32>
    %182 = tpu.matmul %181, %4, %cst_55 {dimension_numbers = #tpu.dot_dimension_numbers<[1], [0], [0], [1], [0, 0, 1, 1], [], []>} : vector<2x32xf32>, vector<32x48xf32>, vector<2x48xf32> -> vector<2x48xf32>
    %183 = vector.broadcast %6 : vector<1x48xf32> to vector<2x48xf32>
    %184 = arith.addf %182, %183 : vector<2x48xf32>
    %cst_56 = arith.constant dense<0.000000e+00> : vector<2x48xf32>
    %185 = tpu.matmul %145, %5, %cst_56 {dimension_numbers = #tpu.dot_dimension_numbers<[1], [0], [0], [1], [0, 0, 1, 1], [], []>} : vector<2x16xf32>, vector<16x48xf32>, vector<2x48xf32> -> vector<2x48xf32>
    %186 = vector.broadcast %7 : vector<1x48xf32> to vector<2x48xf32>
    %187 = arith.addf %185, %186 : vector<2x48xf32>
    %188 = vector.extract_strided_slice %184 {offsets = [0, 0], sizes = [2, 16], strides = [1, 1]} : vector<2x48xf32> to vector<2x16xf32>
    %189 = vector.extract_strided_slice %187 {offsets = [0, 0], sizes = [2, 16], strides = [1, 1]} : vector<2x48xf32> to vector<2x16xf32>
    %190 = arith.addf %188, %189 : vector<2x16xf32>
    %191 = arith.negf %190 : vector<2x16xf32>
    %192 = math.exp %191 : vector<2x16xf32>
    %cst_57 = arith.constant 1.000000e+00 : f32
    %193 = vector.broadcast %cst_57 : f32 to vector<2x16xf32>
    %194 = arith.addf %193, %192 : vector<2x16xf32>
    %195 = arith.divf %193, %194 : vector<2x16xf32>
    %196 = vector.extract_strided_slice %184 {offsets = [0, 16], sizes = [2, 16], strides = [1, 1]} : vector<2x48xf32> to vector<2x16xf32>
    %197 = vector.extract_strided_slice %187 {offsets = [0, 16], sizes = [2, 16], strides = [1, 1]} : vector<2x48xf32> to vector<2x16xf32>
    %198 = arith.addf %196, %197 : vector<2x16xf32>
    %199 = arith.negf %198 : vector<2x16xf32>
    %200 = math.exp %199 : vector<2x16xf32>
    %cst_58 = arith.constant 1.000000e+00 : f32
    %201 = vector.broadcast %cst_58 : f32 to vector<2x16xf32>
    %202 = arith.addf %201, %200 : vector<2x16xf32>
    %203 = arith.divf %201, %202 : vector<2x16xf32>
    %204 = vector.extract_strided_slice %184 {offsets = [0, 32], sizes = [2, 16], strides = [1, 1]} : vector<2x48xf32> to vector<2x16xf32>
    %205 = vector.extract_strided_slice %187 {offsets = [0, 32], sizes = [2, 16], strides = [1, 1]} : vector<2x48xf32> to vector<2x16xf32>
    %206 = arith.mulf %195, %205 : vector<2x16xf32>
    %207 = arith.addf %204, %206 : vector<2x16xf32>
    %208 = math.tanh %207 : vector<2x16xf32>
    %cst_59 = arith.constant 1.000000e+00 : f32
    %209 = vector.broadcast %cst_59 : f32 to vector<2x16xf32>
    %210 = arith.subf %209, %203 : vector<2x16xf32>
    %211 = arith.mulf %210, %208 : vector<2x16xf32>
    %212 = arith.mulf %203, %145 : vector<2x16xf32>
    %213 = arith.addf %211, %212 : vector<2x16xf32>
    %c3_60 = arith.constant 3 : index
    %c0_61 = arith.constant 0 : index
    %c0_62 = arith.constant 0 : index
    %214 = vector.load %arg0[%c3_60, %c0_61, %c0_62] : memref<5x2x32xf32, #tpu.memory_space<vmem>>, vector<1x2x32xf32>
    %215 = vector.shape_cast %214 : vector<1x2x32xf32> to vector<2x32xf32>
    %cst_63 = arith.constant dense<0.000000e+00> : vector<2x48xf32>
    %216 = tpu.matmul %215, %0, %cst_63 {dimension_numbers = #tpu.dot_dimension_numbers<[1], [0], [0], [1], [0, 0, 1, 1], [], []>} : vector<2x32xf32>, vector<32x48xf32>, vector<2x48xf32> -> vector<2x48xf32>
    %217 = vector.broadcast %2 : vector<1x48xf32> to vector<2x48xf32>
    %218 = arith.addf %216, %217 : vector<2x48xf32>
    %cst_64 = arith.constant dense<0.000000e+00> : vector<2x48xf32>
    %219 = tpu.matmul %179, %1, %cst_64 {dimension_numbers = #tpu.dot_dimension_numbers<[1], [0], [0], [1], [0, 0, 1, 1], [], []>} : vector<2x16xf32>, vector<16x48xf32>, vector<2x48xf32> -> vector<2x48xf32>
    %220 = vector.broadcast %3 : vector<1x48xf32> to vector<2x48xf32>
    %221 = arith.addf %219, %220 : vector<2x48xf32>
    %222 = vector.extract_strided_slice %218 {offsets = [0, 0], sizes = [2, 16], strides = [1, 1]} : vector<2x48xf32> to vector<2x16xf32>
    %223 = vector.extract_strided_slice %221 {offsets = [0, 0], sizes = [2, 16], strides = [1, 1]} : vector<2x48xf32> to vector<2x16xf32>
    %224 = arith.addf %222, %223 : vector<2x16xf32>
    %225 = arith.negf %224 : vector<2x16xf32>
    %226 = math.exp %225 : vector<2x16xf32>
    %cst_65 = arith.constant 1.000000e+00 : f32
    %227 = vector.broadcast %cst_65 : f32 to vector<2x16xf32>
    %228 = arith.addf %227, %226 : vector<2x16xf32>
    %229 = arith.divf %227, %228 : vector<2x16xf32>
    %230 = vector.extract_strided_slice %218 {offsets = [0, 16], sizes = [2, 16], strides = [1, 1]} : vector<2x48xf32> to vector<2x16xf32>
    %231 = vector.extract_strided_slice %221 {offsets = [0, 16], sizes = [2, 16], strides = [1, 1]} : vector<2x48xf32> to vector<2x16xf32>
    %232 = arith.addf %230, %231 : vector<2x16xf32>
    %233 = arith.negf %232 : vector<2x16xf32>
    %234 = math.exp %233 : vector<2x16xf32>
    %cst_66 = arith.constant 1.000000e+00 : f32
    %235 = vector.broadcast %cst_66 : f32 to vector<2x16xf32>
    %236 = arith.addf %235, %234 : vector<2x16xf32>
    %237 = arith.divf %235, %236 : vector<2x16xf32>
    %238 = vector.extract_strided_slice %218 {offsets = [0, 32], sizes = [2, 16], strides = [1, 1]} : vector<2x48xf32> to vector<2x16xf32>
    %239 = vector.extract_strided_slice %221 {offsets = [0, 32], sizes = [2, 16], strides = [1, 1]} : vector<2x48xf32> to vector<2x16xf32>
    %240 = arith.mulf %229, %239 : vector<2x16xf32>
    %241 = arith.addf %238, %240 : vector<2x16xf32>
    %242 = math.tanh %241 : vector<2x16xf32>
    %cst_67 = arith.constant 1.000000e+00 : f32
    %243 = vector.broadcast %cst_67 : f32 to vector<2x16xf32>
    %244 = arith.subf %243, %237 : vector<2x16xf32>
    %245 = arith.mulf %244, %242 : vector<2x16xf32>
    %246 = arith.mulf %237, %179 : vector<2x16xf32>
    %247 = arith.addf %245, %246 : vector<2x16xf32>
    %c1_68 = arith.constant 1 : index
    %c0_69 = arith.constant 0 : index
    %c0_70 = arith.constant 0 : index
    %248 = vector.load %arg0[%c1_68, %c0_69, %c0_70] : memref<5x2x32xf32, #tpu.memory_space<vmem>>, vector<1x2x32xf32>
    %249 = vector.shape_cast %248 : vector<1x2x32xf32> to vector<2x32xf32>
    %cst_71 = arith.constant dense<0.000000e+00> : vector<2x48xf32>
    %250 = tpu.matmul %249, %4, %cst_71 {dimension_numbers = #tpu.dot_dimension_numbers<[1], [0], [0], [1], [0, 0, 1, 1], [], []>} : vector<2x32xf32>, vector<32x48xf32>, vector<2x48xf32> -> vector<2x48xf32>
    %251 = vector.broadcast %6 : vector<1x48xf32> to vector<2x48xf32>
    %252 = arith.addf %250, %251 : vector<2x48xf32>
    %cst_72 = arith.constant dense<0.000000e+00> : vector<2x48xf32>
    %253 = tpu.matmul %213, %5, %cst_72 {dimension_numbers = #tpu.dot_dimension_numbers<[1], [0], [0], [1], [0, 0, 1, 1], [], []>} : vector<2x16xf32>, vector<16x48xf32>, vector<2x48xf32> -> vector<2x48xf32>
    %254 = vector.broadcast %7 : vector<1x48xf32> to vector<2x48xf32>
    %255 = arith.addf %253, %254 : vector<2x48xf32>
    %256 = vector.extract_strided_slice %252 {offsets = [0, 0], sizes = [2, 16], strides = [1, 1]} : vector<2x48xf32> to vector<2x16xf32>
    %257 = vector.extract_strided_slice %255 {offsets = [0, 0], sizes = [2, 16], strides = [1, 1]} : vector<2x48xf32> to vector<2x16xf32>
    %258 = arith.addf %256, %257 : vector<2x16xf32>
    %259 = arith.negf %258 : vector<2x16xf32>
    %260 = math.exp %259 : vector<2x16xf32>
    %cst_73 = arith.constant 1.000000e+00 : f32
    %261 = vector.broadcast %cst_73 : f32 to vector<2x16xf32>
    %262 = arith.addf %261, %260 : vector<2x16xf32>
    %263 = arith.divf %261, %262 : vector<2x16xf32>
    %264 = vector.extract_strided_slice %252 {offsets = [0, 16], sizes = [2, 16], strides = [1, 1]} : vector<2x48xf32> to vector<2x16xf32>
    %265 = vector.extract_strided_slice %255 {offsets = [0, 16], sizes = [2, 16], strides = [1, 1]} : vector<2x48xf32> to vector<2x16xf32>
    %266 = arith.addf %264, %265 : vector<2x16xf32>
    %267 = arith.negf %266 : vector<2x16xf32>
    %268 = math.exp %267 : vector<2x16xf32>
    %cst_74 = arith.constant 1.000000e+00 : f32
    %269 = vector.broadcast %cst_74 : f32 to vector<2x16xf32>
    %270 = arith.addf %269, %268 : vector<2x16xf32>
    %271 = arith.divf %269, %270 : vector<2x16xf32>
    %272 = vector.extract_strided_slice %252 {offsets = [0, 32], sizes = [2, 16], strides = [1, 1]} : vector<2x48xf32> to vector<2x16xf32>
    %273 = vector.extract_strided_slice %255 {offsets = [0, 32], sizes = [2, 16], strides = [1, 1]} : vector<2x48xf32> to vector<2x16xf32>
    %274 = arith.mulf %263, %273 : vector<2x16xf32>
    %275 = arith.addf %272, %274 : vector<2x16xf32>
    %276 = math.tanh %275 : vector<2x16xf32>
    %cst_75 = arith.constant 1.000000e+00 : f32
    %277 = vector.broadcast %cst_75 : f32 to vector<2x16xf32>
    %278 = arith.subf %277, %271 : vector<2x16xf32>
    %279 = arith.mulf %278, %276 : vector<2x16xf32>
    %280 = arith.mulf %271, %213 : vector<2x16xf32>
    %281 = arith.addf %279, %280 : vector<2x16xf32>
    %c4_76 = arith.constant 4 : index
    %c0_77 = arith.constant 0 : index
    %c0_78 = arith.constant 0 : index
    %282 = vector.load %arg0[%c4_76, %c0_77, %c0_78] : memref<5x2x32xf32, #tpu.memory_space<vmem>>, vector<1x2x32xf32>
    %283 = vector.shape_cast %282 : vector<1x2x32xf32> to vector<2x32xf32>
    %cst_79 = arith.constant dense<0.000000e+00> : vector<2x48xf32>
    %284 = tpu.matmul %283, %0, %cst_79 {dimension_numbers = #tpu.dot_dimension_numbers<[1], [0], [0], [1], [0, 0, 1, 1], [], []>} : vector<2x32xf32>, vector<32x48xf32>, vector<2x48xf32> -> vector<2x48xf32>
    %285 = vector.broadcast %2 : vector<1x48xf32> to vector<2x48xf32>
    %286 = arith.addf %284, %285 : vector<2x48xf32>
    %cst_80 = arith.constant dense<0.000000e+00> : vector<2x48xf32>
    %287 = tpu.matmul %247, %1, %cst_80 {dimension_numbers = #tpu.dot_dimension_numbers<[1], [0], [0], [1], [0, 0, 1, 1], [], []>} : vector<2x16xf32>, vector<16x48xf32>, vector<2x48xf32> -> vector<2x48xf32>
    %288 = vector.broadcast %3 : vector<1x48xf32> to vector<2x48xf32>
    %289 = arith.addf %287, %288 : vector<2x48xf32>
    %290 = vector.extract_strided_slice %286 {offsets = [0, 0], sizes = [2, 16], strides = [1, 1]} : vector<2x48xf32> to vector<2x16xf32>
    %291 = vector.extract_strided_slice %289 {offsets = [0, 0], sizes = [2, 16], strides = [1, 1]} : vector<2x48xf32> to vector<2x16xf32>
    %292 = arith.addf %290, %291 : vector<2x16xf32>
    %293 = arith.negf %292 : vector<2x16xf32>
    %294 = math.exp %293 : vector<2x16xf32>
    %cst_81 = arith.constant 1.000000e+00 : f32
    %295 = vector.broadcast %cst_81 : f32 to vector<2x16xf32>
    %296 = arith.addf %295, %294 : vector<2x16xf32>
    %297 = arith.divf %295, %296 : vector<2x16xf32>
    %298 = vector.extract_strided_slice %286 {offsets = [0, 16], sizes = [2, 16], strides = [1, 1]} : vector<2x48xf32> to vector<2x16xf32>
    %299 = vector.extract_strided_slice %289 {offsets = [0, 16], sizes = [2, 16], strides = [1, 1]} : vector<2x48xf32> to vector<2x16xf32>
    %300 = arith.addf %298, %299 : vector<2x16xf32>
    %301 = arith.negf %300 : vector<2x16xf32>
    %302 = math.exp %301 : vector<2x16xf32>
    %cst_82 = arith.constant 1.000000e+00 : f32
    %303 = vector.broadcast %cst_82 : f32 to vector<2x16xf32>
    %304 = arith.addf %303, %302 : vector<2x16xf32>
    %305 = arith.divf %303, %304 : vector<2x16xf32>
    %306 = vector.extract_strided_slice %286 {offsets = [0, 32], sizes = [2, 16], strides = [1, 1]} : vector<2x48xf32> to vector<2x16xf32>
    %307 = vector.extract_strided_slice %289 {offsets = [0, 32], sizes = [2, 16], strides = [1, 1]} : vector<2x48xf32> to vector<2x16xf32>
    %308 = arith.mulf %297, %307 : vector<2x16xf32>
    %309 = arith.addf %306, %308 : vector<2x16xf32>
    %310 = math.tanh %309 : vector<2x16xf32>
    %cst_83 = arith.constant 1.000000e+00 : f32
    %311 = vector.broadcast %cst_83 : f32 to vector<2x16xf32>
    %312 = arith.subf %311, %305 : vector<2x16xf32>
    %313 = arith.mulf %312, %310 : vector<2x16xf32>
    %314 = arith.mulf %305, %247 : vector<2x16xf32>
    %315 = arith.addf %313, %314 : vector<2x16xf32>
    %c0_84 = arith.constant 0 : index
    %c0_85 = arith.constant 0 : index
    %c0_86 = arith.constant 0 : index
    %316 = vector.load %arg0[%c0_84, %c0_85, %c0_86] : memref<5x2x32xf32, #tpu.memory_space<vmem>>, vector<1x2x32xf32>
    %317 = vector.shape_cast %316 : vector<1x2x32xf32> to vector<2x32xf32>
    %cst_87 = arith.constant dense<0.000000e+00> : vector<2x48xf32>
    %318 = tpu.matmul %317, %4, %cst_87 {dimension_numbers = #tpu.dot_dimension_numbers<[1], [0], [0], [1], [0, 0, 1, 1], [], []>} : vector<2x32xf32>, vector<32x48xf32>, vector<2x48xf32> -> vector<2x48xf32>
    %319 = vector.broadcast %6 : vector<1x48xf32> to vector<2x48xf32>
    %320 = arith.addf %318, %319 : vector<2x48xf32>
    %cst_88 = arith.constant dense<0.000000e+00> : vector<2x48xf32>
    %321 = tpu.matmul %281, %5, %cst_88 {dimension_numbers = #tpu.dot_dimension_numbers<[1], [0], [0], [1], [0, 0, 1, 1], [], []>} : vector<2x16xf32>, vector<16x48xf32>, vector<2x48xf32> -> vector<2x48xf32>
    %322 = vector.broadcast %7 : vector<1x48xf32> to vector<2x48xf32>
    %323 = arith.addf %321, %322 : vector<2x48xf32>
    %324 = vector.extract_strided_slice %320 {offsets = [0, 0], sizes = [2, 16], strides = [1, 1]} : vector<2x48xf32> to vector<2x16xf32>
    %325 = vector.extract_strided_slice %323 {offsets = [0, 0], sizes = [2, 16], strides = [1, 1]} : vector<2x48xf32> to vector<2x16xf32>
    %326 = arith.addf %324, %325 : vector<2x16xf32>
    %327 = arith.negf %326 : vector<2x16xf32>
    %328 = math.exp %327 : vector<2x16xf32>
    %cst_89 = arith.constant 1.000000e+00 : f32
    %329 = vector.broadcast %cst_89 : f32 to vector<2x16xf32>
    %330 = arith.addf %329, %328 : vector<2x16xf32>
    %331 = arith.divf %329, %330 : vector<2x16xf32>
    %332 = vector.extract_strided_slice %320 {offsets = [0, 16], sizes = [2, 16], strides = [1, 1]} : vector<2x48xf32> to vector<2x16xf32>
    %333 = vector.extract_strided_slice %323 {offsets = [0, 16], sizes = [2, 16], strides = [1, 1]} : vector<2x48xf32> to vector<2x16xf32>
    %334 = arith.addf %332, %333 : vector<2x16xf32>
    %335 = arith.negf %334 : vector<2x16xf32>
    %336 = math.exp %335 : vector<2x16xf32>
    %cst_90 = arith.constant 1.000000e+00 : f32
    %337 = vector.broadcast %cst_90 : f32 to vector<2x16xf32>
    %338 = arith.addf %337, %336 : vector<2x16xf32>
    %339 = arith.divf %337, %338 : vector<2x16xf32>
    %340 = vector.extract_strided_slice %320 {offsets = [0, 32], sizes = [2, 16], strides = [1, 1]} : vector<2x48xf32> to vector<2x16xf32>
    %341 = vector.extract_strided_slice %323 {offsets = [0, 32], sizes = [2, 16], strides = [1, 1]} : vector<2x48xf32> to vector<2x16xf32>
    %342 = arith.mulf %331, %341 : vector<2x16xf32>
    %343 = arith.addf %340, %342 : vector<2x16xf32>
    %344 = math.tanh %343 : vector<2x16xf32>
    %cst_91 = arith.constant 1.000000e+00 : f32
    %345 = vector.broadcast %cst_91 : f32 to vector<2x16xf32>
    %346 = arith.subf %345, %339 : vector<2x16xf32>
    %347 = arith.mulf %346, %344 : vector<2x16xf32>
    %348 = arith.mulf %339, %281 : vector<2x16xf32>
    %349 = arith.addf %347, %348 : vector<2x16xf32>
    %350 = arith.addf %315, %349 : vector<2x16xf32>
    %c0_92 = arith.constant 0 : index
    %c0_93 = arith.constant 0 : index
    %351 = vector.load %arg9[%c0_92, %c0_93] : memref<2x16xf32, #tpu.memory_space<vmem>>, vector<2x16xf32>
    tpu.vector_store %arg9[%c0_92, %c0_93], %350 {strides = array<i32>} : memref<2x16xf32, #tpu.memory_space<vmem>>, vector<2x16xf32>,
    return
  }
}

module attributes {stable_mosaic.version = 11 : i64} {
  func.func @_gt_block_kernel(%arg0: memref<2x5x32xf32, #tpu.memory_space<vmem>>, %arg1: memref<2x1x5xf32, #tpu.memory_space<vmem>>, %arg2: memref<32x32xf32, #tpu.memory_space<vmem>>, %arg3: memref<32x32xf32, #tpu.memory_space<vmem>>, %arg4: memref<32x32xf32, #tpu.memory_space<vmem>>, %arg5: memref<32x32xf32, #tpu.memory_space<vmem>>, %arg6: memref<32x160xf32, #tpu.memory_space<vmem>>, %arg7: memref<1x160xf32, #tpu.memory_space<vmem>>, %arg8: memref<32x160xf32, #tpu.memory_space<vmem>>, %arg9: memref<1x160xf32, #tpu.memory_space<vmem>>, %arg10: memref<32x32xf32, #tpu.memory_space<vmem>>, %arg11: memref<1x32xf32, #tpu.memory_space<vmem>>, %arg12: memref<1x32xf32, #tpu.memory_space<vmem>>, %arg13: memref<1x32xf32, #tpu.memory_space<vmem>>, %arg14: memref<32x32xf32, #tpu.memory_space<vmem>>, %arg15: memref<1x32xf32, #tpu.memory_space<vmem>>, %arg16: memref<1x32xf32, #tpu.memory_space<vmem>>, %arg17: memref<1x32xf32, #tpu.memory_space<vmem>>, %arg18: memref<1x32xf32, #tpu.memory_space<vmem>>, %arg19: memref<1x32xf32, #tpu.memory_space<vmem>>, %arg20: memref<2x5x32xf32, #tpu.memory_space<vmem>>, %arg21: memref<2x5x32xf32, #tpu.memory_space<vmem>>) attributes {dimension_semantics = [], scalar_prefetch = 0 : i64, scratch_operands = 0 : i64, tpu.core_type = #tpu.core_type<tc>} {
    %c0 = arith.constant 0 : index
    %c0_0 = arith.constant 0 : index
    %0 = vector.load %arg2[%c0, %c0_0] : memref<32x32xf32, #tpu.memory_space<vmem>>, vector<32x32xf32>
    %c0_1 = arith.constant 0 : index
    %c0_2 = arith.constant 0 : index
    %1 = vector.load %arg3[%c0_1, %c0_2] : memref<32x32xf32, #tpu.memory_space<vmem>>, vector<32x32xf32>
    %c0_3 = arith.constant 0 : index
    %c0_4 = arith.constant 0 : index
    %2 = vector.load %arg4[%c0_3, %c0_4] : memref<32x32xf32, #tpu.memory_space<vmem>>, vector<32x32xf32>
    %c0_5 = arith.constant 0 : index
    %c0_6 = arith.constant 0 : index
    %3 = vector.load %arg5[%c0_5, %c0_6] : memref<32x32xf32, #tpu.memory_space<vmem>>, vector<32x32xf32>
    %c0_7 = arith.constant 0 : index
    %c0_8 = arith.constant 0 : index
    %4 = vector.load %arg6[%c0_7, %c0_8] : memref<32x160xf32, #tpu.memory_space<vmem>>, vector<32x160xf32>
    %c0_9 = arith.constant 0 : index
    %c0_10 = arith.constant 0 : index
    %5 = vector.load %arg7[%c0_9, %c0_10] : memref<1x160xf32, #tpu.memory_space<vmem>>, vector<1x160xf32>
    %c0_11 = arith.constant 0 : index
    %c0_12 = arith.constant 0 : index
    %6 = vector.load %arg8[%c0_11, %c0_12] : memref<32x160xf32, #tpu.memory_space<vmem>>, vector<32x160xf32>
    %c0_13 = arith.constant 0 : index
    %c0_14 = arith.constant 0 : index
    %7 = vector.load %arg9[%c0_13, %c0_14] : memref<1x160xf32, #tpu.memory_space<vmem>>, vector<1x160xf32>
    %c0_15 = arith.constant 0 : index
    %c0_16 = arith.constant 0 : index
    %c0_17 = arith.constant 0 : index
    %8 = vector.load %arg0[%c0_15, %c0_16, %c0_17] : memref<2x5x32xf32, #tpu.memory_space<vmem>>, vector<1x5x32xf32>
    %9 = vector.shape_cast %8 : vector<1x5x32xf32> to vector<5x32xf32>
    %c0_18 = arith.constant 0 : index
    %c0_19 = arith.constant 0 : index
    %c0_20 = arith.constant 0 : index
    %10 = vector.load %arg1[%c0_18, %c0_19, %c0_20] : memref<2x1x5xf32, #tpu.memory_space<vmem>>, vector<1x1x5xf32>
    %11 = vector.shape_cast %10 : vector<1x1x5xf32> to vector<1x5xf32>
    %cst = arith.constant dense<0.000000e+00> : vector<5x32xf32>
    %12 = tpu.matmul %9, %1, %cst {dimension_numbers = #tpu.dot_dimension_numbers<[1], [0], [0], [1], [0, 0, 1, 1], [], []>} : vector<5x32xf32>, vector<32x32xf32>, vector<5x32xf32> -> vector<5x32xf32>
    %cst_21 = arith.constant dense<0xFF800000> : vector<5xf32>
    %13 = vector.multi_reduction <maximumf>, %12, %cst_21 [1] : vector<5x32xf32> to vector<5xf32>
    %14 = vector.shape_cast %13 : vector<5xf32> to vector<5x1xf32>
    %15 = vector.broadcast %14 : vector<5x1xf32> to vector<5x32xf32>
    %16 = arith.subf %12, %15 : vector<5x32xf32>
    %17 = math.exp %16 : vector<5x32xf32>
    %cst_22 = arith.constant dense<0.000000e+00> : vector<5xf32>
    %18 = vector.multi_reduction <add>, %17, %cst_22 [1] : vector<5x32xf32> to vector<5xf32>
    %19 = vector.shape_cast %18 : vector<5xf32> to vector<5x1xf32>
    %20 = tpu.reciprocal %19 {approx = true} : vector<5x1xf32> -> vector<5x1xf32>
    %21 = vector.broadcast %20 : vector<5x1xf32> to vector<5x32xf32>
    %22 = arith.mulf %17, %21 : vector<5x32xf32>
    %cst_23 = arith.constant dense<0.000000e+00> : vector<5x32xf32>
    %23 = tpu.matmul %22, %0, %cst_23 {dimension_numbers = #tpu.dot_dimension_numbers<[1], [0], [0], [1], [0, 0, 1, 1], [], []>} : vector<5x32xf32>, vector<32x32xf32>, vector<5x32xf32> -> vector<5x32xf32>
    %cst_24 = arith.constant dense<0.000000e+00> : vector<5x32xf32>
    %24 = tpu.matmul %9, %3, %cst_24 {dimension_numbers = #tpu.dot_dimension_numbers<[1], [0], [0], [1], [0, 0, 1, 1], [], []>} : vector<5x32xf32>, vector<32x32xf32>, vector<5x32xf32> -> vector<5x32xf32>
    %cst_25 = arith.constant dense<0xFF800000> : vector<5xf32>
    %25 = vector.multi_reduction <maximumf>, %24, %cst_25 [1] : vector<5x32xf32> to vector<5xf32>
    %26 = vector.shape_cast %25 : vector<5xf32> to vector<5x1xf32>
    %27 = vector.broadcast %26 : vector<5x1xf32> to vector<5x32xf32>
    %28 = arith.subf %24, %27 : vector<5x32xf32>
    %29 = math.exp %28 : vector<5x32xf32>
    %cst_26 = arith.constant dense<0.000000e+00> : vector<5xf32>
    %30 = vector.multi_reduction <add>, %29, %cst_26 [1] : vector<5x32xf32> to vector<5xf32>
    %31 = vector.shape_cast %30 : vector<5xf32> to vector<5x1xf32>
    %32 = tpu.reciprocal %31 {approx = true} : vector<5x1xf32> -> vector<5x1xf32>
    %33 = vector.broadcast %32 : vector<5x1xf32> to vector<5x32xf32>
    %34 = arith.mulf %29, %33 : vector<5x32xf32>
    %cst_27 = arith.constant dense<0.000000e+00> : vector<5x32xf32>
    %35 = tpu.matmul %34, %2, %cst_27 {dimension_numbers = #tpu.dot_dimension_numbers<[1], [0], [0], [1], [0, 0, 1, 1], [], []>} : vector<5x32xf32>, vector<32x32xf32>, vector<5x32xf32> -> vector<5x32xf32>
    %36 = arith.addf %23, %9 : vector<5x32xf32>
    %37 = arith.addf %35, %9 : vector<5x32xf32>
    %cst_28 = arith.constant dense<0.000000e+00> : vector<5x160xf32>
    %38 = tpu.matmul %36, %4, %cst_28 {dimension_numbers = #tpu.dot_dimension_numbers<[1], [0], [0], [1], [0, 0, 1, 1], [], []>} : vector<5x32xf32>, vector<32x160xf32>, vector<5x160xf32> -> vector<5x160xf32>
    %39 = vector.broadcast %5 : vector<1x160xf32> to vector<5x160xf32>
    %40 = arith.addf %38, %39 : vector<5x160xf32>
    %cst_29 = arith.constant dense<0.000000e+00> : vector<5x160xf32>
    %41 = tpu.matmul %37, %6, %cst_29 {dimension_numbers = #tpu.dot_dimension_numbers<[1], [0], [0], [1], [0, 0, 1, 1], [], []>} : vector<5x32xf32>, vector<32x160xf32>, vector<5x160xf32> -> vector<5x160xf32>
    %42 = vector.broadcast %7 : vector<1x160xf32> to vector<5x160xf32>
    %43 = arith.addf %41, %42 : vector<5x160xf32>
    %44 = vector.extract_strided_slice %40 {offsets = [0, 0], sizes = [5, 64], strides = [1, 1]} : vector<5x160xf32> to vector<5x64xf32>
    %45 = vector.extract_strided_slice %40 {offsets = [0, 64], sizes = [5, 64], strides = [1, 1]} : vector<5x160xf32> to vector<5x64xf32>
    %46 = vector.extract_strided_slice %40 {offsets = [0, 128], sizes = [5, 32], strides = [1, 1]} : vector<5x160xf32> to vector<5x32xf32>
    %47 = vector.extract_strided_slice %43 {offsets = [0, 0], sizes = [5, 64], strides = [1, 1]} : vector<5x160xf32> to vector<5x64xf32>
    %48 = vector.extract_strided_slice %43 {offsets = [0, 64], sizes = [5, 64], strides = [1, 1]} : vector<5x160xf32> to vector<5x64xf32>
    %49 = vector.extract_strided_slice %43 {offsets = [0, 128], sizes = [5, 32], strides = [1, 1]} : vector<5x160xf32> to vector<5x32xf32>
    %50 = vector.extract_strided_slice %44 {offsets = [0, 0], sizes = [5, 16], strides = [1, 1]} : vector<5x64xf32> to vector<5x16xf32>
    %51 = vector.extract_strided_slice %47 {offsets = [0, 0], sizes = [5, 16], strides = [1, 1]} : vector<5x64xf32> to vector<5x16xf32>
    %52 = tpu.transpose %51, [1, 0] : vector<5x16xf32> -> vector<16x5xf32>
    %cst_30 = arith.constant dense<0.000000e+00> : vector<5x5xf32>
    %53 = tpu.matmul %50, %52, %cst_30 {dimension_numbers = #tpu.dot_dimension_numbers<[1], [0], [0], [1], [0, 0, 1, 1], [], []>} : vector<5x16xf32>, vector<16x5xf32>, vector<5x5xf32> -> vector<5x5xf32>
    %cst_31 = arith.constant 2.500000e-01 : f32
    %54 = vector.broadcast %cst_31 : f32 to vector<5x5xf32>
    %55 = arith.mulf %53, %54 : vector<5x5xf32>
    %56 = vector.broadcast %11 : vector<1x5xf32> to vector<5x5xf32>
    %57 = arith.addf %55, %56 : vector<5x5xf32>
    %cst_32 = arith.constant dense<0xFF800000> : vector<5xf32>
    %58 = vector.multi_reduction <maximumf>, %57, %cst_32 [1] : vector<5x5xf32> to vector<5xf32>
    %59 = vector.shape_cast %58 : vector<5xf32> to vector<5x1xf32>
    %60 = vector.broadcast %59 : vector<5x1xf32> to vector<5x5xf32>
    %61 = arith.subf %57, %60 : vector<5x5xf32>
    %62 = math.exp %61 : vector<5x5xf32>
    %cst_33 = arith.constant dense<0.000000e+00> : vector<5xf32>
    %63 = vector.multi_reduction <add>, %62, %cst_33 [1] : vector<5x5xf32> to vector<5xf32>
    %64 = vector.shape_cast %63 : vector<5xf32> to vector<5x1xf32>
    %65 = tpu.reciprocal %64 {approx = true} : vector<5x1xf32> -> vector<5x1xf32>
    %66 = vector.broadcast %65 : vector<5x1xf32> to vector<5x5xf32>
    %67 = arith.mulf %62, %66 : vector<5x5xf32>
    %68 = vector.extract_strided_slice %48 {offsets = [0, 0], sizes = [5, 16], strides = [1, 1]} : vector<5x64xf32> to vector<5x16xf32>
    %69 = vector.extract_strided_slice %45 {offsets = [0, 0], sizes = [5, 16], strides = [1, 1]} : vector<5x64xf32> to vector<5x16xf32>
    %70 = tpu.transpose %69, [1, 0] : vector<5x16xf32> -> vector<16x5xf32>
    %cst_34 = arith.constant dense<0.000000e+00> : vector<5x5xf32>
    %71 = tpu.matmul %68, %70, %cst_34 {dimension_numbers = #tpu.dot_dimension_numbers<[1], [0], [0], [1], [0, 0, 1, 1], [], []>} : vector<5x16xf32>, vector<16x5xf32>, vector<5x5xf32> -> vector<5x5xf32>
    %cst_35 = arith.constant 2.500000e-01 : f32
    %72 = vector.broadcast %cst_35 : f32 to vector<5x5xf32>
    %73 = arith.mulf %71, %72 : vector<5x5xf32>
    %74 = vector.broadcast %11 : vector<1x5xf32> to vector<5x5xf32>
    %75 = arith.addf %73, %74 : vector<5x5xf32>
    %cst_36 = arith.constant dense<0xFF800000> : vector<5xf32>
    %76 = vector.multi_reduction <maximumf>, %75, %cst_36 [1] : vector<5x5xf32> to vector<5xf32>
    %77 = vector.shape_cast %76 : vector<5xf32> to vector<5x1xf32>
    %78 = vector.broadcast %77 : vector<5x1xf32> to vector<5x5xf32>
    %79 = arith.subf %75, %78 : vector<5x5xf32>
    %80 = math.exp %79 : vector<5x5xf32>
    %cst_37 = arith.constant dense<0.000000e+00> : vector<5xf32>
    %81 = vector.multi_reduction <add>, %80, %cst_37 [1] : vector<5x5xf32> to vector<5xf32>
    %82 = vector.shape_cast %81 : vector<5xf32> to vector<5x1xf32>
    %83 = tpu.reciprocal %82 {approx = true} : vector<5x1xf32> -> vector<5x1xf32>
    %84 = vector.broadcast %83 : vector<5x1xf32> to vector<5x5xf32>
    %85 = arith.mulf %80, %84 : vector<5x5xf32>
    %86 = vector.extract_strided_slice %49 {offsets = [0, 0], sizes = [5, 8], strides = [1, 1]} : vector<5x32xf32> to vector<5x8xf32>
    %cst_38 = arith.constant dense<0.000000e+00> : vector<5x8xf32>
    %87 = tpu.matmul %67, %86, %cst_38 {dimension_numbers = #tpu.dot_dimension_numbers<[1], [0], [0], [1], [0, 0, 1, 1], [], []>} : vector<5x5xf32>, vector<5x8xf32>, vector<5x8xf32> -> vector<5x8xf32>
    %88 = vector.extract_strided_slice %46 {offsets = [0, 0], sizes = [5, 8], strides = [1, 1]} : vector<5x32xf32> to vector<5x8xf32>
    %cst_39 = arith.constant dense<0.000000e+00> : vector<5x8xf32>
    %89 = tpu.matmul %85, %88, %cst_39 {dimension_numbers = #tpu.dot_dimension_numbers<[1], [0], [0], [1], [0, 0, 1, 1], [], []>} : vector<5x5xf32>, vector<5x8xf32>, vector<5x8xf32> -> vector<5x8xf32>
    %90 = vector.extract_strided_slice %44 {offsets = [0, 16], sizes = [5, 16], strides = [1, 1]} : vector<5x64xf32> to vector<5x16xf32>
    %91 = vector.extract_strided_slice %47 {offsets = [0, 16], sizes = [5, 16], strides = [1, 1]} : vector<5x64xf32> to vector<5x16xf32>
    %92 = tpu.transpose %91, [1, 0] : vector<5x16xf32> -> vector<16x5xf32>
    %cst_40 = arith.constant dense<0.000000e+00> : vector<5x5xf32>
    %93 = tpu.matmul %90, %92, %cst_40 {dimension_numbers = #tpu.dot_dimension_numbers<[1], [0], [0], [1], [0, 0, 1, 1], [], []>} : vector<5x16xf32>, vector<16x5xf32>, vector<5x5xf32> -> vector<5x5xf32>
    %cst_41 = arith.constant 2.500000e-01 : f32
    %94 = vector.broadcast %cst_41 : f32 to vector<5x5xf32>
    %95 = arith.mulf %93, %94 : vector<5x5xf32>
    %96 = vector.broadcast %11 : vector<1x5xf32> to vector<5x5xf32>
    %97 = arith.addf %95, %96 : vector<5x5xf32>
    %cst_42 = arith.constant dense<0xFF800000> : vector<5xf32>
    %98 = vector.multi_reduction <maximumf>, %97, %cst_42 [1] : vector<5x5xf32> to vector<5xf32>
    %99 = vector.shape_cast %98 : vector<5xf32> to vector<5x1xf32>
    %100 = vector.broadcast %99 : vector<5x1xf32> to vector<5x5xf32>
    %101 = arith.subf %97, %100 : vector<5x5xf32>
    %102 = math.exp %101 : vector<5x5xf32>
    %cst_43 = arith.constant dense<0.000000e+00> : vector<5xf32>
    %103 = vector.multi_reduction <add>, %102, %cst_43 [1] : vector<5x5xf32> to vector<5xf32>
    %104 = vector.shape_cast %103 : vector<5xf32> to vector<5x1xf32>
    %105 = tpu.reciprocal %104 {approx = true} : vector<5x1xf32> -> vector<5x1xf32>
    %106 = vector.broadcast %105 : vector<5x1xf32> to vector<5x5xf32>
    %107 = arith.mulf %102, %106 : vector<5x5xf32>
    %108 = vector.extract_strided_slice %48 {offsets = [0, 16], sizes = [5, 16], strides = [1, 1]} : vector<5x64xf32> to vector<5x16xf32>
    %109 = vector.extract_strided_slice %45 {offsets = [0, 16], sizes = [5, 16], strides = [1, 1]} : vector<5x64xf32> to vector<5x16xf32>
    %110 = tpu.transpose %109, [1, 0] : vector<5x16xf32> -> vector<16x5xf32>
    %cst_44 = arith.constant dense<0.000000e+00> : vector<5x5xf32>
    %111 = tpu.matmul %108, %110, %cst_44 {dimension_numbers = #tpu.dot_dimension_numbers<[1], [0], [0], [1], [0, 0, 1, 1], [], []>} : vector<5x16xf32>, vector<16x5xf32>, vector<5x5xf32> -> vector<5x5xf32>
    %cst_45 = arith.constant 2.500000e-01 : f32
    %112 = vector.broadcast %cst_45 : f32 to vector<5x5xf32>
    %113 = arith.mulf %111, %112 : vector<5x5xf32>
    %114 = vector.broadcast %11 : vector<1x5xf32> to vector<5x5xf32>
    %115 = arith.addf %113, %114 : vector<5x5xf32>
    %cst_46 = arith.constant dense<0xFF800000> : vector<5xf32>
    %116 = vector.multi_reduction <maximumf>, %115, %cst_46 [1] : vector<5x5xf32> to vector<5xf32>
    %117 = vector.shape_cast %116 : vector<5xf32> to vector<5x1xf32>
    %118 = vector.broadcast %117 : vector<5x1xf32> to vector<5x5xf32>
    %119 = arith.subf %115, %118 : vector<5x5xf32>
    %120 = math.exp %119 : vector<5x5xf32>
    %cst_47 = arith.constant dense<0.000000e+00> : vector<5xf32>
    %121 = vector.multi_reduction <add>, %120, %cst_47 [1] : vector<5x5xf32> to vector<5xf32>
    %122 = vector.shape_cast %121 : vector<5xf32> to vector<5x1xf32>
    %123 = tpu.reciprocal %122 {approx = true} : vector<5x1xf32> -> vector<5x1xf32>
    %124 = vector.broadcast %123 : vector<5x1xf32> to vector<5x5xf32>
    %125 = arith.mulf %120, %124 : vector<5x5xf32>
    %126 = vector.extract_strided_slice %49 {offsets = [0, 8], sizes = [5, 8], strides = [1, 1]} : vector<5x32xf32> to vector<5x8xf32>
    %cst_48 = arith.constant dense<0.000000e+00> : vector<5x8xf32>
    %127 = tpu.matmul %107, %126, %cst_48 {dimension_numbers = #tpu.dot_dimension_numbers<[1], [0], [0], [1], [0, 0, 1, 1], [], []>} : vector<5x5xf32>, vector<5x8xf32>, vector<5x8xf32> -> vector<5x8xf32>
    %128 = vector.extract_strided_slice %46 {offsets = [0, 8], sizes = [5, 8], strides = [1, 1]} : vector<5x32xf32> to vector<5x8xf32>
    %cst_49 = arith.constant dense<0.000000e+00> : vector<5x8xf32>
    %129 = tpu.matmul %125, %128, %cst_49 {dimension_numbers = #tpu.dot_dimension_numbers<[1], [0], [0], [1], [0, 0, 1, 1], [], []>} : vector<5x5xf32>, vector<5x8xf32>, vector<5x8xf32> -> vector<5x8xf32>
    %130 = vector.extract_strided_slice %44 {offsets = [0, 32], sizes = [5, 16], strides = [1, 1]} : vector<5x64xf32> to vector<5x16xf32>
    %131 = vector.extract_strided_slice %47 {offsets = [0, 32], sizes = [5, 16], strides = [1, 1]} : vector<5x64xf32> to vector<5x16xf32>
    %132 = tpu.transpose %131, [1, 0] : vector<5x16xf32> -> vector<16x5xf32>
    %cst_50 = arith.constant dense<0.000000e+00> : vector<5x5xf32>
    %133 = tpu.matmul %130, %132, %cst_50 {dimension_numbers = #tpu.dot_dimension_numbers<[1], [0], [0], [1], [0, 0, 1, 1], [], []>} : vector<5x16xf32>, vector<16x5xf32>, vector<5x5xf32> -> vector<5x5xf32>
    %cst_51 = arith.constant 2.500000e-01 : f32
    %134 = vector.broadcast %cst_51 : f32 to vector<5x5xf32>
    %135 = arith.mulf %133, %134 : vector<5x5xf32>
    %136 = vector.broadcast %11 : vector<1x5xf32> to vector<5x5xf32>
    %137 = arith.addf %135, %136 : vector<5x5xf32>
    %cst_52 = arith.constant dense<0xFF800000> : vector<5xf32>
    %138 = vector.multi_reduction <maximumf>, %137, %cst_52 [1] : vector<5x5xf32> to vector<5xf32>
    %139 = vector.shape_cast %138 : vector<5xf32> to vector<5x1xf32>
    %140 = vector.broadcast %139 : vector<5x1xf32> to vector<5x5xf32>
    %141 = arith.subf %137, %140 : vector<5x5xf32>
    %142 = math.exp %141 : vector<5x5xf32>
    %cst_53 = arith.constant dense<0.000000e+00> : vector<5xf32>
    %143 = vector.multi_reduction <add>, %142, %cst_53 [1] : vector<5x5xf32> to vector<5xf32>
    %144 = vector.shape_cast %143 : vector<5xf32> to vector<5x1xf32>
    %145 = tpu.reciprocal %144 {approx = true} : vector<5x1xf32> -> vector<5x1xf32>
    %146 = vector.broadcast %145 : vector<5x1xf32> to vector<5x5xf32>
    %147 = arith.mulf %142, %146 : vector<5x5xf32>
    %148 = vector.extract_strided_slice %48 {offsets = [0, 32], sizes = [5, 16], strides = [1, 1]} : vector<5x64xf32> to vector<5x16xf32>
    %149 = vector.extract_strided_slice %45 {offsets = [0, 32], sizes = [5, 16], strides = [1, 1]} : vector<5x64xf32> to vector<5x16xf32>
    %150 = tpu.transpose %149, [1, 0] : vector<5x16xf32> -> vector<16x5xf32>
    %cst_54 = arith.constant dense<0.000000e+00> : vector<5x5xf32>
    %151 = tpu.matmul %148, %150, %cst_54 {dimension_numbers = #tpu.dot_dimension_numbers<[1], [0], [0], [1], [0, 0, 1, 1], [], []>} : vector<5x16xf32>, vector<16x5xf32>, vector<5x5xf32> -> vector<5x5xf32>
    %cst_55 = arith.constant 2.500000e-01 : f32
    %152 = vector.broadcast %cst_55 : f32 to vector<5x5xf32>
    %153 = arith.mulf %151, %152 : vector<5x5xf32>
    %154 = vector.broadcast %11 : vector<1x5xf32> to vector<5x5xf32>
    %155 = arith.addf %153, %154 : vector<5x5xf32>
    %cst_56 = arith.constant dense<0xFF800000> : vector<5xf32>
    %156 = vector.multi_reduction <maximumf>, %155, %cst_56 [1] : vector<5x5xf32> to vector<5xf32>
    %157 = vector.shape_cast %156 : vector<5xf32> to vector<5x1xf32>
    %158 = vector.broadcast %157 : vector<5x1xf32> to vector<5x5xf32>
    %159 = arith.subf %155, %158 : vector<5x5xf32>
    %160 = math.exp %159 : vector<5x5xf32>
    %cst_57 = arith.constant dense<0.000000e+00> : vector<5xf32>
    %161 = vector.multi_reduction <add>, %160, %cst_57 [1] : vector<5x5xf32> to vector<5xf32>
    %162 = vector.shape_cast %161 : vector<5xf32> to vector<5x1xf32>
    %163 = tpu.reciprocal %162 {approx = true} : vector<5x1xf32> -> vector<5x1xf32>
    %164 = vector.broadcast %163 : vector<5x1xf32> to vector<5x5xf32>
    %165 = arith.mulf %160, %164 : vector<5x5xf32>
    %166 = vector.extract_strided_slice %49 {offsets = [0, 16], sizes = [5, 8], strides = [1, 1]} : vector<5x32xf32> to vector<5x8xf32>
    %cst_58 = arith.constant dense<0.000000e+00> : vector<5x8xf32>
    %167 = tpu.matmul %147, %166, %cst_58 {dimension_numbers = #tpu.dot_dimension_numbers<[1], [0], [0], [1], [0, 0, 1, 1], [], []>} : vector<5x5xf32>, vector<5x8xf32>, vector<5x8xf32> -> vector<5x8xf32>
    %168 = vector.extract_strided_slice %46 {offsets = [0, 16], sizes = [5, 8], strides = [1, 1]} : vector<5x32xf32> to vector<5x8xf32>
    %cst_59 = arith.constant dense<0.000000e+00> : vector<5x8xf32>
    %169 = tpu.matmul %165, %168, %cst_59 {dimension_numbers = #tpu.dot_dimension_numbers<[1], [0], [0], [1], [0, 0, 1, 1], [], []>} : vector<5x5xf32>, vector<5x8xf32>, vector<5x8xf32> -> vector<5x8xf32>
    %170 = vector.extract_strided_slice %44 {offsets = [0, 48], sizes = [5, 16], strides = [1, 1]} : vector<5x64xf32> to vector<5x16xf32>
    %171 = vector.extract_strided_slice %47 {offsets = [0, 48], sizes = [5, 16], strides = [1, 1]} : vector<5x64xf32> to vector<5x16xf32>
    %172 = tpu.transpose %171, [1, 0] : vector<5x16xf32> -> vector<16x5xf32>
    %cst_60 = arith.constant dense<0.000000e+00> : vector<5x5xf32>
    %173 = tpu.matmul %170, %172, %cst_60 {dimension_numbers = #tpu.dot_dimension_numbers<[1], [0], [0], [1], [0, 0, 1, 1], [], []>} : vector<5x16xf32>, vector<16x5xf32>, vector<5x5xf32> -> vector<5x5xf32>
    %cst_61 = arith.constant 2.500000e-01 : f32
    %174 = vector.broadcast %cst_61 : f32 to vector<5x5xf32>
    %175 = arith.mulf %173, %174 : vector<5x5xf32>
    %176 = vector.broadcast %11 : vector<1x5xf32> to vector<5x5xf32>
    %177 = arith.addf %175, %176 : vector<5x5xf32>
    %cst_62 = arith.constant dense<0xFF800000> : vector<5xf32>
    %178 = vector.multi_reduction <maximumf>, %177, %cst_62 [1] : vector<5x5xf32> to vector<5xf32>
    %179 = vector.shape_cast %178 : vector<5xf32> to vector<5x1xf32>
    %180 = vector.broadcast %179 : vector<5x1xf32> to vector<5x5xf32>
    %181 = arith.subf %177, %180 : vector<5x5xf32>
    %182 = math.exp %181 : vector<5x5xf32>
    %cst_63 = arith.constant dense<0.000000e+00> : vector<5xf32>
    %183 = vector.multi_reduction <add>, %182, %cst_63 [1] : vector<5x5xf32> to vector<5xf32>
    %184 = vector.shape_cast %183 : vector<5xf32> to vector<5x1xf32>
    %185 = tpu.reciprocal %184 {approx = true} : vector<5x1xf32> -> vector<5x1xf32>
    %186 = vector.broadcast %185 : vector<5x1xf32> to vector<5x5xf32>
    %187 = arith.mulf %182, %186 : vector<5x5xf32>
    %188 = vector.extract_strided_slice %48 {offsets = [0, 48], sizes = [5, 16], strides = [1, 1]} : vector<5x64xf32> to vector<5x16xf32>
    %189 = vector.extract_strided_slice %45 {offsets = [0, 48], sizes = [5, 16], strides = [1, 1]} : vector<5x64xf32> to vector<5x16xf32>
    %190 = tpu.transpose %189, [1, 0] : vector<5x16xf32> -> vector<16x5xf32>
    %cst_64 = arith.constant dense<0.000000e+00> : vector<5x5xf32>
    %191 = tpu.matmul %188, %190, %cst_64 {dimension_numbers = #tpu.dot_dimension_numbers<[1], [0], [0], [1], [0, 0, 1, 1], [], []>} : vector<5x16xf32>, vector<16x5xf32>, vector<5x5xf32> -> vector<5x5xf32>
    %cst_65 = arith.constant 2.500000e-01 : f32
    %192 = vector.broadcast %cst_65 : f32 to vector<5x5xf32>
    %193 = arith.mulf %191, %192 : vector<5x5xf32>
    %194 = vector.broadcast %11 : vector<1x5xf32> to vector<5x5xf32>
    %195 = arith.addf %193, %194 : vector<5x5xf32>
    %cst_66 = arith.constant dense<0xFF800000> : vector<5xf32>
    %196 = vector.multi_reduction <maximumf>, %195, %cst_66 [1] : vector<5x5xf32> to vector<5xf32>
    %197 = vector.shape_cast %196 : vector<5xf32> to vector<5x1xf32>
    %198 = vector.broadcast %197 : vector<5x1xf32> to vector<5x5xf32>
    %199 = arith.subf %195, %198 : vector<5x5xf32>
    %200 = math.exp %199 : vector<5x5xf32>
    %cst_67 = arith.constant dense<0.000000e+00> : vector<5xf32>
    %201 = vector.multi_reduction <add>, %200, %cst_67 [1] : vector<5x5xf32> to vector<5xf32>
    %202 = vector.shape_cast %201 : vector<5xf32> to vector<5x1xf32>
    %203 = tpu.reciprocal %202 {approx = true} : vector<5x1xf32> -> vector<5x1xf32>
    %204 = vector.broadcast %203 : vector<5x1xf32> to vector<5x5xf32>
    %205 = arith.mulf %200, %204 : vector<5x5xf32>
    %206 = vector.extract_strided_slice %49 {offsets = [0, 24], sizes = [5, 8], strides = [1, 1]} : vector<5x32xf32> to vector<5x8xf32>
    %cst_68 = arith.constant dense<0.000000e+00> : vector<5x8xf32>
    %207 = tpu.matmul %187, %206, %cst_68 {dimension_numbers = #tpu.dot_dimension_numbers<[1], [0], [0], [1], [0, 0, 1, 1], [], []>} : vector<5x5xf32>, vector<5x8xf32>, vector<5x8xf32> -> vector<5x8xf32>
    %208 = vector.extract_strided_slice %46 {offsets = [0, 24], sizes = [5, 8], strides = [1, 1]} : vector<5x32xf32> to vector<5x8xf32>
    %cst_69 = arith.constant dense<0.000000e+00> : vector<5x8xf32>
    %209 = tpu.matmul %205, %208, %cst_69 {dimension_numbers = #tpu.dot_dimension_numbers<[1], [0], [0], [1], [0, 0, 1, 1], [], []>} : vector<5x5xf32>, vector<5x8xf32>, vector<5x8xf32> -> vector<5x8xf32>
    %210 = tpu.concatenate %87, %127, %167, %207 in 1 : vector<5x8xf32>, vector<5x8xf32>, vector<5x8xf32>, vector<5x8xf32> -> vector<5x32xf32>
    %211 = tpu.concatenate %89, %129, %169, %209 in 1 : vector<5x8xf32>, vector<5x8xf32>, vector<5x8xf32>, vector<5x8xf32> -> vector<5x32xf32>
    %c0_70 = arith.constant 0 : index
    %c0_71 = arith.constant 0 : index
    %212 = vector.load %arg10[%c0_70, %c0_71] : memref<32x32xf32, #tpu.memory_space<vmem>>, vector<32x32xf32>
    %cst_72 = arith.constant dense<0.000000e+00> : vector<5x32xf32>
    %213 = tpu.matmul %211, %212, %cst_72 {dimension_numbers = #tpu.dot_dimension_numbers<[1], [0], [0], [1], [0, 0, 1, 1], [], []>} : vector<5x32xf32>, vector<32x32xf32>, vector<5x32xf32> -> vector<5x32xf32>
    %c0_73 = arith.constant 0 : index
    %c0_74 = arith.constant 0 : index
    %214 = vector.load %arg11[%c0_73, %c0_74] : memref<1x32xf32, #tpu.memory_space<vmem>>, vector<1x32xf32>
    %215 = vector.broadcast %214 : vector<1x32xf32> to vector<5x32xf32>
    %216 = arith.addf %213, %215 : vector<5x32xf32>
    %217 = arith.addf %216, %37 : vector<5x32xf32>
    %c0_75 = arith.constant 0 : index
    %c0_76 = arith.constant 0 : index
    %218 = vector.load %arg12[%c0_75, %c0_76] : memref<1x32xf32, #tpu.memory_space<vmem>>, vector<1x32xf32>
    %c0_77 = arith.constant 0 : index
    %c0_78 = arith.constant 0 : index
    %219 = vector.load %arg13[%c0_77, %c0_78] : memref<1x32xf32, #tpu.memory_space<vmem>>, vector<1x32xf32>
    %cst_79 = arith.constant dense<0.000000e+00> : vector<5xf32>
    %220 = vector.multi_reduction <add>, %217, %cst_79 [1] : vector<5x32xf32> to vector<5xf32>
    %221 = vector.shape_cast %220 : vector<5xf32> to vector<5x1xf32>
    %cst_80 = arith.constant 3.200000e+01 : f32
    %222 = vector.broadcast %cst_80 : f32 to vector<5x1xf32>
    %223 = arith.divf %221, %222 : vector<5x1xf32>
    %224 = vector.broadcast %223 : vector<5x1xf32> to vector<5x32xf32>
    %225 = arith.subf %217, %224 : vector<5x32xf32>
    %226 = arith.mulf %225, %225 : vector<5x32xf32>
    %cst_81 = arith.constant dense<0.000000e+00> : vector<5xf32>
    %227 = vector.multi_reduction <add>, %226, %cst_81 [1] : vector<5x32xf32> to vector<5xf32>
    %228 = vector.shape_cast %227 : vector<5xf32> to vector<5x1xf32>
    %cst_82 = arith.constant 3.200000e+01 : f32
    %229 = vector.broadcast %cst_82 : f32 to vector<5x1xf32>
    %230 = arith.divf %228, %229 : vector<5x1xf32>
    %cst_83 = arith.constant 9.99999996E-13 : f32
    %231 = vector.broadcast %cst_83 : f32 to vector<5x1xf32>
    %232 = arith.addf %230, %231 : vector<5x1xf32>
    %233 = math.rsqrt %232 : vector<5x1xf32>
    %234 = vector.broadcast %233 : vector<5x1xf32> to vector<5x32xf32>
    %235 = arith.mulf %225, %234 : vector<5x32xf32>
    %236 = vector.broadcast %218 : vector<1x32xf32> to vector<5x32xf32>
    %237 = arith.mulf %235, %236 : vector<5x32xf32>
    %238 = vector.broadcast %219 : vector<1x32xf32> to vector<5x32xf32>
    %239 = arith.addf %237, %238 : vector<5x32xf32>
    %c0_84 = arith.constant 0 : index
    %c0_85 = arith.constant 0 : index
    %240 = vector.load %arg14[%c0_84, %c0_85] : memref<32x32xf32, #tpu.memory_space<vmem>>, vector<32x32xf32>
    %cst_86 = arith.constant dense<0.000000e+00> : vector<5x32xf32>
    %241 = tpu.matmul %210, %240, %cst_86 {dimension_numbers = #tpu.dot_dimension_numbers<[1], [0], [0], [1], [0, 0, 1, 1], [], []>} : vector<5x32xf32>, vector<32x32xf32>, vector<5x32xf32> -> vector<5x32xf32>
    %c0_87 = arith.constant 0 : index
    %c0_88 = arith.constant 0 : index
    %242 = vector.load %arg15[%c0_87, %c0_88] : memref<1x32xf32, #tpu.memory_space<vmem>>, vector<1x32xf32>
    %243 = vector.broadcast %242 : vector<1x32xf32> to vector<5x32xf32>
    %244 = arith.addf %241, %243 : vector<5x32xf32>
    %245 = arith.addf %244, %36 : vector<5x32xf32>
    %c0_89 = arith.constant 0 : index
    %c0_90 = arith.constant 0 : index
    %246 = vector.load %arg16[%c0_89, %c0_90] : memref<1x32xf32, #tpu.memory_space<vmem>>, vector<1x32xf32>
    %c0_91 = arith.constant 0 : index
    %c0_92 = arith.constant 0 : index
    %247 = vector.load %arg17[%c0_91, %c0_92] : memref<1x32xf32, #tpu.memory_space<vmem>>, vector<1x32xf32>
    %cst_93 = arith.constant dense<0.000000e+00> : vector<5xf32>
    %248 = vector.multi_reduction <add>, %245, %cst_93 [1] : vector<5x32xf32> to vector<5xf32>
    %249 = vector.shape_cast %248 : vector<5xf32> to vector<5x1xf32>
    %cst_94 = arith.constant 3.200000e+01 : f32
    %250 = vector.broadcast %cst_94 : f32 to vector<5x1xf32>
    %251 = arith.divf %249, %250 : vector<5x1xf32>
    %252 = vector.broadcast %251 : vector<5x1xf32> to vector<5x32xf32>
    %253 = arith.subf %245, %252 : vector<5x32xf32>
    %254 = arith.mulf %253, %253 : vector<5x32xf32>
    %cst_95 = arith.constant dense<0.000000e+00> : vector<5xf32>
    %255 = vector.multi_reduction <add>, %254, %cst_95 [1] : vector<5x32xf32> to vector<5xf32>
    %256 = vector.shape_cast %255 : vector<5xf32> to vector<5x1xf32>
    %cst_96 = arith.constant 3.200000e+01 : f32
    %257 = vector.broadcast %cst_96 : f32 to vector<5x1xf32>
    %258 = arith.divf %256, %257 : vector<5x1xf32>
    %cst_97 = arith.constant 9.99999996E-13 : f32
    %259 = vector.broadcast %cst_97 : f32 to vector<5x1xf32>
    %260 = arith.addf %258, %259 : vector<5x1xf32>
    %261 = math.rsqrt %260 : vector<5x1xf32>
    %262 = vector.broadcast %261 : vector<5x1xf32> to vector<5x32xf32>
    %263 = arith.mulf %253, %262 : vector<5x32xf32>
    %264 = vector.broadcast %246 : vector<1x32xf32> to vector<5x32xf32>
    %265 = arith.mulf %263, %264 : vector<5x32xf32>
    %266 = vector.broadcast %247 : vector<1x32xf32> to vector<5x32xf32>
    %267 = arith.addf %265, %266 : vector<5x32xf32>
    %268 = arith.addf %267, %9 : vector<5x32xf32>
    %c0_98 = arith.constant 0 : index
    %c0_99 = arith.constant 0 : index
    %269 = vector.load %arg18[%c0_98, %c0_99] : memref<1x32xf32, #tpu.memory_space<vmem>>, vector<1x32xf32>
    %c0_100 = arith.constant 0 : index
    %c0_101 = arith.constant 0 : index
    %270 = vector.load %arg19[%c0_100, %c0_101] : memref<1x32xf32, #tpu.memory_space<vmem>>, vector<1x32xf32>
    %cst_102 = arith.constant dense<0.000000e+00> : vector<5xf32>
    %271 = vector.multi_reduction <add>, %268, %cst_102 [1] : vector<5x32xf32> to vector<5xf32>
    %272 = vector.shape_cast %271 : vector<5xf32> to vector<5x1xf32>
    %cst_103 = arith.constant 3.200000e+01 : f32
    %273 = vector.broadcast %cst_103 : f32 to vector<5x1xf32>
    %274 = arith.divf %272, %273 : vector<5x1xf32>
    %275 = vector.broadcast %274 : vector<5x1xf32> to vector<5x32xf32>
    %276 = arith.subf %268, %275 : vector<5x32xf32>
    %277 = arith.mulf %276, %276 : vector<5x32xf32>
    %cst_104 = arith.constant dense<0.000000e+00> : vector<5xf32>
    %278 = vector.multi_reduction <add>, %277, %cst_104 [1] : vector<5x32xf32> to vector<5xf32>
    %279 = vector.shape_cast %278 : vector<5xf32> to vector<5x1xf32>
    %cst_105 = arith.constant 3.200000e+01 : f32
    %280 = vector.broadcast %cst_105 : f32 to vector<5x1xf32>
    %281 = arith.divf %279, %280 : vector<5x1xf32>
    %cst_106 = arith.constant 9.99999974E-6 : f32
    %282 = vector.broadcast %cst_106 : f32 to vector<5x1xf32>
    %283 = arith.addf %281, %282 : vector<5x1xf32>
    %284 = math.rsqrt %283 : vector<5x1xf32>
    %285 = vector.broadcast %284 : vector<5x1xf32> to vector<5x32xf32>
    %286 = arith.mulf %276, %285 : vector<5x32xf32>
    %287 = vector.broadcast %269 : vector<1x32xf32> to vector<5x32xf32>
    %288 = arith.mulf %286, %287 : vector<5x32xf32>
    %289 = vector.broadcast %270 : vector<1x32xf32> to vector<5x32xf32>
    %290 = arith.addf %288, %289 : vector<5x32xf32>
    %c0_107 = arith.constant 0 : index
    %c0_108 = arith.constant 0 : index
    %c0_109 = arith.constant 0 : index
    %291 = vector.load %arg20[%c0_107, %c0_108, %c0_109] : memref<2x5x32xf32, #tpu.memory_space<vmem>>, vector<1x5x32xf32>
    %292 = vector.shape_cast %291 : vector<1x5x32xf32> to vector<5x32xf32>
    %293 = vector.shape_cast %290 : vector<5x32xf32> to vector<1x5x32xf32>
    tpu.vector_store %arg20[%c0_107, %c0_108, %c0_109], %293 {strides = array<i32>} : memref<2x5x32xf32, #tpu.memory_space<vmem>>, vector<1x5x32xf32>,
    %294 = arith.addf %239, %9 : vector<5x32xf32>
    %c0_110 = arith.constant 0 : index
    %c0_111 = arith.constant 0 : index
    %295 = vector.load %arg18[%c0_110, %c0_111] : memref<1x32xf32, #tpu.memory_space<vmem>>, vector<1x32xf32>
    %c0_112 = arith.constant 0 : index
    %c0_113 = arith.constant 0 : index
    %296 = vector.load %arg19[%c0_112, %c0_113] : memref<1x32xf32, #tpu.memory_space<vmem>>, vector<1x32xf32>
    %cst_114 = arith.constant dense<0.000000e+00> : vector<5xf32>
    %297 = vector.multi_reduction <add>, %294, %cst_114 [1] : vector<5x32xf32> to vector<5xf32>
    %298 = vector.shape_cast %297 : vector<5xf32> to vector<5x1xf32>
    %cst_115 = arith.constant 3.200000e+01 : f32
    %299 = vector.broadcast %cst_115 : f32 to vector<5x1xf32>
    %300 = arith.divf %298, %299 : vector<5x1xf32>
    %301 = vector.broadcast %300 : vector<5x1xf32> to vector<5x32xf32>
    %302 = arith.subf %294, %301 : vector<5x32xf32>
    %303 = arith.mulf %302, %302 : vector<5x32xf32>
    %cst_116 = arith.constant dense<0.000000e+00> : vector<5xf32>
    %304 = vector.multi_reduction <add>, %303, %cst_116 [1] : vector<5x32xf32> to vector<5xf32>
    %305 = vector.shape_cast %304 : vector<5xf32> to vector<5x1xf32>
    %cst_117 = arith.constant 3.200000e+01 : f32
    %306 = vector.broadcast %cst_117 : f32 to vector<5x1xf32>
    %307 = arith.divf %305, %306 : vector<5x1xf32>
    %cst_118 = arith.constant 9.99999974E-6 : f32
    %308 = vector.broadcast %cst_118 : f32 to vector<5x1xf32>
    %309 = arith.addf %307, %308 : vector<5x1xf32>
    %310 = math.rsqrt %309 : vector<5x1xf32>
    %311 = vector.broadcast %310 : vector<5x1xf32> to vector<5x32xf32>
    %312 = arith.mulf %302, %311 : vector<5x32xf32>
    %313 = vector.broadcast %295 : vector<1x32xf32> to vector<5x32xf32>
    %314 = arith.mulf %312, %313 : vector<5x32xf32>
    %315 = vector.broadcast %296 : vector<1x32xf32> to vector<5x32xf32>
    %316 = arith.addf %314, %315 : vector<5x32xf32>
    %c0_119 = arith.constant 0 : index
    %c0_120 = arith.constant 0 : index
    %c0_121 = arith.constant 0 : index
    %317 = vector.load %arg21[%c0_119, %c0_120, %c0_121] : memref<2x5x32xf32, #tpu.memory_space<vmem>>, vector<1x5x32xf32>
    %318 = vector.shape_cast %317 : vector<1x5x32xf32> to vector<5x32xf32>
    %319 = vector.shape_cast %316 : vector<5x32xf32> to vector<1x5x32xf32>
    tpu.vector_store %arg21[%c0_119, %c0_120, %c0_121], %319 {strides = array<i32>} : memref<2x5x32xf32, #tpu.memory_space<vmem>>, vector<1x5x32xf32>,
    %c1 = arith.constant 1 : index
    %c0_122 = arith.constant 0 : index
    %c0_123 = arith.constant 0 : index
    %320 = vector.load %arg0[%c1, %c0_122, %c0_123] : memref<2x5x32xf32, #tpu.memory_space<vmem>>, vector<1x5x32xf32>
    %321 = vector.shape_cast %320 : vector<1x5x32xf32> to vector<5x32xf32>
    %c1_124 = arith.constant 1 : index
    %c0_125 = arith.constant 0 : index
    %c0_126 = arith.constant 0 : index
    %322 = vector.load %arg1[%c1_124, %c0_125, %c0_126] : memref<2x1x5xf32, #tpu.memory_space<vmem>>, vector<1x1x5xf32>
    %323 = vector.shape_cast %322 : vector<1x1x5xf32> to vector<1x5xf32>
    %cst_127 = arith.constant dense<0.000000e+00> : vector<5x32xf32>
    %324 = tpu.matmul %321, %1, %cst_127 {dimension_numbers = #tpu.dot_dimension_numbers<[1], [0], [0], [1], [0, 0, 1, 1], [], []>} : vector<5x32xf32>, vector<32x32xf32>, vector<5x32xf32> -> vector<5x32xf32>
    %cst_128 = arith.constant dense<0xFF800000> : vector<5xf32>
    %325 = vector.multi_reduction <maximumf>, %324, %cst_128 [1] : vector<5x32xf32> to vector<5xf32>
    %326 = vector.shape_cast %325 : vector<5xf32> to vector<5x1xf32>
    %327 = vector.broadcast %326 : vector<5x1xf32> to vector<5x32xf32>
    %328 = arith.subf %324, %327 : vector<5x32xf32>
    %329 = math.exp %328 : vector<5x32xf32>
    %cst_129 = arith.constant dense<0.000000e+00> : vector<5xf32>
    %330 = vector.multi_reduction <add>, %329, %cst_129 [1] : vector<5x32xf32> to vector<5xf32>
    %331 = vector.shape_cast %330 : vector<5xf32> to vector<5x1xf32>
    %332 = tpu.reciprocal %331 {approx = true} : vector<5x1xf32> -> vector<5x1xf32>
    %333 = vector.broadcast %332 : vector<5x1xf32> to vector<5x32xf32>
    %334 = arith.mulf %329, %333 : vector<5x32xf32>
    %cst_130 = arith.constant dense<0.000000e+00> : vector<5x32xf32>
    %335 = tpu.matmul %334, %0, %cst_130 {dimension_numbers = #tpu.dot_dimension_numbers<[1], [0], [0], [1], [0, 0, 1, 1], [], []>} : vector<5x32xf32>, vector<32x32xf32>, vector<5x32xf32> -> vector<5x32xf32>
    %cst_131 = arith.constant dense<0.000000e+00> : vector<5x32xf32>
    %336 = tpu.matmul %321, %3, %cst_131 {dimension_numbers = #tpu.dot_dimension_numbers<[1], [0], [0], [1], [0, 0, 1, 1], [], []>} : vector<5x32xf32>, vector<32x32xf32>, vector<5x32xf32> -> vector<5x32xf32>
    %cst_132 = arith.constant dense<0xFF800000> : vector<5xf32>
    %337 = vector.multi_reduction <maximumf>, %336, %cst_132 [1] : vector<5x32xf32> to vector<5xf32>
    %338 = vector.shape_cast %337 : vector<5xf32> to vector<5x1xf32>
    %339 = vector.broadcast %338 : vector<5x1xf32> to vector<5x32xf32>
    %340 = arith.subf %336, %339 : vector<5x32xf32>
    %341 = math.exp %340 : vector<5x32xf32>
    %cst_133 = arith.constant dense<0.000000e+00> : vector<5xf32>
    %342 = vector.multi_reduction <add>, %341, %cst_133 [1] : vector<5x32xf32> to vector<5xf32>
    %343 = vector.shape_cast %342 : vector<5xf32> to vector<5x1xf32>
    %344 = tpu.reciprocal %343 {approx = true} : vector<5x1xf32> -> vector<5x1xf32>
    %345 = vector.broadcast %344 : vector<5x1xf32> to vector<5x32xf32>
    %346 = arith.mulf %341, %345 : vector<5x32xf32>
    %cst_134 = arith.constant dense<0.000000e+00> : vector<5x32xf32>
    %347 = tpu.matmul %346, %2, %cst_134 {dimension_numbers = #tpu.dot_dimension_numbers<[1], [0], [0], [1], [0, 0, 1, 1], [], []>} : vector<5x32xf32>, vector<32x32xf32>, vector<5x32xf32> -> vector<5x32xf32>
    %348 = arith.addf %335, %321 : vector<5x32xf32>
    %349 = arith.addf %347, %321 : vector<5x32xf32>
    %cst_135 = arith.constant dense<0.000000e+00> : vector<5x160xf32>
    %350 = tpu.matmul %348, %4, %cst_135 {dimension_numbers = #tpu.dot_dimension_numbers<[1], [0], [0], [1], [0, 0, 1, 1], [], []>} : vector<5x32xf32>, vector<32x160xf32>, vector<5x160xf32> -> vector<5x160xf32>
    %351 = vector.broadcast %5 : vector<1x160xf32> to vector<5x160xf32>
    %352 = arith.addf %350, %351 : vector<5x160xf32>
    %cst_136 = arith.constant dense<0.000000e+00> : vector<5x160xf32>
    %353 = tpu.matmul %349, %6, %cst_136 {dimension_numbers = #tpu.dot_dimension_numbers<[1], [0], [0], [1], [0, 0, 1, 1], [], []>} : vector<5x32xf32>, vector<32x160xf32>, vector<5x160xf32> -> vector<5x160xf32>
    %354 = vector.broadcast %7 : vector<1x160xf32> to vector<5x160xf32>
    %355 = arith.addf %353, %354 : vector<5x160xf32>
    %356 = vector.extract_strided_slice %352 {offsets = [0, 0], sizes = [5, 64], strides = [1, 1]} : vector<5x160xf32> to vector<5x64xf32>
    %357 = vector.extract_strided_slice %352 {offsets = [0, 64], sizes = [5, 64], strides = [1, 1]} : vector<5x160xf32> to vector<5x64xf32>
    %358 = vector.extract_strided_slice %352 {offsets = [0, 128], sizes = [5, 32], strides = [1, 1]} : vector<5x160xf32> to vector<5x32xf32>
    %359 = vector.extract_strided_slice %355 {offsets = [0, 0], sizes = [5, 64], strides = [1, 1]} : vector<5x160xf32> to vector<5x64xf32>
    %360 = vector.extract_strided_slice %355 {offsets = [0, 64], sizes = [5, 64], strides = [1, 1]} : vector<5x160xf32> to vector<5x64xf32>
    %361 = vector.extract_strided_slice %355 {offsets = [0, 128], sizes = [5, 32], strides = [1, 1]} : vector<5x160xf32> to vector<5x32xf32>
    %362 = vector.extract_strided_slice %356 {offsets = [0, 0], sizes = [5, 16], strides = [1, 1]} : vector<5x64xf32> to vector<5x16xf32>
    %363 = vector.extract_strided_slice %359 {offsets = [0, 0], sizes = [5, 16], strides = [1, 1]} : vector<5x64xf32> to vector<5x16xf32>
    %364 = tpu.transpose %363, [1, 0] : vector<5x16xf32> -> vector<16x5xf32>
    %cst_137 = arith.constant dense<0.000000e+00> : vector<5x5xf32>
    %365 = tpu.matmul %362, %364, %cst_137 {dimension_numbers = #tpu.dot_dimension_numbers<[1], [0], [0], [1], [0, 0, 1, 1], [], []>} : vector<5x16xf32>, vector<16x5xf32>, vector<5x5xf32> -> vector<5x5xf32>
    %cst_138 = arith.constant 2.500000e-01 : f32
    %366 = vector.broadcast %cst_138 : f32 to vector<5x5xf32>
    %367 = arith.mulf %365, %366 : vector<5x5xf32>
    %368 = vector.broadcast %323 : vector<1x5xf32> to vector<5x5xf32>
    %369 = arith.addf %367, %368 : vector<5x5xf32>
    %cst_139 = arith.constant dense<0xFF800000> : vector<5xf32>
    %370 = vector.multi_reduction <maximumf>, %369, %cst_139 [1] : vector<5x5xf32> to vector<5xf32>
    %371 = vector.shape_cast %370 : vector<5xf32> to vector<5x1xf32>
    %372 = vector.broadcast %371 : vector<5x1xf32> to vector<5x5xf32>
    %373 = arith.subf %369, %372 : vector<5x5xf32>
    %374 = math.exp %373 : vector<5x5xf32>
    %cst_140 = arith.constant dense<0.000000e+00> : vector<5xf32>
    %375 = vector.multi_reduction <add>, %374, %cst_140 [1] : vector<5x5xf32> to vector<5xf32>
    %376 = vector.shape_cast %375 : vector<5xf32> to vector<5x1xf32>
    %377 = tpu.reciprocal %376 {approx = true} : vector<5x1xf32> -> vector<5x1xf32>
    %378 = vector.broadcast %377 : vector<5x1xf32> to vector<5x5xf32>
    %379 = arith.mulf %374, %378 : vector<5x5xf32>
    %380 = vector.extract_strided_slice %360 {offsets = [0, 0], sizes = [5, 16], strides = [1, 1]} : vector<5x64xf32> to vector<5x16xf32>
    %381 = vector.extract_strided_slice %357 {offsets = [0, 0], sizes = [5, 16], strides = [1, 1]} : vector<5x64xf32> to vector<5x16xf32>
    %382 = tpu.transpose %381, [1, 0] : vector<5x16xf32> -> vector<16x5xf32>
    %cst_141 = arith.constant dense<0.000000e+00> : vector<5x5xf32>
    %383 = tpu.matmul %380, %382, %cst_141 {dimension_numbers = #tpu.dot_dimension_numbers<[1], [0], [0], [1], [0, 0, 1, 1], [], []>} : vector<5x16xf32>, vector<16x5xf32>, vector<5x5xf32> -> vector<5x5xf32>
    %cst_142 = arith.constant 2.500000e-01 : f32
    %384 = vector.broadcast %cst_142 : f32 to vector<5x5xf32>
    %385 = arith.mulf %383, %384 : vector<5x5xf32>
    %386 = vector.broadcast %323 : vector<1x5xf32> to vector<5x5xf32>
    %387 = arith.addf %385, %386 : vector<5x5xf32>
    %cst_143 = arith.constant dense<0xFF800000> : vector<5xf32>
    %388 = vector.multi_reduction <maximumf>, %387, %cst_143 [1] : vector<5x5xf32> to vector<5xf32>
    %389 = vector.shape_cast %388 : vector<5xf32> to vector<5x1xf32>
    %390 = vector.broadcast %389 : vector<5x1xf32> to vector<5x5xf32>
    %391 = arith.subf %387, %390 : vector<5x5xf32>
    %392 = math.exp %391 : vector<5x5xf32>
    %cst_144 = arith.constant dense<0.000000e+00> : vector<5xf32>
    %393 = vector.multi_reduction <add>, %392, %cst_144 [1] : vector<5x5xf32> to vector<5xf32>
    %394 = vector.shape_cast %393 : vector<5xf32> to vector<5x1xf32>
    %395 = tpu.reciprocal %394 {approx = true} : vector<5x1xf32> -> vector<5x1xf32>
    %396 = vector.broadcast %395 : vector<5x1xf32> to vector<5x5xf32>
    %397 = arith.mulf %392, %396 : vector<5x5xf32>
    %398 = vector.extract_strided_slice %361 {offsets = [0, 0], sizes = [5, 8], strides = [1, 1]} : vector<5x32xf32> to vector<5x8xf32>
    %cst_145 = arith.constant dense<0.000000e+00> : vector<5x8xf32>
    %399 = tpu.matmul %379, %398, %cst_145 {dimension_numbers = #tpu.dot_dimension_numbers<[1], [0], [0], [1], [0, 0, 1, 1], [], []>} : vector<5x5xf32>, vector<5x8xf32>, vector<5x8xf32> -> vector<5x8xf32>
    %400 = vector.extract_strided_slice %358 {offsets = [0, 0], sizes = [5, 8], strides = [1, 1]} : vector<5x32xf32> to vector<5x8xf32>
    %cst_146 = arith.constant dense<0.000000e+00> : vector<5x8xf32>
    %401 = tpu.matmul %397, %400, %cst_146 {dimension_numbers = #tpu.dot_dimension_numbers<[1], [0], [0], [1], [0, 0, 1, 1], [], []>} : vector<5x5xf32>, vector<5x8xf32>, vector<5x8xf32> -> vector<5x8xf32>
    %402 = vector.extract_strided_slice %356 {offsets = [0, 16], sizes = [5, 16], strides = [1, 1]} : vector<5x64xf32> to vector<5x16xf32>
    %403 = vector.extract_strided_slice %359 {offsets = [0, 16], sizes = [5, 16], strides = [1, 1]} : vector<5x64xf32> to vector<5x16xf32>
    %404 = tpu.transpose %403, [1, 0] : vector<5x16xf32> -> vector<16x5xf32>
    %cst_147 = arith.constant dense<0.000000e+00> : vector<5x5xf32>
    %405 = tpu.matmul %402, %404, %cst_147 {dimension_numbers = #tpu.dot_dimension_numbers<[1], [0], [0], [1], [0, 0, 1, 1], [], []>} : vector<5x16xf32>, vector<16x5xf32>, vector<5x5xf32> -> vector<5x5xf32>
    %cst_148 = arith.constant 2.500000e-01 : f32
    %406 = vector.broadcast %cst_148 : f32 to vector<5x5xf32>
    %407 = arith.mulf %405, %406 : vector<5x5xf32>
    %408 = vector.broadcast %323 : vector<1x5xf32> to vector<5x5xf32>
    %409 = arith.addf %407, %408 : vector<5x5xf32>
    %cst_149 = arith.constant dense<0xFF800000> : vector<5xf32>
    %410 = vector.multi_reduction <maximumf>, %409, %cst_149 [1] : vector<5x5xf32> to vector<5xf32>
    %411 = vector.shape_cast %410 : vector<5xf32> to vector<5x1xf32>
    %412 = vector.broadcast %411 : vector<5x1xf32> to vector<5x5xf32>
    %413 = arith.subf %409, %412 : vector<5x5xf32>
    %414 = math.exp %413 : vector<5x5xf32>
    %cst_150 = arith.constant dense<0.000000e+00> : vector<5xf32>
    %415 = vector.multi_reduction <add>, %414, %cst_150 [1] : vector<5x5xf32> to vector<5xf32>
    %416 = vector.shape_cast %415 : vector<5xf32> to vector<5x1xf32>
    %417 = tpu.reciprocal %416 {approx = true} : vector<5x1xf32> -> vector<5x1xf32>
    %418 = vector.broadcast %417 : vector<5x1xf32> to vector<5x5xf32>
    %419 = arith.mulf %414, %418 : vector<5x5xf32>
    %420 = vector.extract_strided_slice %360 {offsets = [0, 16], sizes = [5, 16], strides = [1, 1]} : vector<5x64xf32> to vector<5x16xf32>
    %421 = vector.extract_strided_slice %357 {offsets = [0, 16], sizes = [5, 16], strides = [1, 1]} : vector<5x64xf32> to vector<5x16xf32>
    %422 = tpu.transpose %421, [1, 0] : vector<5x16xf32> -> vector<16x5xf32>
    %cst_151 = arith.constant dense<0.000000e+00> : vector<5x5xf32>
    %423 = tpu.matmul %420, %422, %cst_151 {dimension_numbers = #tpu.dot_dimension_numbers<[1], [0], [0], [1], [0, 0, 1, 1], [], []>} : vector<5x16xf32>, vector<16x5xf32>, vector<5x5xf32> -> vector<5x5xf32>
    %cst_152 = arith.constant 2.500000e-01 : f32
    %424 = vector.broadcast %cst_152 : f32 to vector<5x5xf32>
    %425 = arith.mulf %423, %424 : vector<5x5xf32>
    %426 = vector.broadcast %323 : vector<1x5xf32> to vector<5x5xf32>
    %427 = arith.addf %425, %426 : vector<5x5xf32>
    %cst_153 = arith.constant dense<0xFF800000> : vector<5xf32>
    %428 = vector.multi_reduction <maximumf>, %427, %cst_153 [1] : vector<5x5xf32> to vector<5xf32>
    %429 = vector.shape_cast %428 : vector<5xf32> to vector<5x1xf32>
    %430 = vector.broadcast %429 : vector<5x1xf32> to vector<5x5xf32>
    %431 = arith.subf %427, %430 : vector<5x5xf32>
    %432 = math.exp %431 : vector<5x5xf32>
    %cst_154 = arith.constant dense<0.000000e+00> : vector<5xf32>
    %433 = vector.multi_reduction <add>, %432, %cst_154 [1] : vector<5x5xf32> to vector<5xf32>
    %434 = vector.shape_cast %433 : vector<5xf32> to vector<5x1xf32>
    %435 = tpu.reciprocal %434 {approx = true} : vector<5x1xf32> -> vector<5x1xf32>
    %436 = vector.broadcast %435 : vector<5x1xf32> to vector<5x5xf32>
    %437 = arith.mulf %432, %436 : vector<5x5xf32>
    %438 = vector.extract_strided_slice %361 {offsets = [0, 8], sizes = [5, 8], strides = [1, 1]} : vector<5x32xf32> to vector<5x8xf32>
    %cst_155 = arith.constant dense<0.000000e+00> : vector<5x8xf32>
    %439 = tpu.matmul %419, %438, %cst_155 {dimension_numbers = #tpu.dot_dimension_numbers<[1], [0], [0], [1], [0, 0, 1, 1], [], []>} : vector<5x5xf32>, vector<5x8xf32>, vector<5x8xf32> -> vector<5x8xf32>
    %440 = vector.extract_strided_slice %358 {offsets = [0, 8], sizes = [5, 8], strides = [1, 1]} : vector<5x32xf32> to vector<5x8xf32>
    %cst_156 = arith.constant dense<0.000000e+00> : vector<5x8xf32>
    %441 = tpu.matmul %437, %440, %cst_156 {dimension_numbers = #tpu.dot_dimension_numbers<[1], [0], [0], [1], [0, 0, 1, 1], [], []>} : vector<5x5xf32>, vector<5x8xf32>, vector<5x8xf32> -> vector<5x8xf32>
    %442 = vector.extract_strided_slice %356 {offsets = [0, 32], sizes = [5, 16], strides = [1, 1]} : vector<5x64xf32> to vector<5x16xf32>
    %443 = vector.extract_strided_slice %359 {offsets = [0, 32], sizes = [5, 16], strides = [1, 1]} : vector<5x64xf32> to vector<5x16xf32>
    %444 = tpu.transpose %443, [1, 0] : vector<5x16xf32> -> vector<16x5xf32>
    %cst_157 = arith.constant dense<0.000000e+00> : vector<5x5xf32>
    %445 = tpu.matmul %442, %444, %cst_157 {dimension_numbers = #tpu.dot_dimension_numbers<[1], [0], [0], [1], [0, 0, 1, 1], [], []>} : vector<5x16xf32>, vector<16x5xf32>, vector<5x5xf32> -> vector<5x5xf32>
    %cst_158 = arith.constant 2.500000e-01 : f32
    %446 = vector.broadcast %cst_158 : f32 to vector<5x5xf32>
    %447 = arith.mulf %445, %446 : vector<5x5xf32>
    %448 = vector.broadcast %323 : vector<1x5xf32> to vector<5x5xf32>
    %449 = arith.addf %447, %448 : vector<5x5xf32>
    %cst_159 = arith.constant dense<0xFF800000> : vector<5xf32>
    %450 = vector.multi_reduction <maximumf>, %449, %cst_159 [1] : vector<5x5xf32> to vector<5xf32>
    %451 = vector.shape_cast %450 : vector<5xf32> to vector<5x1xf32>
    %452 = vector.broadcast %451 : vector<5x1xf32> to vector<5x5xf32>
    %453 = arith.subf %449, %452 : vector<5x5xf32>
    %454 = math.exp %453 : vector<5x5xf32>
    %cst_160 = arith.constant dense<0.000000e+00> : vector<5xf32>
    %455 = vector.multi_reduction <add>, %454, %cst_160 [1] : vector<5x5xf32> to vector<5xf32>
    %456 = vector.shape_cast %455 : vector<5xf32> to vector<5x1xf32>
    %457 = tpu.reciprocal %456 {approx = true} : vector<5x1xf32> -> vector<5x1xf32>
    %458 = vector.broadcast %457 : vector<5x1xf32> to vector<5x5xf32>
    %459 = arith.mulf %454, %458 : vector<5x5xf32>
    %460 = vector.extract_strided_slice %360 {offsets = [0, 32], sizes = [5, 16], strides = [1, 1]} : vector<5x64xf32> to vector<5x16xf32>
    %461 = vector.extract_strided_slice %357 {offsets = [0, 32], sizes = [5, 16], strides = [1, 1]} : vector<5x64xf32> to vector<5x16xf32>
    %462 = tpu.transpose %461, [1, 0] : vector<5x16xf32> -> vector<16x5xf32>
    %cst_161 = arith.constant dense<0.000000e+00> : vector<5x5xf32>
    %463 = tpu.matmul %460, %462, %cst_161 {dimension_numbers = #tpu.dot_dimension_numbers<[1], [0], [0], [1], [0, 0, 1, 1], [], []>} : vector<5x16xf32>, vector<16x5xf32>, vector<5x5xf32> -> vector<5x5xf32>
    %cst_162 = arith.constant 2.500000e-01 : f32
    %464 = vector.broadcast %cst_162 : f32 to vector<5x5xf32>
    %465 = arith.mulf %463, %464 : vector<5x5xf32>
    %466 = vector.broadcast %323 : vector<1x5xf32> to vector<5x5xf32>
    %467 = arith.addf %465, %466 : vector<5x5xf32>
    %cst_163 = arith.constant dense<0xFF800000> : vector<5xf32>
    %468 = vector.multi_reduction <maximumf>, %467, %cst_163 [1] : vector<5x5xf32> to vector<5xf32>
    %469 = vector.shape_cast %468 : vector<5xf32> to vector<5x1xf32>
    %470 = vector.broadcast %469 : vector<5x1xf32> to vector<5x5xf32>
    %471 = arith.subf %467, %470 : vector<5x5xf32>
    %472 = math.exp %471 : vector<5x5xf32>
    %cst_164 = arith.constant dense<0.000000e+00> : vector<5xf32>
    %473 = vector.multi_reduction <add>, %472, %cst_164 [1] : vector<5x5xf32> to vector<5xf32>
    %474 = vector.shape_cast %473 : vector<5xf32> to vector<5x1xf32>
    %475 = tpu.reciprocal %474 {approx = true} : vector<5x1xf32> -> vector<5x1xf32>
    %476 = vector.broadcast %475 : vector<5x1xf32> to vector<5x5xf32>
    %477 = arith.mulf %472, %476 : vector<5x5xf32>
    %478 = vector.extract_strided_slice %361 {offsets = [0, 16], sizes = [5, 8], strides = [1, 1]} : vector<5x32xf32> to vector<5x8xf32>
    %cst_165 = arith.constant dense<0.000000e+00> : vector<5x8xf32>
    %479 = tpu.matmul %459, %478, %cst_165 {dimension_numbers = #tpu.dot_dimension_numbers<[1], [0], [0], [1], [0, 0, 1, 1], [], []>} : vector<5x5xf32>, vector<5x8xf32>, vector<5x8xf32> -> vector<5x8xf32>
    %480 = vector.extract_strided_slice %358 {offsets = [0, 16], sizes = [5, 8], strides = [1, 1]} : vector<5x32xf32> to vector<5x8xf32>
    %cst_166 = arith.constant dense<0.000000e+00> : vector<5x8xf32>
    %481 = tpu.matmul %477, %480, %cst_166 {dimension_numbers = #tpu.dot_dimension_numbers<[1], [0], [0], [1], [0, 0, 1, 1], [], []>} : vector<5x5xf32>, vector<5x8xf32>, vector<5x8xf32> -> vector<5x8xf32>
    %482 = vector.extract_strided_slice %356 {offsets = [0, 48], sizes = [5, 16], strides = [1, 1]} : vector<5x64xf32> to vector<5x16xf32>
    %483 = vector.extract_strided_slice %359 {offsets = [0, 48], sizes = [5, 16], strides = [1, 1]} : vector<5x64xf32> to vector<5x16xf32>
    %484 = tpu.transpose %483, [1, 0] : vector<5x16xf32> -> vector<16x5xf32>
    %cst_167 = arith.constant dense<0.000000e+00> : vector<5x5xf32>
    %485 = tpu.matmul %482, %484, %cst_167 {dimension_numbers = #tpu.dot_dimension_numbers<[1], [0], [0], [1], [0, 0, 1, 1], [], []>} : vector<5x16xf32>, vector<16x5xf32>, vector<5x5xf32> -> vector<5x5xf32>
    %cst_168 = arith.constant 2.500000e-01 : f32
    %486 = vector.broadcast %cst_168 : f32 to vector<5x5xf32>
    %487 = arith.mulf %485, %486 : vector<5x5xf32>
    %488 = vector.broadcast %323 : vector<1x5xf32> to vector<5x5xf32>
    %489 = arith.addf %487, %488 : vector<5x5xf32>
    %cst_169 = arith.constant dense<0xFF800000> : vector<5xf32>
    %490 = vector.multi_reduction <maximumf>, %489, %cst_169 [1] : vector<5x5xf32> to vector<5xf32>
    %491 = vector.shape_cast %490 : vector<5xf32> to vector<5x1xf32>
    %492 = vector.broadcast %491 : vector<5x1xf32> to vector<5x5xf32>
    %493 = arith.subf %489, %492 : vector<5x5xf32>
    %494 = math.exp %493 : vector<5x5xf32>
    %cst_170 = arith.constant dense<0.000000e+00> : vector<5xf32>
    %495 = vector.multi_reduction <add>, %494, %cst_170 [1] : vector<5x5xf32> to vector<5xf32>
    %496 = vector.shape_cast %495 : vector<5xf32> to vector<5x1xf32>
    %497 = tpu.reciprocal %496 {approx = true} : vector<5x1xf32> -> vector<5x1xf32>
    %498 = vector.broadcast %497 : vector<5x1xf32> to vector<5x5xf32>
    %499 = arith.mulf %494, %498 : vector<5x5xf32>
    %500 = vector.extract_strided_slice %360 {offsets = [0, 48], sizes = [5, 16], strides = [1, 1]} : vector<5x64xf32> to vector<5x16xf32>
    %501 = vector.extract_strided_slice %357 {offsets = [0, 48], sizes = [5, 16], strides = [1, 1]} : vector<5x64xf32> to vector<5x16xf32>
    %502 = tpu.transpose %501, [1, 0] : vector<5x16xf32> -> vector<16x5xf32>
    %cst_171 = arith.constant dense<0.000000e+00> : vector<5x5xf32>
    %503 = tpu.matmul %500, %502, %cst_171 {dimension_numbers = #tpu.dot_dimension_numbers<[1], [0], [0], [1], [0, 0, 1, 1], [], []>} : vector<5x16xf32>, vector<16x5xf32>, vector<5x5xf32> -> vector<5x5xf32>
    %cst_172 = arith.constant 2.500000e-01 : f32
    %504 = vector.broadcast %cst_172 : f32 to vector<5x5xf32>
    %505 = arith.mulf %503, %504 : vector<5x5xf32>
    %506 = vector.broadcast %323 : vector<1x5xf32> to vector<5x5xf32>
    %507 = arith.addf %505, %506 : vector<5x5xf32>
    %cst_173 = arith.constant dense<0xFF800000> : vector<5xf32>
    %508 = vector.multi_reduction <maximumf>, %507, %cst_173 [1] : vector<5x5xf32> to vector<5xf32>
    %509 = vector.shape_cast %508 : vector<5xf32> to vector<5x1xf32>
    %510 = vector.broadcast %509 : vector<5x1xf32> to vector<5x5xf32>
    %511 = arith.subf %507, %510 : vector<5x5xf32>
    %512 = math.exp %511 : vector<5x5xf32>
    %cst_174 = arith.constant dense<0.000000e+00> : vector<5xf32>
    %513 = vector.multi_reduction <add>, %512, %cst_174 [1] : vector<5x5xf32> to vector<5xf32>
    %514 = vector.shape_cast %513 : vector<5xf32> to vector<5x1xf32>
    %515 = tpu.reciprocal %514 {approx = true} : vector<5x1xf32> -> vector<5x1xf32>
    %516 = vector.broadcast %515 : vector<5x1xf32> to vector<5x5xf32>
    %517 = arith.mulf %512, %516 : vector<5x5xf32>
    %518 = vector.extract_strided_slice %361 {offsets = [0, 24], sizes = [5, 8], strides = [1, 1]} : vector<5x32xf32> to vector<5x8xf32>
    %cst_175 = arith.constant dense<0.000000e+00> : vector<5x8xf32>
    %519 = tpu.matmul %499, %518, %cst_175 {dimension_numbers = #tpu.dot_dimension_numbers<[1], [0], [0], [1], [0, 0, 1, 1], [], []>} : vector<5x5xf32>, vector<5x8xf32>, vector<5x8xf32> -> vector<5x8xf32>
    %520 = vector.extract_strided_slice %358 {offsets = [0, 24], sizes = [5, 8], strides = [1, 1]} : vector<5x32xf32> to vector<5x8xf32>
    %cst_176 = arith.constant dense<0.000000e+00> : vector<5x8xf32>
    %521 = tpu.matmul %517, %520, %cst_176 {dimension_numbers = #tpu.dot_dimension_numbers<[1], [0], [0], [1], [0, 0, 1, 1], [], []>} : vector<5x5xf32>, vector<5x8xf32>, vector<5x8xf32> -> vector<5x8xf32>
    %522 = tpu.concatenate %399, %439, %479, %519 in 1 : vector<5x8xf32>, vector<5x8xf32>, vector<5x8xf32>, vector<5x8xf32> -> vector<5x32xf32>
    %523 = tpu.concatenate %401, %441, %481, %521 in 1 : vector<5x8xf32>, vector<5x8xf32>, vector<5x8xf32>, vector<5x8xf32> -> vector<5x32xf32>
    %c0_177 = arith.constant 0 : index
    %c0_178 = arith.constant 0 : index
    %524 = vector.load %arg10[%c0_177, %c0_178] : memref<32x32xf32, #tpu.memory_space<vmem>>, vector<32x32xf32>
    %cst_179 = arith.constant dense<0.000000e+00> : vector<5x32xf32>
    %525 = tpu.matmul %523, %524, %cst_179 {dimension_numbers = #tpu.dot_dimension_numbers<[1], [0], [0], [1], [0, 0, 1, 1], [], []>} : vector<5x32xf32>, vector<32x32xf32>, vector<5x32xf32> -> vector<5x32xf32>
    %c0_180 = arith.constant 0 : index
    %c0_181 = arith.constant 0 : index
    %526 = vector.load %arg11[%c0_180, %c0_181] : memref<1x32xf32, #tpu.memory_space<vmem>>, vector<1x32xf32>
    %527 = vector.broadcast %526 : vector<1x32xf32> to vector<5x32xf32>
    %528 = arith.addf %525, %527 : vector<5x32xf32>
    %529 = arith.addf %528, %349 : vector<5x32xf32>
    %c0_182 = arith.constant 0 : index
    %c0_183 = arith.constant 0 : index
    %530 = vector.load %arg12[%c0_182, %c0_183] : memref<1x32xf32, #tpu.memory_space<vmem>>, vector<1x32xf32>
    %c0_184 = arith.constant 0 : index
    %c0_185 = arith.constant 0 : index
    %531 = vector.load %arg13[%c0_184, %c0_185] : memref<1x32xf32, #tpu.memory_space<vmem>>, vector<1x32xf32>
    %cst_186 = arith.constant dense<0.000000e+00> : vector<5xf32>
    %532 = vector.multi_reduction <add>, %529, %cst_186 [1] : vector<5x32xf32> to vector<5xf32>
    %533 = vector.shape_cast %532 : vector<5xf32> to vector<5x1xf32>
    %cst_187 = arith.constant 3.200000e+01 : f32
    %534 = vector.broadcast %cst_187 : f32 to vector<5x1xf32>
    %535 = arith.divf %533, %534 : vector<5x1xf32>
    %536 = vector.broadcast %535 : vector<5x1xf32> to vector<5x32xf32>
    %537 = arith.subf %529, %536 : vector<5x32xf32>
    %538 = arith.mulf %537, %537 : vector<5x32xf32>
    %cst_188 = arith.constant dense<0.000000e+00> : vector<5xf32>
    %539 = vector.multi_reduction <add>, %538, %cst_188 [1] : vector<5x32xf32> to vector<5xf32>
    %540 = vector.shape_cast %539 : vector<5xf32> to vector<5x1xf32>
    %cst_189 = arith.constant 3.200000e+01 : f32
    %541 = vector.broadcast %cst_189 : f32 to vector<5x1xf32>
    %542 = arith.divf %540, %541 : vector<5x1xf32>
    %cst_190 = arith.constant 9.99999996E-13 : f32
    %543 = vector.broadcast %cst_190 : f32 to vector<5x1xf32>
    %544 = arith.addf %542, %543 : vector<5x1xf32>
    %545 = math.rsqrt %544 : vector<5x1xf32>
    %546 = vector.broadcast %545 : vector<5x1xf32> to vector<5x32xf32>
    %547 = arith.mulf %537, %546 : vector<5x32xf32>
    %548 = vector.broadcast %530 : vector<1x32xf32> to vector<5x32xf32>
    %549 = arith.mulf %547, %548 : vector<5x32xf32>
    %550 = vector.broadcast %531 : vector<1x32xf32> to vector<5x32xf32>
    %551 = arith.addf %549, %550 : vector<5x32xf32>
    %c0_191 = arith.constant 0 : index
    %c0_192 = arith.constant 0 : index
    %552 = vector.load %arg14[%c0_191, %c0_192] : memref<32x32xf32, #tpu.memory_space<vmem>>, vector<32x32xf32>
    %cst_193 = arith.constant dense<0.000000e+00> : vector<5x32xf32>
    %553 = tpu.matmul %522, %552, %cst_193 {dimension_numbers = #tpu.dot_dimension_numbers<[1], [0], [0], [1], [0, 0, 1, 1], [], []>} : vector<5x32xf32>, vector<32x32xf32>, vector<5x32xf32> -> vector<5x32xf32>
    %c0_194 = arith.constant 0 : index
    %c0_195 = arith.constant 0 : index
    %554 = vector.load %arg15[%c0_194, %c0_195] : memref<1x32xf32, #tpu.memory_space<vmem>>, vector<1x32xf32>
    %555 = vector.broadcast %554 : vector<1x32xf32> to vector<5x32xf32>
    %556 = arith.addf %553, %555 : vector<5x32xf32>
    %557 = arith.addf %556, %348 : vector<5x32xf32>
    %c0_196 = arith.constant 0 : index
    %c0_197 = arith.constant 0 : index
    %558 = vector.load %arg16[%c0_196, %c0_197] : memref<1x32xf32, #tpu.memory_space<vmem>>, vector<1x32xf32>
    %c0_198 = arith.constant 0 : index
    %c0_199 = arith.constant 0 : index
    %559 = vector.load %arg17[%c0_198, %c0_199] : memref<1x32xf32, #tpu.memory_space<vmem>>, vector<1x32xf32>
    %cst_200 = arith.constant dense<0.000000e+00> : vector<5xf32>
    %560 = vector.multi_reduction <add>, %557, %cst_200 [1] : vector<5x32xf32> to vector<5xf32>
    %561 = vector.shape_cast %560 : vector<5xf32> to vector<5x1xf32>
    %cst_201 = arith.constant 3.200000e+01 : f32
    %562 = vector.broadcast %cst_201 : f32 to vector<5x1xf32>
    %563 = arith.divf %561, %562 : vector<5x1xf32>
    %564 = vector.broadcast %563 : vector<5x1xf32> to vector<5x32xf32>
    %565 = arith.subf %557, %564 : vector<5x32xf32>
    %566 = arith.mulf %565, %565 : vector<5x32xf32>
    %cst_202 = arith.constant dense<0.000000e+00> : vector<5xf32>
    %567 = vector.multi_reduction <add>, %566, %cst_202 [1] : vector<5x32xf32> to vector<5xf32>
    %568 = vector.shape_cast %567 : vector<5xf32> to vector<5x1xf32>
    %cst_203 = arith.constant 3.200000e+01 : f32
    %569 = vector.broadcast %cst_203 : f32 to vector<5x1xf32>
    %570 = arith.divf %568, %569 : vector<5x1xf32>
    %cst_204 = arith.constant 9.99999996E-13 : f32
    %571 = vector.broadcast %cst_204 : f32 to vector<5x1xf32>
    %572 = arith.addf %570, %571 : vector<5x1xf32>
    %573 = math.rsqrt %572 : vector<5x1xf32>
    %574 = vector.broadcast %573 : vector<5x1xf32> to vector<5x32xf32>
    %575 = arith.mulf %565, %574 : vector<5x32xf32>
    %576 = vector.broadcast %558 : vector<1x32xf32> to vector<5x32xf32>
    %577 = arith.mulf %575, %576 : vector<5x32xf32>
    %578 = vector.broadcast %559 : vector<1x32xf32> to vector<5x32xf32>
    %579 = arith.addf %577, %578 : vector<5x32xf32>
    %580 = arith.addf %579, %321 : vector<5x32xf32>
    %c0_205 = arith.constant 0 : index
    %c0_206 = arith.constant 0 : index
    %581 = vector.load %arg18[%c0_205, %c0_206] : memref<1x32xf32, #tpu.memory_space<vmem>>, vector<1x32xf32>
    %c0_207 = arith.constant 0 : index
    %c0_208 = arith.constant 0 : index
    %582 = vector.load %arg19[%c0_207, %c0_208] : memref<1x32xf32, #tpu.memory_space<vmem>>, vector<1x32xf32>
    %cst_209 = arith.constant dense<0.000000e+00> : vector<5xf32>
    %583 = vector.multi_reduction <add>, %580, %cst_209 [1] : vector<5x32xf32> to vector<5xf32>
    %584 = vector.shape_cast %583 : vector<5xf32> to vector<5x1xf32>
    %cst_210 = arith.constant 3.200000e+01 : f32
    %585 = vector.broadcast %cst_210 : f32 to vector<5x1xf32>
    %586 = arith.divf %584, %585 : vector<5x1xf32>
    %587 = vector.broadcast %586 : vector<5x1xf32> to vector<5x32xf32>
    %588 = arith.subf %580, %587 : vector<5x32xf32>
    %589 = arith.mulf %588, %588 : vector<5x32xf32>
    %cst_211 = arith.constant dense<0.000000e+00> : vector<5xf32>
    %590 = vector.multi_reduction <add>, %589, %cst_211 [1] : vector<5x32xf32> to vector<5xf32>
    %591 = vector.shape_cast %590 : vector<5xf32> to vector<5x1xf32>
    %cst_212 = arith.constant 3.200000e+01 : f32
    %592 = vector.broadcast %cst_212 : f32 to vector<5x1xf32>
    %593 = arith.divf %591, %592 : vector<5x1xf32>
    %cst_213 = arith.constant 9.99999974E-6 : f32
    %594 = vector.broadcast %cst_213 : f32 to vector<5x1xf32>
    %595 = arith.addf %593, %594 : vector<5x1xf32>
    %596 = math.rsqrt %595 : vector<5x1xf32>
    %597 = vector.broadcast %596 : vector<5x1xf32> to vector<5x32xf32>
    %598 = arith.mulf %588, %597 : vector<5x32xf32>
    %599 = vector.broadcast %581 : vector<1x32xf32> to vector<5x32xf32>
    %600 = arith.mulf %598, %599 : vector<5x32xf32>
    %601 = vector.broadcast %582 : vector<1x32xf32> to vector<5x32xf32>
    %602 = arith.addf %600, %601 : vector<5x32xf32>
    %c1_214 = arith.constant 1 : index
    %c0_215 = arith.constant 0 : index
    %c0_216 = arith.constant 0 : index
    %603 = vector.load %arg20[%c1_214, %c0_215, %c0_216] : memref<2x5x32xf32, #tpu.memory_space<vmem>>, vector<1x5x32xf32>
    %604 = vector.shape_cast %603 : vector<1x5x32xf32> to vector<5x32xf32>
    %605 = vector.shape_cast %602 : vector<5x32xf32> to vector<1x5x32xf32>
    tpu.vector_store %arg20[%c1_214, %c0_215, %c0_216], %605 {strides = array<i32>} : memref<2x5x32xf32, #tpu.memory_space<vmem>>, vector<1x5x32xf32>,
    %606 = arith.addf %551, %321 : vector<5x32xf32>
    %c0_217 = arith.constant 0 : index
    %c0_218 = arith.constant 0 : index
    %607 = vector.load %arg18[%c0_217, %c0_218] : memref<1x32xf32, #tpu.memory_space<vmem>>, vector<1x32xf32>
    %c0_219 = arith.constant 0 : index
    %c0_220 = arith.constant 0 : index
    %608 = vector.load %arg19[%c0_219, %c0_220] : memref<1x32xf32, #tpu.memory_space<vmem>>, vector<1x32xf32>
    %cst_221 = arith.constant dense<0.000000e+00> : vector<5xf32>
    %609 = vector.multi_reduction <add>, %606, %cst_221 [1] : vector<5x32xf32> to vector<5xf32>
    %610 = vector.shape_cast %609 : vector<5xf32> to vector<5x1xf32>
    %cst_222 = arith.constant 3.200000e+01 : f32
    %611 = vector.broadcast %cst_222 : f32 to vector<5x1xf32>
    %612 = arith.divf %610, %611 : vector<5x1xf32>
    %613 = vector.broadcast %612 : vector<5x1xf32> to vector<5x32xf32>
    %614 = arith.subf %606, %613 : vector<5x32xf32>
    %615 = arith.mulf %614, %614 : vector<5x32xf32>
    %cst_223 = arith.constant dense<0.000000e+00> : vector<5xf32>
    %616 = vector.multi_reduction <add>, %615, %cst_223 [1] : vector<5x32xf32> to vector<5xf32>
    %617 = vector.shape_cast %616 : vector<5xf32> to vector<5x1xf32>
    %cst_224 = arith.constant 3.200000e+01 : f32
    %618 = vector.broadcast %cst_224 : f32 to vector<5x1xf32>
    %619 = arith.divf %617, %618 : vector<5x1xf32>
    %cst_225 = arith.constant 9.99999974E-6 : f32
    %620 = vector.broadcast %cst_225 : f32 to vector<5x1xf32>
    %621 = arith.addf %619, %620 : vector<5x1xf32>
    %622 = math.rsqrt %621 : vector<5x1xf32>
    %623 = vector.broadcast %622 : vector<5x1xf32> to vector<5x32xf32>
    %624 = arith.mulf %614, %623 : vector<5x32xf32>
    %625 = vector.broadcast %607 : vector<1x32xf32> to vector<5x32xf32>
    %626 = arith.mulf %624, %625 : vector<5x32xf32>
    %627 = vector.broadcast %608 : vector<1x32xf32> to vector<5x32xf32>
    %628 = arith.addf %626, %627 : vector<5x32xf32>
    %c1_226 = arith.constant 1 : index
    %c0_227 = arith.constant 0 : index
    %c0_228 = arith.constant 0 : index
    %629 = vector.load %arg21[%c1_226, %c0_227, %c0_228] : memref<2x5x32xf32, #tpu.memory_space<vmem>>, vector<1x5x32xf32>
    %630 = vector.shape_cast %629 : vector<1x5x32xf32> to vector<5x32xf32>
    %631 = vector.shape_cast %628 : vector<5x32xf32> to vector<1x5x32xf32>
    tpu.vector_store %arg21[%c1_226, %c0_227, %c0_228], %631 {strides = array<i32>} : memref<2x5x32xf32, #tpu.memory_space<vmem>>, vector<1x5x32xf32>,
    return
  }
}

module attributes {stable_mosaic.version = 11 : i64} {
  func.func @_gnn_kernel(%arg0: memref<2x5x32xf32, #tpu.memory_space<vmem>>, %arg1: memref<2x1x5xf32, #tpu.memory_space<vmem>>, %arg2: memref<2x5x5x16xf32, #tpu.memory_space<vmem>>, %arg3: memref<32x96xf32, #tpu.memory_space<vmem>>, %arg4: memref<1x96xf32, #tpu.memory_space<vmem>>, %arg5: memref<1x16xf32, #tpu.memory_space<vmem>>, %arg6: memref<1x16xf32, #tpu.memory_space<vmem>>, %arg7: memref<16x16xf32, #tpu.memory_space<vmem>>, %arg8: memref<1x16xf32, #tpu.memory_space<vmem>>, %arg9: memref<32x32xf32, #tpu.memory_space<vmem>>, %arg10: memref<1x32xf32, #tpu.memory_space<vmem>>, %arg11: memref<1x32xf32, #tpu.memory_space<vmem>>, %arg12: memref<1x32xf32, #tpu.memory_space<vmem>>, %arg13: memref<2x5x32xf32, #tpu.memory_space<vmem>>) attributes {dimension_semantics = [], scalar_prefetch = 0 : i64, scratch_operands = 0 : i64, tpu.core_type = #tpu.core_type<tc>} {
    %c0 = arith.constant 0 : index
    %c0_0 = arith.constant 0 : index
    %0 = vector.load %arg3[%c0, %c0_0] : memref<32x96xf32, #tpu.memory_space<vmem>>, vector<32x96xf32>
    %c0_1 = arith.constant 0 : index
    %c0_2 = arith.constant 0 : index
    %1 = vector.load %arg4[%c0_1, %c0_2] : memref<1x96xf32, #tpu.memory_space<vmem>>, vector<1x96xf32>
    %c0_3 = arith.constant 0 : index
    %c0_4 = arith.constant 0 : index
    %2 = vector.load %arg5[%c0_3, %c0_4] : memref<1x16xf32, #tpu.memory_space<vmem>>, vector<1x16xf32>
    %c0_5 = arith.constant 0 : index
    %c0_6 = arith.constant 0 : index
    %3 = vector.load %arg6[%c0_5, %c0_6] : memref<1x16xf32, #tpu.memory_space<vmem>>, vector<1x16xf32>
    %c0_7 = arith.constant 0 : index
    %c0_8 = arith.constant 0 : index
    %4 = vector.load %arg7[%c0_7, %c0_8] : memref<16x16xf32, #tpu.memory_space<vmem>>, vector<16x16xf32>
    %c0_9 = arith.constant 0 : index
    %c0_10 = arith.constant 0 : index
    %5 = vector.load %arg8[%c0_9, %c0_10] : memref<1x16xf32, #tpu.memory_space<vmem>>, vector<1x16xf32>
    %c0_11 = arith.constant 0 : index
    %c0_12 = arith.constant 0 : index
    %c0_13 = arith.constant 0 : index
    %6 = vector.load %arg0[%c0_11, %c0_12, %c0_13] : memref<2x5x32xf32, #tpu.memory_space<vmem>>, vector<1x5x32xf32>
    %7 = vector.shape_cast %6 : vector<1x5x32xf32> to vector<5x32xf32>
    %c0_14 = arith.constant 0 : index
    %c0_15 = arith.constant 0 : index
    %c0_16 = arith.constant 0 : index
    %8 = vector.load %arg1[%c0_14, %c0_15, %c0_16] : memref<2x1x5xf32, #tpu.memory_space<vmem>>, vector<1x1x5xf32>
    %9 = vector.shape_cast %8 : vector<1x1x5xf32> to vector<1x5xf32>
    %cst = arith.constant dense<0.000000e+00> : vector<5x96xf32>
    %10 = tpu.matmul %7, %0, %cst {dimension_numbers = #tpu.dot_dimension_numbers<[1], [0], [0], [1], [0, 0, 1, 1], [], []>} : vector<5x32xf32>, vector<32x96xf32>, vector<5x96xf32> -> vector<5x96xf32>
    %11 = vector.broadcast %1 : vector<1x96xf32> to vector<5x96xf32>
    %12 = arith.addf %10, %11 : vector<5x96xf32>
    %13 = vector.extract_strided_slice %12 {offsets = [0, 0], sizes = [5, 32], strides = [1, 1]} : vector<5x96xf32> to vector<5x32xf32>
    %cst_17 = arith.constant 0.353553385 : f32
    %14 = vector.broadcast %cst_17 : f32 to vector<5x32xf32>
    %15 = arith.mulf %13, %14 : vector<5x32xf32>
    %16 = vector.extract_strided_slice %12 {offsets = [0, 32], sizes = [5, 32], strides = [1, 1]} : vector<5x96xf32> to vector<5x32xf32>
    %17 = vector.extract_strided_slice %12 {offsets = [0, 64], sizes = [5, 32], strides = [1, 1]} : vector<5x96xf32> to vector<5x32xf32>
    %c0_18 = arith.constant 0 : index
    %c0_19 = arith.constant 0 : index
    %c0_20 = arith.constant 0 : index
    %c0_21 = arith.constant 0 : index
    %18 = vector.load %arg2[%c0_18, %c0_19, %c0_20, %c0_21] : memref<2x5x5x16xf32, #tpu.memory_space<vmem>>, vector<1x5x5x16xf32>
    %19 = vector.shape_cast %18 : vector<1x5x5x16xf32> to vector<5x5x16xf32>
    %20 = vector.extract_strided_slice %19 {offsets = [0, 0, 0], sizes = [1, 5, 16], strides = [1, 1, 1]} : vector<5x5x16xf32> to vector<1x5x16xf32>
    %21 = vector.shape_cast %20 : vector<1x5x16xf32> to vector<5x16xf32>
    %cst_22 = arith.constant dense<0.000000e+00> : vector<5xf32>
    %22 = vector.multi_reduction <add>, %21, %cst_22 [1] : vector<5x16xf32> to vector<5xf32>
    %23 = vector.shape_cast %22 : vector<5xf32> to vector<5x1xf32>
    %cst_23 = arith.constant 1.600000e+01 : f32
    %24 = vector.broadcast %cst_23 : f32 to vector<5x1xf32>
    %25 = arith.divf %23, %24 : vector<5x1xf32>
    %26 = vector.broadcast %25 : vector<5x1xf32> to vector<5x16xf32>
    %27 = arith.subf %21, %26 : vector<5x16xf32>
    %28 = arith.mulf %27, %27 : vector<5x16xf32>
    %cst_24 = arith.constant dense<0.000000e+00> : vector<5xf32>
    %29 = vector.multi_reduction <add>, %28, %cst_24 [1] : vector<5x16xf32> to vector<5xf32>
    %30 = vector.shape_cast %29 : vector<5xf32> to vector<5x1xf32>
    %cst_25 = arith.constant 1.600000e+01 : f32
    %31 = vector.broadcast %cst_25 : f32 to vector<5x1xf32>
    %32 = arith.divf %30, %31 : vector<5x1xf32>
    %cst_26 = arith.constant 9.99999974E-6 : f32
    %33 = vector.broadcast %cst_26 : f32 to vector<5x1xf32>
    %34 = arith.addf %32, %33 : vector<5x1xf32>
    %35 = math.rsqrt %34 : vector<5x1xf32>
    %36 = vector.broadcast %35 : vector<5x1xf32> to vector<5x16xf32>
    %37 = arith.mulf %27, %36 : vector<5x16xf32>
    %38 = vector.broadcast %2 : vector<1x16xf32> to vector<5x16xf32>
    %39 = arith.mulf %37, %38 : vector<5x16xf32>
    %40 = vector.broadcast %3 : vector<1x16xf32> to vector<5x16xf32>
    %41 = arith.addf %39, %40 : vector<5x16xf32>
    %cst_27 = arith.constant dense<0.000000e+00> : vector<5x16xf32>
    %42 = tpu.matmul %41, %4, %cst_27 {dimension_numbers = #tpu.dot_dimension_numbers<[1], [0], [0], [1], [0, 0, 1, 1], [], []>} : vector<5x16xf32>, vector<16x16xf32>, vector<5x16xf32> -> vector<5x16xf32>
    %43 = vector.broadcast %5 : vector<1x16xf32> to vector<5x16xf32>
    %44 = arith.addf %42, %43 : vector<5x16xf32>
    %45 = vector.extract_strided_slice %44 {offsets = [0, 0], sizes = [5, 8], strides = [1, 1]} : vector<5x16xf32> to vector<5x8xf32>
    %46 = vector.extract_strided_slice %44 {offsets = [0, 8], sizes = [5, 8], strides = [1, 1]} : vector<5x16xf32> to vector<5x8xf32>
    %47 = tpu.transpose %45, [1, 0] : vector<5x8xf32> -> vector<8x5xf32>
    %48 = vector.extract_strided_slice %19 {offsets = [1, 0, 0], sizes = [1, 5, 16], strides = [1, 1, 1]} : vector<5x5x16xf32> to vector<1x5x16xf32>
    %49 = vector.shape_cast %48 : vector<1x5x16xf32> to vector<5x16xf32>
    %cst_28 = arith.constant dense<0.000000e+00> : vector<5xf32>
    %50 = vector.multi_reduction <add>, %49, %cst_28 [1] : vector<5x16xf32> to vector<5xf32>
    %51 = vector.shape_cast %50 : vector<5xf32> to vector<5x1xf32>
    %cst_29 = arith.constant 1.600000e+01 : f32
    %52 = vector.broadcast %cst_29 : f32 to vector<5x1xf32>
    %53 = arith.divf %51, %52 : vector<5x1xf32>
    %54 = vector.broadcast %53 : vector<5x1xf32> to vector<5x16xf32>
    %55 = arith.subf %49, %54 : vector<5x16xf32>
    %56 = arith.mulf %55, %55 : vector<5x16xf32>
    %cst_30 = arith.constant dense<0.000000e+00> : vector<5xf32>
    %57 = vector.multi_reduction <add>, %56, %cst_30 [1] : vector<5x16xf32> to vector<5xf32>
    %58 = vector.shape_cast %57 : vector<5xf32> to vector<5x1xf32>
    %cst_31 = arith.constant 1.600000e+01 : f32
    %59 = vector.broadcast %cst_31 : f32 to vector<5x1xf32>
    %60 = arith.divf %58, %59 : vector<5x1xf32>
    %cst_32 = arith.constant 9.99999974E-6 : f32
    %61 = vector.broadcast %cst_32 : f32 to vector<5x1xf32>
    %62 = arith.addf %60, %61 : vector<5x1xf32>
    %63 = math.rsqrt %62 : vector<5x1xf32>
    %64 = vector.broadcast %63 : vector<5x1xf32> to vector<5x16xf32>
    %65 = arith.mulf %55, %64 : vector<5x16xf32>
    %66 = vector.broadcast %2 : vector<1x16xf32> to vector<5x16xf32>
    %67 = arith.mulf %65, %66 : vector<5x16xf32>
    %68 = vector.broadcast %3 : vector<1x16xf32> to vector<5x16xf32>
    %69 = arith.addf %67, %68 : vector<5x16xf32>
    %cst_33 = arith.constant dense<0.000000e+00> : vector<5x16xf32>
    %70 = tpu.matmul %69, %4, %cst_33 {dimension_numbers = #tpu.dot_dimension_numbers<[1], [0], [0], [1], [0, 0, 1, 1], [], []>} : vector<5x16xf32>, vector<16x16xf32>, vector<5x16xf32> -> vector<5x16xf32>
    %71 = vector.broadcast %5 : vector<1x16xf32> to vector<5x16xf32>
    %72 = arith.addf %70, %71 : vector<5x16xf32>
    %73 = vector.extract_strided_slice %72 {offsets = [0, 0], sizes = [5, 8], strides = [1, 1]} : vector<5x16xf32> to vector<5x8xf32>
    %74 = vector.extract_strided_slice %72 {offsets = [0, 8], sizes = [5, 8], strides = [1, 1]} : vector<5x16xf32> to vector<5x8xf32>
    %75 = tpu.transpose %73, [1, 0] : vector<5x8xf32> -> vector<8x5xf32>
    %76 = vector.extract_strided_slice %19 {offsets = [2, 0, 0], sizes = [1, 5, 16], strides = [1, 1, 1]} : vector<5x5x16xf32> to vector<1x5x16xf32>
    %77 = vector.shape_cast %76 : vector<1x5x16xf32> to vector<5x16xf32>
    %cst_34 = arith.constant dense<0.000000e+00> : vector<5xf32>
    %78 = vector.multi_reduction <add>, %77, %cst_34 [1] : vector<5x16xf32> to vector<5xf32>
    %79 = vector.shape_cast %78 : vector<5xf32> to vector<5x1xf32>
    %cst_35 = arith.constant 1.600000e+01 : f32
    %80 = vector.broadcast %cst_35 : f32 to vector<5x1xf32>
    %81 = arith.divf %79, %80 : vector<5x1xf32>
    %82 = vector.broadcast %81 : vector<5x1xf32> to vector<5x16xf32>
    %83 = arith.subf %77, %82 : vector<5x16xf32>
    %84 = arith.mulf %83, %83 : vector<5x16xf32>
    %cst_36 = arith.constant dense<0.000000e+00> : vector<5xf32>
    %85 = vector.multi_reduction <add>, %84, %cst_36 [1] : vector<5x16xf32> to vector<5xf32>
    %86 = vector.shape_cast %85 : vector<5xf32> to vector<5x1xf32>
    %cst_37 = arith.constant 1.600000e+01 : f32
    %87 = vector.broadcast %cst_37 : f32 to vector<5x1xf32>
    %88 = arith.divf %86, %87 : vector<5x1xf32>
    %cst_38 = arith.constant 9.99999974E-6 : f32
    %89 = vector.broadcast %cst_38 : f32 to vector<5x1xf32>
    %90 = arith.addf %88, %89 : vector<5x1xf32>
    %91 = math.rsqrt %90 : vector<5x1xf32>
    %92 = vector.broadcast %91 : vector<5x1xf32> to vector<5x16xf32>
    %93 = arith.mulf %83, %92 : vector<5x16xf32>
    %94 = vector.broadcast %2 : vector<1x16xf32> to vector<5x16xf32>
    %95 = arith.mulf %93, %94 : vector<5x16xf32>
    %96 = vector.broadcast %3 : vector<1x16xf32> to vector<5x16xf32>
    %97 = arith.addf %95, %96 : vector<5x16xf32>
    %cst_39 = arith.constant dense<0.000000e+00> : vector<5x16xf32>
    %98 = tpu.matmul %97, %4, %cst_39 {dimension_numbers = #tpu.dot_dimension_numbers<[1], [0], [0], [1], [0, 0, 1, 1], [], []>} : vector<5x16xf32>, vector<16x16xf32>, vector<5x16xf32> -> vector<5x16xf32>
    %99 = vector.broadcast %5 : vector<1x16xf32> to vector<5x16xf32>
    %100 = arith.addf %98, %99 : vector<5x16xf32>
    %101 = vector.extract_strided_slice %100 {offsets = [0, 0], sizes = [5, 8], strides = [1, 1]} : vector<5x16xf32> to vector<5x8xf32>
    %102 = vector.extract_strided_slice %100 {offsets = [0, 8], sizes = [5, 8], strides = [1, 1]} : vector<5x16xf32> to vector<5x8xf32>
    %103 = tpu.transpose %101, [1, 0] : vector<5x8xf32> -> vector<8x5xf32>
    %104 = vector.extract_strided_slice %19 {offsets = [3, 0, 0], sizes = [1, 5, 16], strides = [1, 1, 1]} : vector<5x5x16xf32> to vector<1x5x16xf32>
    %105 = vector.shape_cast %104 : vector<1x5x16xf32> to vector<5x16xf32>
    %cst_40 = arith.constant dense<0.000000e+00> : vector<5xf32>
    %106 = vector.multi_reduction <add>, %105, %cst_40 [1] : vector<5x16xf32> to vector<5xf32>
    %107 = vector.shape_cast %106 : vector<5xf32> to vector<5x1xf32>
    %cst_41 = arith.constant 1.600000e+01 : f32
    %108 = vector.broadcast %cst_41 : f32 to vector<5x1xf32>
    %109 = arith.divf %107, %108 : vector<5x1xf32>
    %110 = vector.broadcast %109 : vector<5x1xf32> to vector<5x16xf32>
    %111 = arith.subf %105, %110 : vector<5x16xf32>
    %112 = arith.mulf %111, %111 : vector<5x16xf32>
    %cst_42 = arith.constant dense<0.000000e+00> : vector<5xf32>
    %113 = vector.multi_reduction <add>, %112, %cst_42 [1] : vector<5x16xf32> to vector<5xf32>
    %114 = vector.shape_cast %113 : vector<5xf32> to vector<5x1xf32>
    %cst_43 = arith.constant 1.600000e+01 : f32
    %115 = vector.broadcast %cst_43 : f32 to vector<5x1xf32>
    %116 = arith.divf %114, %115 : vector<5x1xf32>
    %cst_44 = arith.constant 9.99999974E-6 : f32
    %117 = vector.broadcast %cst_44 : f32 to vector<5x1xf32>
    %118 = arith.addf %116, %117 : vector<5x1xf32>
    %119 = math.rsqrt %118 : vector<5x1xf32>
    %120 = vector.broadcast %119 : vector<5x1xf32> to vector<5x16xf32>
    %121 = arith.mulf %111, %120 : vector<5x16xf32>
    %122 = vector.broadcast %2 : vector<1x16xf32> to vector<5x16xf32>
    %123 = arith.mulf %121, %122 : vector<5x16xf32>
    %124 = vector.broadcast %3 : vector<1x16xf32> to vector<5x16xf32>
    %125 = arith.addf %123, %124 : vector<5x16xf32>
    %cst_45 = arith.constant dense<0.000000e+00> : vector<5x16xf32>
    %126 = tpu.matmul %125, %4, %cst_45 {dimension_numbers = #tpu.dot_dimension_numbers<[1], [0], [0], [1], [0, 0, 1, 1], [], []>} : vector<5x16xf32>, vector<16x16xf32>, vector<5x16xf32> -> vector<5x16xf32>
    %127 = vector.broadcast %5 : vector<1x16xf32> to vector<5x16xf32>
    %128 = arith.addf %126, %127 : vector<5x16xf32>
    %129 = vector.extract_strided_slice %128 {offsets = [0, 0], sizes = [5, 8], strides = [1, 1]} : vector<5x16xf32> to vector<5x8xf32>
    %130 = vector.extract_strided_slice %128 {offsets = [0, 8], sizes = [5, 8], strides = [1, 1]} : vector<5x16xf32> to vector<5x8xf32>
    %131 = tpu.transpose %129, [1, 0] : vector<5x8xf32> -> vector<8x5xf32>
    %132 = vector.extract_strided_slice %19 {offsets = [4, 0, 0], sizes = [1, 5, 16], strides = [1, 1, 1]} : vector<5x5x16xf32> to vector<1x5x16xf32>
    %133 = vector.shape_cast %132 : vector<1x5x16xf32> to vector<5x16xf32>
    %cst_46 = arith.constant dense<0.000000e+00> : vector<5xf32>
    %134 = vector.multi_reduction <add>, %133, %cst_46 [1] : vector<5x16xf32> to vector<5xf32>
    %135 = vector.shape_cast %134 : vector<5xf32> to vector<5x1xf32>
    %cst_47 = arith.constant 1.600000e+01 : f32
    %136 = vector.broadcast %cst_47 : f32 to vector<5x1xf32>
    %137 = arith.divf %135, %136 : vector<5x1xf32>
    %138 = vector.broadcast %137 : vector<5x1xf32> to vector<5x16xf32>
    %139 = arith.subf %133, %138 : vector<5x16xf32>
    %140 = arith.mulf %139, %139 : vector<5x16xf32>
    %cst_48 = arith.constant dense<0.000000e+00> : vector<5xf32>
    %141 = vector.multi_reduction <add>, %140, %cst_48 [1] : vector<5x16xf32> to vector<5xf32>
    %142 = vector.shape_cast %141 : vector<5xf32> to vector<5x1xf32>
    %cst_49 = arith.constant 1.600000e+01 : f32
    %143 = vector.broadcast %cst_49 : f32 to vector<5x1xf32>
    %144 = arith.divf %142, %143 : vector<5x1xf32>
    %cst_50 = arith.constant 9.99999974E-6 : f32
    %145 = vector.broadcast %cst_50 : f32 to vector<5x1xf32>
    %146 = arith.addf %144, %145 : vector<5x1xf32>
    %147 = math.rsqrt %146 : vector<5x1xf32>
    %148 = vector.broadcast %147 : vector<5x1xf32> to vector<5x16xf32>
    %149 = arith.mulf %139, %148 : vector<5x16xf32>
    %150 = vector.broadcast %2 : vector<1x16xf32> to vector<5x16xf32>
    %151 = arith.mulf %149, %150 : vector<5x16xf32>
    %152 = vector.broadcast %3 : vector<1x16xf32> to vector<5x16xf32>
    %153 = arith.addf %151, %152 : vector<5x16xf32>
    %cst_51 = arith.constant dense<0.000000e+00> : vector<5x16xf32>
    %154 = tpu.matmul %153, %4, %cst_51 {dimension_numbers = #tpu.dot_dimension_numbers<[1], [0], [0], [1], [0, 0, 1, 1], [], []>} : vector<5x16xf32>, vector<16x16xf32>, vector<5x16xf32> -> vector<5x16xf32>
    %155 = vector.broadcast %5 : vector<1x16xf32> to vector<5x16xf32>
    %156 = arith.addf %154, %155 : vector<5x16xf32>
    %157 = vector.extract_strided_slice %156 {offsets = [0, 0], sizes = [5, 8], strides = [1, 1]} : vector<5x16xf32> to vector<5x8xf32>
    %158 = vector.extract_strided_slice %156 {offsets = [0, 8], sizes = [5, 8], strides = [1, 1]} : vector<5x16xf32> to vector<5x8xf32>
    %159 = tpu.transpose %157, [1, 0] : vector<5x8xf32> -> vector<8x5xf32>
    %160 = vector.extract_strided_slice %15 {offsets = [0, 0], sizes = [5, 8], strides = [1, 1]} : vector<5x32xf32> to vector<5x8xf32>
    %161 = vector.extract_strided_slice %16 {offsets = [0, 0], sizes = [5, 8], strides = [1, 1]} : vector<5x32xf32> to vector<5x8xf32>
    %162 = vector.extract_strided_slice %17 {offsets = [0, 0], sizes = [5, 8], strides = [1, 1]} : vector<5x32xf32> to vector<5x8xf32>
    %163 = tpu.transpose %161, [1, 0] : vector<5x8xf32> -> vector<8x5xf32>
    %cst_52 = arith.constant dense<0.000000e+00> : vector<5x5xf32>
    %164 = tpu.matmul %160, %163, %cst_52 {dimension_numbers = #tpu.dot_dimension_numbers<[1], [0], [0], [1], [0, 0, 1, 1], [], []>} : vector<5x8xf32>, vector<8x5xf32>, vector<5x5xf32> -> vector<5x5xf32>
    %165 = vector.extract_strided_slice %160 {offsets = [0, 0], sizes = [1, 8], strides = [1, 1]} : vector<5x8xf32> to vector<1x8xf32>
    %cst_53 = arith.constant dense<0.000000e+00> : vector<1x5xf32>
    %166 = tpu.matmul %165, %47, %cst_53 {dimension_numbers = #tpu.dot_dimension_numbers<[1], [0], [0], [1], [0, 0, 1, 1], [], []>} : vector<1x8xf32>, vector<8x5xf32>, vector<1x5xf32> -> vector<1x5xf32>
    %167 = vector.extract_strided_slice %160 {offsets = [1, 0], sizes = [1, 8], strides = [1, 1]} : vector<5x8xf32> to vector<1x8xf32>
    %cst_54 = arith.constant dense<0.000000e+00> : vector<1x5xf32>
    %168 = tpu.matmul %167, %75, %cst_54 {dimension_numbers = #tpu.dot_dimension_numbers<[1], [0], [0], [1], [0, 0, 1, 1], [], []>} : vector<1x8xf32>, vector<8x5xf32>, vector<1x5xf32> -> vector<1x5xf32>
    %169 = vector.extract_strided_slice %160 {offsets = [2, 0], sizes = [1, 8], strides = [1, 1]} : vector<5x8xf32> to vector<1x8xf32>
    %cst_55 = arith.constant dense<0.000000e+00> : vector<1x5xf32>
    %170 = tpu.matmul %169, %103, %cst_55 {dimension_numbers = #tpu.dot_dimension_numbers<[1], [0], [0], [1], [0, 0, 1, 1], [], []>} : vector<1x8xf32>, vector<8x5xf32>, vector<1x5xf32> -> vector<1x5xf32>
    %171 = vector.extract_strided_slice %160 {offsets = [3, 0], sizes = [1, 8], strides = [1, 1]} : vector<5x8xf32> to vector<1x8xf32>
    %cst_56 = arith.constant dense<0.000000e+00> : vector<1x5xf32>
    %172 = tpu.matmul %171, %131, %cst_56 {dimension_numbers = #tpu.dot_dimension_numbers<[1], [0], [0], [1], [0, 0, 1, 1], [], []>} : vector<1x8xf32>, vector<8x5xf32>, vector<1x5xf32> -> vector<1x5xf32>
    %173 = vector.extract_strided_slice %160 {offsets = [4, 0], sizes = [1, 8], strides = [1, 1]} : vector<5x8xf32> to vector<1x8xf32>
    %cst_57 = arith.constant dense<0.000000e+00> : vector<1x5xf32>
    %174 = tpu.matmul %173, %159, %cst_57 {dimension_numbers = #tpu.dot_dimension_numbers<[1], [0], [0], [1], [0, 0, 1, 1], [], []>} : vector<1x8xf32>, vector<8x5xf32>, vector<1x5xf32> -> vector<1x5xf32>
    %175 = tpu.concatenate %166, %168, %170, %172, %174 in 0 : vector<1x5xf32>, vector<1x5xf32>, vector<1x5xf32>, vector<1x5xf32>, vector<1x5xf32> -> vector<5x5xf32>
    %176 = arith.addf %164, %175 : vector<5x5xf32>
    %177 = vector.broadcast %9 : vector<1x5xf32> to vector<5x5xf32>
    %178 = arith.addf %176, %177 : vector<5x5xf32>
    %cst_58 = arith.constant dense<0xFF800000> : vector<5xf32>
    %179 = vector.multi_reduction <maximumf>, %178, %cst_58 [1] : vector<5x5xf32> to vector<5xf32>
    %180 = vector.shape_cast %179 : vector<5xf32> to vector<5x1xf32>
    %181 = vector.broadcast %180 : vector<5x1xf32> to vector<5x5xf32>
    %182 = arith.subf %178, %181 : vector<5x5xf32>
    %183 = math.exp %182 : vector<5x5xf32>
    %cst_59 = arith.constant dense<0.000000e+00> : vector<5xf32>
    %184 = vector.multi_reduction <add>, %183, %cst_59 [1] : vector<5x5xf32> to vector<5xf32>
    %185 = vector.shape_cast %184 : vector<5xf32> to vector<5x1xf32>
    %186 = tpu.reciprocal %185 {approx = true} : vector<5x1xf32> -> vector<5x1xf32>
    %187 = vector.broadcast %186 : vector<5x1xf32> to vector<5x5xf32>
    %188 = arith.mulf %183, %187 : vector<5x5xf32>
    %cst_60 = arith.constant dense<0.000000e+00> : vector<5x8xf32>
    %189 = tpu.matmul %188, %162, %cst_60 {dimension_numbers = #tpu.dot_dimension_numbers<[1], [0], [0], [1], [0, 0, 1, 1], [], []>} : vector<5x5xf32>, vector<5x8xf32>, vector<5x8xf32> -> vector<5x8xf32>
    %190 = vector.extract_strided_slice %188 {offsets = [0, 0], sizes = [1, 5], strides = [1, 1]} : vector<5x5xf32> to vector<1x5xf32>
    %cst_61 = arith.constant dense<0.000000e+00> : vector<1x8xf32>
    %191 = tpu.matmul %190, %46, %cst_61 {dimension_numbers = #tpu.dot_dimension_numbers<[1], [0], [0], [1], [0, 0, 1, 1], [], []>} : vector<1x5xf32>, vector<5x8xf32>, vector<1x8xf32> -> vector<1x8xf32>
    %192 = vector.extract_strided_slice %188 {offsets = [1, 0], sizes = [1, 5], strides = [1, 1]} : vector<5x5xf32> to vector<1x5xf32>
    %cst_62 = arith.constant dense<0.000000e+00> : vector<1x8xf32>
    %193 = tpu.matmul %192, %74, %cst_62 {dimension_numbers = #tpu.dot_dimension_numbers<[1], [0], [0], [1], [0, 0, 1, 1], [], []>} : vector<1x5xf32>, vector<5x8xf32>, vector<1x8xf32> -> vector<1x8xf32>
    %194 = vector.extract_strided_slice %188 {offsets = [2, 0], sizes = [1, 5], strides = [1, 1]} : vector<5x5xf32> to vector<1x5xf32>
    %cst_63 = arith.constant dense<0.000000e+00> : vector<1x8xf32>
    %195 = tpu.matmul %194, %102, %cst_63 {dimension_numbers = #tpu.dot_dimension_numbers<[1], [0], [0], [1], [0, 0, 1, 1], [], []>} : vector<1x5xf32>, vector<5x8xf32>, vector<1x8xf32> -> vector<1x8xf32>
    %196 = vector.extract_strided_slice %188 {offsets = [3, 0], sizes = [1, 5], strides = [1, 1]} : vector<5x5xf32> to vector<1x5xf32>
    %cst_64 = arith.constant dense<0.000000e+00> : vector<1x8xf32>
    %197 = tpu.matmul %196, %130, %cst_64 {dimension_numbers = #tpu.dot_dimension_numbers<[1], [0], [0], [1], [0, 0, 1, 1], [], []>} : vector<1x5xf32>, vector<5x8xf32>, vector<1x8xf32> -> vector<1x8xf32>
    %198 = vector.extract_strided_slice %188 {offsets = [4, 0], sizes = [1, 5], strides = [1, 1]} : vector<5x5xf32> to vector<1x5xf32>
    %cst_65 = arith.constant dense<0.000000e+00> : vector<1x8xf32>
    %199 = tpu.matmul %198, %158, %cst_65 {dimension_numbers = #tpu.dot_dimension_numbers<[1], [0], [0], [1], [0, 0, 1, 1], [], []>} : vector<1x5xf32>, vector<5x8xf32>, vector<1x8xf32> -> vector<1x8xf32>
    %200 = tpu.concatenate %191, %193, %195, %197, %199 in 0 : vector<1x8xf32>, vector<1x8xf32>, vector<1x8xf32>, vector<1x8xf32>, vector<1x8xf32> -> vector<5x8xf32>
    %201 = arith.addf %189, %200 : vector<5x8xf32>
    %202 = vector.extract_strided_slice %15 {offsets = [0, 8], sizes = [5, 8], strides = [1, 1]} : vector<5x32xf32> to vector<5x8xf32>
    %203 = vector.extract_strided_slice %16 {offsets = [0, 8], sizes = [5, 8], strides = [1, 1]} : vector<5x32xf32> to vector<5x8xf32>
    %204 = vector.extract_strided_slice %17 {offsets = [0, 8], sizes = [5, 8], strides = [1, 1]} : vector<5x32xf32> to vector<5x8xf32>
    %205 = tpu.transpose %203, [1, 0] : vector<5x8xf32> -> vector<8x5xf32>
    %cst_66 = arith.constant dense<0.000000e+00> : vector<5x5xf32>
    %206 = tpu.matmul %202, %205, %cst_66 {dimension_numbers = #tpu.dot_dimension_numbers<[1], [0], [0], [1], [0, 0, 1, 1], [], []>} : vector<5x8xf32>, vector<8x5xf32>, vector<5x5xf32> -> vector<5x5xf32>
    %207 = vector.extract_strided_slice %202 {offsets = [0, 0], sizes = [1, 8], strides = [1, 1]} : vector<5x8xf32> to vector<1x8xf32>
    %cst_67 = arith.constant dense<0.000000e+00> : vector<1x5xf32>
    %208 = tpu.matmul %207, %47, %cst_67 {dimension_numbers = #tpu.dot_dimension_numbers<[1], [0], [0], [1], [0, 0, 1, 1], [], []>} : vector<1x8xf32>, vector<8x5xf32>, vector<1x5xf32> -> vector<1x5xf32>
    %209 = vector.extract_strided_slice %202 {offsets = [1, 0], sizes = [1, 8], strides = [1, 1]} : vector<5x8xf32> to vector<1x8xf32>
    %cst_68 = arith.constant dense<0.000000e+00> : vector<1x5xf32>
    %210 = tpu.matmul %209, %75, %cst_68 {dimension_numbers = #tpu.dot_dimension_numbers<[1], [0], [0], [1], [0, 0, 1, 1], [], []>} : vector<1x8xf32>, vector<8x5xf32>, vector<1x5xf32> -> vector<1x5xf32>
    %211 = vector.extract_strided_slice %202 {offsets = [2, 0], sizes = [1, 8], strides = [1, 1]} : vector<5x8xf32> to vector<1x8xf32>
    %cst_69 = arith.constant dense<0.000000e+00> : vector<1x5xf32>
    %212 = tpu.matmul %211, %103, %cst_69 {dimension_numbers = #tpu.dot_dimension_numbers<[1], [0], [0], [1], [0, 0, 1, 1], [], []>} : vector<1x8xf32>, vector<8x5xf32>, vector<1x5xf32> -> vector<1x5xf32>
    %213 = vector.extract_strided_slice %202 {offsets = [3, 0], sizes = [1, 8], strides = [1, 1]} : vector<5x8xf32> to vector<1x8xf32>
    %cst_70 = arith.constant dense<0.000000e+00> : vector<1x5xf32>
    %214 = tpu.matmul %213, %131, %cst_70 {dimension_numbers = #tpu.dot_dimension_numbers<[1], [0], [0], [1], [0, 0, 1, 1], [], []>} : vector<1x8xf32>, vector<8x5xf32>, vector<1x5xf32> -> vector<1x5xf32>
    %215 = vector.extract_strided_slice %202 {offsets = [4, 0], sizes = [1, 8], strides = [1, 1]} : vector<5x8xf32> to vector<1x8xf32>
    %cst_71 = arith.constant dense<0.000000e+00> : vector<1x5xf32>
    %216 = tpu.matmul %215, %159, %cst_71 {dimension_numbers = #tpu.dot_dimension_numbers<[1], [0], [0], [1], [0, 0, 1, 1], [], []>} : vector<1x8xf32>, vector<8x5xf32>, vector<1x5xf32> -> vector<1x5xf32>
    %217 = tpu.concatenate %208, %210, %212, %214, %216 in 0 : vector<1x5xf32>, vector<1x5xf32>, vector<1x5xf32>, vector<1x5xf32>, vector<1x5xf32> -> vector<5x5xf32>
    %218 = arith.addf %206, %217 : vector<5x5xf32>
    %219 = vector.broadcast %9 : vector<1x5xf32> to vector<5x5xf32>
    %220 = arith.addf %218, %219 : vector<5x5xf32>
    %cst_72 = arith.constant dense<0xFF800000> : vector<5xf32>
    %221 = vector.multi_reduction <maximumf>, %220, %cst_72 [1] : vector<5x5xf32> to vector<5xf32>
    %222 = vector.shape_cast %221 : vector<5xf32> to vector<5x1xf32>
    %223 = vector.broadcast %222 : vector<5x1xf32> to vector<5x5xf32>
    %224 = arith.subf %220, %223 : vector<5x5xf32>
    %225 = math.exp %224 : vector<5x5xf32>
    %cst_73 = arith.constant dense<0.000000e+00> : vector<5xf32>
    %226 = vector.multi_reduction <add>, %225, %cst_73 [1] : vector<5x5xf32> to vector<5xf32>
    %227 = vector.shape_cast %226 : vector<5xf32> to vector<5x1xf32>
    %228 = tpu.reciprocal %227 {approx = true} : vector<5x1xf32> -> vector<5x1xf32>
    %229 = vector.broadcast %228 : vector<5x1xf32> to vector<5x5xf32>
    %230 = arith.mulf %225, %229 : vector<5x5xf32>
    %cst_74 = arith.constant dense<0.000000e+00> : vector<5x8xf32>
    %231 = tpu.matmul %230, %204, %cst_74 {dimension_numbers = #tpu.dot_dimension_numbers<[1], [0], [0], [1], [0, 0, 1, 1], [], []>} : vector<5x5xf32>, vector<5x8xf32>, vector<5x8xf32> -> vector<5x8xf32>
    %232 = vector.extract_strided_slice %230 {offsets = [0, 0], sizes = [1, 5], strides = [1, 1]} : vector<5x5xf32> to vector<1x5xf32>
    %cst_75 = arith.constant dense<0.000000e+00> : vector<1x8xf32>
    %233 = tpu.matmul %232, %46, %cst_75 {dimension_numbers = #tpu.dot_dimension_numbers<[1], [0], [0], [1], [0, 0, 1, 1], [], []>} : vector<1x5xf32>, vector<5x8xf32>, vector<1x8xf32> -> vector<1x8xf32>
    %234 = vector.extract_strided_slice %230 {offsets = [1, 0], sizes = [1, 5], strides = [1, 1]} : vector<5x5xf32> to vector<1x5xf32>
    %cst_76 = arith.constant dense<0.000000e+00> : vector<1x8xf32>
    %235 = tpu.matmul %234, %74, %cst_76 {dimension_numbers = #tpu.dot_dimension_numbers<[1], [0], [0], [1], [0, 0, 1, 1], [], []>} : vector<1x5xf32>, vector<5x8xf32>, vector<1x8xf32> -> vector<1x8xf32>
    %236 = vector.extract_strided_slice %230 {offsets = [2, 0], sizes = [1, 5], strides = [1, 1]} : vector<5x5xf32> to vector<1x5xf32>
    %cst_77 = arith.constant dense<0.000000e+00> : vector<1x8xf32>
    %237 = tpu.matmul %236, %102, %cst_77 {dimension_numbers = #tpu.dot_dimension_numbers<[1], [0], [0], [1], [0, 0, 1, 1], [], []>} : vector<1x5xf32>, vector<5x8xf32>, vector<1x8xf32> -> vector<1x8xf32>
    %238 = vector.extract_strided_slice %230 {offsets = [3, 0], sizes = [1, 5], strides = [1, 1]} : vector<5x5xf32> to vector<1x5xf32>
    %cst_78 = arith.constant dense<0.000000e+00> : vector<1x8xf32>
    %239 = tpu.matmul %238, %130, %cst_78 {dimension_numbers = #tpu.dot_dimension_numbers<[1], [0], [0], [1], [0, 0, 1, 1], [], []>} : vector<1x5xf32>, vector<5x8xf32>, vector<1x8xf32> -> vector<1x8xf32>
    %240 = vector.extract_strided_slice %230 {offsets = [4, 0], sizes = [1, 5], strides = [1, 1]} : vector<5x5xf32> to vector<1x5xf32>
    %cst_79 = arith.constant dense<0.000000e+00> : vector<1x8xf32>
    %241 = tpu.matmul %240, %158, %cst_79 {dimension_numbers = #tpu.dot_dimension_numbers<[1], [0], [0], [1], [0, 0, 1, 1], [], []>} : vector<1x5xf32>, vector<5x8xf32>, vector<1x8xf32> -> vector<1x8xf32>
    %242 = tpu.concatenate %233, %235, %237, %239, %241 in 0 : vector<1x8xf32>, vector<1x8xf32>, vector<1x8xf32>, vector<1x8xf32>, vector<1x8xf32> -> vector<5x8xf32>
    %243 = arith.addf %231, %242 : vector<5x8xf32>
    %244 = vector.extract_strided_slice %15 {offsets = [0, 16], sizes = [5, 8], strides = [1, 1]} : vector<5x32xf32> to vector<5x8xf32>
    %245 = vector.extract_strided_slice %16 {offsets = [0, 16], sizes = [5, 8], strides = [1, 1]} : vector<5x32xf32> to vector<5x8xf32>
    %246 = vector.extract_strided_slice %17 {offsets = [0, 16], sizes = [5, 8], strides = [1, 1]} : vector<5x32xf32> to vector<5x8xf32>
    %247 = tpu.transpose %245, [1, 0] : vector<5x8xf32> -> vector<8x5xf32>
    %cst_80 = arith.constant dense<0.000000e+00> : vector<5x5xf32>
    %248 = tpu.matmul %244, %247, %cst_80 {dimension_numbers = #tpu.dot_dimension_numbers<[1], [0], [0], [1], [0, 0, 1, 1], [], []>} : vector<5x8xf32>, vector<8x5xf32>, vector<5x5xf32> -> vector<5x5xf32>
    %249 = vector.extract_strided_slice %244 {offsets = [0, 0], sizes = [1, 8], strides = [1, 1]} : vector<5x8xf32> to vector<1x8xf32>
    %cst_81 = arith.constant dense<0.000000e+00> : vector<1x5xf32>
    %250 = tpu.matmul %249, %47, %cst_81 {dimension_numbers = #tpu.dot_dimension_numbers<[1], [0], [0], [1], [0, 0, 1, 1], [], []>} : vector<1x8xf32>, vector<8x5xf32>, vector<1x5xf32> -> vector<1x5xf32>
    %251 = vector.extract_strided_slice %244 {offsets = [1, 0], sizes = [1, 8], strides = [1, 1]} : vector<5x8xf32> to vector<1x8xf32>
    %cst_82 = arith.constant dense<0.000000e+00> : vector<1x5xf32>
    %252 = tpu.matmul %251, %75, %cst_82 {dimension_numbers = #tpu.dot_dimension_numbers<[1], [0], [0], [1], [0, 0, 1, 1], [], []>} : vector<1x8xf32>, vector<8x5xf32>, vector<1x5xf32> -> vector<1x5xf32>
    %253 = vector.extract_strided_slice %244 {offsets = [2, 0], sizes = [1, 8], strides = [1, 1]} : vector<5x8xf32> to vector<1x8xf32>
    %cst_83 = arith.constant dense<0.000000e+00> : vector<1x5xf32>
    %254 = tpu.matmul %253, %103, %cst_83 {dimension_numbers = #tpu.dot_dimension_numbers<[1], [0], [0], [1], [0, 0, 1, 1], [], []>} : vector<1x8xf32>, vector<8x5xf32>, vector<1x5xf32> -> vector<1x5xf32>
    %255 = vector.extract_strided_slice %244 {offsets = [3, 0], sizes = [1, 8], strides = [1, 1]} : vector<5x8xf32> to vector<1x8xf32>
    %cst_84 = arith.constant dense<0.000000e+00> : vector<1x5xf32>
    %256 = tpu.matmul %255, %131, %cst_84 {dimension_numbers = #tpu.dot_dimension_numbers<[1], [0], [0], [1], [0, 0, 1, 1], [], []>} : vector<1x8xf32>, vector<8x5xf32>, vector<1x5xf32> -> vector<1x5xf32>
    %257 = vector.extract_strided_slice %244 {offsets = [4, 0], sizes = [1, 8], strides = [1, 1]} : vector<5x8xf32> to vector<1x8xf32>
    %cst_85 = arith.constant dense<0.000000e+00> : vector<1x5xf32>
    %258 = tpu.matmul %257, %159, %cst_85 {dimension_numbers = #tpu.dot_dimension_numbers<[1], [0], [0], [1], [0, 0, 1, 1], [], []>} : vector<1x8xf32>, vector<8x5xf32>, vector<1x5xf32> -> vector<1x5xf32>
    %259 = tpu.concatenate %250, %252, %254, %256, %258 in 0 : vector<1x5xf32>, vector<1x5xf32>, vector<1x5xf32>, vector<1x5xf32>, vector<1x5xf32> -> vector<5x5xf32>
    %260 = arith.addf %248, %259 : vector<5x5xf32>
    %261 = vector.broadcast %9 : vector<1x5xf32> to vector<5x5xf32>
    %262 = arith.addf %260, %261 : vector<5x5xf32>
    %cst_86 = arith.constant dense<0xFF800000> : vector<5xf32>
    %263 = vector.multi_reduction <maximumf>, %262, %cst_86 [1] : vector<5x5xf32> to vector<5xf32>
    %264 = vector.shape_cast %263 : vector<5xf32> to vector<5x1xf32>
    %265 = vector.broadcast %264 : vector<5x1xf32> to vector<5x5xf32>
    %266 = arith.subf %262, %265 : vector<5x5xf32>
    %267 = math.exp %266 : vector<5x5xf32>
    %cst_87 = arith.constant dense<0.000000e+00> : vector<5xf32>
    %268 = vector.multi_reduction <add>, %267, %cst_87 [1] : vector<5x5xf32> to vector<5xf32>
    %269 = vector.shape_cast %268 : vector<5xf32> to vector<5x1xf32>
    %270 = tpu.reciprocal %269 {approx = true} : vector<5x1xf32> -> vector<5x1xf32>
    %271 = vector.broadcast %270 : vector<5x1xf32> to vector<5x5xf32>
    %272 = arith.mulf %267, %271 : vector<5x5xf32>
    %cst_88 = arith.constant dense<0.000000e+00> : vector<5x8xf32>
    %273 = tpu.matmul %272, %246, %cst_88 {dimension_numbers = #tpu.dot_dimension_numbers<[1], [0], [0], [1], [0, 0, 1, 1], [], []>} : vector<5x5xf32>, vector<5x8xf32>, vector<5x8xf32> -> vector<5x8xf32>
    %274 = vector.extract_strided_slice %272 {offsets = [0, 0], sizes = [1, 5], strides = [1, 1]} : vector<5x5xf32> to vector<1x5xf32>
    %cst_89 = arith.constant dense<0.000000e+00> : vector<1x8xf32>
    %275 = tpu.matmul %274, %46, %cst_89 {dimension_numbers = #tpu.dot_dimension_numbers<[1], [0], [0], [1], [0, 0, 1, 1], [], []>} : vector<1x5xf32>, vector<5x8xf32>, vector<1x8xf32> -> vector<1x8xf32>
    %276 = vector.extract_strided_slice %272 {offsets = [1, 0], sizes = [1, 5], strides = [1, 1]} : vector<5x5xf32> to vector<1x5xf32>
    %cst_90 = arith.constant dense<0.000000e+00> : vector<1x8xf32>
    %277 = tpu.matmul %276, %74, %cst_90 {dimension_numbers = #tpu.dot_dimension_numbers<[1], [0], [0], [1], [0, 0, 1, 1], [], []>} : vector<1x5xf32>, vector<5x8xf32>, vector<1x8xf32> -> vector<1x8xf32>
    %278 = vector.extract_strided_slice %272 {offsets = [2, 0], sizes = [1, 5], strides = [1, 1]} : vector<5x5xf32> to vector<1x5xf32>
    %cst_91 = arith.constant dense<0.000000e+00> : vector<1x8xf32>
    %279 = tpu.matmul %278, %102, %cst_91 {dimension_numbers = #tpu.dot_dimension_numbers<[1], [0], [0], [1], [0, 0, 1, 1], [], []>} : vector<1x5xf32>, vector<5x8xf32>, vector<1x8xf32> -> vector<1x8xf32>
    %280 = vector.extract_strided_slice %272 {offsets = [3, 0], sizes = [1, 5], strides = [1, 1]} : vector<5x5xf32> to vector<1x5xf32>
    %cst_92 = arith.constant dense<0.000000e+00> : vector<1x8xf32>
    %281 = tpu.matmul %280, %130, %cst_92 {dimension_numbers = #tpu.dot_dimension_numbers<[1], [0], [0], [1], [0, 0, 1, 1], [], []>} : vector<1x5xf32>, vector<5x8xf32>, vector<1x8xf32> -> vector<1x8xf32>
    %282 = vector.extract_strided_slice %272 {offsets = [4, 0], sizes = [1, 5], strides = [1, 1]} : vector<5x5xf32> to vector<1x5xf32>
    %cst_93 = arith.constant dense<0.000000e+00> : vector<1x8xf32>
    %283 = tpu.matmul %282, %158, %cst_93 {dimension_numbers = #tpu.dot_dimension_numbers<[1], [0], [0], [1], [0, 0, 1, 1], [], []>} : vector<1x5xf32>, vector<5x8xf32>, vector<1x8xf32> -> vector<1x8xf32>
    %284 = tpu.concatenate %275, %277, %279, %281, %283 in 0 : vector<1x8xf32>, vector<1x8xf32>, vector<1x8xf32>, vector<1x8xf32>, vector<1x8xf32> -> vector<5x8xf32>
    %285 = arith.addf %273, %284 : vector<5x8xf32>
    %286 = vector.extract_strided_slice %15 {offsets = [0, 24], sizes = [5, 8], strides = [1, 1]} : vector<5x32xf32> to vector<5x8xf32>
    %287 = vector.extract_strided_slice %16 {offsets = [0, 24], sizes = [5, 8], strides = [1, 1]} : vector<5x32xf32> to vector<5x8xf32>
    %288 = vector.extract_strided_slice %17 {offsets = [0, 24], sizes = [5, 8], strides = [1, 1]} : vector<5x32xf32> to vector<5x8xf32>
    %289 = tpu.transpose %287, [1, 0] : vector<5x8xf32> -> vector<8x5xf32>
    %cst_94 = arith.constant dense<0.000000e+00> : vector<5x5xf32>
    %290 = tpu.matmul %286, %289, %cst_94 {dimension_numbers = #tpu.dot_dimension_numbers<[1], [0], [0], [1], [0, 0, 1, 1], [], []>} : vector<5x8xf32>, vector<8x5xf32>, vector<5x5xf32> -> vector<5x5xf32>
    %291 = vector.extract_strided_slice %286 {offsets = [0, 0], sizes = [1, 8], strides = [1, 1]} : vector<5x8xf32> to vector<1x8xf32>
    %cst_95 = arith.constant dense<0.000000e+00> : vector<1x5xf32>
    %292 = tpu.matmul %291, %47, %cst_95 {dimension_numbers = #tpu.dot_dimension_numbers<[1], [0], [0], [1], [0, 0, 1, 1], [], []>} : vector<1x8xf32>, vector<8x5xf32>, vector<1x5xf32> -> vector<1x5xf32>
    %293 = vector.extract_strided_slice %286 {offsets = [1, 0], sizes = [1, 8], strides = [1, 1]} : vector<5x8xf32> to vector<1x8xf32>
    %cst_96 = arith.constant dense<0.000000e+00> : vector<1x5xf32>
    %294 = tpu.matmul %293, %75, %cst_96 {dimension_numbers = #tpu.dot_dimension_numbers<[1], [0], [0], [1], [0, 0, 1, 1], [], []>} : vector<1x8xf32>, vector<8x5xf32>, vector<1x5xf32> -> vector<1x5xf32>
    %295 = vector.extract_strided_slice %286 {offsets = [2, 0], sizes = [1, 8], strides = [1, 1]} : vector<5x8xf32> to vector<1x8xf32>
    %cst_97 = arith.constant dense<0.000000e+00> : vector<1x5xf32>
    %296 = tpu.matmul %295, %103, %cst_97 {dimension_numbers = #tpu.dot_dimension_numbers<[1], [0], [0], [1], [0, 0, 1, 1], [], []>} : vector<1x8xf32>, vector<8x5xf32>, vector<1x5xf32> -> vector<1x5xf32>
    %297 = vector.extract_strided_slice %286 {offsets = [3, 0], sizes = [1, 8], strides = [1, 1]} : vector<5x8xf32> to vector<1x8xf32>
    %cst_98 = arith.constant dense<0.000000e+00> : vector<1x5xf32>
    %298 = tpu.matmul %297, %131, %cst_98 {dimension_numbers = #tpu.dot_dimension_numbers<[1], [0], [0], [1], [0, 0, 1, 1], [], []>} : vector<1x8xf32>, vector<8x5xf32>, vector<1x5xf32> -> vector<1x5xf32>
    %299 = vector.extract_strided_slice %286 {offsets = [4, 0], sizes = [1, 8], strides = [1, 1]} : vector<5x8xf32> to vector<1x8xf32>
    %cst_99 = arith.constant dense<0.000000e+00> : vector<1x5xf32>
    %300 = tpu.matmul %299, %159, %cst_99 {dimension_numbers = #tpu.dot_dimension_numbers<[1], [0], [0], [1], [0, 0, 1, 1], [], []>} : vector<1x8xf32>, vector<8x5xf32>, vector<1x5xf32> -> vector<1x5xf32>
    %301 = tpu.concatenate %292, %294, %296, %298, %300 in 0 : vector<1x5xf32>, vector<1x5xf32>, vector<1x5xf32>, vector<1x5xf32>, vector<1x5xf32> -> vector<5x5xf32>
    %302 = arith.addf %290, %301 : vector<5x5xf32>
    %303 = vector.broadcast %9 : vector<1x5xf32> to vector<5x5xf32>
    %304 = arith.addf %302, %303 : vector<5x5xf32>
    %cst_100 = arith.constant dense<0xFF800000> : vector<5xf32>
    %305 = vector.multi_reduction <maximumf>, %304, %cst_100 [1] : vector<5x5xf32> to vector<5xf32>
    %306 = vector.shape_cast %305 : vector<5xf32> to vector<5x1xf32>
    %307 = vector.broadcast %306 : vector<5x1xf32> to vector<5x5xf32>
    %308 = arith.subf %304, %307 : vector<5x5xf32>
    %309 = math.exp %308 : vector<5x5xf32>
    %cst_101 = arith.constant dense<0.000000e+00> : vector<5xf32>
    %310 = vector.multi_reduction <add>, %309, %cst_101 [1] : vector<5x5xf32> to vector<5xf32>
    %311 = vector.shape_cast %310 : vector<5xf32> to vector<5x1xf32>
    %312 = tpu.reciprocal %311 {approx = true} : vector<5x1xf32> -> vector<5x1xf32>
    %313 = vector.broadcast %312 : vector<5x1xf32> to vector<5x5xf32>
    %314 = arith.mulf %309, %313 : vector<5x5xf32>
    %cst_102 = arith.constant dense<0.000000e+00> : vector<5x8xf32>
    %315 = tpu.matmul %314, %288, %cst_102 {dimension_numbers = #tpu.dot_dimension_numbers<[1], [0], [0], [1], [0, 0, 1, 1], [], []>} : vector<5x5xf32>, vector<5x8xf32>, vector<5x8xf32> -> vector<5x8xf32>
    %316 = vector.extract_strided_slice %314 {offsets = [0, 0], sizes = [1, 5], strides = [1, 1]} : vector<5x5xf32> to vector<1x5xf32>
    %cst_103 = arith.constant dense<0.000000e+00> : vector<1x8xf32>
    %317 = tpu.matmul %316, %46, %cst_103 {dimension_numbers = #tpu.dot_dimension_numbers<[1], [0], [0], [1], [0, 0, 1, 1], [], []>} : vector<1x5xf32>, vector<5x8xf32>, vector<1x8xf32> -> vector<1x8xf32>
    %318 = vector.extract_strided_slice %314 {offsets = [1, 0], sizes = [1, 5], strides = [1, 1]} : vector<5x5xf32> to vector<1x5xf32>
    %cst_104 = arith.constant dense<0.000000e+00> : vector<1x8xf32>
    %319 = tpu.matmul %318, %74, %cst_104 {dimension_numbers = #tpu.dot_dimension_numbers<[1], [0], [0], [1], [0, 0, 1, 1], [], []>} : vector<1x5xf32>, vector<5x8xf32>, vector<1x8xf32> -> vector<1x8xf32>
    %320 = vector.extract_strided_slice %314 {offsets = [2, 0], sizes = [1, 5], strides = [1, 1]} : vector<5x5xf32> to vector<1x5xf32>
    %cst_105 = arith.constant dense<0.000000e+00> : vector<1x8xf32>
    %321 = tpu.matmul %320, %102, %cst_105 {dimension_numbers = #tpu.dot_dimension_numbers<[1], [0], [0], [1], [0, 0, 1, 1], [], []>} : vector<1x5xf32>, vector<5x8xf32>, vector<1x8xf32> -> vector<1x8xf32>
    %322 = vector.extract_strided_slice %314 {offsets = [3, 0], sizes = [1, 5], strides = [1, 1]} : vector<5x5xf32> to vector<1x5xf32>
    %cst_106 = arith.constant dense<0.000000e+00> : vector<1x8xf32>
    %323 = tpu.matmul %322, %130, %cst_106 {dimension_numbers = #tpu.dot_dimension_numbers<[1], [0], [0], [1], [0, 0, 1, 1], [], []>} : vector<1x5xf32>, vector<5x8xf32>, vector<1x8xf32> -> vector<1x8xf32>
    %324 = vector.extract_strided_slice %314 {offsets = [4, 0], sizes = [1, 5], strides = [1, 1]} : vector<5x5xf32> to vector<1x5xf32>
    %cst_107 = arith.constant dense<0.000000e+00> : vector<1x8xf32>
    %325 = tpu.matmul %324, %158, %cst_107 {dimension_numbers = #tpu.dot_dimension_numbers<[1], [0], [0], [1], [0, 0, 1, 1], [], []>} : vector<1x5xf32>, vector<5x8xf32>, vector<1x8xf32> -> vector<1x8xf32>
    %326 = tpu.concatenate %317, %319, %321, %323, %325 in 0 : vector<1x8xf32>, vector<1x8xf32>, vector<1x8xf32>, vector<1x8xf32>, vector<1x8xf32> -> vector<5x8xf32>
    %327 = arith.addf %315, %326 : vector<5x8xf32>
    %328 = tpu.concatenate %201, %243, %285, %327 in 1 : vector<5x8xf32>, vector<5x8xf32>, vector<5x8xf32>, vector<5x8xf32> -> vector<5x32xf32>
    %c0_108 = arith.constant 0 : index
    %c0_109 = arith.constant 0 : index
    %329 = vector.load %arg9[%c0_108, %c0_109] : memref<32x32xf32, #tpu.memory_space<vmem>>, vector<32x32xf32>
    %cst_110 = arith.constant dense<0.000000e+00> : vector<5x32xf32>
    %330 = tpu.matmul %328, %329, %cst_110 {dimension_numbers = #tpu.dot_dimension_numbers<[1], [0], [0], [1], [0, 0, 1, 1], [], []>} : vector<5x32xf32>, vector<32x32xf32>, vector<5x32xf32> -> vector<5x32xf32>
    %c0_111 = arith.constant 0 : index
    %c0_112 = arith.constant 0 : index
    %331 = vector.load %arg10[%c0_111, %c0_112] : memref<1x32xf32, #tpu.memory_space<vmem>>, vector<1x32xf32>
    %332 = vector.broadcast %331 : vector<1x32xf32> to vector<5x32xf32>
    %333 = arith.addf %330, %332 : vector<5x32xf32>
    %cst_113 = arith.constant 0.000000e+00 : f32
    %334 = vector.broadcast %cst_113 : f32 to vector<5x32xf32>
    %335 = arith.maximumf %333, %334 : vector<5x32xf32>
    %336 = arith.addf %7, %335 : vector<5x32xf32>
    %c0_114 = arith.constant 0 : index
    %c0_115 = arith.constant 0 : index
    %337 = vector.load %arg11[%c0_114, %c0_115] : memref<1x32xf32, #tpu.memory_space<vmem>>, vector<1x32xf32>
    %c0_116 = arith.constant 0 : index
    %c0_117 = arith.constant 0 : index
    %338 = vector.load %arg12[%c0_116, %c0_117] : memref<1x32xf32, #tpu.memory_space<vmem>>, vector<1x32xf32>
    %cst_118 = arith.constant dense<0.000000e+00> : vector<5xf32>
    %339 = vector.multi_reduction <add>, %336, %cst_118 [1] : vector<5x32xf32> to vector<5xf32>
    %340 = vector.shape_cast %339 : vector<5xf32> to vector<5x1xf32>
    %cst_119 = arith.constant 3.200000e+01 : f32
    %341 = vector.broadcast %cst_119 : f32 to vector<5x1xf32>
    %342 = arith.divf %340, %341 : vector<5x1xf32>
    %343 = vector.broadcast %342 : vector<5x1xf32> to vector<5x32xf32>
    %344 = arith.subf %336, %343 : vector<5x32xf32>
    %345 = arith.mulf %344, %344 : vector<5x32xf32>
    %cst_120 = arith.constant dense<0.000000e+00> : vector<5xf32>
    %346 = vector.multi_reduction <add>, %345, %cst_120 [1] : vector<5x32xf32> to vector<5xf32>
    %347 = vector.shape_cast %346 : vector<5xf32> to vector<5x1xf32>
    %cst_121 = arith.constant 3.200000e+01 : f32
    %348 = vector.broadcast %cst_121 : f32 to vector<5x1xf32>
    %349 = arith.divf %347, %348 : vector<5x1xf32>
    %cst_122 = arith.constant 9.99999974E-6 : f32
    %350 = vector.broadcast %cst_122 : f32 to vector<5x1xf32>
    %351 = arith.addf %349, %350 : vector<5x1xf32>
    %352 = math.rsqrt %351 : vector<5x1xf32>
    %353 = vector.broadcast %352 : vector<5x1xf32> to vector<5x32xf32>
    %354 = arith.mulf %344, %353 : vector<5x32xf32>
    %355 = vector.broadcast %337 : vector<1x32xf32> to vector<5x32xf32>
    %356 = arith.mulf %354, %355 : vector<5x32xf32>
    %357 = vector.broadcast %338 : vector<1x32xf32> to vector<5x32xf32>
    %358 = arith.addf %356, %357 : vector<5x32xf32>
    %c0_123 = arith.constant 0 : index
    %c0_124 = arith.constant 0 : index
    %c0_125 = arith.constant 0 : index
    %359 = vector.load %arg13[%c0_123, %c0_124, %c0_125] : memref<2x5x32xf32, #tpu.memory_space<vmem>>, vector<1x5x32xf32>
    %360 = vector.shape_cast %359 : vector<1x5x32xf32> to vector<5x32xf32>
    %361 = vector.shape_cast %358 : vector<5x32xf32> to vector<1x5x32xf32>
    tpu.vector_store %arg13[%c0_123, %c0_124, %c0_125], %361 {strides = array<i32>} : memref<2x5x32xf32, #tpu.memory_space<vmem>>, vector<1x5x32xf32>,
    %c1 = arith.constant 1 : index
    %c0_126 = arith.constant 0 : index
    %c0_127 = arith.constant 0 : index
    %362 = vector.load %arg0[%c1, %c0_126, %c0_127] : memref<2x5x32xf32, #tpu.memory_space<vmem>>, vector<1x5x32xf32>
    %363 = vector.shape_cast %362 : vector<1x5x32xf32> to vector<5x32xf32>
    %c1_128 = arith.constant 1 : index
    %c0_129 = arith.constant 0 : index
    %c0_130 = arith.constant 0 : index
    %364 = vector.load %arg1[%c1_128, %c0_129, %c0_130] : memref<2x1x5xf32, #tpu.memory_space<vmem>>, vector<1x1x5xf32>
    %365 = vector.shape_cast %364 : vector<1x1x5xf32> to vector<1x5xf32>
    %cst_131 = arith.constant dense<0.000000e+00> : vector<5x96xf32>
    %366 = tpu.matmul %363, %0, %cst_131 {dimension_numbers = #tpu.dot_dimension_numbers<[1], [0], [0], [1], [0, 0, 1, 1], [], []>} : vector<5x32xf32>, vector<32x96xf32>, vector<5x96xf32> -> vector<5x96xf32>
    %367 = vector.broadcast %1 : vector<1x96xf32> to vector<5x96xf32>
    %368 = arith.addf %366, %367 : vector<5x96xf32>
    %369 = vector.extract_strided_slice %368 {offsets = [0, 0], sizes = [5, 32], strides = [1, 1]} : vector<5x96xf32> to vector<5x32xf32>
    %cst_132 = arith.constant 0.353553385 : f32
    %370 = vector.broadcast %cst_132 : f32 to vector<5x32xf32>
    %371 = arith.mulf %369, %370 : vector<5x32xf32>
    %372 = vector.extract_strided_slice %368 {offsets = [0, 32], sizes = [5, 32], strides = [1, 1]} : vector<5x96xf32> to vector<5x32xf32>
    %373 = vector.extract_strided_slice %368 {offsets = [0, 64], sizes = [5, 32], strides = [1, 1]} : vector<5x96xf32> to vector<5x32xf32>
    %c1_133 = arith.constant 1 : index
    %c0_134 = arith.constant 0 : index
    %c0_135 = arith.constant 0 : index
    %c0_136 = arith.constant 0 : index
    %374 = vector.load %arg2[%c1_133, %c0_134, %c0_135, %c0_136] : memref<2x5x5x16xf32, #tpu.memory_space<vmem>>, vector<1x5x5x16xf32>
    %375 = vector.shape_cast %374 : vector<1x5x5x16xf32> to vector<5x5x16xf32>
    %376 = vector.extract_strided_slice %375 {offsets = [0, 0, 0], sizes = [1, 5, 16], strides = [1, 1, 1]} : vector<5x5x16xf32> to vector<1x5x16xf32>
    %377 = vector.shape_cast %376 : vector<1x5x16xf32> to vector<5x16xf32>
    %cst_137 = arith.constant dense<0.000000e+00> : vector<5xf32>
    %378 = vector.multi_reduction <add>, %377, %cst_137 [1] : vector<5x16xf32> to vector<5xf32>
    %379 = vector.shape_cast %378 : vector<5xf32> to vector<5x1xf32>
    %cst_138 = arith.constant 1.600000e+01 : f32
    %380 = vector.broadcast %cst_138 : f32 to vector<5x1xf32>
    %381 = arith.divf %379, %380 : vector<5x1xf32>
    %382 = vector.broadcast %381 : vector<5x1xf32> to vector<5x16xf32>
    %383 = arith.subf %377, %382 : vector<5x16xf32>
    %384 = arith.mulf %383, %383 : vector<5x16xf32>
    %cst_139 = arith.constant dense<0.000000e+00> : vector<5xf32>
    %385 = vector.multi_reduction <add>, %384, %cst_139 [1] : vector<5x16xf32> to vector<5xf32>
    %386 = vector.shape_cast %385 : vector<5xf32> to vector<5x1xf32>
    %cst_140 = arith.constant 1.600000e+01 : f32
    %387 = vector.broadcast %cst_140 : f32 to vector<5x1xf32>
    %388 = arith.divf %386, %387 : vector<5x1xf32>
    %cst_141 = arith.constant 9.99999974E-6 : f32
    %389 = vector.broadcast %cst_141 : f32 to vector<5x1xf32>
    %390 = arith.addf %388, %389 : vector<5x1xf32>
    %391 = math.rsqrt %390 : vector<5x1xf32>
    %392 = vector.broadcast %391 : vector<5x1xf32> to vector<5x16xf32>
    %393 = arith.mulf %383, %392 : vector<5x16xf32>
    %394 = vector.broadcast %2 : vector<1x16xf32> to vector<5x16xf32>
    %395 = arith.mulf %393, %394 : vector<5x16xf32>
    %396 = vector.broadcast %3 : vector<1x16xf32> to vector<5x16xf32>
    %397 = arith.addf %395, %396 : vector<5x16xf32>
    %cst_142 = arith.constant dense<0.000000e+00> : vector<5x16xf32>
    %398 = tpu.matmul %397, %4, %cst_142 {dimension_numbers = #tpu.dot_dimension_numbers<[1], [0], [0], [1], [0, 0, 1, 1], [], []>} : vector<5x16xf32>, vector<16x16xf32>, vector<5x16xf32> -> vector<5x16xf32>
    %399 = vector.broadcast %5 : vector<1x16xf32> to vector<5x16xf32>
    %400 = arith.addf %398, %399 : vector<5x16xf32>
    %401 = vector.extract_strided_slice %400 {offsets = [0, 0], sizes = [5, 8], strides = [1, 1]} : vector<5x16xf32> to vector<5x8xf32>
    %402 = vector.extract_strided_slice %400 {offsets = [0, 8], sizes = [5, 8], strides = [1, 1]} : vector<5x16xf32> to vector<5x8xf32>
    %403 = tpu.transpose %401, [1, 0] : vector<5x8xf32> -> vector<8x5xf32>
    %404 = vector.extract_strided_slice %375 {offsets = [1, 0, 0], sizes = [1, 5, 16], strides = [1, 1, 1]} : vector<5x5x16xf32> to vector<1x5x16xf32>
    %405 = vector.shape_cast %404 : vector<1x5x16xf32> to vector<5x16xf32>
    %cst_143 = arith.constant dense<0.000000e+00> : vector<5xf32>
    %406 = vector.multi_reduction <add>, %405, %cst_143 [1] : vector<5x16xf32> to vector<5xf32>
    %407 = vector.shape_cast %406 : vector<5xf32> to vector<5x1xf32>
    %cst_144 = arith.constant 1.600000e+01 : f32
    %408 = vector.broadcast %cst_144 : f32 to vector<5x1xf32>
    %409 = arith.divf %407, %408 : vector<5x1xf32>
    %410 = vector.broadcast %409 : vector<5x1xf32> to vector<5x16xf32>
    %411 = arith.subf %405, %410 : vector<5x16xf32>
    %412 = arith.mulf %411, %411 : vector<5x16xf32>
    %cst_145 = arith.constant dense<0.000000e+00> : vector<5xf32>
    %413 = vector.multi_reduction <add>, %412, %cst_145 [1] : vector<5x16xf32> to vector<5xf32>
    %414 = vector.shape_cast %413 : vector<5xf32> to vector<5x1xf32>
    %cst_146 = arith.constant 1.600000e+01 : f32
    %415 = vector.broadcast %cst_146 : f32 to vector<5x1xf32>
    %416 = arith.divf %414, %415 : vector<5x1xf32>
    %cst_147 = arith.constant 9.99999974E-6 : f32
    %417 = vector.broadcast %cst_147 : f32 to vector<5x1xf32>
    %418 = arith.addf %416, %417 : vector<5x1xf32>
    %419 = math.rsqrt %418 : vector<5x1xf32>
    %420 = vector.broadcast %419 : vector<5x1xf32> to vector<5x16xf32>
    %421 = arith.mulf %411, %420 : vector<5x16xf32>
    %422 = vector.broadcast %2 : vector<1x16xf32> to vector<5x16xf32>
    %423 = arith.mulf %421, %422 : vector<5x16xf32>
    %424 = vector.broadcast %3 : vector<1x16xf32> to vector<5x16xf32>
    %425 = arith.addf %423, %424 : vector<5x16xf32>
    %cst_148 = arith.constant dense<0.000000e+00> : vector<5x16xf32>
    %426 = tpu.matmul %425, %4, %cst_148 {dimension_numbers = #tpu.dot_dimension_numbers<[1], [0], [0], [1], [0, 0, 1, 1], [], []>} : vector<5x16xf32>, vector<16x16xf32>, vector<5x16xf32> -> vector<5x16xf32>
    %427 = vector.broadcast %5 : vector<1x16xf32> to vector<5x16xf32>
    %428 = arith.addf %426, %427 : vector<5x16xf32>
    %429 = vector.extract_strided_slice %428 {offsets = [0, 0], sizes = [5, 8], strides = [1, 1]} : vector<5x16xf32> to vector<5x8xf32>
    %430 = vector.extract_strided_slice %428 {offsets = [0, 8], sizes = [5, 8], strides = [1, 1]} : vector<5x16xf32> to vector<5x8xf32>
    %431 = tpu.transpose %429, [1, 0] : vector<5x8xf32> -> vector<8x5xf32>
    %432 = vector.extract_strided_slice %375 {offsets = [2, 0, 0], sizes = [1, 5, 16], strides = [1, 1, 1]} : vector<5x5x16xf32> to vector<1x5x16xf32>
    %433 = vector.shape_cast %432 : vector<1x5x16xf32> to vector<5x16xf32>
    %cst_149 = arith.constant dense<0.000000e+00> : vector<5xf32>
    %434 = vector.multi_reduction <add>, %433, %cst_149 [1] : vector<5x16xf32> to vector<5xf32>
    %435 = vector.shape_cast %434 : vector<5xf32> to vector<5x1xf32>
    %cst_150 = arith.constant 1.600000e+01 : f32
    %436 = vector.broadcast %cst_150 : f32 to vector<5x1xf32>
    %437 = arith.divf %435, %436 : vector<5x1xf32>
    %438 = vector.broadcast %437 : vector<5x1xf32> to vector<5x16xf32>
    %439 = arith.subf %433, %438 : vector<5x16xf32>
    %440 = arith.mulf %439, %439 : vector<5x16xf32>
    %cst_151 = arith.constant dense<0.000000e+00> : vector<5xf32>
    %441 = vector.multi_reduction <add>, %440, %cst_151 [1] : vector<5x16xf32> to vector<5xf32>
    %442 = vector.shape_cast %441 : vector<5xf32> to vector<5x1xf32>
    %cst_152 = arith.constant 1.600000e+01 : f32
    %443 = vector.broadcast %cst_152 : f32 to vector<5x1xf32>
    %444 = arith.divf %442, %443 : vector<5x1xf32>
    %cst_153 = arith.constant 9.99999974E-6 : f32
    %445 = vector.broadcast %cst_153 : f32 to vector<5x1xf32>
    %446 = arith.addf %444, %445 : vector<5x1xf32>
    %447 = math.rsqrt %446 : vector<5x1xf32>
    %448 = vector.broadcast %447 : vector<5x1xf32> to vector<5x16xf32>
    %449 = arith.mulf %439, %448 : vector<5x16xf32>
    %450 = vector.broadcast %2 : vector<1x16xf32> to vector<5x16xf32>
    %451 = arith.mulf %449, %450 : vector<5x16xf32>
    %452 = vector.broadcast %3 : vector<1x16xf32> to vector<5x16xf32>
    %453 = arith.addf %451, %452 : vector<5x16xf32>
    %cst_154 = arith.constant dense<0.000000e+00> : vector<5x16xf32>
    %454 = tpu.matmul %453, %4, %cst_154 {dimension_numbers = #tpu.dot_dimension_numbers<[1], [0], [0], [1], [0, 0, 1, 1], [], []>} : vector<5x16xf32>, vector<16x16xf32>, vector<5x16xf32> -> vector<5x16xf32>
    %455 = vector.broadcast %5 : vector<1x16xf32> to vector<5x16xf32>
    %456 = arith.addf %454, %455 : vector<5x16xf32>
    %457 = vector.extract_strided_slice %456 {offsets = [0, 0], sizes = [5, 8], strides = [1, 1]} : vector<5x16xf32> to vector<5x8xf32>
    %458 = vector.extract_strided_slice %456 {offsets = [0, 8], sizes = [5, 8], strides = [1, 1]} : vector<5x16xf32> to vector<5x8xf32>
    %459 = tpu.transpose %457, [1, 0] : vector<5x8xf32> -> vector<8x5xf32>
    %460 = vector.extract_strided_slice %375 {offsets = [3, 0, 0], sizes = [1, 5, 16], strides = [1, 1, 1]} : vector<5x5x16xf32> to vector<1x5x16xf32>
    %461 = vector.shape_cast %460 : vector<1x5x16xf32> to vector<5x16xf32>
    %cst_155 = arith.constant dense<0.000000e+00> : vector<5xf32>
    %462 = vector.multi_reduction <add>, %461, %cst_155 [1] : vector<5x16xf32> to vector<5xf32>
    %463 = vector.shape_cast %462 : vector<5xf32> to vector<5x1xf32>
    %cst_156 = arith.constant 1.600000e+01 : f32
    %464 = vector.broadcast %cst_156 : f32 to vector<5x1xf32>
    %465 = arith.divf %463, %464 : vector<5x1xf32>
    %466 = vector.broadcast %465 : vector<5x1xf32> to vector<5x16xf32>
    %467 = arith.subf %461, %466 : vector<5x16xf32>
    %468 = arith.mulf %467, %467 : vector<5x16xf32>
    %cst_157 = arith.constant dense<0.000000e+00> : vector<5xf32>
    %469 = vector.multi_reduction <add>, %468, %cst_157 [1] : vector<5x16xf32> to vector<5xf32>
    %470 = vector.shape_cast %469 : vector<5xf32> to vector<5x1xf32>
    %cst_158 = arith.constant 1.600000e+01 : f32
    %471 = vector.broadcast %cst_158 : f32 to vector<5x1xf32>
    %472 = arith.divf %470, %471 : vector<5x1xf32>
    %cst_159 = arith.constant 9.99999974E-6 : f32
    %473 = vector.broadcast %cst_159 : f32 to vector<5x1xf32>
    %474 = arith.addf %472, %473 : vector<5x1xf32>
    %475 = math.rsqrt %474 : vector<5x1xf32>
    %476 = vector.broadcast %475 : vector<5x1xf32> to vector<5x16xf32>
    %477 = arith.mulf %467, %476 : vector<5x16xf32>
    %478 = vector.broadcast %2 : vector<1x16xf32> to vector<5x16xf32>
    %479 = arith.mulf %477, %478 : vector<5x16xf32>
    %480 = vector.broadcast %3 : vector<1x16xf32> to vector<5x16xf32>
    %481 = arith.addf %479, %480 : vector<5x16xf32>
    %cst_160 = arith.constant dense<0.000000e+00> : vector<5x16xf32>
    %482 = tpu.matmul %481, %4, %cst_160 {dimension_numbers = #tpu.dot_dimension_numbers<[1], [0], [0], [1], [0, 0, 1, 1], [], []>} : vector<5x16xf32>, vector<16x16xf32>, vector<5x16xf32> -> vector<5x16xf32>
    %483 = vector.broadcast %5 : vector<1x16xf32> to vector<5x16xf32>
    %484 = arith.addf %482, %483 : vector<5x16xf32>
    %485 = vector.extract_strided_slice %484 {offsets = [0, 0], sizes = [5, 8], strides = [1, 1]} : vector<5x16xf32> to vector<5x8xf32>
    %486 = vector.extract_strided_slice %484 {offsets = [0, 8], sizes = [5, 8], strides = [1, 1]} : vector<5x16xf32> to vector<5x8xf32>
    %487 = tpu.transpose %485, [1, 0] : vector<5x8xf32> -> vector<8x5xf32>
    %488 = vector.extract_strided_slice %375 {offsets = [4, 0, 0], sizes = [1, 5, 16], strides = [1, 1, 1]} : vector<5x5x16xf32> to vector<1x5x16xf32>
    %489 = vector.shape_cast %488 : vector<1x5x16xf32> to vector<5x16xf32>
    %cst_161 = arith.constant dense<0.000000e+00> : vector<5xf32>
    %490 = vector.multi_reduction <add>, %489, %cst_161 [1] : vector<5x16xf32> to vector<5xf32>
    %491 = vector.shape_cast %490 : vector<5xf32> to vector<5x1xf32>
    %cst_162 = arith.constant 1.600000e+01 : f32
    %492 = vector.broadcast %cst_162 : f32 to vector<5x1xf32>
    %493 = arith.divf %491, %492 : vector<5x1xf32>
    %494 = vector.broadcast %493 : vector<5x1xf32> to vector<5x16xf32>
    %495 = arith.subf %489, %494 : vector<5x16xf32>
    %496 = arith.mulf %495, %495 : vector<5x16xf32>
    %cst_163 = arith.constant dense<0.000000e+00> : vector<5xf32>
    %497 = vector.multi_reduction <add>, %496, %cst_163 [1] : vector<5x16xf32> to vector<5xf32>
    %498 = vector.shape_cast %497 : vector<5xf32> to vector<5x1xf32>
    %cst_164 = arith.constant 1.600000e+01 : f32
    %499 = vector.broadcast %cst_164 : f32 to vector<5x1xf32>
    %500 = arith.divf %498, %499 : vector<5x1xf32>
    %cst_165 = arith.constant 9.99999974E-6 : f32
    %501 = vector.broadcast %cst_165 : f32 to vector<5x1xf32>
    %502 = arith.addf %500, %501 : vector<5x1xf32>
    %503 = math.rsqrt %502 : vector<5x1xf32>
    %504 = vector.broadcast %503 : vector<5x1xf32> to vector<5x16xf32>
    %505 = arith.mulf %495, %504 : vector<5x16xf32>
    %506 = vector.broadcast %2 : vector<1x16xf32> to vector<5x16xf32>
    %507 = arith.mulf %505, %506 : vector<5x16xf32>
    %508 = vector.broadcast %3 : vector<1x16xf32> to vector<5x16xf32>
    %509 = arith.addf %507, %508 : vector<5x16xf32>
    %cst_166 = arith.constant dense<0.000000e+00> : vector<5x16xf32>
    %510 = tpu.matmul %509, %4, %cst_166 {dimension_numbers = #tpu.dot_dimension_numbers<[1], [0], [0], [1], [0, 0, 1, 1], [], []>} : vector<5x16xf32>, vector<16x16xf32>, vector<5x16xf32> -> vector<5x16xf32>
    %511 = vector.broadcast %5 : vector<1x16xf32> to vector<5x16xf32>
    %512 = arith.addf %510, %511 : vector<5x16xf32>
    %513 = vector.extract_strided_slice %512 {offsets = [0, 0], sizes = [5, 8], strides = [1, 1]} : vector<5x16xf32> to vector<5x8xf32>
    %514 = vector.extract_strided_slice %512 {offsets = [0, 8], sizes = [5, 8], strides = [1, 1]} : vector<5x16xf32> to vector<5x8xf32>
    %515 = tpu.transpose %513, [1, 0] : vector<5x8xf32> -> vector<8x5xf32>
    %516 = vector.extract_strided_slice %371 {offsets = [0, 0], sizes = [5, 8], strides = [1, 1]} : vector<5x32xf32> to vector<5x8xf32>
    %517 = vector.extract_strided_slice %372 {offsets = [0, 0], sizes = [5, 8], strides = [1, 1]} : vector<5x32xf32> to vector<5x8xf32>
    %518 = vector.extract_strided_slice %373 {offsets = [0, 0], sizes = [5, 8], strides = [1, 1]} : vector<5x32xf32> to vector<5x8xf32>
    %519 = tpu.transpose %517, [1, 0] : vector<5x8xf32> -> vector<8x5xf32>
    %cst_167 = arith.constant dense<0.000000e+00> : vector<5x5xf32>
    %520 = tpu.matmul %516, %519, %cst_167 {dimension_numbers = #tpu.dot_dimension_numbers<[1], [0], [0], [1], [0, 0, 1, 1], [], []>} : vector<5x8xf32>, vector<8x5xf32>, vector<5x5xf32> -> vector<5x5xf32>
    %521 = vector.extract_strided_slice %516 {offsets = [0, 0], sizes = [1, 8], strides = [1, 1]} : vector<5x8xf32> to vector<1x8xf32>
    %cst_168 = arith.constant dense<0.000000e+00> : vector<1x5xf32>
    %522 = tpu.matmul %521, %403, %cst_168 {dimension_numbers = #tpu.dot_dimension_numbers<[1], [0], [0], [1], [0, 0, 1, 1], [], []>} : vector<1x8xf32>, vector<8x5xf32>, vector<1x5xf32> -> vector<1x5xf32>
    %523 = vector.extract_strided_slice %516 {offsets = [1, 0], sizes = [1, 8], strides = [1, 1]} : vector<5x8xf32> to vector<1x8xf32>
    %cst_169 = arith.constant dense<0.000000e+00> : vector<1x5xf32>
    %524 = tpu.matmul %523, %431, %cst_169 {dimension_numbers = #tpu.dot_dimension_numbers<[1], [0], [0], [1], [0, 0, 1, 1], [], []>} : vector<1x8xf32>, vector<8x5xf32>, vector<1x5xf32> -> vector<1x5xf32>
    %525 = vector.extract_strided_slice %516 {offsets = [2, 0], sizes = [1, 8], strides = [1, 1]} : vector<5x8xf32> to vector<1x8xf32>
    %cst_170 = arith.constant dense<0.000000e+00> : vector<1x5xf32>
    %526 = tpu.matmul %525, %459, %cst_170 {dimension_numbers = #tpu.dot_dimension_numbers<[1], [0], [0], [1], [0, 0, 1, 1], [], []>} : vector<1x8xf32>, vector<8x5xf32>, vector<1x5xf32> -> vector<1x5xf32>
    %527 = vector.extract_strided_slice %516 {offsets = [3, 0], sizes = [1, 8], strides = [1, 1]} : vector<5x8xf32> to vector<1x8xf32>
    %cst_171 = arith.constant dense<0.000000e+00> : vector<1x5xf32>
    %528 = tpu.matmul %527, %487, %cst_171 {dimension_numbers = #tpu.dot_dimension_numbers<[1], [0], [0], [1], [0, 0, 1, 1], [], []>} : vector<1x8xf32>, vector<8x5xf32>, vector<1x5xf32> -> vector<1x5xf32>
    %529 = vector.extract_strided_slice %516 {offsets = [4, 0], sizes = [1, 8], strides = [1, 1]} : vector<5x8xf32> to vector<1x8xf32>
    %cst_172 = arith.constant dense<0.000000e+00> : vector<1x5xf32>
    %530 = tpu.matmul %529, %515, %cst_172 {dimension_numbers = #tpu.dot_dimension_numbers<[1], [0], [0], [1], [0, 0, 1, 1], [], []>} : vector<1x8xf32>, vector<8x5xf32>, vector<1x5xf32> -> vector<1x5xf32>
    %531 = tpu.concatenate %522, %524, %526, %528, %530 in 0 : vector<1x5xf32>, vector<1x5xf32>, vector<1x5xf32>, vector<1x5xf32>, vector<1x5xf32> -> vector<5x5xf32>
    %532 = arith.addf %520, %531 : vector<5x5xf32>
    %533 = vector.broadcast %365 : vector<1x5xf32> to vector<5x5xf32>
    %534 = arith.addf %532, %533 : vector<5x5xf32>
    %cst_173 = arith.constant dense<0xFF800000> : vector<5xf32>
    %535 = vector.multi_reduction <maximumf>, %534, %cst_173 [1] : vector<5x5xf32> to vector<5xf32>
    %536 = vector.shape_cast %535 : vector<5xf32> to vector<5x1xf32>
    %537 = vector.broadcast %536 : vector<5x1xf32> to vector<5x5xf32>
    %538 = arith.subf %534, %537 : vector<5x5xf32>
    %539 = math.exp %538 : vector<5x5xf32>
    %cst_174 = arith.constant dense<0.000000e+00> : vector<5xf32>
    %540 = vector.multi_reduction <add>, %539, %cst_174 [1] : vector<5x5xf32> to vector<5xf32>
    %541 = vector.shape_cast %540 : vector<5xf32> to vector<5x1xf32>
    %542 = tpu.reciprocal %541 {approx = true} : vector<5x1xf32> -> vector<5x1xf32>
    %543 = vector.broadcast %542 : vector<5x1xf32> to vector<5x5xf32>
    %544 = arith.mulf %539, %543 : vector<5x5xf32>
    %cst_175 = arith.constant dense<0.000000e+00> : vector<5x8xf32>
    %545 = tpu.matmul %544, %518, %cst_175 {dimension_numbers = #tpu.dot_dimension_numbers<[1], [0], [0], [1], [0, 0, 1, 1], [], []>} : vector<5x5xf32>, vector<5x8xf32>, vector<5x8xf32> -> vector<5x8xf32>
    %546 = vector.extract_strided_slice %544 {offsets = [0, 0], sizes = [1, 5], strides = [1, 1]} : vector<5x5xf32> to vector<1x5xf32>
    %cst_176 = arith.constant dense<0.000000e+00> : vector<1x8xf32>
    %547 = tpu.matmul %546, %402, %cst_176 {dimension_numbers = #tpu.dot_dimension_numbers<[1], [0], [0], [1], [0, 0, 1, 1], [], []>} : vector<1x5xf32>, vector<5x8xf32>, vector<1x8xf32> -> vector<1x8xf32>
    %548 = vector.extract_strided_slice %544 {offsets = [1, 0], sizes = [1, 5], strides = [1, 1]} : vector<5x5xf32> to vector<1x5xf32>
    %cst_177 = arith.constant dense<0.000000e+00> : vector<1x8xf32>
    %549 = tpu.matmul %548, %430, %cst_177 {dimension_numbers = #tpu.dot_dimension_numbers<[1], [0], [0], [1], [0, 0, 1, 1], [], []>} : vector<1x5xf32>, vector<5x8xf32>, vector<1x8xf32> -> vector<1x8xf32>
    %550 = vector.extract_strided_slice %544 {offsets = [2, 0], sizes = [1, 5], strides = [1, 1]} : vector<5x5xf32> to vector<1x5xf32>
    %cst_178 = arith.constant dense<0.000000e+00> : vector<1x8xf32>
    %551 = tpu.matmul %550, %458, %cst_178 {dimension_numbers = #tpu.dot_dimension_numbers<[1], [0], [0], [1], [0, 0, 1, 1], [], []>} : vector<1x5xf32>, vector<5x8xf32>, vector<1x8xf32> -> vector<1x8xf32>
    %552 = vector.extract_strided_slice %544 {offsets = [3, 0], sizes = [1, 5], strides = [1, 1]} : vector<5x5xf32> to vector<1x5xf32>
    %cst_179 = arith.constant dense<0.000000e+00> : vector<1x8xf32>
    %553 = tpu.matmul %552, %486, %cst_179 {dimension_numbers = #tpu.dot_dimension_numbers<[1], [0], [0], [1], [0, 0, 1, 1], [], []>} : vector<1x5xf32>, vector<5x8xf32>, vector<1x8xf32> -> vector<1x8xf32>
    %554 = vector.extract_strided_slice %544 {offsets = [4, 0], sizes = [1, 5], strides = [1, 1]} : vector<5x5xf32> to vector<1x5xf32>
    %cst_180 = arith.constant dense<0.000000e+00> : vector<1x8xf32>
    %555 = tpu.matmul %554, %514, %cst_180 {dimension_numbers = #tpu.dot_dimension_numbers<[1], [0], [0], [1], [0, 0, 1, 1], [], []>} : vector<1x5xf32>, vector<5x8xf32>, vector<1x8xf32> -> vector<1x8xf32>
    %556 = tpu.concatenate %547, %549, %551, %553, %555 in 0 : vector<1x8xf32>, vector<1x8xf32>, vector<1x8xf32>, vector<1x8xf32>, vector<1x8xf32> -> vector<5x8xf32>
    %557 = arith.addf %545, %556 : vector<5x8xf32>
    %558 = vector.extract_strided_slice %371 {offsets = [0, 8], sizes = [5, 8], strides = [1, 1]} : vector<5x32xf32> to vector<5x8xf32>
    %559 = vector.extract_strided_slice %372 {offsets = [0, 8], sizes = [5, 8], strides = [1, 1]} : vector<5x32xf32> to vector<5x8xf32>
    %560 = vector.extract_strided_slice %373 {offsets = [0, 8], sizes = [5, 8], strides = [1, 1]} : vector<5x32xf32> to vector<5x8xf32>
    %561 = tpu.transpose %559, [1, 0] : vector<5x8xf32> -> vector<8x5xf32>
    %cst_181 = arith.constant dense<0.000000e+00> : vector<5x5xf32>
    %562 = tpu.matmul %558, %561, %cst_181 {dimension_numbers = #tpu.dot_dimension_numbers<[1], [0], [0], [1], [0, 0, 1, 1], [], []>} : vector<5x8xf32>, vector<8x5xf32>, vector<5x5xf32> -> vector<5x5xf32>
    %563 = vector.extract_strided_slice %558 {offsets = [0, 0], sizes = [1, 8], strides = [1, 1]} : vector<5x8xf32> to vector<1x8xf32>
    %cst_182 = arith.constant dense<0.000000e+00> : vector<1x5xf32>
    %564 = tpu.matmul %563, %403, %cst_182 {dimension_numbers = #tpu.dot_dimension_numbers<[1], [0], [0], [1], [0, 0, 1, 1], [], []>} : vector<1x8xf32>, vector<8x5xf32>, vector<1x5xf32> -> vector<1x5xf32>
    %565 = vector.extract_strided_slice %558 {offsets = [1, 0], sizes = [1, 8], strides = [1, 1]} : vector<5x8xf32> to vector<1x8xf32>
    %cst_183 = arith.constant dense<0.000000e+00> : vector<1x5xf32>
    %566 = tpu.matmul %565, %431, %cst_183 {dimension_numbers = #tpu.dot_dimension_numbers<[1], [0], [0], [1], [0, 0, 1, 1], [], []>} : vector<1x8xf32>, vector<8x5xf32>, vector<1x5xf32> -> vector<1x5xf32>
    %567 = vector.extract_strided_slice %558 {offsets = [2, 0], sizes = [1, 8], strides = [1, 1]} : vector<5x8xf32> to vector<1x8xf32>
    %cst_184 = arith.constant dense<0.000000e+00> : vector<1x5xf32>
    %568 = tpu.matmul %567, %459, %cst_184 {dimension_numbers = #tpu.dot_dimension_numbers<[1], [0], [0], [1], [0, 0, 1, 1], [], []>} : vector<1x8xf32>, vector<8x5xf32>, vector<1x5xf32> -> vector<1x5xf32>
    %569 = vector.extract_strided_slice %558 {offsets = [3, 0], sizes = [1, 8], strides = [1, 1]} : vector<5x8xf32> to vector<1x8xf32>
    %cst_185 = arith.constant dense<0.000000e+00> : vector<1x5xf32>
    %570 = tpu.matmul %569, %487, %cst_185 {dimension_numbers = #tpu.dot_dimension_numbers<[1], [0], [0], [1], [0, 0, 1, 1], [], []>} : vector<1x8xf32>, vector<8x5xf32>, vector<1x5xf32> -> vector<1x5xf32>
    %571 = vector.extract_strided_slice %558 {offsets = [4, 0], sizes = [1, 8], strides = [1, 1]} : vector<5x8xf32> to vector<1x8xf32>
    %cst_186 = arith.constant dense<0.000000e+00> : vector<1x5xf32>
    %572 = tpu.matmul %571, %515, %cst_186 {dimension_numbers = #tpu.dot_dimension_numbers<[1], [0], [0], [1], [0, 0, 1, 1], [], []>} : vector<1x8xf32>, vector<8x5xf32>, vector<1x5xf32> -> vector<1x5xf32>
    %573 = tpu.concatenate %564, %566, %568, %570, %572 in 0 : vector<1x5xf32>, vector<1x5xf32>, vector<1x5xf32>, vector<1x5xf32>, vector<1x5xf32> -> vector<5x5xf32>
    %574 = arith.addf %562, %573 : vector<5x5xf32>
    %575 = vector.broadcast %365 : vector<1x5xf32> to vector<5x5xf32>
    %576 = arith.addf %574, %575 : vector<5x5xf32>
    %cst_187 = arith.constant dense<0xFF800000> : vector<5xf32>
    %577 = vector.multi_reduction <maximumf>, %576, %cst_187 [1] : vector<5x5xf32> to vector<5xf32>
    %578 = vector.shape_cast %577 : vector<5xf32> to vector<5x1xf32>
    %579 = vector.broadcast %578 : vector<5x1xf32> to vector<5x5xf32>
    %580 = arith.subf %576, %579 : vector<5x5xf32>
    %581 = math.exp %580 : vector<5x5xf32>
    %cst_188 = arith.constant dense<0.000000e+00> : vector<5xf32>
    %582 = vector.multi_reduction <add>, %581, %cst_188 [1] : vector<5x5xf32> to vector<5xf32>
    %583 = vector.shape_cast %582 : vector<5xf32> to vector<5x1xf32>
    %584 = tpu.reciprocal %583 {approx = true} : vector<5x1xf32> -> vector<5x1xf32>
    %585 = vector.broadcast %584 : vector<5x1xf32> to vector<5x5xf32>
    %586 = arith.mulf %581, %585 : vector<5x5xf32>
    %cst_189 = arith.constant dense<0.000000e+00> : vector<5x8xf32>
    %587 = tpu.matmul %586, %560, %cst_189 {dimension_numbers = #tpu.dot_dimension_numbers<[1], [0], [0], [1], [0, 0, 1, 1], [], []>} : vector<5x5xf32>, vector<5x8xf32>, vector<5x8xf32> -> vector<5x8xf32>
    %588 = vector.extract_strided_slice %586 {offsets = [0, 0], sizes = [1, 5], strides = [1, 1]} : vector<5x5xf32> to vector<1x5xf32>
    %cst_190 = arith.constant dense<0.000000e+00> : vector<1x8xf32>
    %589 = tpu.matmul %588, %402, %cst_190 {dimension_numbers = #tpu.dot_dimension_numbers<[1], [0], [0], [1], [0, 0, 1, 1], [], []>} : vector<1x5xf32>, vector<5x8xf32>, vector<1x8xf32> -> vector<1x8xf32>
    %590 = vector.extract_strided_slice %586 {offsets = [1, 0], sizes = [1, 5], strides = [1, 1]} : vector<5x5xf32> to vector<1x5xf32>
    %cst_191 = arith.constant dense<0.000000e+00> : vector<1x8xf32>
    %591 = tpu.matmul %590, %430, %cst_191 {dimension_numbers = #tpu.dot_dimension_numbers<[1], [0], [0], [1], [0, 0, 1, 1], [], []>} : vector<1x5xf32>, vector<5x8xf32>, vector<1x8xf32> -> vector<1x8xf32>
    %592 = vector.extract_strided_slice %586 {offsets = [2, 0], sizes = [1, 5], strides = [1, 1]} : vector<5x5xf32> to vector<1x5xf32>
    %cst_192 = arith.constant dense<0.000000e+00> : vector<1x8xf32>
    %593 = tpu.matmul %592, %458, %cst_192 {dimension_numbers = #tpu.dot_dimension_numbers<[1], [0], [0], [1], [0, 0, 1, 1], [], []>} : vector<1x5xf32>, vector<5x8xf32>, vector<1x8xf32> -> vector<1x8xf32>
    %594 = vector.extract_strided_slice %586 {offsets = [3, 0], sizes = [1, 5], strides = [1, 1]} : vector<5x5xf32> to vector<1x5xf32>
    %cst_193 = arith.constant dense<0.000000e+00> : vector<1x8xf32>
    %595 = tpu.matmul %594, %486, %cst_193 {dimension_numbers = #tpu.dot_dimension_numbers<[1], [0], [0], [1], [0, 0, 1, 1], [], []>} : vector<1x5xf32>, vector<5x8xf32>, vector<1x8xf32> -> vector<1x8xf32>
    %596 = vector.extract_strided_slice %586 {offsets = [4, 0], sizes = [1, 5], strides = [1, 1]} : vector<5x5xf32> to vector<1x5xf32>
    %cst_194 = arith.constant dense<0.000000e+00> : vector<1x8xf32>
    %597 = tpu.matmul %596, %514, %cst_194 {dimension_numbers = #tpu.dot_dimension_numbers<[1], [0], [0], [1], [0, 0, 1, 1], [], []>} : vector<1x5xf32>, vector<5x8xf32>, vector<1x8xf32> -> vector<1x8xf32>
    %598 = tpu.concatenate %589, %591, %593, %595, %597 in 0 : vector<1x8xf32>, vector<1x8xf32>, vector<1x8xf32>, vector<1x8xf32>, vector<1x8xf32> -> vector<5x8xf32>
    %599 = arith.addf %587, %598 : vector<5x8xf32>
    %600 = vector.extract_strided_slice %371 {offsets = [0, 16], sizes = [5, 8], strides = [1, 1]} : vector<5x32xf32> to vector<5x8xf32>
    %601 = vector.extract_strided_slice %372 {offsets = [0, 16], sizes = [5, 8], strides = [1, 1]} : vector<5x32xf32> to vector<5x8xf32>
    %602 = vector.extract_strided_slice %373 {offsets = [0, 16], sizes = [5, 8], strides = [1, 1]} : vector<5x32xf32> to vector<5x8xf32>
    %603 = tpu.transpose %601, [1, 0] : vector<5x8xf32> -> vector<8x5xf32>
    %cst_195 = arith.constant dense<0.000000e+00> : vector<5x5xf32>
    %604 = tpu.matmul %600, %603, %cst_195 {dimension_numbers = #tpu.dot_dimension_numbers<[1], [0], [0], [1], [0, 0, 1, 1], [], []>} : vector<5x8xf32>, vector<8x5xf32>, vector<5x5xf32> -> vector<5x5xf32>
    %605 = vector.extract_strided_slice %600 {offsets = [0, 0], sizes = [1, 8], strides = [1, 1]} : vector<5x8xf32> to vector<1x8xf32>
    %cst_196 = arith.constant dense<0.000000e+00> : vector<1x5xf32>
    %606 = tpu.matmul %605, %403, %cst_196 {dimension_numbers = #tpu.dot_dimension_numbers<[1], [0], [0], [1], [0, 0, 1, 1], [], []>} : vector<1x8xf32>, vector<8x5xf32>, vector<1x5xf32> -> vector<1x5xf32>
    %607 = vector.extract_strided_slice %600 {offsets = [1, 0], sizes = [1, 8], strides = [1, 1]} : vector<5x8xf32> to vector<1x8xf32>
    %cst_197 = arith.constant dense<0.000000e+00> : vector<1x5xf32>
    %608 = tpu.matmul %607, %431, %cst_197 {dimension_numbers = #tpu.dot_dimension_numbers<[1], [0], [0], [1], [0, 0, 1, 1], [], []>} : vector<1x8xf32>, vector<8x5xf32>, vector<1x5xf32> -> vector<1x5xf32>
    %609 = vector.extract_strided_slice %600 {offsets = [2, 0], sizes = [1, 8], strides = [1, 1]} : vector<5x8xf32> to vector<1x8xf32>
    %cst_198 = arith.constant dense<0.000000e+00> : vector<1x5xf32>
    %610 = tpu.matmul %609, %459, %cst_198 {dimension_numbers = #tpu.dot_dimension_numbers<[1], [0], [0], [1], [0, 0, 1, 1], [], []>} : vector<1x8xf32>, vector<8x5xf32>, vector<1x5xf32> -> vector<1x5xf32>
    %611 = vector.extract_strided_slice %600 {offsets = [3, 0], sizes = [1, 8], strides = [1, 1]} : vector<5x8xf32> to vector<1x8xf32>
    %cst_199 = arith.constant dense<0.000000e+00> : vector<1x5xf32>
    %612 = tpu.matmul %611, %487, %cst_199 {dimension_numbers = #tpu.dot_dimension_numbers<[1], [0], [0], [1], [0, 0, 1, 1], [], []>} : vector<1x8xf32>, vector<8x5xf32>, vector<1x5xf32> -> vector<1x5xf32>
    %613 = vector.extract_strided_slice %600 {offsets = [4, 0], sizes = [1, 8], strides = [1, 1]} : vector<5x8xf32> to vector<1x8xf32>
    %cst_200 = arith.constant dense<0.000000e+00> : vector<1x5xf32>
    %614 = tpu.matmul %613, %515, %cst_200 {dimension_numbers = #tpu.dot_dimension_numbers<[1], [0], [0], [1], [0, 0, 1, 1], [], []>} : vector<1x8xf32>, vector<8x5xf32>, vector<1x5xf32> -> vector<1x5xf32>
    %615 = tpu.concatenate %606, %608, %610, %612, %614 in 0 : vector<1x5xf32>, vector<1x5xf32>, vector<1x5xf32>, vector<1x5xf32>, vector<1x5xf32> -> vector<5x5xf32>
    %616 = arith.addf %604, %615 : vector<5x5xf32>
    %617 = vector.broadcast %365 : vector<1x5xf32> to vector<5x5xf32>
    %618 = arith.addf %616, %617 : vector<5x5xf32>
    %cst_201 = arith.constant dense<0xFF800000> : vector<5xf32>
    %619 = vector.multi_reduction <maximumf>, %618, %cst_201 [1] : vector<5x5xf32> to vector<5xf32>
    %620 = vector.shape_cast %619 : vector<5xf32> to vector<5x1xf32>
    %621 = vector.broadcast %620 : vector<5x1xf32> to vector<5x5xf32>
    %622 = arith.subf %618, %621 : vector<5x5xf32>
    %623 = math.exp %622 : vector<5x5xf32>
    %cst_202 = arith.constant dense<0.000000e+00> : vector<5xf32>
    %624 = vector.multi_reduction <add>, %623, %cst_202 [1] : vector<5x5xf32> to vector<5xf32>
    %625 = vector.shape_cast %624 : vector<5xf32> to vector<5x1xf32>
    %626 = tpu.reciprocal %625 {approx = true} : vector<5x1xf32> -> vector<5x1xf32>
    %627 = vector.broadcast %626 : vector<5x1xf32> to vector<5x5xf32>
    %628 = arith.mulf %623, %627 : vector<5x5xf32>
    %cst_203 = arith.constant dense<0.000000e+00> : vector<5x8xf32>
    %629 = tpu.matmul %628, %602, %cst_203 {dimension_numbers = #tpu.dot_dimension_numbers<[1], [0], [0], [1], [0, 0, 1, 1], [], []>} : vector<5x5xf32>, vector<5x8xf32>, vector<5x8xf32> -> vector<5x8xf32>
    %630 = vector.extract_strided_slice %628 {offsets = [0, 0], sizes = [1, 5], strides = [1, 1]} : vector<5x5xf32> to vector<1x5xf32>
    %cst_204 = arith.constant dense<0.000000e+00> : vector<1x8xf32>
    %631 = tpu.matmul %630, %402, %cst_204 {dimension_numbers = #tpu.dot_dimension_numbers<[1], [0], [0], [1], [0, 0, 1, 1], [], []>} : vector<1x5xf32>, vector<5x8xf32>, vector<1x8xf32> -> vector<1x8xf32>
    %632 = vector.extract_strided_slice %628 {offsets = [1, 0], sizes = [1, 5], strides = [1, 1]} : vector<5x5xf32> to vector<1x5xf32>
    %cst_205 = arith.constant dense<0.000000e+00> : vector<1x8xf32>
    %633 = tpu.matmul %632, %430, %cst_205 {dimension_numbers = #tpu.dot_dimension_numbers<[1], [0], [0], [1], [0, 0, 1, 1], [], []>} : vector<1x5xf32>, vector<5x8xf32>, vector<1x8xf32> -> vector<1x8xf32>
    %634 = vector.extract_strided_slice %628 {offsets = [2, 0], sizes = [1, 5], strides = [1, 1]} : vector<5x5xf32> to vector<1x5xf32>
    %cst_206 = arith.constant dense<0.000000e+00> : vector<1x8xf32>
    %635 = tpu.matmul %634, %458, %cst_206 {dimension_numbers = #tpu.dot_dimension_numbers<[1], [0], [0], [1], [0, 0, 1, 1], [], []>} : vector<1x5xf32>, vector<5x8xf32>, vector<1x8xf32> -> vector<1x8xf32>
    %636 = vector.extract_strided_slice %628 {offsets = [3, 0], sizes = [1, 5], strides = [1, 1]} : vector<5x5xf32> to vector<1x5xf32>
    %cst_207 = arith.constant dense<0.000000e+00> : vector<1x8xf32>
    %637 = tpu.matmul %636, %486, %cst_207 {dimension_numbers = #tpu.dot_dimension_numbers<[1], [0], [0], [1], [0, 0, 1, 1], [], []>} : vector<1x5xf32>, vector<5x8xf32>, vector<1x8xf32> -> vector<1x8xf32>
    %638 = vector.extract_strided_slice %628 {offsets = [4, 0], sizes = [1, 5], strides = [1, 1]} : vector<5x5xf32> to vector<1x5xf32>
    %cst_208 = arith.constant dense<0.000000e+00> : vector<1x8xf32>
    %639 = tpu.matmul %638, %514, %cst_208 {dimension_numbers = #tpu.dot_dimension_numbers<[1], [0], [0], [1], [0, 0, 1, 1], [], []>} : vector<1x5xf32>, vector<5x8xf32>, vector<1x8xf32> -> vector<1x8xf32>
    %640 = tpu.concatenate %631, %633, %635, %637, %639 in 0 : vector<1x8xf32>, vector<1x8xf32>, vector<1x8xf32>, vector<1x8xf32>, vector<1x8xf32> -> vector<5x8xf32>
    %641 = arith.addf %629, %640 : vector<5x8xf32>
    %642 = vector.extract_strided_slice %371 {offsets = [0, 24], sizes = [5, 8], strides = [1, 1]} : vector<5x32xf32> to vector<5x8xf32>
    %643 = vector.extract_strided_slice %372 {offsets = [0, 24], sizes = [5, 8], strides = [1, 1]} : vector<5x32xf32> to vector<5x8xf32>
    %644 = vector.extract_strided_slice %373 {offsets = [0, 24], sizes = [5, 8], strides = [1, 1]} : vector<5x32xf32> to vector<5x8xf32>
    %645 = tpu.transpose %643, [1, 0] : vector<5x8xf32> -> vector<8x5xf32>
    %cst_209 = arith.constant dense<0.000000e+00> : vector<5x5xf32>
    %646 = tpu.matmul %642, %645, %cst_209 {dimension_numbers = #tpu.dot_dimension_numbers<[1], [0], [0], [1], [0, 0, 1, 1], [], []>} : vector<5x8xf32>, vector<8x5xf32>, vector<5x5xf32> -> vector<5x5xf32>
    %647 = vector.extract_strided_slice %642 {offsets = [0, 0], sizes = [1, 8], strides = [1, 1]} : vector<5x8xf32> to vector<1x8xf32>
    %cst_210 = arith.constant dense<0.000000e+00> : vector<1x5xf32>
    %648 = tpu.matmul %647, %403, %cst_210 {dimension_numbers = #tpu.dot_dimension_numbers<[1], [0], [0], [1], [0, 0, 1, 1], [], []>} : vector<1x8xf32>, vector<8x5xf32>, vector<1x5xf32> -> vector<1x5xf32>
    %649 = vector.extract_strided_slice %642 {offsets = [1, 0], sizes = [1, 8], strides = [1, 1]} : vector<5x8xf32> to vector<1x8xf32>
    %cst_211 = arith.constant dense<0.000000e+00> : vector<1x5xf32>
    %650 = tpu.matmul %649, %431, %cst_211 {dimension_numbers = #tpu.dot_dimension_numbers<[1], [0], [0], [1], [0, 0, 1, 1], [], []>} : vector<1x8xf32>, vector<8x5xf32>, vector<1x5xf32> -> vector<1x5xf32>
    %651 = vector.extract_strided_slice %642 {offsets = [2, 0], sizes = [1, 8], strides = [1, 1]} : vector<5x8xf32> to vector<1x8xf32>
    %cst_212 = arith.constant dense<0.000000e+00> : vector<1x5xf32>
    %652 = tpu.matmul %651, %459, %cst_212 {dimension_numbers = #tpu.dot_dimension_numbers<[1], [0], [0], [1], [0, 0, 1, 1], [], []>} : vector<1x8xf32>, vector<8x5xf32>, vector<1x5xf32> -> vector<1x5xf32>
    %653 = vector.extract_strided_slice %642 {offsets = [3, 0], sizes = [1, 8], strides = [1, 1]} : vector<5x8xf32> to vector<1x8xf32>
    %cst_213 = arith.constant dense<0.000000e+00> : vector<1x5xf32>
    %654 = tpu.matmul %653, %487, %cst_213 {dimension_numbers = #tpu.dot_dimension_numbers<[1], [0], [0], [1], [0, 0, 1, 1], [], []>} : vector<1x8xf32>, vector<8x5xf32>, vector<1x5xf32> -> vector<1x5xf32>
    %655 = vector.extract_strided_slice %642 {offsets = [4, 0], sizes = [1, 8], strides = [1, 1]} : vector<5x8xf32> to vector<1x8xf32>
    %cst_214 = arith.constant dense<0.000000e+00> : vector<1x5xf32>
    %656 = tpu.matmul %655, %515, %cst_214 {dimension_numbers = #tpu.dot_dimension_numbers<[1], [0], [0], [1], [0, 0, 1, 1], [], []>} : vector<1x8xf32>, vector<8x5xf32>, vector<1x5xf32> -> vector<1x5xf32>
    %657 = tpu.concatenate %648, %650, %652, %654, %656 in 0 : vector<1x5xf32>, vector<1x5xf32>, vector<1x5xf32>, vector<1x5xf32>, vector<1x5xf32> -> vector<5x5xf32>
    %658 = arith.addf %646, %657 : vector<5x5xf32>
    %659 = vector.broadcast %365 : vector<1x5xf32> to vector<5x5xf32>
    %660 = arith.addf %658, %659 : vector<5x5xf32>
    %cst_215 = arith.constant dense<0xFF800000> : vector<5xf32>
    %661 = vector.multi_reduction <maximumf>, %660, %cst_215 [1] : vector<5x5xf32> to vector<5xf32>
    %662 = vector.shape_cast %661 : vector<5xf32> to vector<5x1xf32>
    %663 = vector.broadcast %662 : vector<5x1xf32> to vector<5x5xf32>
    %664 = arith.subf %660, %663 : vector<5x5xf32>
    %665 = math.exp %664 : vector<5x5xf32>
    %cst_216 = arith.constant dense<0.000000e+00> : vector<5xf32>
    %666 = vector.multi_reduction <add>, %665, %cst_216 [1] : vector<5x5xf32> to vector<5xf32>
    %667 = vector.shape_cast %666 : vector<5xf32> to vector<5x1xf32>
    %668 = tpu.reciprocal %667 {approx = true} : vector<5x1xf32> -> vector<5x1xf32>
    %669 = vector.broadcast %668 : vector<5x1xf32> to vector<5x5xf32>
    %670 = arith.mulf %665, %669 : vector<5x5xf32>
    %cst_217 = arith.constant dense<0.000000e+00> : vector<5x8xf32>
    %671 = tpu.matmul %670, %644, %cst_217 {dimension_numbers = #tpu.dot_dimension_numbers<[1], [0], [0], [1], [0, 0, 1, 1], [], []>} : vector<5x5xf32>, vector<5x8xf32>, vector<5x8xf32> -> vector<5x8xf32>
    %672 = vector.extract_strided_slice %670 {offsets = [0, 0], sizes = [1, 5], strides = [1, 1]} : vector<5x5xf32> to vector<1x5xf32>
    %cst_218 = arith.constant dense<0.000000e+00> : vector<1x8xf32>
    %673 = tpu.matmul %672, %402, %cst_218 {dimension_numbers = #tpu.dot_dimension_numbers<[1], [0], [0], [1], [0, 0, 1, 1], [], []>} : vector<1x5xf32>, vector<5x8xf32>, vector<1x8xf32> -> vector<1x8xf32>
    %674 = vector.extract_strided_slice %670 {offsets = [1, 0], sizes = [1, 5], strides = [1, 1]} : vector<5x5xf32> to vector<1x5xf32>
    %cst_219 = arith.constant dense<0.000000e+00> : vector<1x8xf32>
    %675 = tpu.matmul %674, %430, %cst_219 {dimension_numbers = #tpu.dot_dimension_numbers<[1], [0], [0], [1], [0, 0, 1, 1], [], []>} : vector<1x5xf32>, vector<5x8xf32>, vector<1x8xf32> -> vector<1x8xf32>
    %676 = vector.extract_strided_slice %670 {offsets = [2, 0], sizes = [1, 5], strides = [1, 1]} : vector<5x5xf32> to vector<1x5xf32>
    %cst_220 = arith.constant dense<0.000000e+00> : vector<1x8xf32>
    %677 = tpu.matmul %676, %458, %cst_220 {dimension_numbers = #tpu.dot_dimension_numbers<[1], [0], [0], [1], [0, 0, 1, 1], [], []>} : vector<1x5xf32>, vector<5x8xf32>, vector<1x8xf32> -> vector<1x8xf32>
    %678 = vector.extract_strided_slice %670 {offsets = [3, 0], sizes = [1, 5], strides = [1, 1]} : vector<5x5xf32> to vector<1x5xf32>
    %cst_221 = arith.constant dense<0.000000e+00> : vector<1x8xf32>
    %679 = tpu.matmul %678, %486, %cst_221 {dimension_numbers = #tpu.dot_dimension_numbers<[1], [0], [0], [1], [0, 0, 1, 1], [], []>} : vector<1x5xf32>, vector<5x8xf32>, vector<1x8xf32> -> vector<1x8xf32>
    %680 = vector.extract_strided_slice %670 {offsets = [4, 0], sizes = [1, 5], strides = [1, 1]} : vector<5x5xf32> to vector<1x5xf32>
    %cst_222 = arith.constant dense<0.000000e+00> : vector<1x8xf32>
    %681 = tpu.matmul %680, %514, %cst_222 {dimension_numbers = #tpu.dot_dimension_numbers<[1], [0], [0], [1], [0, 0, 1, 1], [], []>} : vector<1x5xf32>, vector<5x8xf32>, vector<1x8xf32> -> vector<1x8xf32>
    %682 = tpu.concatenate %673, %675, %677, %679, %681 in 0 : vector<1x8xf32>, vector<1x8xf32>, vector<1x8xf32>, vector<1x8xf32>, vector<1x8xf32> -> vector<5x8xf32>
    %683 = arith.addf %671, %682 : vector<5x8xf32>
    %684 = tpu.concatenate %557, %599, %641, %683 in 1 : vector<5x8xf32>, vector<5x8xf32>, vector<5x8xf32>, vector<5x8xf32> -> vector<5x32xf32>
    %c0_223 = arith.constant 0 : index
    %c0_224 = arith.constant 0 : index
    %685 = vector.load %arg9[%c0_223, %c0_224] : memref<32x32xf32, #tpu.memory_space<vmem>>, vector<32x32xf32>
    %cst_225 = arith.constant dense<0.000000e+00> : vector<5x32xf32>
    %686 = tpu.matmul %684, %685, %cst_225 {dimension_numbers = #tpu.dot_dimension_numbers<[1], [0], [0], [1], [0, 0, 1, 1], [], []>} : vector<5x32xf32>, vector<32x32xf32>, vector<5x32xf32> -> vector<5x32xf32>
    %c0_226 = arith.constant 0 : index
    %c0_227 = arith.constant 0 : index
    %687 = vector.load %arg10[%c0_226, %c0_227] : memref<1x32xf32, #tpu.memory_space<vmem>>, vector<1x32xf32>
    %688 = vector.broadcast %687 : vector<1x32xf32> to vector<5x32xf32>
    %689 = arith.addf %686, %688 : vector<5x32xf32>
    %cst_228 = arith.constant 0.000000e+00 : f32
    %690 = vector.broadcast %cst_228 : f32 to vector<5x32xf32>
    %691 = arith.maximumf %689, %690 : vector<5x32xf32>
    %692 = arith.addf %363, %691 : vector<5x32xf32>
    %c0_229 = arith.constant 0 : index
    %c0_230 = arith.constant 0 : index
    %693 = vector.load %arg11[%c0_229, %c0_230] : memref<1x32xf32, #tpu.memory_space<vmem>>, vector<1x32xf32>
    %c0_231 = arith.constant 0 : index
    %c0_232 = arith.constant 0 : index
    %694 = vector.load %arg12[%c0_231, %c0_232] : memref<1x32xf32, #tpu.memory_space<vmem>>, vector<1x32xf32>
    %cst_233 = arith.constant dense<0.000000e+00> : vector<5xf32>
    %695 = vector.multi_reduction <add>, %692, %cst_233 [1] : vector<5x32xf32> to vector<5xf32>
    %696 = vector.shape_cast %695 : vector<5xf32> to vector<5x1xf32>
    %cst_234 = arith.constant 3.200000e+01 : f32
    %697 = vector.broadcast %cst_234 : f32 to vector<5x1xf32>
    %698 = arith.divf %696, %697 : vector<5x1xf32>
    %699 = vector.broadcast %698 : vector<5x1xf32> to vector<5x32xf32>
    %700 = arith.subf %692, %699 : vector<5x32xf32>
    %701 = arith.mulf %700, %700 : vector<5x32xf32>
    %cst_235 = arith.constant dense<0.000000e+00> : vector<5xf32>
    %702 = vector.multi_reduction <add>, %701, %cst_235 [1] : vector<5x32xf32> to vector<5xf32>
    %703 = vector.shape_cast %702 : vector<5xf32> to vector<5x1xf32>
    %cst_236 = arith.constant 3.200000e+01 : f32
    %704 = vector.broadcast %cst_236 : f32 to vector<5x1xf32>
    %705 = arith.divf %703, %704 : vector<5x1xf32>
    %cst_237 = arith.constant 9.99999974E-6 : f32
    %706 = vector.broadcast %cst_237 : f32 to vector<5x1xf32>
    %707 = arith.addf %705, %706 : vector<5x1xf32>
    %708 = math.rsqrt %707 : vector<5x1xf32>
    %709 = vector.broadcast %708 : vector<5x1xf32> to vector<5x32xf32>
    %710 = arith.mulf %700, %709 : vector<5x32xf32>
    %711 = vector.broadcast %693 : vector<1x32xf32> to vector<5x32xf32>
    %712 = arith.mulf %710, %711 : vector<5x32xf32>
    %713 = vector.broadcast %694 : vector<1x32xf32> to vector<5x32xf32>
    %714 = arith.addf %712, %713 : vector<5x32xf32>
    %c1_238 = arith.constant 1 : index
    %c0_239 = arith.constant 0 : index
    %c0_240 = arith.constant 0 : index
    %715 = vector.load %arg13[%c1_238, %c0_239, %c0_240] : memref<2x5x32xf32, #tpu.memory_space<vmem>>, vector<1x5x32xf32>
    %716 = vector.shape_cast %715 : vector<1x5x32xf32> to vector<5x32xf32>
    %717 = vector.shape_cast %714 : vector<5x32xf32> to vector<1x5x32xf32>
    tpu.vector_store %arg13[%c1_238, %c0_239, %c0_240], %717 {strides = array<i32>} : memref<2x5x32xf32, #tpu.memory_space<vmem>>, vector<1x5x32xf32>,
    return
  }
}

module attributes {stable_mosaic.version = 11 : i64} {
  func.func @_path_update_kernel(%arg0: memref<50x64xf32, #tpu.memory_space<vmem>>, %arg1: memref<50x16xf32, #tpu.memory_space<vmem>>, %arg2: memref<80x32xf32, #tpu.memory_space<vmem>>, %arg3: memref<1x32xf32, #tpu.memory_space<vmem>>, %arg4: memref<64x16xf32, #tpu.memory_space<vmem>>, %arg5: memref<1x16xf32, #tpu.memory_space<vmem>>, %arg6: memref<16x16xf32, #tpu.memory_space<vmem>>, %arg7: memref<1x16xf32, #tpu.memory_space<vmem>>, %arg8: memref<50x16xf32, #tpu.memory_space<vmem>>) attributes {dimension_semantics = [], scalar_prefetch = 0 : i64, scratch_operands = 0 : i64, tpu.core_type = #tpu.core_type<tc>} {
    %c0 = arith.constant 0 : index
    %c0_0 = arith.constant 0 : index
    %0 = vector.load %arg0[%c0, %c0_0] : memref<50x64xf32, #tpu.memory_space<vmem>>, vector<50x64xf32>
    %c0_1 = arith.constant 0 : index
    %c0_2 = arith.constant 0 : index
    %1 = vector.load %arg1[%c0_1, %c0_2] : memref<50x16xf32, #tpu.memory_space<vmem>>, vector<50x16xf32>
    %2 = tpu.concatenate %0, %1 in 1 : vector<50x64xf32>, vector<50x16xf32> -> vector<50x80xf32>
    %c0_3 = arith.constant 0 : index
    %c0_4 = arith.constant 0 : index
    %3 = vector.load %arg2[%c0_3, %c0_4] : memref<80x32xf32, #tpu.memory_space<vmem>>, vector<80x32xf32>
    %cst = arith.constant dense<0.000000e+00> : vector<50x32xf32>
    %4 = tpu.matmul %2, %3, %cst {dimension_numbers = #tpu.dot_dimension_numbers<[1], [0], [0], [1], [0, 0, 1, 1], [], []>} : vector<50x80xf32>, vector<80x32xf32>, vector<50x32xf32> -> vector<50x32xf32>
    %c0_5 = arith.constant 0 : index
    %c0_6 = arith.constant 0 : index
    %5 = vector.load %arg3[%c0_5, %c0_6] : memref<1x32xf32, #tpu.memory_space<vmem>>, vector<1x32xf32>
    %6 = vector.broadcast %5 : vector<1x32xf32> to vector<50x32xf32>
    %7 = arith.addf %4, %6 : vector<50x32xf32>
    %8 = arith.negf %7 : vector<50x32xf32>
    %9 = math.exp %8 : vector<50x32xf32>
    %cst_7 = arith.constant 1.000000e+00 : f32
    %10 = vector.broadcast %cst_7 : f32 to vector<50x32xf32>
    %11 = arith.addf %10, %9 : vector<50x32xf32>
    %12 = arith.divf %10, %11 : vector<50x32xf32>
    %13 = vector.extract_strided_slice %12 {offsets = [0, 0], sizes = [50, 16], strides = [1, 1]} : vector<50x32xf32> to vector<50x16xf32>
    %14 = vector.extract_strided_slice %12 {offsets = [0, 16], sizes = [50, 16], strides = [1, 1]} : vector<50x32xf32> to vector<50x16xf32>
    %c0_8 = arith.constant 0 : index
    %c0_9 = arith.constant 0 : index
    %15 = vector.load %arg4[%c0_8, %c0_9] : memref<64x16xf32, #tpu.memory_space<vmem>>, vector<64x16xf32>
    %cst_10 = arith.constant dense<0.000000e+00> : vector<50x16xf32>
    %16 = tpu.matmul %0, %15, %cst_10 {dimension_numbers = #tpu.dot_dimension_numbers<[1], [0], [0], [1], [0, 0, 1, 1], [], []>} : vector<50x64xf32>, vector<64x16xf32>, vector<50x16xf32> -> vector<50x16xf32>
    %c0_11 = arith.constant 0 : index
    %c0_12 = arith.constant 0 : index
    %17 = vector.load %arg5[%c0_11, %c0_12] : memref<1x16xf32, #tpu.memory_space<vmem>>, vector<1x16xf32>
    %18 = vector.broadcast %17 : vector<1x16xf32> to vector<50x16xf32>
    %19 = arith.addf %16, %18 : vector<50x16xf32>
    %c0_13 = arith.constant 0 : index
    %c0_14 = arith.constant 0 : index
    %20 = vector.load %arg6[%c0_13, %c0_14] : memref<16x16xf32, #tpu.memory_space<vmem>>, vector<16x16xf32>
    %cst_15 = arith.constant dense<0.000000e+00> : vector<50x16xf32>
    %21 = tpu.matmul %1, %20, %cst_15 {dimension_numbers = #tpu.dot_dimension_numbers<[1], [0], [0], [1], [0, 0, 1, 1], [], []>} : vector<50x16xf32>, vector<16x16xf32>, vector<50x16xf32> -> vector<50x16xf32>
    %c0_16 = arith.constant 0 : index
    %c0_17 = arith.constant 0 : index
    %22 = vector.load %arg7[%c0_16, %c0_17] : memref<1x16xf32, #tpu.memory_space<vmem>>, vector<1x16xf32>
    %23 = vector.broadcast %22 : vector<1x16xf32> to vector<50x16xf32>
    %24 = arith.addf %21, %23 : vector<50x16xf32>
    %25 = arith.mulf %13, %24 : vector<50x16xf32>
    %26 = arith.addf %19, %25 : vector<50x16xf32>
    %27 = math.tanh %26 : vector<50x16xf32>
    %28 = arith.mulf %14, %1 : vector<50x16xf32>
    %cst_18 = arith.constant 1.000000e+00 : f32
    %29 = vector.broadcast %cst_18 : f32 to vector<50x16xf32>
    %30 = arith.subf %29, %14 : vector<50x16xf32>
    %31 = arith.mulf %30, %27 : vector<50x16xf32>
    %32 = arith.addf %28, %31 : vector<50x16xf32>
    %c0_19 = arith.constant 0 : index
    %c0_20 = arith.constant 0 : index
    %33 = vector.load %arg8[%c0_19, %c0_20] : memref<50x16xf32, #tpu.memory_space<vmem>>, vector<50x16xf32>
    tpu.vector_store %arg8[%c0_19, %c0_20], %32 {strides = array<i32>} : memref<50x16xf32, #tpu.memory_space<vmem>>, vector<50x16xf32>,
    return
  }
}

</mosaic_0001>

<bundles_post_ra>
// kernel: _damt_core.13
= control target key start
LH: loop header
LB: loop body
LE: loop exit
PB: predicated region body
PF: predicated region fallthrough
CT: control target
= control target key end

     0   :  { %s648_s9 = smov 64   ;;  %vm363_vm0 = vcmask 130048   ;;  %vm71_vm1 = vcmask 523264   ;;  %vm93_vm2 = vcmask 654336   ;;  %s1092_s1 = inlined_call_operand.vmem [shape: f32[50,16], index: 1, kind: input, shape index: {}]   ;;  %s1093_s2 = inlined_call_operand.vmem [shape: f32[80,32], index: 2, kind: input, shape index: {}]   ;;  %s1094_s3 = inlined_call_operand.vmem [shape: f32[1,32], index: 3, kind: input, shape index: {}]   ;;  %s1095_s4 = inlined_call_operand.vmem [shape: f32[64,16], index: 4, kind: input, shape index: {}]   ;;  %s1096_s6 = inlined_call_operand.vmem [shape: f32[16,16], index: 6, kind: input, shape index: {}]   ;;  %s1097_s0 = inlined_call_operand.vmem [shape: f32[50,64], index: 0, kind: input, shape index: {}]   ;;  %s1098_s7 = inlined_call_operand.vmem [shape: f32[1,16], index: 7, kind: input, shape index: {}]   ;;  %s1099_s5 = inlined_call_operand.vmem [shape: f32[1,16], index: 5, kind: input, shape index: {}]   ;;  %s1100_s8 = inlined_call_operand.vmem [shape: f32[50,16], index: 8, kind: output, shape index: {}]  }
   0x1   :  { %v699_v0 = vld [vmem:[%s1092_s1] sm:$0xff]  ;;  %v704_v1 = vld [vmem:[%s1092_s1 + $0x10] sm:$0xff]  ;;  %v713_v2 = vld [vmem:[%s1092_s1 + $0x18] sm:$0xff] }
   0x2   :  { %50 = vrot.lane.b32.xlu0 %v699_v0, %s648_s9  ;;  %54 = vrot.lane.b32.xlu1 %v704_v1, %s648_s9  ;;  %v88_v3 = vld [vmem:[%s1093_s2 + $0x48] sm:$0xff]  ;;  %v87_v4 = vld [vmem:[%s1093_s2 + $0x40] sm:$0xff] }
   0x3   :  { %56 = vrot.lane.b32.xlu2 %v713_v2, %s648_s9  ;;  %121 = vmatpush.msra.mxu0 %v88_v3  ;;  %v86_v5 = vld [vmem:[%s1093_s2 + $0x38] sm:$0xff]  ;;  %v729_v6 = vld [vmem:[%s1092_s1 + $0x8] sm:$0xff]  ;;  %v85_v8 = vld [vmem:[%s1093_s2 + $0x30] sm:$0xff] }
   0x4   :  { %582 = vmatpush.msra.mxu3 %v88_v3  ;;  %v734_v7 = vld [vmem:[%s1092_s1 + $0x28] sm:$0xff]  ;;  %v742_v9 = vld [vmem:[%s1092_s1 + $0x30] sm:$0x3]  ;;  %v83_v11 = vld [vmem:[%s1093_s2 + $0x20] sm:$0xff] }
   0x5   :  { %122 = vmatpush.msra.mxu0 %v87_v4  ;;  %v84_v10 = vld [vmem:[%s1093_s2 + $0x28] sm:$0xff]  ;;  %v82_v12 = vld [vmem:[%s1093_s2 + $0x18] sm:$0xff]  ;;  %v762_v13 = vld [vmem:[%s1092_s1 + $0x20] sm:$0xff]  ;;  %s649_s1 = smov 16  }
   0x6   :  { %583 = vmatpush.msra.mxu3 %v87_v4  ;;  %v81_v14 = vld [vmem:[%s1093_s2 + $0x10] sm:$0xff]  ;;  %v80_v15 = vld [vmem:[%s1093_s2 + $0x8] sm:$0xff]  ;;  %v79_v16 = vld [vmem:[%s1093_s2] sm:$0xff] }
   0x7   :  { %123 = vmatpush.msra.mxu0 %v86_v5  ;;  %v293_v17 = vld [vmem:[%s1095_s4 + $0x38] sm:$0xff]  ;;  %v292_v18 = vld [vmem:[%s1095_s4 + $0x30] sm:$0xff]  ;;  %v291_v19 = vld [vmem:[%s1095_s4 + $0x28] sm:$0xff] }
   0x8   :  { %584 = vmatpush.msra.mxu3 %v86_v5  ;;  %327 = vmatpush.msra.mxu1 %v293_v17  ;;  %v358_v20 = vld [vmem:[%s1096_s6 + $0x8] sm:$0xff]  ;;  %v357_v21 = vld [vmem:[%s1096_s6] sm:$0xff]  ;;  %v289_v23 = vld [vmem:[%s1095_s4 + $0x18] sm:$0xff] }
   0x9   :  { %124 = vmatpush.msra.mxu0 %v85_v8  ;;  %392 = vmatpush.msra.mxu2 %v358_v20  ;;  %v290_v22 = vld [vmem:[%s1095_s4 + $0x20] sm:$0xff]  ;;  %v288_v24 = vld [vmem:[%s1095_s4 + $0x10] sm:$0xff]  ;;  %v287_v25 = vld [vmem:[%s1095_s4 + $0x8] sm:$0xff] }
   0xa   :  { %52 = vrot.lane.b32.xlu0 %v729_v6, %s648_s9  ;;  %60 = vrot.lane.b32.xlu1 %v734_v7, %s648_s9  ;;  %v286_v26 = vld [vmem:[%s1095_s4] sm:$0xff]  ;;  %v30_v28 = vld [vmem:[%s1097_s0 + $0x8] sm:$0xff] }
   0xb   :  { %585 = vmatpush.msra.mxu3 %v85_v8  ;;  %62 = vrot.lane.b32.xlu2 %v742_v9, %s648_s9  ;;  %v29_v27 = vld [vmem:[%s1097_s0] sm:$0xff]  ;;  %v31_v29 = vld [vmem:[%s1097_s0 + $0x10] sm:$0xff]  ;;  %v34_v34 = vld [vmem:[%s1097_s0 + $0x28] sm:$0xff] }
   0xc   :  { %125 = vmatpush.msra.mxu0 %v84_v10  ;;  %328 = vmatpush.msra.mxu1 %v292_v18  ;;  %v32_v35 = vld [vmem:[%s1097_s0 + $0x18] sm:$0xff]  ;;  %v35_v41 = vld [vmem:[%s1097_s0 + $0x30] sm:$0x3]  ;;  %v33_v44 = vld [vmem:[%s1097_s0 + $0x20] sm:$0xff] }
   0xd   :  { %586 = vmatpush.msra.mxu3 %v84_v10  ;;  %393 = vmatpush.msra.mxu2 %v357_v21  ;;  %v878_v50 = vld [vmem:[%s1094_s3] ss:$0 sm:$0xff] }
   0xe   :  { %126 = vmatpush.msra.mxu0 %v83_v11  ;;  %329 = vmatpush.msra.mxu1 %v291_v19  ;;  %v900_v10 = vld [vmem:[%s1098_s7] ss:$0 sm:$0xff] }
   0xf   :  { %587 = vmatpush.msra.mxu3 %v83_v11  ;;  %575 = vmatmul.msk.f32.vlgmr.msra.gmra.mxu2 %vm363_vm0, %v699_v0 }
  0x10   :  { %127 = vmatpush.msra.mxu0 %v82_v12  ;;  %330 = vmatpush.msra.mxu1 %v290_v22 }
  0x11   :  { %588 = vmatpush.msra.mxu3 %v82_v12 }
  0x12   :  { %58 = vrot.lane.b32.xlu0 %v762_v13, %s648_s9  ;;  %128 = vmatpush.msra.mxu0 %v81_v14 }
  0x13   :  { %589 = vmatpush.msra.mxu3 %v81_v14  ;;  %437 = vrot.lane.b32.xlu1 %v699_v0, %s649_s1 }
  0x14   :  { %129 = vmatpush.msra.mxu0 %v80_v15  ;;  %439 = vrot.lane.b32.xlu2 %v729_v6, %s649_s1 }
  0x15   :  { %590 = vmatpush.msra.mxu3 %v80_v15  ;;  %331 = vmatpush.msra.mxu1 %v289_v23 }
  0x16   :  { %130 = vmatpush.msra.mxu0 %v79_v16 }
  0x17   :  { %591 = vmatpush.msra.mxu3 %v79_v16  ;;  %332 = vmatpush.msra.mxu1 %v288_v24  ;;  %v906_v16 = vld [vmem:[%s1099_s5] ss:$0 sm:$0xff]  ;;  %s650_s5 = smov 112  }
  0x18   :  { %576 = vmatmul.msk.f32.gmra.mxu2 %vm363_vm0, %v729_v6 }
  0x19   :  { %592 = vmatpush.msrb.mxu3 %v293_v17  ;;  %333 = vmatpush.msra.mxu1 %v287_v25 }
  0x1a   :  { %441 = vrot.lane.b32.xlu0 %v704_v1, %s649_s1 }
  0x1b   :  { %443 = vrot.lane.b32.xlu1 %v713_v2, %s649_s1  ;;  %593 = vmatpush.msrb.mxu3 %v292_v18 }
  0x1c   :  { %445 = vrot.lane.b32.xlu2 %v762_v13, %s649_s1  ;;  %334 = vmatpush.msra.mxu1 %v286_v26 }
  0x1d   :  { %594 = vmatpush.msrb.mxu3 %v291_v19  ;;  %568 = vmatmul.msk.f32.vlgmr.msra.gmra.mxu1 %vm71_vm1, %v29_v27 }
  0x1f   :  { %595 = vmatpush.msrb.mxu3 %v290_v22 }
  0x20   :  { %577 = vmatmul.msk.f32.gmra.mxu2 %vm363_vm0, %v704_v1 }
  0x21   :  { %596 = vmatpush.msrb.mxu3 %v289_v23 }
  0x22   :  { %447 = vrot.lane.b32.xlu0 %v734_v7, %s649_s1 }
  0x23   :  { %449 = vrot.lane.b32.xlu1 %v742_v9, %s649_s1  ;;  %597 = vmatpush.msrb.mxu3 %v288_v24 }
  0x25   :  { %598 = vmatpush.msrb.mxu3 %v287_v25  ;;  %569 = vmatmul.msk.f32.gmra.mxu1 %vm71_vm1, %v30_v28 }
  0x27   :  { %599 = vmatpush.msrb.mxu3 %v286_v26 }
  0x28   :  { %578 = vmatmul.msk.f32.gmra.mxu2 %vm363_vm0, %v713_v2 }
  0x2d   :  { %570 = vmatmul.msk.f32.gmra.mxu1 %vm71_vm1, %v31_v29 }
  0x30   :  { %579 = vmatmul.msk.f32.gmra.mxu2 %vm363_vm0, %v762_v13 }
  0x35   :  { %571 = vmatmul.msk.f32.gmra.mxu1 %vm71_vm1, %v32_v35 }
  0x38   :  { %580 = vmatmul.msk.f32.gmra.mxu2 %vm363_vm0, %v734_v7 }
  0x3d   :  { %572 = vmatmul.msk.f32.gmra.mxu1 %vm71_vm1, %v33_v44 }
  0x40   :  { %581 = vmatmul.msk.f32.gmra.mxu2 %vm363_vm0, %v742_v9 }
  0x45   :  { %573 = vmatmul.msk.f32.gmra.mxu1 %vm71_vm1, %v34_v34 }
  0x5d   :  { %v57_v33 = vpop.permute.xlu2 %56 }
  0x5e   :  { %v75_v45 = vsel %vm71_vm1, %v32_v35, %v57_v33 }
  0x65   :  { %v63_v40 = vpop.permute.xlu2 %62 }
  0x66   :  { %v78_v43 = vsel %vm71_vm1, %v35_v41, %v63_v40 }
  0x74   :  { %v51_v30 = vpop.permute.xlu0 %50  ;;  %v55_v31 = vpop.permute.xlu1 %54 }
  0x75   :  { %v72_v32 = vsel %vm71_vm1, %v29_v27, %v51_v30  ;;  %v74_v42 = vsel %vm71_vm1, %v31_v29, %v55_v31 }
  0x76   :  { %554 = vmatmul.msk.f32.vlgmr.msra.gmra.mxu0 %vm93_vm2, %v72_v32 }
  0x7c   :  { %v53_v36 = vpop.permute.xlu0 %52  ;;  %v61_v37 = vpop.permute.xlu1 %60 }
  0x7d   :  { %v73_v38 = vsel %vm71_vm1, %v30_v28, %v53_v36  ;;  %v77_v39 = vsel %vm71_vm1, %v34_v34, %v61_v37 }
  0x7e   :  { %555 = vmatmul.msk.f32.gmra.mxu0 %vm93_vm2, %v73_v38  ;;  %559 = vmatmul.msk.f32.vlgmr.msra.gmra.mxu3 %vm93_vm2, %v77_v39 }
  0x84   :  { %v59_v46 = vpop.permute.xlu0 %58 }
  0x85   :  { %v76_v47 = vsel %vm71_vm1, %v33_v44, %v59_v46 }
  0x86   :  { %556 = vmatmul.msk.f32.gmra.mxu0 %vm93_vm2, %v74_v42  ;;  %560 = vmatmul.msk.f32.gmra.mxu3 %vm93_vm2, %v78_v43 }
  0x8e   :  { %557 = vmatmul.msk.f32.gmra.mxu0 %vm93_vm2, %v75_v45  ;;  %574 = vmatmul.msk.f32.vlgmr.msrb.gmra.mxu3 %vm71_vm1, %v35_v41 }
  0x92   :  { %v395_v48 = vpop.f32.mrf.mxu2 }
  0x93   :  { %v396_v23 = vadd.f32 %v900_v10, %v395_v48 }
  0x96   :  { %558 = vmatmul.msk.f32.gmra.mxu0 %vm93_vm2, %v76_v47 }
  0x9a   :  { %v336_v49 = vpop.f32.mrf.mxu1 }
  0x9b   :  { %v880_v51 = vpop.f32.mrf.mxu2  ;;  %v337_v31 = vadd.f32 %v906_v16, %v336_v49 }
  0x9c   :  { %v399_v46 = vadd.f32 %v900_v10, %v880_v51 }
  0xa2   :  { %v883_v55 = vpop.f32.mrf.mxu1 }
  0xa3   :  { %v885_v56 = vpop.f32.mrf.mxu2  ;;  %v340_v47 = vadd.f32 %v906_v16, %v883_v55 }
  0xaa   :  { %v888_v63 = vpop.f32.mrf.mxu1 }
  0xab   :  { %v892_v4 = vpop.f32.mrf.mxu2 }
  0xb2   :  { %v908_v18 = vpop.f32.mrf.mxu1 }
  0xb3   :  { %v914_v28 = vpop.f32.mrf.mxu2 }
  0xba   :  { %v936_v49 = vpop.f32.mrf.mxu1 }
  0xf3   :  { %v132_v52 = vpop.f32.mrf.mxu0 }
  0xf4   :  { %v133_v53 = vadd.f32 %v878_v50, %v132_v52 }
  0xf6   :  { %v561_v54 = vmul.f32 -1.442695, %v133_v53 }
  0xf8   :  { %606 = vpow2.f32 %v561_v54 }
  0xfb   :  { %v135_v57 = vpop.f32.mrf.mxu0 }
  0xfc   :  { %v136_v58 = vadd.f32 %v878_v50, %v135_v57 }
  0xfe   :  { %v607_v59 = vpop.eup %606  ;;  %v562_v60 = vmul.f32 -1.442695, %v136_v58 }
  0xff   :  { %v174_v61 = vadd.f32 1.0, %v607_v59 }
 0x100   :  { %608 = vpow2.f32 %v562_v60  ;;  %v410_v60 = vpop.f32.mrf.mxu2 }
 0x101   :  { %610 = vrcp.f32 %v174_v61  ;;  %v147_v62 = vpop.f32.mrf.mxu3  ;;  %v190_v14 = vand.u32 2147483647, %v174_v61  ;;  %v192_v15 = vand.u32 2147483648, %v174_v61  ;;  %vm186_vm4 = vweird.f32 %v174_v61 }
 0x102   :  { %v148_v0 = vadd.f32 %v878_v50, %v147_v62 }
 0x103   :  { %v138_v1 = vpop.f32.mrf.mxu0  ;;  %v193_v30 = vor.u32 1.1754944e-38, %v192_v15  ;;  %vm191_vm6 = vcmp.eq.f32.partialorder %v190_v14, 8.507059e+37 }
 0x104   :  { %v139_v2 = vadd.f32 %v878_v50, %v138_v1  ;;  %v566_v3 = vmul.f32 -1.442695, %v148_v0  ;;  %v402_v0 = vadd.f32 %v900_v10, %v885_v56 }
 0x106   :  { %v609_v5 = vpop.eup %608  ;;  %v563_v6 = vmul.f32 -1.442695, %v139_v2  ;;  %612 = vpow2.f32 %v566_v3  ;;  %v343_v3 = vadd.f32 %v906_v16, %v888_v63 }
 0x107   :  { %v611_v7 = vpop.eup %610  ;;  %v894_v8 = vadd.f32 1.0, %v609_v5 }
 0x108   :  { %v182_v9 = vmul.f32 %v611_v7, %v174_v61  ;;  %614 = vpow2.f32 %v563_v6  ;;  %vm187_vm3 = vweird.f32 %v611_v7 }
 0x109   :  { %616 = vrcp.f32 %v894_v8  ;;  %v150_v11 = vpop.f32.mrf.mxu3  ;;  %vm188_vm5 = vmor %vm186_vm4, %vm187_vm3  ;;  %v205_v38 = vand.u32 2147483647, %v894_v8  ;;  %v207_v39 = vand.u32 2147483648, %v894_v8  ;;  %vm201_vm8 = vweird.f32 %v894_v8 }
 0x10a   :  { %v183_v12 = vsub.f32 1.0, %v182_v9  ;;  %v151_v13 = vadd.f32 %v878_v50, %v150_v11  ;;  %v411_v9 = vadd.f32 %v900_v10, %v410_v60 }
 0x10b   :  { %v141_v17 = vpop.f32.mrf.mxu0  ;;  %vm206_vm10 = vcmp.eq.f32.partialorder %v205_v38, 8.507059e+37 }
 0x10c   :  { %v613_v19 = vpop.eup %612  ;;  %v184_v20 = vmul.f32 %v611_v7, %v183_v12  ;;  %v142_v21 = vadd.f32 %v878_v50, %v141_v17  ;;  %v567_v22 = vmul.f32 -1.442695, %v151_v13 }
 0x10d   :  { %v912_v24 = vadd.f32 1.0, %v613_v19 }
 0x10e   :  { %v615_v25 = vpop.eup %614  ;;  %v185_v26 = vadd.f32 %v611_v7, %v184_v20  ;;  %v564_v27 = vmul.f32 -1.442695, %v142_v21  ;;  %618 = vpow2.f32 %v567_v22  ;;  %v349_v20 = vadd.f32 %v906_v16, %v936_v49 }
 0x10f   :  { %v617_v29 = vpop.eup %616  ;;  %v917_v32 = vadd.f32 1.0, %v615_v25  ;;  %620 = vrcp.f32 %v912_v24  ;;  %v265_v5 = vand.u32 2147483647, %v912_v24  ;;  %vm261_vm12 = vweird.f32 %v912_v24 }
 0x110   :  { %v197_v33 = vmul.f32 %v617_v29, %v894_v8  ;;  %v189_v34 = vsel %vm188_vm5, %v611_v7, %v185_v26  ;;  %622 = vpow2.f32 %v564_v27  ;;  %vm202_vm7 = vweird.f32 %v617_v29  ;;  %v351_v27 = vpop.f32.mrf.mxu1 }
 0x111   :  { %v921_v35 = vsel %vm191_vm6, %v193_v30, %v189_v34  ;;  %624 = vrcp.f32 %v917_v32  ;;  %vm203_vm9 = vmor %vm201_vm8, %vm202_vm7  ;;  %v220_v62 = vand.u32 2147483647, %v917_v32  ;;  %v222_v6 = vand.u32 2147483648, %v917_v32 }
 0x112   :  { %v416_v36 = vmul.f32 %v396_v23, %v921_v35  ;;  %v198_v37 = vsub.f32 1.0, %v197_v33  ;;  %v267_v8 = vand.u32 2147483648, %v912_v24  ;;  %vm216_vm13 = vweird.f32 %v917_v32 }
 0x113   :  { %v144_v40 = vpop.f32.mrf.mxu0  ;;  %vm962_vm14 = vcmp.eq.f32.partialorder %v220_v62, 8.507059e+37  ;;  %vm971_vm1 = vcmp.eq.f32.partialorder %v265_v5, 8.507059e+37  ;;  %v223_v22 = vor.u32 1.1754944e-38, %v222_v6  ;;  %v465_v49 = vsub.f32 1.0, %v921_v35 }
 0x114   :  { %v619_v41 = vpop.eup %618  ;;  %v423_v42 = vadd.f32 %v416_v36, %v337_v31  ;;  %v199_v43 = vmul.f32 %v617_v29, %v198_v37  ;;  %v145_v44 = vadd.f32 %v878_v50, %v144_v40  ;;  %v208_v50 = vor.u32 1.1754944e-38, %v207_v39 }
 0x115   :  { %v928_v45 = vpop.eup %620  ;;  %v934_v48 = vadd.f32 1.0, %v619_v41  ;;  %v268_v26 = vor.u32 1.1754944e-38, %v267_v8  ;;  %v352_v37 = vadd.f32 %v906_v16, %v351_v27 }
 0x116   :  { %v623_v52 = vpop.eup %622  ;;  %626 = vtanh.f32 %v423_v42  ;;  %v200_v53 = vadd.f32 %v617_v29, %v199_v43  ;;  %v565_v54 = vmul.f32 -1.442695, %v145_v44  ;;  %v257_v51 = vmul.f32 %v928_v45, %v912_v24 }
 0x117   :  { %v625_v57 = vpop.eup %624  ;;  %v939_v58 = vadd.f32 1.0, %v623_v52  ;;  %628 = vrcp.f32 %v934_v48  ;;  %vm262_vm15 = vweird.f32 %v928_v45  ;;  %vm276_vm4 = vweird.f32 %v934_v48 }
 0x118   :  { %v212_v55 = vmul.f32 %v625_v57, %v917_v32  ;;  %v204_v59 = vsel %vm203_vm9, %v617_v29, %v200_v53  ;;  %630 = vpow2.f32 %v565_v54  ;;  %v258_v7 = vsub.f32 1.0, %v257_v51  ;;  %vm983_vm3 = vmor %vm261_vm12, %vm262_vm15  ;;  %v413_v53 = vpop.f32.mrf.mxu2 }
 0x119   :  { %v945_v61 = vsel %vm206_vm10, %v208_v50, %v204_v59  ;;  %632 = vrcp.f32 %v939_v58  ;;  %vm217_vm11 = vweird.f32 %v625_v57  ;;  %v282_v34 = vand.u32 2147483648, %v934_v48  ;;  %v1022_v59 = vpop.permute.xlu2 %439 }
 0x11a   :  { %v417_v1 = vmul.f32 %v399_v46, %v945_v61  ;;  %v213_v2 = vsub.f32 1.0, %v212_v55  ;;  %v259_v14 = vmul.f32 %v928_v45, %v258_v7  ;;  %vm218_vm2 = vmor %vm216_vm13, %vm217_vm11  ;;  %v280_v38 = vand.u32 2147483647, %v934_v48 }
 0x11b   :  { %v235_v39 = vand.u32 2147483647, %v939_v58  ;;  %v237_v40 = vand.u32 2147483648, %v939_v58  ;;  %v283_v50 = vor.u32 1.1754944e-38, %v282_v34  ;;  %vm231_vm8 = vweird.f32 %v939_v58 }
 0x11c   :  { %v627_v11 = vpop.eup %626  ;;  %v424_v12 = vadd.f32 %v417_v1, %v340_v47  ;;  %v214_v13 = vmul.f32 %v625_v57, %v213_v2  ;;  %v260_v25 = vadd.f32 %v928_v45, %v259_v14  ;;  %vm281_vm9 = vcmp.eq.f32.partialorder %v280_v38, 8.507059e+37  ;;  %v354_v2 = vpop.f32.mrf.mxu3 }
 0x11d   :  { %v959_v56 = vpop.eup %628  ;;  %479 = vrot.lane.b32.xlu2 %v627_v11, %s649_s1  ;;  %v238_v55 = vor.u32 1.1754944e-38, %v237_v40  ;;  %v414_v62 = vadd.f32 %v900_v10, %v413_v53  ;;  %vm236_vm11 = vcmp.eq.f32.partialorder %v235_v39, 8.507059e+37  ;;  %v408_v14 = vadd.f32 %v900_v10, %v914_v28 }
 0x11e   :  { %v631_v15 = vpop.eup %630  ;;  %634 = vtanh.f32 %v424_v12  ;;  %v215_v17 = vadd.f32 %v625_v57, %v214_v13  ;;  %v272_v19 = vmul.f32 %v959_v56, %v934_v48  ;;  %vm277_vm5 = vweird.f32 %v959_v56 }
 0x11f   :  { %v633_v21 = vpop.eup %632  ;;  %v975_v23 = vadd.f32 1.0, %v631_v15  ;;  %v264_v41 = vsel %vm983_vm3, %v928_v45, %v260_v25  ;;  %vm1012_vm7 = vmor %vm276_vm4, %vm277_vm5  ;;  %v405_v45 = vadd.f32 %v900_v10, %v892_v4  ;;  %v346_v4 = vadd.f32 %v906_v16, %v908_v18 }
 0x120   :  { %v227_v29 = vmul.f32 %v633_v21, %v939_v58  ;;  %v219_v30 = vsel %vm218_vm2, %v625_v57, %v215_v17  ;;  %v273_v32 = vsub.f32 1.0, %v272_v19  ;;  %vm232_vm6 = vweird.f32 %v633_v21 }
 0x121   :  { %v990_v33 = vsel %vm962_vm14, %v223_v22, %v219_v30  ;;  %636 = vrcp.f32 %v975_v23  ;;  %v1006_v47 = vsel %vm971_vm1, %v268_v26, %v264_v41  ;;  %vm233_vm10 = vmor %vm231_vm8, %vm232_vm6  ;;  %v250_v18 = vand.u32 2147483647, %v975_v23  ;;  %v446_v17 = vpop.permute.xlu2 %445 }
 0x122   :  { %v418_v36 = vmul.f32 %v402_v0, %v990_v33  ;;  %v228_v24 = vsub.f32 1.0, %v227_v29  ;;  %v274_v42 = vmul.f32 %v959_v56, %v273_v32  ;;  %v421_v54 = vmul.f32 %v411_v9, %v1006_v47 }
 0x123   :  { %v252_v8 = vand.u32 2147483648, %v975_v23  ;;  %v355_v9 = vadd.f32 %v906_v16, %v354_v2  ;;  %vm246_vm13 = vweird.f32 %v975_v23  ;;  %vm251_vm15 = vcmp.eq.f32.partialorder %v250_v18, 8.507059e+37  ;;  %v438_v16 = vpop.permute.xlu1 %437 }
 0x124   :  { %v635_v43 = vpop.eup %634  ;;  %v425_v44 = vadd.f32 %v418_v36, %v343_v3  ;;  %v229_v46 = vmul.f32 %v633_v21, %v228_v24  ;;  %v275_v57 = vadd.f32 %v959_v56, %v274_v42  ;;  %v428_v58 = vadd.f32 %v421_v54, %v352_v37  ;;  %v442_v36 = vpop.permute.xlu0 %441 }
 0x125   :  { %481 = vrot.lane.b32.xlu0 %v635_v43, %s649_s1  ;;  %v253_v15 = vor.u32 1.1754944e-38, %v252_v8  ;;  %v458_v31 = vmul.f32 %v438_v16, %v921_v35  ;;  %v459_v53 = vmul.f32 %v1022_v59, %v945_v61  ;;  %vm548_vm1 = vcmask 123904  }
 0x126   :  { %638 = vtanh.f32 %v425_v44  ;;  %v230_v51 = vadd.f32 %v633_v21, %v229_v46  ;;  %v279_v60 = vsel %vm1012_vm7, %v959_v56, %v275_v57  ;;  %v466_v44 = vsub.f32 1.0, %v945_v61 }
 0x127   :  { %v637_v48 = vpop.eup %636  ;;  %v1031_v5 = vsel %vm281_vm9, %v283_v50, %v279_v60  ;;  %640 = vtanh.f32 %v428_v58  ;;  %v470_v61 = vsub.f32 1.0, %v1006_v47 }
 0x128   :  { %v242_v0 = vmul.f32 %v637_v48, %v975_v23  ;;  %v234_v1 = vsel %vm233_vm10, %v633_v21, %v230_v51  ;;  %vm247_vm12 = vweird.f32 %v637_v48  ;;  %v422_v56 = vmul.f32 %v414_v62, %v1031_v5 }
 0x129   :  { %v239_v3 = vsel %vm236_vm11, %v238_v55, %v234_v1  ;;  %vm248_vm14 = vmor %vm246_vm13, %vm247_vm12  ;;  %v471_v35 = vsub.f32 1.0, %v1031_v5 }
 0x12a   :  { %v419_v6 = vmul.f32 %v405_v45, %v239_v3  ;;  %v243_v7 = vsub.f32 1.0, %v242_v0  ;;  %v429_v21 = vadd.f32 %v422_v56, %v355_v9  ;;  %v468_v37 = vsub.f32 1.0, %v239_v3 }
 0x12b   :  { %v444_v24 = vpop.permute.xlu1 %443 }
 0x12c   :  { %v639_v11 = vpop.eup %638  ;;  %v426_v12 = vadd.f32 %v419_v6, %v346_v4  ;;  %v244_v13 = vmul.f32 %v637_v48, %v243_v7  ;;  %v448_v38 = vpop.permute.xlu0 %447  ;;  %v461_v40 = vmul.f32 %v444_v24, %v239_v3  ;;  %v460_v4 = vmul.f32 %v442_v36, %v990_v33 }
 0x12d   :  { %483 = vrot.lane.b32.xlu1 %v639_v11, %s649_s1  ;;  %v641_v25 = vpop.eup %640  ;;  %v463_v0 = vmul.f32 %v448_v38, %v1006_v47 }
 0x12e   :  { %642 = vtanh.f32 %v426_v12  ;;  %v245_v63 = vadd.f32 %v637_v48, %v244_v13 }
 0x12f   :  { %644 = vtanh.f32 %v429_v21 }
 0x130   :  { %v249_v19 = vsel %vm248_vm14, %v637_v48, %v245_v63  ;;  %v467_v48 = vsub.f32 1.0, %v990_v33 }
 0x131   :  { %v254_v22 = vsel %vm251_vm15, %v253_v15, %v249_v19 }
 0x132   :  { %v420_v26 = vmul.f32 %v408_v14, %v254_v22  ;;  %v462_v27 = vmul.f32 %v446_v17, %v254_v22  ;;  %v469_v2 = vsub.f32 1.0, %v254_v22 }
 0x133   :  { %v450_v43 = vpop.permute.xlu1 %449 }
 0x134   :  { %v643_v29 = vpop.eup %642  ;;  %v427_v30 = vadd.f32 %v420_v26, %v349_v20  ;;  %v464_v45 = vmul.f32 %v450_v43, %v1031_v5 }
 0x135   :  { %489 = vrot.lane.b32.xlu1 %v641_v25, %s649_s1  ;;  %485 = vrot.lane.b32.xlu2 %v643_v29, %s649_s1  ;;  %v645_v10 = vpop.eup %644 }
 0x136   :  { %646 = vtanh.f32 %v427_v30 }
 0x13c   :  { %v647_v28 = vpop.eup %646 }
 0x13d   :  { %487 = vrot.lane.b32.xlu0 %v647_v28, %s649_s1  ;;  %491 = vrot.lane.b32.xlu2 %v645_v10, %s649_s1 }
 0x177   :  { %v480_v23 = vpop.permute.xlu2 %479 }
 0x178   :  { %v500_v32 = vmul.f32 %v480_v23, %v465_v49 }
 0x17a   :  { %v507_v34 = vadd.f32 %v500_v32, %v458_v31 }
 0x17c   :  { %521 = vrot.lane.b32.xlu0 %v507_v34, %s650_s5 }
 0x18f   :  { %v486_v39 = vpop.permute.xlu2 %485 }
 0x190   :  { %v503_v41 = vmul.f32 %v486_v39, %v468_v37 }
 0x192   :  { %v510_v42 = vadd.f32 %v503_v41, %v461_v40 }
 0x194   :  { %527 = vrot.lane.b32.xlu0 %v510_v42, %s650_s5 }
 0x197   :  { %v482_v46 = vpop.permute.xlu0 %481  ;;  %v492_v52 = vpop.permute.xlu2 %491 }
 0x198   :  { %v501_v54 = vmul.f32 %v482_v46, %v466_v44  ;;  %v506_v57 = vmul.f32 %v492_v52, %v471_v35 }
 0x19a   :  { %v508_v50 = vadd.f32 %v501_v54, %v459_v53  ;;  %v513_v51 = vadd.f32 %v506_v57, %v464_v45 }
 0x19c   :  { %523 = vrot.lane.b32.xlu1 %v508_v50, %s650_s5  ;;  %533 = vrot.lane.b32.xlu0 %v513_v51, %s650_s5 }
 0x19f   :  { %v484_v55 = vpop.permute.xlu1 %483 }
 0x1a0   :  { %v502_v60 = vmul.f32 %v484_v55, %v467_v48 }
 0x1a2   :  { %v509_v62 = vadd.f32 %v502_v60, %v460_v4 }
 0x1a4   :  { %525 = vrot.lane.b32.xlu2 %v509_v62, %s650_s5 }
 0x1a7   :  { %v490_v59 = vpop.permute.xlu1 %489 }
 0x1a8   :  { %v505_v1 = vmul.f32 %v490_v59, %v470_v61 }
 0x1aa   :  { %v512_v58 = vadd.f32 %v505_v1, %v463_v0 }
 0x1ac   :  { %531 = vrot.lane.b32.xlu2 %v512_v58, %s650_s5 }
 0x1af   :  { %v488_v3 = vpop.permute.xlu0 %487 }
 0x1b0   :  { %v504_v5 = vmul.f32 %v488_v3, %v469_v2 }
 0x1b2   :  { %v511_v6 = vadd.f32 %v504_v5, %v462_v27 }
 0x1b4   :  { %529 = vrot.lane.b32.xlu1 %v511_v6, %s650_s5 }
 0x1ee   :  { %v522_v33 = vpop.permute.xlu0 %521 }
 0x1ef   :  { %542 = vst.msk [vmem:[%s1100_s8] sm:$0xff] %vm363_vm0, %v522_v33 }
 0x1fe   :  { %v526_v7 = vpop.permute.xlu2 %525 }
 0x1ff   :  { %544 = vst.msk [vmem:[%s1100_s8 + $0x10] sm:$0xff] %vm363_vm0, %v526_v7 }
 0x206   :  { %v528_v47 = vpop.permute.xlu0 %527  ;;  %v532_v18 = vpop.permute.xlu2 %531 }
 0x207   :  { %545 = vst.msk [vmem:[%s1100_s8 + $0x18] sm:$0xff] %vm363_vm0, %v528_v47 }
 0x208   :  { %547 = vst.msk [vmem:[%s1100_s8 + $0x28] sm:$0xff] %vm363_vm0, %v532_v18 }
 0x20e   :  { %v524_v8 = vpop.permute.xlu1 %523  ;;  %v534_v9 = vpop.permute.xlu0 %533 }
 0x20f   :  { %543 = vst.msk [vmem:[%s1100_s8 + $0x8] sm:$0xff] %vm363_vm0, %v524_v8 }
 0x210   :  { %549 = vst.msk [vmem:[%s1100_s8 + $0x30] sm:$0x3] %vm548_vm1, %v534_v9 }
 0x226   :  { %v530_v11 = vpop.permute.xlu1 %529 }
 0x227   :  { %546 = vst.msk [vmem:[%s1100_s8 + $0x20] sm:$0xff] %vm363_vm0, %v530_v11 }

// kernel: _damt_core.10
= control target key start
LH: loop header
LB: loop body
LE: loop exit
PB: predicated region body
PF: predicated region fallthrough
CT: control target
= control target key end

     0   :  { %vm53_vm0 = vcmask 261120   ;;  %v1070_v12 = vmov 0.0   ;;  %s1408_s0 = inlined_call_operand.vmem [shape: f32[5,2,32], index: 0, kind: input, shape index: {}]   ;;  %s1409_s1 = inlined_call_operand.vmem [shape: f32[32,48], index: 1, kind: input, shape index: {}]   ;;  %s1410_s2 = inlined_call_operand.vmem [shape: f32[16,48], index: 2, kind: input, shape index: {}]   ;;  %s1411_s3 = inlined_call_operand.vmem [shape: f32[1,48], index: 3, kind: input, shape index: {}]   ;;  %s1412_s4 = inlined_call_operand.vmem [shape: f32[1,48], index: 4, kind: input, shape index: {}]   ;;  %s1413_s5 = inlined_call_operand.vmem [shape: f32[32,48], index: 5, kind: input, shape index: {}]   ;;  %s1414_s6 = inlined_call_operand.vmem [shape: f32[16,48], index: 6, kind: input, shape index: {}]   ;;  %s1415_s7 = inlined_call_operand.vmem [shape: f32[1,48], index: 7, kind: input, shape index: {}]   ;;  %s1416_s8 = inlined_call_operand.vmem [shape: f32[1,48], index: 8, kind: input, shape index: {}]   ;;  %s1417_s9 = inlined_call_operand.hbm [shape: f32[2,16], index: 9, kind: output, shape index: {}]  }
   0x1   :  { %v1128_v0 = vld [vmem:[%s1409_s1 + $0x18] sm:$0xff]  ;;  %v1133_v1 = vld [vmem:[%s1410_s2 + $0x8] sm:$0xff]  ;;  %v1145_v3 = vld [vmem:[%s1409_s1 + $0x10] sm:$0xff] }
   0x2   :  { %v1138_v2 = vld [vmem:[%s1413_s5 + $0x18] sm:$0xff]  ;;  %69 = vmatpush.msra.mxu0 %v1128_v0  ;;  %98 = vmatpush.msra.mxu1 %v1133_v1  ;;  %v1150_v4 = vld [vmem:[%s1410_s2] sm:$0xff]  ;;  %v1155_v5 = vld [vmem:[%s1413_s5 + $0x10] sm:$0xff] }
   0x3   :  { %163 = vmatpush.msra.mxu2 %v1138_v2  ;;  %v1161_v6 = vld [vmem:[%s1414_s6 + $0x8] sm:$0xff]  ;;  %v1178_v9 = vld [vmem:[%s1414_s6] sm:$0xff] }
   0x4   :  { %v1166_v7 = vld [vmem:[%s1409_s1 + $0x8] sm:$0xff]  ;;  %70 = vmatpush.msra.mxu0 %v1145_v3  ;;  %99 = vmatpush.msra.mxu1 %v1150_v4  ;;  %v1185_v10 = vld [vmem:[%s1409_s1] sm:$0xff] }
   0x5   :  { %v1173_v8 = vld [vmem:[%s1413_s5 + $0x8] sm:$0xff]  ;;  %164 = vmatpush.msra.mxu2 %v1155_v5  ;;  %188 = vmatpush.msra.mxu3 %v1161_v6  ;;  %v1190_v11 = vld [vmem:[%s1413_s5] sm:$0xff] }
   0x6   :  { %100 = vmatmul.f32.vlgmr.msra.gmra.mxu1 %v1070_v12  ;;  %71 = vmatpush.msra.mxu0 %v1166_v7  ;;  %v1196_v13 = vld [vmem:[%s1408_s0] sm:$0x3]  ;;  %v1203_v14 = vld [vmem:[%s1408_s0 + $0x8] sm:$0x3] }
   0x7   :  { %165 = vmatpush.msra.mxu2 %v1173_v8  ;;  %189 = vmatpush.msra.mxu3 %v1178_v9 }
   0x8   :  { %14 = vsyncpa [#allocation3], 0  ;;  %190 = vmatmul.f32.vlgmr.msra.gmra.mxu3 %v1070_v12  ;;  %72 = vmatpush.msra.mxu0 %v1185_v10  ;;  %v1238_v15 = vld [vmem:[%s1412_s4] ss:$0 sm:$0xff]  ;;  %s1071_s14 = smov 96   ;;  %vm80_vm9 = vcmask 130048  }
   0x9   :  { %166 = vmatpush.msra.mxu2 %v1190_v11  ;;  %943 = vmatmul.msk.f32.vlgmr.msra.gmra.mxu0 %vm53_vm0, %v1196_v13  ;;  %v1245_v18 = vld [vmem:[%s1416_s8] ss:$0 sm:$0xff]  ;;  %s934_s27 = sshll.u32 %s1417_s9, 4  ;;  %s935_s27 = int_to_ptr.hbm [resolvable:$true] %s934_s27 }
   0xa   :  { %946 = vmatmul.msk.f32.vlgmr.msra.gmra.mxu2 %vm53_vm0, %v1203_v14  ;;  %277 = vmatpush.msrb.mxu3 %v1133_v1  ;;  %v1252_v21 = vld [vmem:[%s1411_s3] ss:$0 sm:$0xff]  ;;  %s1072_s3 = smov 32  }
   0xb   :  { %250 = vmatpush.msrb.mxu1 %v1128_v0  ;;  %366 = vmatpush.msrb.mxu2 %v1161_v6  ;;  %v1258_v25 = vld [vmem:[%s1415_s7] ss:$0 sm:$0xff]  ;;  %s1073_s7 = smov 112  }
   0xc   :  { %278 = vmatpush.msrb.mxu3 %v1150_v4  ;;  %339 = vmatpush.msrb.mxu0 %v1138_v2 }
   0xd   :  { %251 = vmatpush.msrb.mxu1 %v1145_v3  ;;  %367 = vmatpush.msrb.mxu2 %v1178_v9 }
   0xe   :  { %340 = vmatpush.msrb.mxu0 %v1155_v5  ;;  %455 = vmatpush.msra.mxu3 %v1133_v1 }
   0xf   :  { %252 = vmatpush.msrb.mxu1 %v1166_v7  ;;  %539 = vmatpush.msra.mxu2 %v1161_v6 }
  0x10   :  { %341 = vmatpush.msrb.mxu0 %v1173_v8  ;;  %456 = vmatpush.msra.mxu3 %v1150_v4 }
  0x11   :  { %253 = vmatpush.msrb.mxu1 %v1185_v10  ;;  %540 = vmatpush.msra.mxu2 %v1178_v9 }
  0x12   :  { %342 = vmatpush.msrb.mxu0 %v1190_v11 }
  0x13   :  { %428 = vmatpush.msra.mxu1 %v1128_v0 }
  0x14   :  { %512 = vmatpush.msra.mxu0 %v1138_v2 }
  0x15   :  { %429 = vmatpush.msra.mxu1 %v1145_v3 }
  0x16   :  { %513 = vmatpush.msra.mxu0 %v1155_v5 }
  0x17   :  { %430 = vmatpush.msra.mxu1 %v1166_v7 }
  0x18   :  { %514 = vmatpush.msra.mxu0 %v1173_v8 }
  0x19   :  { %431 = vmatpush.msra.mxu1 %v1185_v10 }
  0x1a   :  { %515 = vmatpush.msra.mxu0 %v1190_v11 }
  0x83   :  { %v101_v16 = vpop.f32.mrf.mxu1 }
  0x84   :  { %v102_v17 = vadd.f32 %v1238_v15, %v101_v16 }
  0x86   :  { %125 = vrot.lane.b32.xlu0 %v102_v17, %s1071_s14  ;;  %v74_v22 = vpop.f32.mrf.mxu0 }
  0x87   :  { %v75_v23 = vadd.f32 %v1252_v21, %v74_v22 }
  0x89   :  { %v104_v24 = vadd.f32 %v102_v17, %v75_v23 }
  0x8b   :  { %v191_v19 = vpop.f32.mrf.mxu3  ;;  %v944_v27 = vmul.f32 -1.442695, %v104_v24 }
  0x8c   :  { %v192_v20 = vadd.f32 %v1245_v18, %v191_v19 }
  0x8d   :  { %v168_v26 = vpop.f32.mrf.mxu2  ;;  %984 = vpow2.f32 %v944_v27 }
  0x8e   :  { %215 = vrot.lane.b32.xlu0 %v192_v20, %s1071_s14  ;;  %v169_v28 = vadd.f32 %v1258_v25, %v168_v26 }
  0x90   :  { %v194_v29 = vadd.f32 %v192_v20, %v169_v28 }
  0x92   :  { %v947_v30 = vmul.f32 -1.442695, %v194_v29  ;;  %v1276_v29 = vld [vmem:[%s1408_s0 + $0x2] sm:$0x3] }
  0x93   :  { %v985_v31 = vpop.eup %984  ;;  %949 = vmatmul.msk.f32.vlgmr.msrb.gmra.mxu1 %vm53_vm0, %v1276_v29 }
  0x94   :  { %986 = vpow2.f32 %v947_v30  ;;  %v108_v32 = vadd.f32 1.0, %v985_v31  ;;  %596 = vmatpush.msrb.mxu1 %v1128_v0  ;;  %v1286_v30 = vld [vmem:[%s1408_s0 + $0x6] sm:$0x3] }
  0x95   :  { %953 = vmatmul.msk.f32.vlgmr.msrb.gmra.mxu0 %vm53_vm0, %v1286_v30 }
  0x96   :  { %988 = vrcp.f32 %v108_v32  ;;  %v120_v43 = vand.u32 2147483648, %v108_v32  ;;  %vm114_vm2 = vweird.f32 %v108_v32  ;;  %v118_v44 = vand.u32 2147483647, %v108_v32  ;;  %597 = vmatpush.msrb.mxu1 %v1145_v3  ;;  %680 = vmatpush.msrb.mxu0 %v1138_v2 }
  0x98   :  { %v121_v47 = vor.u32 1.1754944e-38, %v120_v43  ;;  %vm119_vm4 = vcmp.eq.f32.partialorder %v118_v44, 8.507059e+37  ;;  %598 = vmatpush.msrb.mxu1 %v1166_v7  ;;  %681 = vmatpush.msrb.mxu0 %v1155_v5 }
  0x9a   :  { %v987_v33 = vpop.eup %986  ;;  %599 = vmatpush.msrb.mxu1 %v1185_v10  ;;  %682 = vmatpush.msrb.mxu0 %v1173_v8 }
  0x9b   :  { %v198_v34 = vadd.f32 1.0, %v987_v33 }
  0x9c   :  { %v989_v35 = vpop.eup %988  ;;  %683 = vmatpush.msrb.mxu0 %v1190_v11 }
  0x9d   :  { %990 = vrcp.f32 %v198_v34  ;;  %v110_v36 = vmul.f32 %v989_v35, %v108_v32  ;;  %vm115_vm1 = vweird.f32 %v989_v35  ;;  %v210_v52 = vand.u32 2147483648, %v198_v34 }
  0x9e   :  { %vm116_vm3 = vmor %vm114_vm2, %vm115_vm1  ;;  %vm204_vm6 = vweird.f32 %v198_v34  ;;  %v208_v53 = vand.u32 2147483647, %v198_v34 }
  0x9f   :  { %v111_v37 = vsub.f32 1.0, %v110_v36  ;;  %v211_v55 = vor.u32 1.1754944e-38, %v210_v52 }
  0xa0   :  { %vm209_vm8 = vcmp.eq.f32.partialorder %v208_v53, 8.507059e+37 }
  0xa1   :  { %v112_v39 = vmul.f32 %v989_v35, %v111_v37 }
  0xa3   :  { %v991_v38 = vpop.eup %990  ;;  %v113_v41 = vadd.f32 %v989_v35, %v112_v39 }
  0xa4   :  { %v200_v40 = vmul.f32 %v991_v38, %v198_v34  ;;  %vm205_vm5 = vweird.f32 %v991_v38 }
  0xa5   :  { %v117_v45 = vsel %vm116_vm3, %v989_v35, %v113_v41  ;;  %vm206_vm7 = vmor %vm204_vm6, %vm205_vm5 }
  0xa6   :  { %v201_v42 = vsub.f32 1.0, %v200_v40  ;;  %v122_v49 = vsel %vm119_vm4, %v121_v47, %v117_v45 }
  0xa7   :  { %v135_v16 = vsub.f32 1.0, %v122_v49  ;;  %v141_v19 = vmul.f32 0.0, %v122_v49 }
  0xa8   :  { %v202_v46 = vmul.f32 %v991_v38, %v201_v42 }
  0xaa   :  { %v203_v51 = vadd.f32 %v991_v38, %v202_v46 }
  0xac   :  { %v207_v54 = vsel %vm206_vm7, %v991_v38, %v203_v51 }
  0xad   :  { %v212_v56 = vsel %vm209_vm8, %v211_v55, %v207_v54 }
  0xae   :  { %v231_v26 = vmul.f32 0.0, %v212_v56 }
  0xf8   :  { %v126_v48 = vpop.permute.xlu0 %125 }
  0xf9   :  { %v128_v50 = vmul.f32 %v126_v48, %v122_v49 }
  0xfb   :  { %130 = vrot.lane.b32.xlu1 %v128_v50, %s1072_s3 }
 0x100   :  { %v216_v57 = vpop.permute.xlu0 %215 }
 0x101   :  { %v218_v58 = vmul.f32 %v216_v57, %v212_v56 }
 0x103   :  { %220 = vrot.lane.b32.xlu1 %v218_v58, %s1072_s3 }
 0x110   :  { %v255_v37 = vpop.f32.mrf.mxu1 }
 0x111   :  { %v256_v38 = vadd.f32 %v1252_v21, %v255_v37 }
 0x112   :  { %v344_v43 = vpop.f32.mrf.mxu0 }
 0x113   :  { %v345_v45 = vadd.f32 %v1258_v25, %v344_v43 }
 0x16d   :  { %v131_v59 = vpop.permute.xlu1 %130 }
 0x16e   :  { %v133_v60 = vadd.f32 %v131_v59, %v75_v23  ;;  %v225_v23 = vsub.f32 1.0, %v212_v56 }
 0x170   :  { %992 = vtanh.f32 %v133_v60 }
 0x175   :  { %v221_v61 = vpop.permute.xlu1 %220 }
 0x176   :  { %v993_v62 = vpop.eup %992  ;;  %v223_v63 = vadd.f32 %v221_v61, %v169_v28 }
 0x177   :  { %137 = vrot.lane.b32.xlu2 %v993_v62, %s1073_s7 }
 0x178   :  { %994 = vtanh.f32 %v223_v63 }
 0x17e   :  { %v995_v12 = vpop.eup %994 }
 0x17f   :  { %227 = vrot.lane.b32.xlu2 %v995_v12, %s1073_s7 }
 0x1d1   :  { %v138_v17 = vpop.permute.xlu2 %137 }
 0x1d2   :  { %v140_v20 = vmul.f32 %v138_v17, %v135_v16 }
 0x1d4   :  { %v1265_v22 = vadd.f32 %v141_v19, %v140_v20 }
 0x1d6   :  { %259 = vrot.lane.b32.xlu0 %v1265_v22, %s1073_s7 }
 0x1d9   :  { %v228_v24 = vpop.permute.xlu2 %227 }
 0x1da   :  { %v230_v27 = vmul.f32 %v228_v24, %v225_v23 }
 0x1dc   :  { %v1269_v28 = vadd.f32 %v231_v26, %v230_v27 }
 0x1de   :  { %348 = vrot.lane.b32.xlu1 %v1269_v28, %s1073_s7 }
 0x248   :  { %v260_v31 = vpop.permute.xlu0 %259 }
 0x249   :  { %950 = vmatmul.msk.f32.vlgmr.msrb.gmra.mxu3 %vm80_vm9, %v260_v31 }
 0x24a   :  { %623 = vmatpush.msrb.mxu3 %v1133_v1 }
 0x24c   :  { %624 = vmatpush.msrb.mxu3 %v1150_v4 }
 0x250   :  { %v349_v32 = vpop.permute.xlu1 %348 }
 0x251   :  { %954 = vmatmul.msk.f32.vlgmr.msrb.gmra.mxu2 %vm80_vm9, %v349_v32 }
 0x252   :  { %707 = vmatpush.msrb.mxu2 %v1161_v6 }
 0x254   :  { %708 = vmatpush.msrb.mxu2 %v1178_v9 }
 0x2cc   :  { %v280_v33 = vpop.f32.mrf.mxu3 }
 0x2cd   :  { %v281_v34 = vadd.f32 %v1238_v15, %v280_v33 }
 0x2cf   :  { %304 = vrot.lane.b32.xlu2 %v281_v34, %s1071_s14  ;;  %v283_v39 = vadd.f32 %v281_v34, %v256_v38 }
 0x2d1   :  { %v951_v40 = vmul.f32 -1.442695, %v283_v39 }
 0x2d3   :  { %996 = vpow2.f32 %v951_v40 }
 0x2d4   :  { %v369_v35 = vpop.f32.mrf.mxu2 }
 0x2d5   :  { %v370_v36 = vadd.f32 %v1245_v18, %v369_v35 }
 0x2d7   :  { %393 = vrot.lane.b32.xlu0 %v370_v36, %s1071_s14  ;;  %v372_v47 = vadd.f32 %v370_v36, %v345_v45 }
 0x2d9   :  { %v997_v41 = vpop.eup %996  ;;  %v955_v49 = vmul.f32 -1.442695, %v372_v47 }
 0x2da   :  { %v287_v42 = vadd.f32 1.0, %v997_v41 }
 0x2dc   :  { %998 = vrcp.f32 %v287_v42  ;;  %v299_v52 = vand.u32 2147483648, %v287_v42  ;;  %vm293_vm11 = vweird.f32 %v287_v42  ;;  %v297_v53 = vand.u32 2147483647, %v287_v42 }
 0x2dd   :  { %1000 = vpow2.f32 %v955_v49 }
 0x2de   :  { %v300_v56 = vor.u32 1.1754944e-38, %v299_v52  ;;  %vm298_vm13 = vcmp.eq.f32.partialorder %v297_v53, 8.507059e+37 }
 0x2e2   :  { %v999_v44 = vpop.eup %998 }
 0x2e3   :  { %v289_v46 = vmul.f32 %v999_v44, %v287_v42  ;;  %vm294_vm10 = vweird.f32 %v999_v44  ;;  %v1001_v54 = vpop.eup %1000 }
 0x2e4   :  { %vm295_vm12 = vmor %vm293_vm11, %vm294_vm10  ;;  %v376_v57 = vadd.f32 1.0, %v1001_v54 }
 0x2e5   :  { %v290_v48 = vsub.f32 1.0, %v289_v46 }
 0x2e6   :  { %1002 = vrcp.f32 %v376_v57  ;;  %v388_v17 = vand.u32 2147483648, %v376_v57  ;;  %vm382_vm15 = vweird.f32 %v376_v57  ;;  %v386_v19 = vand.u32 2147483647, %v376_v57 }
 0x2e7   :  { %v291_v50 = vmul.f32 %v999_v44, %v290_v48 }
 0x2e8   :  { %v389_v23 = vor.u32 1.1754944e-38, %v388_v17  ;;  %vm387_vm2 = vcmp.eq.f32.partialorder %v386_v19, 8.507059e+37 }
 0x2e9   :  { %v292_v51 = vadd.f32 %v999_v44, %v291_v50 }
 0x2eb   :  { %v296_v55 = vsel %vm295_vm12, %v999_v44, %v292_v51 }
 0x2ec   :  { %v301_v58 = vsel %vm298_vm13, %v300_v56, %v296_v55  ;;  %v1003_v61 = vpop.eup %1002 }
 0x2ed   :  { %v378_v62 = vmul.f32 %v1003_v61, %v376_v57  ;;  %vm383_vm14 = vweird.f32 %v1003_v61  ;;  %v314_v37 = vsub.f32 1.0, %v301_v58  ;;  %v320_v40 = vmul.f32 %v301_v58, %v1265_v22  ;;  %v956_v22 = vld [vmem:[%s1408_s0 + $0x4] sm:$0x3]  ;;  %s1074_s0 = smov [#allocation2]  }
 0x2ee   :  { %vm384_vm1 = vmor %vm382_vm15, %vm383_vm14  ;;  %957 = vmatmul.msk.f32.vlgmr.msra.gmra.mxu1 %vm53_vm0, %v956_v22  ;;  %960 = vmatmul.msk.f32.vlgmr.msra.gmra.mxu0 %vm53_vm0, %v956_v22  ;;  %s932_s2 = sshll.u32 %s1074_s0, 4  ;;  %s933_s2 = int_to_ptr.vmem [resolvable:$true] %s932_s2 }
 0x2ef   :  { %v379_v63 = vsub.f32 1.0, %v378_v62  ;;  %764 = vmatpush.msra.mxu1 %v1128_v0  ;;  %848 = vmatpush.msra.mxu0 %v1138_v2 }
 0x2f1   :  { %v380_v12 = vmul.f32 %v1003_v61, %v379_v63  ;;  %765 = vmatpush.msra.mxu1 %v1145_v3  ;;  %849 = vmatpush.msra.mxu0 %v1155_v5 }
 0x2f3   :  { %v381_v16 = vadd.f32 %v1003_v61, %v380_v12  ;;  %766 = vmatpush.msra.mxu1 %v1166_v7  ;;  %850 = vmatpush.msra.mxu0 %v1173_v8 }
 0x2f5   :  { %v385_v20 = vsel %vm384_vm1, %v1003_v61, %v381_v16  ;;  %767 = vmatpush.msra.mxu1 %v1185_v10  ;;  %851 = vmatpush.msra.mxu0 %v1190_v11 }
 0x2f6   :  { %v390_v26 = vsel %vm387_vm2, %v389_v23, %v385_v20  ;;  %963 = vmatmul.msk.f32.vlgmr.msrb.gmra.mxu1 %vm53_vm0, %v1286_v30  ;;  %966 = vmatmul.msk.f32.vlgmr.msrb.gmra.mxu0 %vm53_vm0, %v1276_v29 }
 0x2f7   :  { %v409_v44 = vmul.f32 %v390_v26, %v1269_v28 }
 0x2fe   :  { %969 = vmatmul.msk.f32.vlgmr.msra.gmra.mxu1 %vm53_vm0, %v1203_v14  ;;  %972 = vmatmul.msk.f32.vlgmr.msra.gmra.mxu0 %vm53_vm0, %v1196_v13 }
 0x329   :  { %v305_v59 = vpop.permute.xlu2 %304 }
 0x32a   :  { %v307_v60 = vmul.f32 %v305_v59, %v301_v58 }
 0x32c   :  { %309 = vrot.lane.b32.xlu1 %v307_v60, %s1072_s3 }
 0x349   :  { %v394_v24 = vpop.permute.xlu0 %393 }
 0x34a   :  { %v396_v27 = vmul.f32 %v394_v24, %v390_v26 }
 0x34c   :  { %398 = vrot.lane.b32.xlu2 %v396_v27, %s1072_s3 }
 0x36b   :  { %v517_v11 = vpop.f32.mrf.mxu0 }
 0x39e   :  { %v310_v31 = vpop.permute.xlu1 %309 }
 0x39f   :  { %v312_v32 = vadd.f32 %v310_v31, %v256_v38  ;;  %v403_v38 = vsub.f32 1.0, %v390_v26 }
 0x3a1   :  { %1004 = vtanh.f32 %v312_v32 }
 0x3a6   :  { %v399_v33 = vpop.permute.xlu2 %398 }
 0x3a7   :  { %v1005_v34 = vpop.eup %1004  ;;  %v401_v35 = vadd.f32 %v399_v33, %v345_v45 }
 0x3a8   :  { %316 = vrot.lane.b32.xlu0 %v1005_v34, %s1073_s7 }
 0x3a9   :  { %1006 = vtanh.f32 %v401_v35 }
 0x3af   :  { %v1007_v36 = vpop.eup %1006 }
 0x3b0   :  { %405 = vrot.lane.b32.xlu1 %v1007_v36, %s1073_s7 }
 0x41a   :  { %v317_v39 = vpop.permute.xlu0 %316 }
 0x41b   :  { %v319_v41 = vmul.f32 %v317_v39, %v314_v37 }
 0x41d   :  { %v1312_v42 = vadd.f32 %v320_v40, %v319_v41 }
 0x41f   :  { %437 = vrot.lane.b32.xlu2 %v1312_v42, %s1073_s7 }
 0x422   :  { %v406_v43 = vpop.permute.xlu1 %405 }
 0x423   :  { %v408_v45 = vmul.f32 %v406_v43, %v403_v38 }
 0x425   :  { %v1317_v46 = vadd.f32 %v409_v44, %v408_v45 }
 0x427   :  { %521 = vrot.lane.b32.xlu0 %v1317_v46, %s1073_s7 }
 0x479   :  { %v438_v0 = vpop.permute.xlu2 %437 }
 0x47a   :  { %958 = vmatmul.msk.f32.vlgmr.msra.gmra.mxu3 %vm80_vm9, %v438_v0 }
 0x47b   :  { %791 = vmatpush.msra.mxu3 %v1133_v1  ;;  %v433_v1 = vpop.f32.mrf.mxu1 }
 0x47d   :  { %792 = vmatpush.msra.mxu3 %v1150_v4  ;;  %v434_v4 = vadd.f32 %v1252_v21, %v433_v1 }
 0x499   :  { %v522_v2 = vpop.permute.xlu0 %521 }
 0x49a   :  { %961 = vmatmul.msk.f32.vlgmr.msra.gmra.mxu2 %vm80_vm9, %v522_v2 }
 0x49b   :  { %875 = vmatpush.msra.mxu2 %v1161_v6  ;;  %v518_v6 = vadd.f32 %v1258_v25, %v517_v11 }
 0x49d   :  { %876 = vmatpush.msra.mxu2 %v1178_v9 }
 0x4fd   :  { %v458_v3 = vpop.f32.mrf.mxu3 }
 0x4fe   :  { %v459_v5 = vadd.f32 %v1238_v15, %v458_v3 }
 0x500   :  { %482 = vrot.lane.b32.xlu1 %v459_v5, %s1071_s14  ;;  %v461_v10 = vadd.f32 %v459_v5, %v434_v4 }
 0x502   :  { %v959_v13 = vmul.f32 -1.442695, %v461_v10 }
 0x504   :  { %1008 = vpow2.f32 %v959_v13 }
 0x50a   :  { %v1009_v28 = vpop.eup %1008 }
 0x50b   :  { %v465_v29 = vadd.f32 1.0, %v1009_v28 }
 0x50d   :  { %v477_v56 = vand.u32 2147483648, %v465_v29  ;;  %vm471_vm3 = vweird.f32 %v465_v29  ;;  %v475_v57 = vand.u32 2147483647, %v465_v29 }
 0x50f   :  { %v478_v60 = vor.u32 1.1754944e-38, %v477_v56  ;;  %vm476_vm5 = vcmp.eq.f32.partialorder %v475_v57, 8.507059e+37 }
 0x51d   :  { %v542_v7 = vpop.f32.mrf.mxu2 }
 0x51e   :  { %v543_v8 = vadd.f32 %v1245_v18, %v542_v7  ;;  %v601_v7 = vpop.f32.mrf.mxu1 }
 0x520   :  { %566 = vrot.lane.b32.xlu2 %v543_v8, %s1071_s14  ;;  %v545_v9 = vadd.f32 %v543_v8, %v518_v6  ;;  %v602_v8 = vadd.f32 %v1252_v21, %v601_v7 }
 0x522   :  { %v962_v14 = vmul.f32 -1.442695, %v545_v9 }
 0x524   :  { %1010 = vpow2.f32 %v962_v14 }
 0x525   :  { %1012 = vrcp.f32 %v465_v29 }
 0x52a   :  { %v1011_v30 = vpop.eup %1010 }
 0x52b   :  { %v549_v47 = vadd.f32 1.0, %v1011_v30  ;;  %v1013_v48 = vpop.eup %1012 }
 0x52c   :  { %v467_v49 = vmul.f32 %v1013_v48, %v465_v29  ;;  %vm472_vm0 = vweird.f32 %v1013_v48 }
 0x52d   :  { %1014 = vrcp.f32 %v549_v47  ;;  %vm473_vm4 = vmor %vm471_vm3, %vm472_vm0  ;;  %v561_v16 = vand.u32 2147483648, %v549_v47  ;;  %vm555_vm7 = vweird.f32 %v549_v47  ;;  %v559_v17 = vand.u32 2147483647, %v549_v47 }
 0x52e   :  { %v468_v50 = vsub.f32 1.0, %v467_v49 }
 0x52f   :  { %v562_v20 = vor.u32 1.1754944e-38, %v561_v16  ;;  %vm560_vm10 = vcmp.eq.f32.partialorder %v559_v17, 8.507059e+37 }
 0x530   :  { %v469_v52 = vmul.f32 %v1013_v48, %v468_v50 }
 0x532   :  { %v470_v54 = vadd.f32 %v1013_v48, %v469_v52 }
 0x533   :  { %v1015_v51 = vpop.eup %1014 }
 0x534   :  { %v551_v53 = vmul.f32 %v1015_v51, %v549_v47  ;;  %v474_v58 = vsel %vm473_vm4, %v1013_v48, %v470_v54  ;;  %vm556_vm6 = vweird.f32 %v1015_v51 }
 0x535   :  { %v479_v62 = vsel %vm476_vm5, %v478_v60, %v474_v58  ;;  %vm557_vm8 = vmor %vm555_vm7, %vm556_vm6 }
 0x536   :  { %v552_v55 = vsub.f32 1.0, %v551_v53  ;;  %v492_v36 = vsub.f32 1.0, %v479_v62  ;;  %v498_v39 = vmul.f32 %v479_v62, %v1312_v42 }
 0x538   :  { %v553_v59 = vmul.f32 %v1015_v51, %v552_v55 }
 0x53a   :  { %v554_v12 = vadd.f32 %v1015_v51, %v553_v59 }
 0x53c   :  { %v558_v19 = vsel %vm557_vm8, %v1015_v51, %v554_v12 }
 0x53d   :  { %v563_v23 = vsel %vm560_vm10, %v562_v20, %v558_v19 }
 0x53e   :  { %v576_v38 = vsub.f32 1.0, %v563_v23  ;;  %v582_v44 = vmul.f32 %v563_v23, %v1317_v46 }
 0x572   :  { %v483_v61 = vpop.permute.xlu1 %482 }
 0x573   :  { %v485_v63 = vmul.f32 %v483_v61, %v479_v62 }
 0x575   :  { %487 = vrot.lane.b32.xlu0 %v485_v63, %s1072_s3 }
 0x57a   :  { %v567_v24 = vpop.permute.xlu2 %566 }
 0x57b   :  { %v569_v26 = vmul.f32 %v567_v24, %v563_v23 }
 0x57d   :  { %571 = vrot.lane.b32.xlu1 %v569_v26, %s1072_s3 }
 0x5e7   :  { %v488_v27 = vpop.permute.xlu0 %487 }
 0x5e8   :  { %v490_v31 = vadd.f32 %v488_v27, %v434_v4  ;;  %v685_v4 = vpop.f32.mrf.mxu0 }
 0x5e9   :  { %v686_v11 = vadd.f32 %v1258_v25, %v685_v4 }
 0x5ea   :  { %1016 = vtanh.f32 %v490_v31 }
 0x5ef   :  { %v572_v32 = vpop.permute.xlu1 %571 }
 0x5f0   :  { %v1017_v33 = vpop.eup %1016  ;;  %v574_v34 = vadd.f32 %v572_v32, %v518_v6 }
 0x5f1   :  { %494 = vrot.lane.b32.xlu2 %v1017_v33, %s1073_s7 }
 0x5f2   :  { %1018 = vtanh.f32 %v574_v34 }
 0x5f8   :  { %v1019_v35 = vpop.eup %1018 }
 0x5f9   :  { %578 = vrot.lane.b32.xlu0 %v1019_v35, %s1073_s7 }
 0x64b   :  { %v495_v37 = vpop.permute.xlu2 %494 }
 0x64c   :  { %v497_v40 = vmul.f32 %v495_v37, %v492_v36 }
 0x64e   :  { %v1359_v41 = vadd.f32 %v498_v39, %v497_v40 }
 0x650   :  { %605 = vrot.lane.b32.xlu1 %v1359_v41, %s1073_s7 }
 0x66b   :  { %v579_v43 = vpop.permute.xlu0 %578 }
 0x66c   :  { %v581_v45 = vmul.f32 %v579_v43, %v576_v38 }
 0x66e   :  { %v1364_v22 = vadd.f32 %v582_v44, %v581_v45 }
 0x670   :  { %689 = vrot.lane.b32.xlu2 %v1364_v22, %s1073_s7 }
 0x6c2   :  { %v606_v0 = vpop.permute.xlu1 %605 }
 0x6c3   :  { %964 = vmatmul.msk.f32.vlgmr.msrb.gmra.mxu3 %vm80_vm9, %v606_v0 }
 0x6ca   :  { %v690_v42 = vpop.permute.xlu2 %689 }
 0x6cb   :  { %967 = vmatmul.msk.f32.vlgmr.msrb.gmra.mxu2 %vm80_vm9, %v690_v42 }
 0x746   :  { %v626_v2 = vpop.f32.mrf.mxu3 }
 0x747   :  { %v627_v3 = vadd.f32 %v1238_v15, %v626_v2 }
 0x749   :  { %650 = vrot.lane.b32.xlu0 %v627_v3, %s1071_s14  ;;  %v629_v1 = vadd.f32 %v627_v3, %v602_v8 }
 0x74b   :  { %v965_v10 = vmul.f32 -1.442695, %v629_v1 }
 0x74d   :  { %1020 = vpow2.f32 %v965_v10  ;;  %v853_v10 = vpop.f32.mrf.mxu0 }
 0x74e   :  { %v710_v5 = vpop.f32.mrf.mxu2 }
 0x74f   :  { %v711_v46 = vadd.f32 %v1245_v18, %v710_v5  ;;  %v769_v5 = vpop.f32.mrf.mxu1 }
 0x751   :  { %734 = vrot.lane.b32.xlu1 %v711_v46, %s1071_s14  ;;  %v713_v13 = vadd.f32 %v711_v46, %v686_v11  ;;  %v770_v46 = vadd.f32 %v1252_v21, %v769_v5 }
 0x753   :  { %v968_v6 = vmul.f32 -1.442695, %v713_v13  ;;  %v1021_v9 = vpop.eup %1020 }
 0x754   :  { %v633_v14 = vadd.f32 1.0, %v1021_v9 }
 0x755   :  { %1022 = vpow2.f32 %v968_v6 }
 0x756   :  { %1024 = vrcp.f32 %v633_v14  ;;  %v645_v54 = vand.u32 2147483648, %v633_v14  ;;  %vm639_vm12 = vweird.f32 %v633_v14  ;;  %v643_v55 = vand.u32 2147483647, %v633_v14 }
 0x758   :  { %v646_v58 = vor.u32 1.1754944e-38, %v645_v54  ;;  %vm644_vm14 = vcmp.eq.f32.partialorder %v643_v55, 8.507059e+37 }
 0x75b   :  { %v1023_v28 = vpop.eup %1022 }
 0x75c   :  { %v717_v29 = vadd.f32 1.0, %v1023_v28  ;;  %v1025_v30 = vpop.eup %1024 }
 0x75d   :  { %v635_v47 = vmul.f32 %v1025_v30, %v633_v14  ;;  %vm640_vm11 = vweird.f32 %v1025_v30 }
 0x75e   :  { %1026 = vrcp.f32 %v717_v29  ;;  %vm641_vm13 = vmor %vm639_vm12, %vm640_vm11  ;;  %v729_v63 = vand.u32 2147483648, %v717_v29  ;;  %vm723_vm1 = vweird.f32 %v717_v29  ;;  %v727_v12 = vand.u32 2147483647, %v717_v29 }
 0x75f   :  { %v636_v48 = vsub.f32 1.0, %v635_v47  ;;  %vm925_vm11 = vcmask 123904  }
 0x760   :  { %v730_v17 = vor.u32 1.1754944e-38, %v729_v63  ;;  %vm728_vm0 = vcmp.eq.f32.partialorder %v727_v12, 8.507059e+37 }
 0x761   :  { %v637_v50 = vmul.f32 %v1025_v30, %v636_v48 }
 0x763   :  { %v638_v52 = vadd.f32 %v1025_v30, %v637_v50 }
 0x764   :  { %v1027_v49 = vpop.eup %1026 }
 0x765   :  { %v719_v51 = vmul.f32 %v1027_v49, %v717_v29  ;;  %v642_v56 = vsel %vm641_vm13, %v1025_v30, %v638_v52  ;;  %vm724_vm15 = vweird.f32 %v1027_v49 }
 0x766   :  { %v647_v60 = vsel %vm644_vm14, %v646_v58, %v642_v56  ;;  %vm725_vm2 = vmor %vm723_vm1, %vm724_vm15 }
 0x767   :  { %v720_v53 = vsub.f32 1.0, %v719_v51  ;;  %v660_v34 = vsub.f32 1.0, %v647_v60  ;;  %v666_v36 = vmul.f32 %v647_v60, %v1359_v41 }
 0x769   :  { %v721_v57 = vmul.f32 %v1027_v49, %v720_v53 }
 0x76b   :  { %v722_v62 = vadd.f32 %v1027_v49, %v721_v57 }
 0x76d   :  { %v726_v16 = vsel %vm725_vm2, %v1027_v49, %v722_v62 }
 0x76e   :  { %v731_v20 = vsel %vm728_vm0, %v730_v17, %v726_v16 }
 0x76f   :  { %v744_v40 = vsub.f32 1.0, %v731_v20  ;;  %v750_v43 = vmul.f32 %v731_v20, %v1364_v22 }
 0x7bb   :  { %v651_v59 = vpop.permute.xlu0 %650 }
 0x7bc   :  { %v653_v61 = vmul.f32 %v651_v59, %v647_v60 }
 0x7be   :  { %655 = vrot.lane.b32.xlu2 %v653_v61, %s1072_s3 }
 0x7c3   :  { %v735_v19 = vpop.permute.xlu1 %734 }
 0x7c4   :  { %v737_v23 = vmul.f32 %v735_v19, %v731_v20 }
 0x7c6   :  { %739 = vrot.lane.b32.xlu0 %v737_v23, %s1072_s3 }
 0x818   :  { %v656_v24 = vpop.permute.xlu2 %655 }
 0x819   :  { %v658_v26 = vadd.f32 %v656_v24, %v602_v8 }
 0x81b   :  { %1028 = vtanh.f32 %v658_v26 }
 0x821   :  { %v1029_v27 = vpop.eup %1028 }
 0x822   :  { %662 = vrot.lane.b32.xlu1 %v1029_v27, %s1073_s7 }
 0x838   :  { %v740_v31 = vpop.permute.xlu0 %739 }
 0x839   :  { %v742_v32 = vadd.f32 %v740_v31, %v686_v11 }
 0x83b   :  { %1030 = vtanh.f32 %v742_v32 }
 0x841   :  { %v1031_v33 = vpop.eup %1030 }
 0x842   :  { %746 = vrot.lane.b32.xlu2 %v1031_v33, %s1073_s7 }
 0x894   :  { %v663_v35 = vpop.permute.xlu1 %662 }
 0x895   :  { %v665_v37 = vmul.f32 %v663_v35, %v660_v34 }
 0x897   :  { %v1381_v39 = vadd.f32 %v666_v36, %v665_v37 }
 0x899   :  { %773 = vrot.lane.b32.xlu0 %v1381_v39, %s1073_s7 }
 0x89c   :  { %v747_v38 = vpop.permute.xlu2 %746 }
 0x89d   :  { %v749_v44 = vmul.f32 %v747_v38, %v744_v40 }
 0x89f   :  { %v1386_v45 = vadd.f32 %v750_v43, %v749_v44 }
 0x8a1   :  { %857 = vrot.lane.b32.xlu1 %v1386_v45, %s1073_s7 }
 0x90b   :  { %v774_v0 = vpop.permute.xlu0 %773 }
 0x90c   :  { %970 = vmatmul.msk.f32.vlgmr.msra.gmra.mxu3 %vm80_vm9, %v774_v0 }
 0x913   :  { %v858_v41 = vpop.permute.xlu1 %857 }
 0x914   :  { %973 = vmatmul.msk.f32.vlgmr.msra.gmra.mxu2 %vm80_vm9, %v858_v41 }
 0x98f   :  { %v794_v42 = vpop.f32.mrf.mxu3 }
 0x990   :  { %v795_v2 = vadd.f32 %v1238_v15, %v794_v42  ;;  %v854_v15 = vadd.f32 %v1258_v25, %v853_v10 }
 0x992   :  { %818 = vrot.lane.b32.xlu2 %v795_v2, %s1071_s14  ;;  %v797_v7 = vadd.f32 %v795_v2, %v770_v46 }
 0x994   :  { %v971_v8 = vmul.f32 -1.442695, %v797_v7 }
 0x996   :  { %1032 = vpow2.f32 %v971_v8 }
 0x997   :  { %v878_v3 = vpop.f32.mrf.mxu2 }
 0x998   :  { %v879_v22 = vadd.f32 %v1245_v18, %v878_v3 }
 0x99a   :  { %902 = vrot.lane.b32.xlu0 %v879_v22, %s1071_s14  ;;  %v881_v6 = vadd.f32 %v879_v22, %v854_v15 }
 0x99c   :  { %v1033_v1 = vpop.eup %1032  ;;  %v974_v14 = vmul.f32 -1.442695, %v881_v6 }
 0x99d   :  { %v801_v4 = vadd.f32 1.0, %v1033_v1 }
 0x99f   :  { %1034 = vrcp.f32 %v801_v4  ;;  %v813_v29 = vand.u32 2147483648, %v801_v4  ;;  %vm807_vm3 = vweird.f32 %v801_v4  ;;  %v811_v21 = vand.u32 2147483647, %v801_v4 }
 0x9a0   :  { %1036 = vpow2.f32 %v974_v14 }
 0x9a1   :  { %v814_v48 = vor.u32 1.1754944e-38, %v813_v29  ;;  %vm812_vm5 = vcmp.eq.f32.partialorder %v811_v21, 8.507059e+37 }
 0x9a5   :  { %v1035_v11 = vpop.eup %1034 }
 0x9a6   :  { %v803_v13 = vmul.f32 %v1035_v11, %v801_v4  ;;  %vm808_vm9 = vweird.f32 %v1035_v11  ;;  %v1037_v30 = vpop.eup %1036 }
 0x9a7   :  { %vm809_vm4 = vmor %vm807_vm3, %vm808_vm9  ;;  %v885_v49 = vadd.f32 1.0, %v1037_v30 }
 0x9a8   :  { %v804_v9 = vsub.f32 1.0, %v803_v13 }
 0x9a9   :  { %1038 = vrcp.f32 %v885_v49  ;;  %v897_v57 = vand.u32 2147483648, %v885_v49  ;;  %vm891_vm7 = vweird.f32 %v885_v49  ;;  %v895_v58 = vand.u32 2147483647, %v885_v49 }
 0x9aa   :  { %v805_v18 = vmul.f32 %v1035_v11, %v804_v9 }
 0x9ab   :  { %v898_v60 = vor.u32 1.1754944e-38, %v897_v57  ;;  %vm896_vm10 = vcmp.eq.f32.partialorder %v895_v58, 8.507059e+37 }
 0x9ac   :  { %v806_v28 = vadd.f32 %v1035_v11, %v805_v18 }
 0x9ae   :  { %v810_v47 = vsel %vm809_vm4, %v1035_v11, %v806_v28 }
 0x9af   :  { %v815_v50 = vsel %vm812_vm5, %v814_v48, %v810_v47  ;;  %v1039_v52 = vpop.eup %1038 }
 0x9b0   :  { %v887_v53 = vmul.f32 %v1039_v52, %v885_v49  ;;  %vm892_vm6 = vweird.f32 %v1039_v52  ;;  %v828_v26 = vsub.f32 1.0, %v815_v50  ;;  %v834_v33 = vmul.f32 %v815_v50, %v1381_v39 }
 0x9b1   :  { %vm893_vm8 = vmor %vm891_vm7, %vm892_vm6 }
 0x9b2   :  { %v888_v54 = vsub.f32 1.0, %v887_v53 }
 0x9b4   :  { %v889_v55 = vmul.f32 %v1039_v52, %v888_v54 }
 0x9b6   :  { %v890_v56 = vadd.f32 %v1039_v52, %v889_v55 }
 0x9b8   :  { %v894_v59 = vsel %vm893_vm8, %v1039_v52, %v890_v56 }
 0x9b9   :  { %v899_v62 = vsel %vm896_vm10, %v898_v60, %v894_v59 }
 0x9ba   :  { %v912_v31 = vsub.f32 1.0, %v899_v62  ;;  %v918_v34 = vmul.f32 %v899_v62, %v1386_v45 }
 0x9ec   :  { %v819_v51 = vpop.permute.xlu2 %818 }
 0x9ed   :  { %v821_v25 = vmul.f32 %v819_v51, %v815_v50 }
 0x9ef   :  { %823 = vrot.lane.b32.xlu1 %v821_v25, %s1072_s3 }
 0xa0c   :  { %v903_v61 = vpop.permute.xlu0 %902 }
 0xa0d   :  { %v905_v63 = vmul.f32 %v903_v61, %v899_v62 }
 0xa0f   :  { %907 = vrot.lane.b32.xlu2 %v905_v63, %s1072_s3 }
 0xa61   :  { %v824_v12 = vpop.permute.xlu1 %823 }
 0xa62   :  { %v826_v16 = vadd.f32 %v824_v12, %v770_v46 }
 0xa64   :  { %1040 = vtanh.f32 %v826_v16 }
 0xa69   :  { %v908_v17 = vpop.permute.xlu2 %907 }
 0xa6a   :  { %v1041_v19 = vpop.eup %1040  ;;  %v910_v20 = vadd.f32 %v908_v17, %v854_v15 }
 0xa6b   :  { %830 = vrot.lane.b32.xlu0 %v1041_v19, %s1073_s7 }
 0xa6c   :  { %1042 = vtanh.f32 %v910_v20 }
 0xa72   :  { %v1043_v23 = vpop.eup %1042 }
 0xa73   :  { %914 = vrot.lane.b32.xlu1 %v1043_v23, %s1073_s7 }
 0xadd   :  { %v831_v24 = vpop.permute.xlu0 %830 }
 0xade   :  { %v833_v27 = vmul.f32 %v831_v24, %v828_v26 }
 0xae0   :  { %v835_v36 = vadd.f32 %v834_v33, %v833_v27 }
 0xae5   :  { %v915_v32 = vpop.permute.xlu1 %914 }
 0xae6   :  { %v917_v35 = vmul.f32 %v915_v32, %v912_v31 }
 0xae8   :  { %v919_v37 = vadd.f32 %v918_v34, %v917_v35 }
 0xaea   :  { %v920_v40 = vadd.f32 %v919_v37, %v835_v36 }
 0xaec   :  { %922 = vrot.lane.b32.xlu2 %v920_v40, %s1073_s7 }
 0xb46   :  { %v923_v38 = vpop.permute.xlu2 %922 }
 0xb47   :  { %926 = vst.msk [vmem:[#allocation2] sm:$0x3] %vm925_vm11, %v923_v38 }
 0xb48   :  { %937 = dma.vmem_to_hbm [thread:$0]  %s933_s2, 32, %s935_s27, [#allocation3]  }
 0xb49   :  { %1068 = dma.done.wait [#allocation3], 32  }
 0xb4a   :  { %1069 = vsyncadd [#allocation3], 4294967264 }
 0xb4b   :  { %942 = vsyncpa [#allocation3], 1 }

// kernel: _damt_core.11
= control target key start
LH: loop header
LB: loop body
LE: loop exit
PB: predicated region body
PF: predicated region fallthrough
CT: control target
= control target key end

     0   :  { %vm103_vm0 = vcmask 261120   ;;  %vm127_vm1 = vcmask 258048   ;;  %vm401_vm2 = vcmask 1044480   ;;  %vm312_vm3 = vcmask 130048   ;;  %s2303_s22 = smov 120   ;;  %s3170_s25 = smov 24   ;;  %s3142_s5 = inlined_call_operand.vmem [shape: f32[32,32], index: 5, kind: input, shape index: {}]   ;;  %s3143_s3 = inlined_call_operand.vmem [shape: f32[32,32], index: 3, kind: input, shape index: {}]   ;;  %s3144_s0 = inlined_call_operand.vmem [shape: f32[2,5,32], index: 0, kind: input, shape index: {}]   ;;  %s3145_s4 = inlined_call_operand.vmem [shape: f32[32,32], index: 4, kind: input, shape index: {}]   ;;  %s3146_s2 = inlined_call_operand.vmem [shape: f32[32,32], index: 2, kind: input, shape index: {}]   ;;  %s3147_s8 = inlined_call_operand.vmem [shape: f32[32,160], index: 8, kind: input, shape index: {}]   ;;  %s3148_s6 = inlined_call_operand.vmem [shape: f32[32,160], index: 6, kind: input, shape index: {}]   ;;  %s3149_s9 = inlined_call_operand.vmem [shape: f32[1,160], index: 9, kind: input, shape index: {}]   ;;  %s3150_s7 = inlined_call_operand.vmem [shape: f32[1,160], index: 7, kind: input, shape index: {}]   ;;  %s3151_s1 = inlined_call_operand.vmem [shape: f32[2,1,5], index: 1, kind: input, shape index: {}]   ;;  %s3152_s10 = inlined_call_operand.vmem [shape: f32[32,32], index: 10, kind: input, shape index: {}]   ;;  %s3153_s11 = inlined_call_operand.vmem [shape: f32[1,32], index: 11, kind: input, shape index: {}]   ;;  %s3154_s14 = inlined_call_operand.vmem [shape: f32[32,32], index: 14, kind: input, shape index: {}]   ;;  %s3155_s15 = inlined_call_operand.vmem [shape: f32[1,32], index: 15, kind: input, shape index: {}]   ;;  %s3156_s12 = inlined_call_operand.vmem [shape: f32[1,32], index: 12, kind: input, shape index: {}]   ;;  %s3157_s13 = inlined_call_operand.vmem [shape: f32[1,32], index: 13, kind: input, shape index: {}]   ;;  %s3158_s16 = inlined_call_operand.vmem [shape: f32[1,32], index: 16, kind: input, shape index: {}]   ;;  %s3159_s17 = inlined_call_operand.vmem [shape: f32[1,32], index: 17, kind: input, shape index: {}]   ;;  %s3160_s18 = inlined_call_operand.vmem [shape: f32[1,32], index: 18, kind: input, shape index: {}]   ;;  %s3161_s19 = inlined_call_operand.vmem [shape: f32[1,32], index: 19, kind: input, shape index: {}]   ;;  %s3162_s21 = inlined_call_operand.vmem [shape: f32[2,5,32], index: 21, kind: output, shape index: {1}]   ;;  %s3163_s20 = inlined_call_operand.vmem [shape: f32[2,5,32], index: 20, kind: output, shape index: {0}]  }
   0x1   :  { %3172 = sst [smem:[#allocation2_spill]] %s3142_s5  ;;  %v2580_v45 = vld [vmem:[%s3148_s6 + $0x30] sm:$0xff]  ;;  %v2585_v46 = vld [vmem:[%s3148_s6 + $0x38] sm:$0xff]  ;;  %v2590_v47 = vld [vmem:[%s3148_s6 + $0x20] sm:$0xff]  ;;  %vm344_vm4 = vcmask 36864   ;;  %vm397_vm5 = vcmask 39936  }
   0x2   :  { %3173 = sst [smem:[#allocation3_spill]] %s3143_s3  ;;  %v2597_v48 = vld [vmem:[%s3148_s6 + $0x28] sm:$0xff]  ;;  %v2604_v49 = vld [vmem:[%s3148_s6 + $0x10] sm:$0xff]  ;;  %v2609_v50 = vld [vmem:[%s3148_s6 + $0x18] sm:$0xff]  ;;  %s2304_s3 = smov 104   ;;  %vm871_vm6 = vcmask 64512  }
   0x3   :  { %3174 = sst [smem:[#allocation4_spill]] %s3144_s0  ;;  %v2616_v51 = vld [vmem:[%s3148_s6] sm:$0xff]  ;;  %v2621_v52 = vld [vmem:[%s3148_s6 + $0x8] sm:$0xff]  ;;  %s2305_s6 = smov 8   ;;  %vm874_vm7 = vcmask 195584  }
   0x4   :  { %3175 = sst [smem:[#allocation5_spill]] %s3145_s4  ;;  %v2642_v57 = vld [vmem:[%s3149_s9] sm:$0x3]  ;;  %s2297_s9 = smov 112  }
   0x5   :  { %3176 = sst [smem:[#allocation6_spill]] %s3146_s2  ;;  %v2647_v58 = vld [vmem:[%s3150_s7] sm:$0x3]  ;;  %v265_v59 = vperm.slane %v2642_v57, 0  ;;  %v266_v60 = vperm.slane %v2642_v57, 1  ;;  %s2296_s7 = smov 64  }
   0x6   :  { %3177 = sst [smem:[#allocation7_spill]] %s3147_s8  ;;  %v217_v61 = vperm.slane %v2647_v58, 0  ;;  %v218_v62 = vperm.slane %v2647_v58, 1  ;;  %s2298_s2 = smov 32  }
   0x7   :  { %s3178_s26 = sld [smem:[#allocation2_spill]] }
   0x8   :  { %s3179_s29 = sld [smem:[#allocation3_spill]] }
   0x9   :  { %s3180_s4 = sld [smem:[#allocation4_spill]] }
   0xa   :  { %s3181_s5 = sld [smem:[#allocation5_spill]] }
   0xb   :  { %s3182_s27 = sld [smem:[#allocation6_spill]] }
   0xc   :  { %s3183_s23 = sld [smem:[#allocation7_spill]] }
   0xd   :  { %v2421_v0 = vld [vmem:[%s3178_s26 + $0x18] sm:$0xff]  ;;  %v2426_v1 = vld [vmem:[%s3178_s26 + $0x10] sm:$0xff]  ;;  %v2437_v3 = vld [vmem:[%s3178_s26 + $0x8] sm:$0xff] }
   0xe   :  { %151 = vmatpush.msra.mxu1 %v2421_v0  ;;  %v2432_v2 = vld [vmem:[%s3179_s29 + $0x18] sm:$0xff]  ;;  %v2443_v4 = vld [vmem:[%s3179_s29 + $0x10] sm:$0xff]  ;;  %v2449_v5 = vld [vmem:[%s3179_s29 + $0x8] sm:$0xff] }
   0xf   :  { %119 = vmatpush.msra.mxu0 %v2432_v2  ;;  %v2454_v6 = vld [vmem:[%s3178_s26] sm:$0xff]  ;;  %s2300_s26 = smov 16  }
  0x10   :  { %152 = vmatpush.msra.mxu1 %v2426_v1  ;;  %v2461_v7 = vld [vmem:[%s3180_s4] sm:$0x1f]  ;;  %v2482_v23 = vld [vmem:[%s3181_s5 + $0x18] sm:$0xff]  ;;  %v2487_v24 = vld [vmem:[%s3181_s5 + $0x10] sm:$0xff] }
  0x11   :  { %120 = vmatpush.msra.mxu0 %v2443_v4  ;;  %v2466_v8 = vld [vmem:[%s3179_s29] sm:$0xff]  ;;  %208 = vmatpush.msra.mxu3 %v2482_v23  ;;  %v2493_v25 = vld [vmem:[%s3181_s5 + $0x8] sm:$0xff]  ;;  %v2506_v27 = vld [vmem:[%s3182_s27 + $0x18] sm:$0xff]  ;;  %s2301_s29 = smov 80  }
  0x12   :  { %153 = vmatpush.msra.mxu1 %v2437_v3  ;;  %v2500_v26 = vld [vmem:[%s3181_s5] sm:$0xff]  ;;  %v2511_v28 = vld [vmem:[%s3182_s27 + $0x10] sm:$0xff]  ;;  %185 = vmatpush.msra.mxu2 %v2506_v27  ;;  %v2517_v29 = vld [vmem:[%s3182_s27 + $0x8] sm:$0xff]  ;;  %s2302_s5 = smov 96  }
  0x13   :  { %121 = vmatpush.msra.mxu0 %v2449_v5  ;;  %209 = vmatpush.msra.mxu3 %v2487_v24  ;;  %v2523_v30 = vld [vmem:[%s3182_s27] sm:$0xff]  ;;  %v2530_v31 = vld [vmem:[%s3183_s23 + $0x30] sm:$0xff]  ;;  %v2535_v32 = vld [vmem:[%s3183_s23 + $0x38] sm:$0xff] }
  0x14   :  { %154 = vmatpush.msra.mxu1 %v2454_v6  ;;  %186 = vmatpush.msra.mxu2 %v2511_v28  ;;  %v2540_v33 = vld [vmem:[%s3183_s23 + $0x20] sm:$0xff]  ;;  %v2547_v34 = vld [vmem:[%s3183_s23 + $0x28] sm:$0xff]  ;;  %v2556_v41 = vld [vmem:[%s3183_s23 + $0x10] sm:$0xff] }
  0x15   :  { %2075 = vmatmul.msk.f32.vlgmr.msra.gmra.mxu1 %vm103_vm0, %v2461_v7  ;;  %122 = vmatpush.msra.mxu0 %v2466_v8  ;;  %v2561_v42 = vld [vmem:[%s3183_s23 + $0x18] sm:$0xff]  ;;  %v2568_v43 = vld [vmem:[%s3183_s23] sm:$0xff]  ;;  %v2573_v44 = vld [vmem:[%s3183_s23 + $0x8] sm:$0xff]  ;;  %s2299_s23 = smov 48  }
  0x16   :  { %2074 = vmatmul.msk.f32.vlgmr.msra.gmra.mxu0 %vm103_vm0, %v2461_v7  ;;  %210 = vmatpush.msra.mxu3 %v2493_v25 }
  0x17   :  { %187 = vmatpush.msra.mxu2 %v2517_v29  ;;  %236 = vmatpush.msrb.mxu0 %v2580_v45 }
  0x18   :  { %211 = vmatpush.msra.mxu3 %v2500_v26  ;;  %256 = vmatpush.msrb.mxu1 %v2585_v46 }
  0x19   :  { %188 = vmatpush.msra.mxu2 %v2523_v30  ;;  %237 = vmatpush.msrb.mxu0 %v2590_v47 }
  0x1a   :  { %304 = vmatpush.msrb.mxu3 %v2535_v32  ;;  %257 = vmatpush.msrb.mxu1 %v2597_v48 }
  0x1b   :  { %284 = vmatpush.msrb.mxu2 %v2530_v31  ;;  %238 = vmatpush.msrb.mxu0 %v2604_v49 }
  0x1c   :  { %305 = vmatpush.msrb.mxu3 %v2547_v34  ;;  %258 = vmatpush.msrb.mxu1 %v2609_v50 }
  0x1d   :  { %285 = vmatpush.msrb.mxu2 %v2540_v33  ;;  %239 = vmatpush.msrb.mxu0 %v2616_v51 }
  0x1e   :  { %306 = vmatpush.msrb.mxu3 %v2561_v42  ;;  %259 = vmatpush.msrb.mxu1 %v2621_v52 }
  0x1f   :  { %286 = vmatpush.msrb.mxu2 %v2556_v41 }
  0x20   :  { %307 = vmatpush.msrb.mxu3 %v2573_v44 }
  0x21   :  { %287 = vmatpush.msrb.mxu2 %v2568_v43 }
  0x92   :  { %v156_v9 = vpop.f32.mrf.mxu1 }
  0x93   :  { %v159_v10 = vsel %vm127_vm1, %v156_v9, -inf  ;;  %v124_v11 = vpop.f32.mrf.mxu0 }
  0x94   :  { %160 = vmax.xlane.f32.xlu0 %v159_v10  ;;  %v128_v12 = vsel %vm127_vm1, %v124_v11, -inf }
  0x9c   :  { %129 = vmax.xlane.f32.xlu0 %v128_v12 }
 0x107   :  { %v161_v13 = vpop.xlane.xlu0 %160 }
 0x108   :  { %v162_v14 = vsub.f32 %v156_v9, %v161_v13 }
 0x10a   :  { %v163_v15 = vmul.f32 1.442695, %v162_v14 }
 0x10c   :  { %2196 = vpow2.f32 %v163_v15 }
 0x10f   :  { %v130_v16 = vpop.xlane.xlu0 %129 }
 0x110   :  { %v131_v17 = vsub.f32 %v124_v11, %v130_v16 }
 0x112   :  { %v2197_v18 = vpop.eup %2196  ;;  %v132_v19 = vmul.f32 1.442695, %v131_v17 }
 0x113   :  { %v165_v20 = vsel %vm127_vm1, %v2197_v18, 0.0 }
 0x114   :  { %2198 = vpow2.f32 %v132_v19  ;;  %166 = vadd.xlane.f32.xlu1 %v165_v20 }
 0x11a   :  { %v2199_v21 = vpop.eup %2198 }
 0x11b   :  { %v134_v22 = vsel %vm127_vm1, %v2199_v21, 0.0 }
 0x11c   :  { %135 = vadd.xlane.f32.xlu1 %v134_v22 }
 0x187   :  { %v167_v35 = vpop.xlane.xlu1 %166 }
 0x188   :  { %2200 = vrcp.f32 %v167_v35 }
 0x18e   :  { %v2201_v36 = vpop.eup %2200 }
 0x18f   :  { %v136_v37 = vpop.xlane.xlu1 %135  ;;  %v169_v38 = vmul.f32 %v2201_v36, %v2197_v18  ;;  %v2174_v36 = vld [vmem:[%s3151_s1] ss:$0 sm:$0xff] }
 0x190   :  { %2202 = vrcp.f32 %v136_v37 }
 0x191   :  { %2077 = vmatmul.msk.f32.vlgmr.msra.gmra.mxu3 %vm103_vm0, %v169_v38 }
 0x196   :  { %v2203_v39 = vpop.eup %2202 }
 0x197   :  { %v138_v40 = vmul.f32 %v2203_v39, %v2199_v21 }
 0x199   :  { %2076 = vmatmul.msk.f32.vlgmr.msra.gmra.mxu2 %vm103_vm0, %v138_v40 }
 0x214   :  { %v213_v53 = vpop.f32.mrf.mxu3 }
 0x215   :  { %v2626_v54 = vadd.f32 %v213_v53, %v2461_v7 }
 0x217   :  { %2080 = vmatmul.msk.f32.vlgmr.msrb.gmra.mxu2 %vm103_vm0, %v2626_v54  ;;  %2081 = vmatmul.msk.f32.vlgmr.msrb.gmra.mxu3 %vm103_vm0, %v2626_v54 }
 0x21c   :  { %v190_v55 = vpop.f32.mrf.mxu2 }
 0x21d   :  { %v2633_v56 = vadd.f32 %v190_v55, %v2461_v7 }
 0x21f   :  { %2078 = vmatmul.msk.f32.vlgmr.msrb.gmra.mxu0 %vm103_vm0, %v2633_v56  ;;  %2079 = vmatmul.msk.f32.vlgmr.msrb.gmra.mxu1 %vm103_vm0, %v2633_v56 }
 0x29a   :  { %v289_v63 = vpop.f32.mrf.mxu2  ;;  %v309_v7 = vpop.f32.mrf.mxu3 }
 0x29b   :  { %v290_v9 = vadd.f32 %v289_v63, %v265_v59  ;;  %v2657_v10 = vadd.f32 %v309_v7, %v266_v60 }
 0x29c   :  { %v241_v11 = vpop.f32.mrf.mxu0  ;;  %v261_v12 = vpop.f32.mrf.mxu1 }
 0x29d   :  { %v242_v13 = vadd.f32 %v241_v11, %v217_v61  ;;  %v2663_v14 = vadd.f32 %v261_v12, %v218_v62  ;;  %2086 = vmatpush.msk.msra.mxu2 %vm401_vm2, %v2657_v10  ;;  %356 = vrot.lane.b32.xlu1 %v290_v9, %s2296_s7 }
 0x29e   :  { %2082 = vmatpush.xpose.msk.msra.mxu0 %vm312_vm3, %v290_v9 }
 0x29f   :  { %2088 = vmatpush.msk.msra.mxu3 %vm401_vm2, %v2663_v14  ;;  %451 = vrot.lane.b32.xlu0 %v242_v13, %s2297_s9 }
 0x2a0   :  { %358 = vrot.lane.b32.xlu2 %v242_v13, %s2296_s7 }
 0x2a1   :  { %2083 = vmatmul.msk.f32.vlgmr.msra.gmra.mxu0 %vm312_vm3, %v242_v13 }
 0x2a5   :  { %630 = vrot.lane.b32.xlu1 %v242_v13, %s2298_s2 }
 0x2a7   :  { %492 = vrot.lane.b32.xlu0 %v290_v9, %s2299_s23 }
 0x2a8   :  { %453 = vrot.lane.b32.xlu2 %v290_v9, %s2297_s9 }
 0x2ad   :  { %766 = vrot.lane.b32.xlu1 %v242_v13, %s2300_s26 }
 0x2af   :  { %723 = vrot.lane.b32.xlu0 %v242_v13, %s2301_s29 }
 0x2b0   :  { %494 = vrot.lane.b32.xlu2 %v242_v13, %s2299_s23 }
 0x2b7   :  { %764 = vrot.lane.b32.xlu0 %v290_v9, %s2300_s26 }
 0x2b8   :  { %587 = vrot.lane.b32.xlu2 %v242_v13, %s2302_s5 }
 0x2c0   :  { %589 = vrot.lane.b32.xlu2 %v290_v9, %s2302_s5 }
 0x2c8   :  { %725 = vrot.lane.b32.xlu2 %v290_v9, %s2301_s29 }
 0x2d0   :  { %628 = vrot.lane.b32.xlu2 %v290_v9, %s2298_s2 }
 0x2fa   :  { %v359_v15 = vpop.permute.xlu2 %358 }
 0x2fb   :  { %2084 = vmatpush.xpose.msk.msra.mxu1 %vm312_vm3, %v359_v15 }
 0x302   :  { %v454_v16 = vpop.permute.xlu2 %453 }
 0x303   :  { %2090 = vmatpush.xpose.msk.msrb.mxu0 %vm312_vm3, %v454_v16 }
 0x30a   :  { %v495_v17 = vpop.permute.xlu2 %494 }
 0x30b   :  { %2092 = vmatpush.xpose.msk.msrb.mxu1 %vm312_vm3, %v495_v17 }
 0x30f   :  { %v357_v18 = vpop.permute.xlu1 %356 }
 0x310   :  { %2085 = vmatmul.msk.f32.vlgmr.msra.gmra.mxu1 %vm312_vm3, %v357_v18 }
 0x311   :  { %v452_v19 = vpop.permute.xlu0 %451 }
 0x312   :  { %v588_v20 = vpop.permute.xlu2 %587  ;;  %2091 = vmatmul.msk.f32.vlgmr.msrb.gmra.mxu0 %vm312_vm3, %v452_v19 }
 0x317   :  { %v631_v21 = vpop.permute.xlu1 %630 }
 0x318   :  { %2100 = vmatpush.xpose.msk.msra.mxu1 %vm312_vm3, %v631_v21 }
 0x319   :  { %v493_v22 = vpop.permute.xlu0 %492 }
 0x31a   :  { %v590_v35 = vpop.permute.xlu2 %589  ;;  %2093 = vmatmul.msk.f32.vlgmr.msrb.gmra.mxu1 %vm312_vm3, %v493_v22 }
 0x31b   :  { %2098 = vmatpush.xpose.msk.msra.mxu0 %vm312_vm3, %v590_v35 }
 0x31e   :  { %v336_v37 = vpop.f32.mrf.mxu0  ;;  %2099 = vmatmul.msk.f32.vlgmr.msra.gmra.mxu0 %vm312_vm3, %v588_v20 }
 0x31f   :  { %v339_v38 = vmul.f32 0.25, %v336_v37  ;;  %v767_v39 = vpop.permute.xlu1 %766 }
 0x320   :  { %2108 = vmatpush.xpose.msk.msrb.mxu1 %vm312_vm3, %v767_v39 }
 0x321   :  { %v343_v40 = vadd.f32 %v2174_v36, %v339_v38  ;;  %v724_v63 = vpop.permute.xlu0 %723 }
 0x322   :  { %v726_v53 = vpop.permute.xlu2 %725 }
 0x323   :  { %2106 = vmatpush.xpose.msk.msrb.mxu0 %vm312_vm3, %v726_v53  ;;  %v345_v55 = vsel %vm344_vm4, %v343_v40, -inf }
 0x324   :  { %346 = vmax.xlane.f32.xlu2 %v345_v55 }
 0x326   :  { %2107 = vmatmul.msk.f32.vlgmr.msrb.gmra.mxu0 %vm312_vm3, %v724_v63 }
 0x329   :  { %v765_v9 = vpop.permute.xlu0 %764 }
 0x32a   :  { %v629_v7 = vpop.permute.xlu2 %628 }
 0x32b   :  { %2101 = vmatmul.msk.f32.vlgmr.msra.gmra.mxu1 %vm312_vm3, %v629_v7 }
 0x333   :  { %2109 = vmatmul.msk.f32.vlgmr.msrb.gmra.mxu1 %vm312_vm3, %v765_v9 }
 0x38d   :  { %v381_v11 = vpop.f32.mrf.mxu1 }
 0x38e   :  { %v384_v12 = vmul.f32 0.25, %v381_v11 }
 0x38f   :  { %v476_v13 = vpop.f32.mrf.mxu0 }
 0x390   :  { %v479_v15 = vmul.f32 0.25, %v476_v13  ;;  %v385_v16 = vadd.f32 %v2174_v36, %v384_v12 }
 0x392   :  { %v386_v17 = vsel %vm344_vm4, %v385_v16, -inf  ;;  %v480_v18 = vadd.f32 %v2174_v36, %v479_v15 }
 0x393   :  { %387 = vmax.xlane.f32.xlu0 %v386_v17 }
 0x394   :  { %v481_v19 = vsel %vm344_vm4, %v480_v18, -inf }
 0x395   :  { %482 = vmax.xlane.f32.xlu1 %v481_v19 }
 0x397   :  { %v347_v20 = vpop.xlane.xlu2 %346  ;;  %v517_v21 = vpop.f32.mrf.mxu1 }
 0x398   :  { %v348_v22 = vsub.f32 %v343_v40, %v347_v20  ;;  %v520_v35 = vmul.f32 0.25, %v517_v21 }
 0x39a   :  { %v349_v37 = vmul.f32 1.442695, %v348_v22  ;;  %v521_v38 = vadd.f32 %v2174_v36, %v520_v35 }
 0x39b   :  { %v612_v39 = vpop.f32.mrf.mxu0 }
 0x39c   :  { %2204 = vpow2.f32 %v349_v37  ;;  %v615_v53 = vmul.f32 0.25, %v612_v39  ;;  %v522_v55 = vsel %vm344_vm4, %v521_v38, -inf }
 0x39d   :  { %523 = vmax.xlane.f32.xlu1 %v522_v55 }
 0x39e   :  { %v616_v63 = vadd.f32 %v2174_v36, %v615_v53 }
 0x3a0   :  { %v617_v7 = vsel %vm344_vm4, %v616_v63, -inf }
 0x3a1   :  { %618 = vmax.xlane.f32.xlu2 %v617_v7 }
 0x3a2   :  { %v2205_v9 = vpop.eup %2204 }
 0x3a3   :  { %v748_v11 = vpop.f32.mrf.mxu0  ;;  %v351_v12 = vsel %vm344_vm4, %v2205_v9, 0.0 }
 0x3a4   :  { %v751_v13 = vmul.f32 0.25, %v748_v11  ;;  %352 = vadd.xlane.f32.xlu0 %v351_v12 }
 0x3a6   :  { %v752_v40 = vadd.f32 %v2174_v36, %v751_v13 }
 0x3a8   :  { %v653_v15 = vpop.f32.mrf.mxu1  ;;  %v753_v19 = vsel %vm344_vm4, %v752_v40, -inf }
 0x3a9   :  { %v656_v17 = vmul.f32 0.25, %v653_v15 }
 0x3ab   :  { %v657_v20 = vadd.f32 %v2174_v36, %v656_v17 }
 0x3ac   :  { %754 = vmax.xlane.f32.xlu0 %v753_v19 }
 0x3ad   :  { %v658_v21 = vsel %vm344_vm4, %v657_v20, -inf }
 0x3ae   :  { %659 = vmax.xlane.f32.xlu2 %v658_v21 }
 0x3b0   :  { %v789_v22 = vpop.f32.mrf.mxu1 }
 0x3b1   :  { %v792_v35 = vmul.f32 0.25, %v789_v22 }
 0x3b3   :  { %v793_v37 = vadd.f32 %v2174_v36, %v792_v35 }
 0x3b5   :  { %v794_v39 = vsel %vm344_vm4, %v793_v37, -inf }
 0x3b6   :  { %795 = vmax.xlane.f32.xlu1 %v794_v39 }
 0x3c0   :  { %669 = vrot.lane.b32.xlu0 %v2657_v10, %s2297_s9 }
 0x3c6   :  { %560 = vrot.lane.b32.xlu2 %v2663_v14, %s2303_s22 }
 0x406   :  { %v388_v53 = vpop.xlane.xlu0 %387 }
 0x407   :  { %v389_v55 = vsub.f32 %v385_v16, %v388_v53 }
 0x408   :  { %v483_v7 = vpop.xlane.xlu1 %482 }
 0x409   :  { %v390_v11 = vmul.f32 1.442695, %v389_v55  ;;  %v484_v12 = vsub.f32 %v480_v18, %v483_v7 }
 0x40b   :  { %2206 = vpow2.f32 %v390_v11  ;;  %v485_v13 = vmul.f32 1.442695, %v484_v12 }
 0x40d   :  { %2208 = vpow2.f32 %v485_v13 }
 0x410   :  { %v524_v15 = vpop.xlane.xlu1 %523 }
 0x411   :  { %v2207_v36 = vpop.eup %2206  ;;  %v525_v17 = vsub.f32 %v521_v38, %v524_v15 }
 0x412   :  { %v392_v19 = vsel %vm344_vm4, %v2207_v36, 0.0 }
 0x413   :  { %v2716_v21 = vpop.eup %2208  ;;  %v526_v22 = vmul.f32 1.442695, %v525_v17  ;;  %393 = vadd.xlane.f32.xlu1 %v392_v19 }
 0x414   :  { %v619_v35 = vpop.xlane.xlu2 %618  ;;  %v487_v39 = vsel %vm344_vm4, %v2716_v21, 0.0 }
 0x415   :  { %2210 = vpow2.f32 %v526_v22  ;;  %v620_v16 = vsub.f32 %v616_v63, %v619_v35  ;;  %488 = vadd.xlane.f32.xlu2 %v487_v39 }
 0x417   :  { %v621_v18 = vmul.f32 1.442695, %v620_v16  ;;  %v353_v53 = vpop.xlane.xlu0 %352 }
 0x418   :  { %2212 = vrcp.f32 %v353_v53 }
 0x419   :  { %2214 = vpow2.f32 %v621_v18 }
 0x41b   :  { %v2211_v55 = vpop.eup %2210 }
 0x41c   :  { %v528_v38 = vsel %vm344_vm4, %v2211_v55, 0.0 }
 0x41d   :  { %529 = vadd.xlane.f32.xlu2 %v528_v38 }
 0x41e   :  { %v2213_v7 = vpop.eup %2212 }
 0x41f   :  { %v2215_v11 = vpop.eup %2214  ;;  %v355_v12 = vmul.f32 %v2213_v7, %v2205_v9  ;;  %v755_v13 = vpop.xlane.xlu0 %754 }
 0x420   :  { %v756_v15 = vsub.f32 %v752_v40, %v755_v13  ;;  %v623_v17 = vsel %vm344_vm4, %v2215_v11, 0.0 }
 0x421   :  { %2087 = vmatmul.msk.f32.vlgmr.msra.gmra.mxu2 %vm397_vm5, %v355_v12  ;;  %624 = vadd.xlane.f32.xlu0 %v623_v17  ;;  %v660_v63 = vpop.xlane.xlu2 %659 }
 0x422   :  { %v757_v19 = vmul.f32 1.442695, %v756_v15  ;;  %v661_v22 = vsub.f32 %v657_v20, %v660_v63 }
 0x424   :  { %2216 = vpow2.f32 %v757_v19  ;;  %v662_v35 = vmul.f32 1.442695, %v661_v22 }
 0x426   :  { %2218 = vpow2.f32 %v662_v35 }
 0x429   :  { %v561_v39 = vpop.permute.xlu2 %560  ;;  %v796_v20 = vpop.xlane.xlu1 %795 }
 0x42a   :  { %v2217_v16 = vpop.eup %2216  ;;  %2096 = vmatpush.msk.msrb.mxu3 %vm401_vm2, %v561_v39  ;;  %v797_v53 = vsub.f32 %v793_v37, %v796_v20 }
 0x42b   :  { %v759_v18 = vsel %vm344_vm4, %v2217_v16, 0.0 }
 0x42c   :  { %v2219_v9 = vpop.eup %2218  ;;  %760 = vadd.xlane.f32.xlu0 %v759_v18  ;;  %533 = vrot.lane.b32.xlu1 %v2657_v10, %s2303_s22  ;;  %v798_v38 = vmul.f32 1.442695, %v797_v53 }
 0x42d   :  { %v664_v40 = vsel %vm344_vm4, %v2219_v9, 0.0 }
 0x42e   :  { %665 = vadd.xlane.f32.xlu2 %v664_v40  ;;  %2220 = vpow2.f32 %v798_v38 }
 0x432   :  { %v670_v37 = vpop.permute.xlu0 %669 }
 0x434   :  { %v2221_v7 = vpop.eup %2220 }
 0x435   :  { %v800_v12 = vsel %vm344_vm4, %v2221_v7, 0.0 }
 0x440   :  { %805 = vrot.lane.b32.xlu0 %v2657_v10, %s2304_s3 }
 0x446   :  { %696 = vrot.lane.b32.xlu2 %v2663_v14, %s2297_s9 }
 0x448   :  { %832 = vrot.lane.b32.xlu0 %v2663_v14, %s2304_s3 }
 0x456   :  { %801 = vadd.xlane.f32.xlu1 %v800_v12 }
 0x486   :  { %v394_v13 = vpop.xlane.xlu1 %393 }
 0x487   :  { %2222 = vrcp.f32 %v394_v13 }
 0x488   :  { %v489_v15 = vpop.xlane.xlu2 %488 }
 0x48d   :  { %v2223_v17 = vpop.eup %2222 }
 0x48e   :  { %v396_v63 = vmul.f32 %v2223_v17, %v2207_v36  ;;  %v2803_v17 = vld [vmem:[%s3152_s10] sm:$0xff] }
 0x490   :  { %2089 = vmatmul.msk.f32.vlgmr.msra.gmra.mxu3 %vm397_vm5, %v396_v63  ;;  %v530_v10 = vpop.xlane.xlu2 %529 }
 0x491   :  { %2224 = vrcp.f32 %v530_v10 }
 0x492   :  { %2226 = vrcp.f32 %v489_v15 }
 0x494   :  { %v625_v35 = vpop.xlane.xlu0 %624 }
 0x495   :  { %2228 = vrcp.f32 %v625_v35 }
 0x497   :  { %v2225_v19 = vpop.eup %2224 }
 0x498   :  { %v532_v22 = vmul.f32 %v2225_v19, %v2211_v55  ;;  %v2227_v14 = vpop.eup %2226 }
 0x499   :  { %v491_v39 = vmul.f32 %v2227_v14, %v2716_v21 }
 0x49a   :  { %2097 = vmatmul.msk.f32.vlgmr.msrb.gmra.mxu3 %vm397_vm5, %v532_v22 }
 0x49b   :  { %v2229_v40 = vpop.eup %2228 }
 0x49c   :  { %v627_v20 = vmul.f32 %v2229_v40, %v2215_v11  ;;  %v2752_v11 = vld [vmem:[%s3180_s4 + $0x8] sm:$0x1f] }
 0x49e   :  { %v534_v18 = vpop.permute.xlu1 %533 }
 0x49f   :  { %2094 = vmatpush.msk.msrb.mxu2 %vm401_vm2, %v534_v18  ;;  %v761_v53 = vpop.xlane.xlu0 %760 }
 0x4a0   :  { %2095 = vmatmul.msk.f32.vlgmr.msrb.gmra.mxu2 %vm397_vm5, %v491_v39 }
 0x4a1   :  { %2102 = vmatpush.msk.msra.mxu2 %vm401_vm2, %v670_v37  ;;  %v666_v36 = vpop.xlane.xlu2 %665 }
 0x4a2   :  { %2230 = vrcp.f32 %v666_v36 }
 0x4a3   :  { %2232 = vrcp.f32 %v761_v53 }
 0x4a8   :  { %v2231_v55 = vpop.eup %2230  ;;  %2103 = vmatmul.msk.f32.vlgmr.msra.gmra.mxu2 %vm397_vm5, %v627_v20 }
 0x4a9   :  { %v668_v38 = vmul.f32 %v2231_v55, %v2219_v9  ;;  %v697_v12 = vpop.permute.xlu2 %696  ;;  %v2233_v21 = vpop.eup %2232 }
 0x4aa   :  { %2104 = vmatpush.msk.msra.mxu3 %vm401_vm2, %v697_v12  ;;  %v763_v13 = vmul.f32 %v2233_v21, %v2217_v16  ;;  %v2790_v16 = vld [vmem:[%s3152_s10 + $0x10] sm:$0xff] }
 0x4ab   :  { %2105 = vmatmul.msk.f32.vlgmr.msra.gmra.mxu3 %vm397_vm5, %v668_v38 }
 0x4b2   :  { %v806_v15 = vpop.permute.xlu0 %805 }
 0x4b3   :  { %2110 = vmatpush.msk.msrb.mxu2 %vm401_vm2, %v806_v15 }
 0x4b4   :  { %2111 = vmatmul.msk.f32.vlgmr.msrb.gmra.mxu2 %vm397_vm5, %v763_v13 }
 0x4b5   :  { %1113 = vmatpush.msra.mxu2 %v2432_v2 }
 0x4b7   :  { %1114 = vmatpush.msra.mxu2 %v2443_v4 }
 0x4b9   :  { %1115 = vmatpush.msra.mxu2 %v2449_v5 }
 0x4ba   :  { %v833_v9 = vpop.permute.xlu0 %832 }
 0x4bb   :  { %2112 = vmatpush.msk.msrb.mxu3 %vm401_vm2, %v833_v9  ;;  %1116 = vmatpush.msra.mxu2 %v2466_v8 }
 0x4bc   :  { %2118 = vmatmul.msk.f32.vlgmr.msra.gmra.mxu2 %vm103_vm0, %v2752_v11 }
 0x4bd   :  { %1144 = vmatpush.msra.mxu3 %v2421_v0  ;;  %1224 = vmatpush.msrb.mxu2 %v2580_v45 }
 0x4bf   :  { %1145 = vmatpush.msra.mxu3 %v2426_v1  ;;  %1225 = vmatpush.msrb.mxu2 %v2590_v47  ;;  %v2773_v1 = vpop.f32.mrf.mxu2 }
 0x4c1   :  { %1146 = vmatpush.msra.mxu3 %v2437_v3  ;;  %1226 = vmatpush.msrb.mxu2 %v2604_v49 }
 0x4c3   :  { %1147 = vmatpush.msra.mxu3 %v2454_v6  ;;  %1227 = vmatpush.msrb.mxu2 %v2616_v51 }
 0x4c9   :  { %v802_v2 = vpop.xlane.xlu1 %801 }
 0x4ca   :  { %2234 = vrcp.f32 %v802_v2 }
 0x4d0   :  { %v2235_v4 = vpop.eup %2234 }
 0x4d1   :  { %v804_v5 = vmul.f32 %v2235_v4, %v2221_v7  ;;  %v2796_v7 = vld [vmem:[%s3152_s10 + $0x8] sm:$0xff] }
 0x4d3   :  { %2113 = vmatmul.msk.f32.vlgmr.msrb.gmra.mxu3 %vm397_vm5, %v804_v5 }
 0x4d4   :  { %1244 = vmatpush.msrb.mxu3 %v2585_v46 }
 0x4d6   :  { %1245 = vmatpush.msrb.mxu3 %v2597_v48 }
 0x4d8   :  { %1246 = vmatpush.msrb.mxu3 %v2609_v50 }
 0x4da   :  { %1247 = vmatpush.msrb.mxu3 %v2621_v52  ;;  %v2785_v52 = vld [vmem:[%s3152_s10 + $0x18] sm:$0xff] }
 0x4db   :  { %2119 = vmatmul.msk.f32.vlgmr.msra.gmra.mxu3 %vm103_vm0, %v2752_v11  ;;  %914 = vmatpush.msra.mxu0 %v2785_v52 }
 0x4dd   :  { %915 = vmatpush.msra.mxu0 %v2790_v16 }
 0x4df   :  { %916 = vmatpush.msra.mxu0 %v2796_v7 }
 0x4e1   :  { %917 = vmatpush.msra.mxu0 %v2803_v17 }
 0x4e3   :  { %1178 = vmatpush.msrb.mxu0 %v2506_v27 }
 0x4e5   :  { %1179 = vmatpush.msrb.mxu0 %v2511_v28 }
 0x4e7   :  { %1180 = vmatpush.msrb.mxu0 %v2517_v29 }
 0x4e9   :  { %1181 = vmatpush.msrb.mxu0 %v2523_v30 }
 0x513   :  { %v448_v0 = vpop.f32.mrf.mxu3 }
 0x51d   :  { %v584_v3 = vpop.f32.mrf.mxu3 }
 0x51e   :  { %877 = vrot.lane.b32.xlu1 %v584_v3, %s2305_s6 }
 0x523   :  { %v557_v6 = vpop.f32.mrf.mxu2 }
 0x52b   :  { %v693_v8 = vpop.f32.mrf.mxu2 }
 0x52e   :  { %v720_v48 = vpop.f32.mrf.mxu3 }
 0x537   :  { %v829_v45 = vpop.f32.mrf.mxu2 }
 0x53f   :  { %v1118_v46 = vpop.f32.mrf.mxu2 }
 0x540   :  { %v1121_v47 = vsel %vm127_vm1, %v1118_v46, -inf }
 0x541   :  { %1122 = vmax.xlane.f32.xlu2 %v1121_v47  ;;  %v2918_v47 = vld [vmem:[%s3151_s1 + $0x1] ss:$0 sm:$0xff]  ;;  %s3184_s1 = smov 24  }
 0x556   :  { %v856_v49 = vpop.f32.mrf.mxu3 }
 0x557   :  { %885 = vrot.lane.b32.xlu1 %v856_v49, %s3170_s25 }
 0x559   :  { %881 = vrot.lane.b32.xlu2 %v720_v48, %s2300_s26 }
 0x55e   :  { %v1149_v50 = vpop.f32.mrf.mxu3 }
 0x55f   :  { %864 = vrot.lane.b32.xlu1 %v693_v8, %s2300_s26  ;;  %v1152_v51 = vsel %vm127_vm1, %v1149_v50, -inf }
 0x560   :  { %1153 = vmax.xlane.f32.xlu0 %v1152_v51 }
 0x561   :  { %868 = vrot.lane.b32.xlu2 %v829_v45, %s3170_s25 }
 0x590   :  { %v878_v35 = vpop.permute.xlu1 %877 }
 0x591   :  { %v888_v27 = vsel %vm871_vm6, %v448_v0, %v878_v35 }
 0x5b4   :  { %v1123_v63 = vpop.xlane.xlu2 %1122 }
 0x5b5   :  { %v1124_v10 = vsub.f32 %v1118_v46, %v1123_v63 }
 0x5b7   :  { %v1125_v37 = vmul.f32 1.442695, %v1124_v10 }
 0x5b9   :  { %2236 = vpow2.f32 %v1125_v37 }
 0x5bc   :  { %v882_v14 = vpop.permute.xlu2 %881 }
 0x5bd   :  { %v889_v28 = vsel %vm312_vm3, %v888_v27, %v882_v14 }
 0x5bf   :  { %v2237_v19 = vpop.eup %2236 }
 0x5c0   :  { %v1127_v22 = vsel %vm127_vm1, %v2237_v19, 0.0 }
 0x5c1   :  { %1128 = vadd.xlane.f32.xlu0 %v1127_v22 }
 0x5c4   :  { %v869_v15 = vpop.permute.xlu2 %868 }
 0x5c9   :  { %v886_v39 = vpop.permute.xlu1 %885 }
 0x5ca   :  { %v890_v29 = vsel %vm874_vm7, %v889_v28, %v886_v39 }
 0x5cb   :  { %2114 = vmatmul.msk.f32.vlgmr.msra.gmra.mxu0 %vm103_vm0, %v890_v29 }
 0x5cc   :  { %1267 = vmatpush.msra.mxu0 %v2530_v31  ;;  %v2824_v31 = vld [vmem:[%s3154_s14 + $0x18] sm:$0xff] }
 0x5cd   :  { %985 = vmatpush.msra.mxu1 %v2824_v31 }
 0x5ce   :  { %1268 = vmatpush.msra.mxu0 %v2540_v33  ;;  %v2829_v33 = vld [vmem:[%s3154_s14 + $0x10] sm:$0xff] }
 0x5cf   :  { %986 = vmatpush.msra.mxu1 %v2829_v33 }
 0x5d0   :  { %1269 = vmatpush.msra.mxu0 %v2556_v41  ;;  %v2836_v41 = vld [vmem:[%s3154_s14 + $0x8] sm:$0xff] }
 0x5d1   :  { %987 = vmatpush.msra.mxu1 %v2836_v41  ;;  %v865_v21 = vpop.permute.xlu1 %864 }
 0x5d2   :  { %1270 = vmatpush.msra.mxu0 %v2568_v43  ;;  %v2842_v43 = vld [vmem:[%s3154_s14] sm:$0xff] }
 0x5d3   :  { %v1154_v30 = vpop.xlane.xlu0 %1153  ;;  %988 = vmatpush.msra.mxu1 %v2842_v43 }
 0x5d4   :  { %v1155_v18 = vsub.f32 %v1149_v50, %v1154_v30 }
 0x5d5   :  { %860 = vrot.lane.b32.xlu0 %v557_v6, %s2305_s6  ;;  %1201 = vmatpush.msrb.mxu1 %v2482_v23 }
 0x5d6   :  { %v1156_v36 = vmul.f32 1.442695, %v1155_v18 }
 0x5d7   :  { %1202 = vmatpush.msrb.mxu1 %v2487_v24 }
 0x5d8   :  { %2238 = vpow2.f32 %v1156_v36 }
 0x5d9   :  { %1203 = vmatpush.msrb.mxu1 %v2493_v25 }
 0x5db   :  { %1204 = vmatpush.msrb.mxu1 %v2500_v26 }
 0x5de   :  { %v2239_v40 = vpop.eup %2238 }
 0x5df   :  { %v1158_v20 = vsel %vm127_vm1, %v2239_v40, 0.0 }
 0x5e0   :  { %1159 = vadd.xlane.f32.xlu1 %v1158_v20 }
 0x634   :  { %v1129_v53 = vpop.xlane.xlu0 %1128 }
 0x635   :  { %2240 = vrcp.f32 %v1129_v53 }
 0x63b   :  { %v2241_v55 = vpop.eup %2240 }
 0x63c   :  { %v1131_v38 = vmul.f32 %v2241_v55, %v2237_v19 }
 0x63e   :  { %2120 = vmatmul.msk.f32.vlgmr.msrb.gmra.mxu0 %vm103_vm0, %v1131_v38 }
 0x647   :  { %v861_v12 = vpop.permute.xlu0 %860 }
 0x648   :  { %v872_v13 = vsel %vm871_vm6, %v2773_v1, %v861_v12  ;;  %v2860_v2 = vpop.f32.mrf.mxu0 }
 0x649   :  { %v873_v23 = vsel %vm312_vm3, %v872_v13, %v865_v21 }
 0x64a   :  { %v875_v24 = vsel %vm874_vm7, %v873_v23, %v869_v15 }
 0x64b   :  { %2115 = vmatmul.msk.f32.vlgmr.msra.gmra.mxu1 %vm103_vm0, %v875_v24 }
 0x64c   :  { %1287 = vmatpush.msra.mxu1 %v2535_v32 }
 0x64e   :  { %1288 = vmatpush.msra.mxu1 %v2547_v34 }
 0x650   :  { %1289 = vmatpush.msra.mxu1 %v2561_v42 }
 0x652   :  { %1290 = vmatpush.msra.mxu1 %v2573_v44 }
 0x653   :  { %v1160_v25 = vpop.xlane.xlu1 %1159 }
 0x654   :  { %2242 = vrcp.f32 %v1160_v25 }
 0x65a   :  { %v2243_v26 = vpop.eup %2242 }
 0x65b   :  { %v1162_v9 = vmul.f32 %v2243_v26, %v2239_v40 }
 0x65d   :  { %2121 = vmatmul.msk.f32.vlgmr.msrb.gmra.mxu1 %vm103_vm0, %v1162_v9 }
 0x6bb   :  { %v1183_v4 = vpop.f32.mrf.mxu0 }
 0x6bc   :  { %v2863_v5 = vadd.f32 %v2752_v11, %v1183_v4 }
 0x6be   :  { %2122 = vmatmul.msk.f32.vlgmr.msrb.gmra.mxu2 %vm103_vm0, %v2863_v5  ;;  %2123 = vmatmul.msk.f32.vlgmr.msrb.gmra.mxu3 %vm103_vm0, %v2863_v5 }
 0x6c8   :  { %v2869_v32 = vpop.f32.mrf.mxu1 }
 0x6da   :  { %v1206_v34 = vpop.f32.mrf.mxu1 }
 0x6db   :  { %v2872_v42 = vadd.f32 %v2752_v11, %v1206_v34 }
 0x6dd   :  { %2124 = vmatmul.msk.f32.vlgmr.msra.gmra.mxu0 %vm103_vm0, %v2872_v42  ;;  %2125 = vmatmul.msk.f32.vlgmr.msra.gmra.mxu1 %vm103_vm0, %v2872_v42 }
 0x741   :  { %v1249_v44 = vpop.f32.mrf.mxu3  ;;  %v1229_v8 = vpop.f32.mrf.mxu2 }
 0x742   :  { %v2880_v0 = vadd.f32 %v1249_v44, %v218_v62  ;;  %v1230_v62 = vadd.f32 %v1229_v8, %v217_v61 }
 0x744   :  { %2132 = vmatpush.msk.msrb.mxu1 %vm401_vm2, %v2880_v0 }
 0x75a   :  { %v1272_v1 = vpop.f32.mrf.mxu0  ;;  %v1292_v3 = vpop.f32.mrf.mxu1 }
 0x75b   :  { %v1273_v11 = vadd.f32 %v1272_v1, %v265_v59  ;;  %v2888_v6 = vadd.f32 %v1292_v3, %v266_v60 }
 0x75d   :  { %2130 = vmatpush.msk.msrb.mxu0 %vm401_vm2, %v2888_v6  ;;  %1607 = vrot.lane.b32.xlu1 %v1273_v11, %s2298_s2 }
 0x75e   :  { %1432 = vrot.lane.b32.xlu0 %v1273_v11, %s2297_s9  ;;  %1337 = vrot.lane.b32.xlu2 %v1273_v11, %s2296_s7 }
 0x75f   :  { %2126 = vmatpush.xpose.msk.msra.mxu2 %vm312_vm3, %v1273_v11 }
 0x762   :  { %2127 = vmatmul.msk.f32.vlgmr.msra.gmra.mxu2 %vm312_vm3, %v1230_v62 }
 0x766   :  { %1568 = vrot.lane.b32.xlu0 %v1273_v11, %s2302_s5  ;;  %1471 = vrot.lane.b32.xlu2 %v1273_v11, %s2299_s23 }
 0x76e   :  { %1339 = vrot.lane.b32.xlu0 %v1230_v62, %s2296_s7  ;;  %1473 = vrot.lane.b32.xlu2 %v1230_v62, %s2299_s23 }
 0x776   :  { %1430 = vrot.lane.b32.xlu0 %v1230_v62, %s2297_s9  ;;  %1609 = vrot.lane.b32.xlu2 %v1230_v62, %s2298_s2 }
 0x77e   :  { %1566 = vrot.lane.b32.xlu0 %v1230_v62, %s2302_s5  ;;  %1704 = vrot.lane.b32.xlu2 %v1273_v11, %s2301_s29 }
 0x786   :  { %1745 = vrot.lane.b32.xlu0 %v1230_v62, %s2300_s26  ;;  %1702 = vrot.lane.b32.xlu2 %v1230_v62, %s2301_s29 }
 0x78e   :  { %1743 = vrot.lane.b32.xlu0 %v1273_v11, %s2300_s26 }
 0x7b8   :  { %v1338_v57 = vpop.permute.xlu2 %1337 }
 0x7c0   :  { %v1472_v58 = vpop.permute.xlu2 %1471 }
 0x7c8   :  { %v1474_v60 = vpop.permute.xlu2 %1473 }
 0x7cf   :  { %v1608_v19 = vpop.permute.xlu1 %1607 }
 0x7d0   :  { %v1433_v59 = vpop.permute.xlu0 %1432  ;;  %v1610_v45 = vpop.permute.xlu2 %1609 }
 0x7d1   :  { %2134 = vmatpush.xpose.msk.msrb.mxu2 %vm312_vm3, %v1433_v59 }
 0x7d8   :  { %v1569_v61 = vpop.permute.xlu0 %1568  ;;  %v1705_v63 = vpop.permute.xlu2 %1704 }
 0x7d9   :  { %2142 = vmatpush.xpose.msk.msra.mxu2 %vm312_vm3, %v1569_v61 }
 0x7e0   :  { %v1340_v46 = vpop.permute.xlu0 %1339  ;;  %v1703_v22 = vpop.permute.xlu2 %1702 }
 0x7e1   :  { %2128 = vmatpush.xpose.msk.msra.mxu3 %vm312_vm3, %v1340_v46 }
 0x7e4   :  { %2129 = vmatmul.msk.f32.vlgmr.msra.gmra.mxu3 %vm312_vm3, %v1338_v57 }
 0x7e5   :  { %2136 = vmatpush.xpose.msk.msrb.mxu3 %vm312_vm3, %v1474_v60  ;;  %v1318_v48 = vpop.f32.mrf.mxu2 }
 0x7e6   :  { %v1321_v49 = vmul.f32 0.25, %v1318_v48 }
 0x7e8   :  { %v1431_v50 = vpop.permute.xlu0 %1430  ;;  %v1325_v51 = vadd.f32 %v2918_v47, %v1321_v49 }
 0x7e9   :  { %2144 = vmatpush.xpose.msk.msra.mxu3 %vm312_vm3, %v1610_v45  ;;  %2135 = vmatmul.msk.f32.vlgmr.msrb.gmra.mxu2 %vm312_vm3, %v1431_v50 }
 0x7ea   :  { %2150 = vmatpush.xpose.msk.msrb.mxu2 %vm312_vm3, %v1705_v63  ;;  %v1326_v10 = vsel %vm344_vm4, %v1325_v51, -inf }
 0x7eb   :  { %1327 = vmax.xlane.f32.xlu2 %v1326_v10 }
 0x7ec   :  { %2137 = vmatmul.msk.f32.vlgmr.msrb.gmra.mxu3 %vm312_vm3, %v1472_v58 }
 0x7f0   :  { %v1567_v37 = vpop.permute.xlu0 %1566 }
 0x7f1   :  { %2143 = vmatmul.msk.f32.vlgmr.msra.gmra.mxu2 %vm312_vm3, %v1567_v37 }
 0x7f2   :  { %1891 = vmatpush.msra.mxu2 %v2785_v52 }
 0x7f4   :  { %2145 = vmatmul.msk.f32.vlgmr.msra.gmra.mxu3 %vm312_vm3, %v1608_v19  ;;  %1892 = vmatpush.msra.mxu2 %v2790_v16 }
 0x7f6   :  { %1893 = vmatpush.msra.mxu2 %v2796_v7 }
 0x7f8   :  { %v1746_v35 = vpop.permute.xlu0 %1745  ;;  %1894 = vmatpush.msra.mxu2 %v2803_v17 }
 0x7f9   :  { %2151 = vmatmul.msk.f32.vlgmr.msrb.gmra.mxu2 %vm312_vm3, %v1703_v22  ;;  %2152 = vmatpush.xpose.msk.msrb.mxu3 %vm312_vm3, %v1746_v35 }
 0x7fd   :  { %1955 = vmatpush.msra.mxu3 %v2824_v31 }
 0x7ff   :  { %1956 = vmatpush.msra.mxu3 %v2829_v33 }
 0x800   :  { %v1744_v52 = vpop.permute.xlu0 %1743 }
 0x801   :  { %1957 = vmatpush.msra.mxu3 %v2836_v41 }
 0x802   :  { %2153 = vmatmul.msk.f32.vlgmr.msrb.gmra.mxu3 %vm312_vm3, %v1744_v52 }
 0x803   :  { %1958 = vmatpush.msra.mxu3 %v2842_v43 }
 0x85e   :  { %v1328_v7 = vpop.xlane.xlu2 %1327 }
 0x85f   :  { %v1329_v27 = vsub.f32 %v1325_v51, %v1328_v7 }
 0x861   :  { %v1330_v30 = vmul.f32 1.442695, %v1329_v27 }
 0x863   :  { %2244 = vpow2.f32 %v1330_v30 }
 0x867   :  { %v1362_v16 = vpop.f32.mrf.mxu3 }
 0x868   :  { %v1365_v14 = vmul.f32 0.25, %v1362_v16 }
 0x869   :  { %v2245_v55 = vpop.eup %2244 }
 0x86a   :  { %v1366_v17 = vadd.f32 %v2918_v47, %v1365_v14  ;;  %v1332_v15 = vsel %vm344_vm4, %v2245_v55, 0.0 }
 0x86c   :  { %v1455_v28 = vpop.f32.mrf.mxu2  ;;  %v1367_v39 = vsel %vm344_vm4, %v1366_v17, -inf }
 0x86d   :  { %v1458_v29 = vmul.f32 0.25, %v1455_v28  ;;  %1368 = vmax.xlane.f32.xlu0 %v1367_v39 }
 0x86f   :  { %v1496_v18 = vpop.f32.mrf.mxu3  ;;  %v1459_v36 = vadd.f32 %v2918_v47, %v1458_v29 }
 0x870   :  { %v1499_v40 = vmul.f32 0.25, %v1496_v18 }
 0x871   :  { %v1460_v20 = vsel %vm344_vm4, %v1459_v36, -inf }
 0x872   :  { %1461 = vmax.xlane.f32.xlu1 %v1460_v20  ;;  %v1500_v31 = vadd.f32 %v2918_v47, %v1499_v40 }
 0x874   :  { %v1591_v33 = vpop.f32.mrf.mxu2  ;;  %v1501_v41 = vsel %vm344_vm4, %v1500_v31, -inf }
 0x875   :  { %v1594_v43 = vmul.f32 0.25, %v1591_v33  ;;  %1502 = vmax.xlane.f32.xlu2 %v1501_v41 }
 0x877   :  { %v1595_v53 = vadd.f32 %v2918_v47, %v1594_v43  ;;  %v1632_v38 = vpop.f32.mrf.mxu3 }
 0x878   :  { %v1635_v21 = vmul.f32 0.25, %v1632_v38 }
 0x879   :  { %v1596_v12 = vsel %vm344_vm4, %v1595_v53, -inf }
 0x87a   :  { %1597 = vmax.xlane.f32.xlu0 %v1596_v12  ;;  %v1636_v25 = vadd.f32 %v2918_v47, %v1635_v21 }
 0x87c   :  { %v1727_v13 = vpop.f32.mrf.mxu2  ;;  %v1637_v4 = vsel %vm344_vm4, %v1636_v25, -inf }
 0x87d   :  { %v1730_v23 = vmul.f32 0.25, %v1727_v13  ;;  %1333 = vadd.xlane.f32.xlu2 %v1332_v15 }
 0x87f   :  { %v1731_v24 = vadd.f32 %v2918_v47, %v1730_v23 }
 0x881   :  { %v1732_v26 = vsel %vm344_vm4, %v1731_v24, -inf }
 0x882   :  { %1733 = vmax.xlane.f32.xlu1 %v1732_v26 }
 0x885   :  { %v1768_v9 = vpop.f32.mrf.mxu3  ;;  %1638 = vmax.xlane.f32.xlu2 %v1637_v4 }
 0x886   :  { %v1771_v34 = vmul.f32 0.25, %v1768_v9 }
 0x888   :  { %v1772_v44 = vadd.f32 %v2918_v47, %v1771_v34 }
 0x88a   :  { %v1773_v1 = vsel %vm344_vm4, %v1772_v44, -inf }
 0x88b   :  { %1774 = vmax.xlane.f32.xlu0 %v1773_v1 }
 0x89b   :  { %1539 = vrot.lane.b32.xlu1 %v2880_v0, %s2303_s22 }
 0x89d   :  { %1512 = vrot.lane.b32.xlu2 %v2888_v6, %s2303_s22 }
 0x8e0   :  { %v1369_v3 = vpop.xlane.xlu0 %1368 }
 0x8e1   :  { %v1370_v11 = vsub.f32 %v1366_v17, %v1369_v3 }
 0x8e3   :  { %v1371_v8 = vmul.f32 1.442695, %v1370_v11 }
 0x8e5   :  { %2246 = vpow2.f32 %v1371_v8  ;;  %v1462_v62 = vpop.xlane.xlu1 %1461 }
 0x8e6   :  { %v1463_v57 = vsub.f32 %v1459_v36, %v1462_v62 }
 0x8e8   :  { %v1464_v58 = vmul.f32 1.442695, %v1463_v57  ;;  %v1503_v59 = vpop.xlane.xlu2 %1502 }
 0x8e9   :  { %v1504_v60 = vsub.f32 %v1500_v31, %v1503_v59 }
 0x8ea   :  { %2248 = vpow2.f32 %v1464_v58 }
 0x8eb   :  { %v2247_v61 = vpop.eup %2246  ;;  %v1505_v45 = vmul.f32 1.442695, %v1504_v60 }
 0x8ec   :  { %v1373_v46 = vsel %vm344_vm4, %v2247_v61, 0.0 }
 0x8ed   :  { %2250 = vpow2.f32 %v1505_v45  ;;  %v1598_v47 = vpop.xlane.xlu0 %1597  ;;  %1374 = vadd.xlane.f32.xlu1 %v1373_v46 }
 0x8ee   :  { %v1599_v48 = vsub.f32 %v1595_v53, %v1598_v47 }
 0x8f0   :  { %v2249_v49 = vpop.eup %2248  ;;  %v1600_v50 = vmul.f32 1.442695, %v1599_v48  ;;  %v1334_v51 = vpop.xlane.xlu2 %1333 }
 0x8f1   :  { %2252 = vrcp.f32 %v1334_v51  ;;  %v1466_v63 = vsel %vm344_vm4, %v2249_v49, 0.0  ;;  %v2175_v51 = vld [vmem:[%s3153_s11] ss:$0 sm:$0xff] }
 0x8f2   :  { %2254 = vpow2.f32 %v1600_v50  ;;  %1467 = vadd.xlane.f32.xlu0 %v1466_v63  ;;  %v920_v63 = vadd.f32 %v2175_v51, %v2860_v2 }
 0x8f3   :  { %v2251_v10 = vpop.eup %2250 }
 0x8f4   :  { %v1507_v37 = vsel %vm344_vm4, %v2251_v10, 0.0 }
 0x8f5   :  { %v1734_v19 = vpop.xlane.xlu1 %1733  ;;  %1508 = vadd.xlane.f32.xlu2 %v1507_v37 }
 0x8f6   :  { %v1735_v22 = vsub.f32 %v1731_v24, %v1734_v19  ;;  %v2176_v19 = vld [vmem:[%s3155_s15] ss:$0 sm:$0xff] }
 0x8f7   :  { %v2253_v35 = vpop.eup %2252 }
 0x8f8   :  { %v2961_v52 = vpop.eup %2254  ;;  %v1336_v16 = vmul.f32 %v2253_v35, %v2245_v55  ;;  %v1736_v7 = vmul.f32 1.442695, %v1735_v22  ;;  %v1639_v14 = vpop.xlane.xlu2 %1638  ;;  %v991_v22 = vadd.f32 %v2176_v19, %v2869_v32 }
 0x8f9   :  { %v1640_v17 = vsub.f32 %v1636_v25, %v1639_v14  ;;  %v1602_v27 = vsel %vm344_vm4, %v2961_v52, 0.0  ;;  %v2307_v14 = vmov 32.0  }
 0x8fa   :  { %2256 = vpow2.f32 %v1736_v7  ;;  %1603 = vadd.xlane.f32.xlu1 %v1602_v27  ;;  %2131 = vmatmul.msk.f32.vlgmr.msrb.gmra.mxu0 %vm397_vm5, %v1336_v16  ;;  %v993_v35 = vadd.f32 %v991_v22, %v2633_v56 }
 0x8fb   :  { %v1641_v28 = vmul.f32 1.442695, %v1640_v17 }
 0x8fd   :  { %2258 = vpow2.f32 %v1641_v28 }
 0x8fe   :  { %v1775_v39 = vpop.xlane.xlu0 %1774 }
 0x8ff   :  { %v1776_v30 = vsub.f32 %v1772_v44, %v1775_v39 }
 0x900   :  { %v2257_v29 = vpop.eup %2256  ;;  %v1513_v18 = vpop.permute.xlu2 %1512 }
 0x901   :  { %2138 = vmatpush.msk.msra.mxu0 %vm401_vm2, %v1513_v18  ;;  %v1738_v36 = vsel %vm344_vm4, %v2257_v29, 0.0  ;;  %v1777_v40 = vmul.f32 1.442695, %v1776_v30 }
 0x902   :  { %1739 = vadd.xlane.f32.xlu0 %v1738_v36 }
 0x903   :  { %v2259_v20 = vpop.eup %2258  ;;  %2260 = vpow2.f32 %v1777_v40 }
 0x904   :  { %v1643_v31 = vsel %vm344_vm4, %v2259_v20, 0.0 }
 0x909   :  { %v2261_v41 = vpop.eup %2260 }
 0x90a   :  { %1644 = vadd.xlane.f32.xlu0 %v1643_v31  ;;  %v1779_v43 = vsel %vm344_vm4, %v2261_v41, 0.0 }
 0x90d   :  { %v1540_v33 = vpop.permute.xlu1 %1539  ;;  %1675 = vrot.lane.b32.xlu2 %v2880_v0, %s2297_s9 }
 0x90e   :  { %2140 = vmatpush.msk.msra.mxu1 %vm401_vm2, %v1540_v33 }
 0x912   :  { %1780 = vadd.xlane.f32.xlu0 %v1779_v43 }
 0x913   :  { %1784 = vrot.lane.b32.xlu1 %v2888_v6, %s2304_s3 }
 0x915   :  { %1811 = vrot.lane.b32.xlu2 %v2880_v0, %s2304_s3 }
 0x926   :  { %1648 = vrot.lane.b32.xlu0 %v2888_v6, %s2297_s9 }
 0x960   :  { %v1375_v53 = vpop.xlane.xlu1 %1374 }
 0x961   :  { %2262 = vrcp.f32 %v1375_v53 }
 0x965   :  { %v1468_v55 = vpop.xlane.xlu0 %1467 }
 0x966   :  { %2264 = vrcp.f32 %v1468_v55 }
 0x967   :  { %v2263_v38 = vpop.eup %2262 }
 0x968   :  { %v1377_v12 = vmul.f32 %v2263_v38, %v2247_v61  ;;  %v1509_v21 = vpop.xlane.xlu2 %1508 }
 0x969   :  { %2266 = vrcp.f32 %v1509_v21 }
 0x96a   :  { %2133 = vmatmul.msk.f32.vlgmr.msrb.gmra.mxu1 %vm397_vm5, %v1377_v12  ;;  %v2178_v12 = vld [vmem:[%s3155_s15] ss:$0 sm:$0xff] }
 0x96c   :  { %v2265_v13 = vpop.eup %2264 }
 0x96d   :  { %v1470_v15 = vmul.f32 %v2265_v13, %v2249_v49  ;;  %v1604_v1 = vpop.xlane.xlu1 %1603 }
 0x96f   :  { %v2267_v23 = vpop.eup %2266  ;;  %2139 = vmatmul.msk.f32.vlgmr.msra.gmra.mxu0 %vm397_vm5, %v1470_v15 }
 0x970   :  { %v1511_v24 = vmul.f32 %v2267_v23, %v2251_v10  ;;  %v1676_v0 = vpop.permute.xlu2 %1675  ;;  %v922_v10 = vadd.f32 %v920_v63, %v2626_v54  ;;  %v2179_v23 = vld [vmem:[%s3153_s11] ss:$0 sm:$0xff] }
 0x971   :  { %2148 = vmatpush.msk.msrb.mxu1 %vm401_vm2, %v1676_v0 }
 0x972   :  { %2141 = vmatmul.msk.f32.vlgmr.msra.gmra.mxu1 %vm397_vm5, %v1511_v24  ;;  %v925_v37 = vsel %vm127_vm1, %v922_v10, 0.0 }
 0x975   :  { %v1740_v6 = vpop.xlane.xlu0 %1739 }
 0x977   :  { %v1401_v60 = vpop.f32.mrf.mxu0 }
 0x978   :  { %v1812_v25 = vpop.permute.xlu2 %1811 }
 0x979   :  { %2156 = vmatpush.msk.msra.mxu1 %vm401_vm2, %v1812_v25 }
 0x97d   :  { %v1645_v26 = vpop.xlane.xlu0 %1644 }
 0x97e   :  { %2268 = vrcp.f32 %v1645_v26 }
 0x984   :  { %v2269_v9 = vpop.eup %2268 }
 0x985   :  { %v1647_v4 = vmul.f32 %v2269_v9, %v2259_v20  ;;  %v1781_v34 = vpop.xlane.xlu0 %1780  ;;  %v1785_v57 = vpop.permute.xlu1 %1784 }
 0x986   :  { %2270 = vrcp.f32 %v1781_v34 }
 0x987   :  { %2149 = vmatmul.msk.f32.vlgmr.msrb.gmra.mxu1 %vm397_vm5, %v1647_v4  ;;  %2272 = vrcp.f32 %v1604_v1 }
 0x988   :  { %2274 = vrcp.f32 %v1740_v6 }
 0x989   :  { %2276 = vrcp.f32 %v2307_v14 }
 0x98c   :  { %v2271_v44 = vpop.eup %2270 }
 0x98d   :  { %v1783_v3 = vmul.f32 %v2271_v44, %v2261_v41  ;;  %v2273_v11 = vpop.eup %2272 }
 0x98e   :  { %v1606_v8 = vmul.f32 %v2273_v11, %v2961_v52  ;;  %v2275_v58 = vpop.eup %2274  ;;  %v996_v52 = vsel %vm127_vm1, %v993_v35, 0.0 }
 0x98f   :  { %2157 = vmatmul.msk.f32.vlgmr.msra.gmra.mxu1 %vm397_vm5, %v1783_v3  ;;  %v1742_v59 = vmul.f32 %v2275_v58, %v2257_v29  ;;  %v2277_v39 = vpop.eup %2276 }
 0x990   :  { %v929_v56 = vmul.f32 32.0, %v2277_v39  ;;  %vm933_vm8 = vweird.f32 %v2277_v39 }
 0x992   :  { %v930_v40 = vsub.f32 1.0, %v929_v56 }
 0x994   :  { %v931_v20 = vmul.f32 %v2277_v39, %v930_v40  ;;  %v2183_v40 = vld [vmem:[%s3159_s17] ss:$0 sm:$0xff] }
 0x996   :  { %v932_v31 = vadd.f32 %v2277_v39, %v931_v20 }
 0x998   :  { %v1649_v62 = vpop.permute.xlu0 %1648  ;;  %v3017_v33 = vsel %vm933_vm8, %v2277_v39, %v932_v31 }
 0x999   :  { %2146 = vmatpush.msk.msrb.mxu0 %vm401_vm2, %v1649_v62 }
 0x99a   :  { %2147 = vmatmul.msk.f32.vlgmr.msrb.gmra.mxu0 %vm397_vm5, %v1606_v8 }
 0x99b   :  { %2154 = vmatpush.msk.msra.mxu0 %vm401_vm2, %v1785_v57 }
 0x9a2   :  { %2155 = vmatmul.msk.f32.vlgmr.msra.gmra.mxu0 %vm397_vm5, %v1742_v59 }
 0x9e7   :  { %v1427_v61 = vpop.f32.mrf.mxu1 }
 0x9ec   :  { %v1536_v45 = vpop.f32.mrf.mxu0 }
 0x9ed   :  { %1839 = vrot.lane.b32.xlu1 %v1536_v45, %s2305_s6  ;;  %v2180_v45 = vld [vmem:[%s3156_s12] ss:$0 sm:$0xff] }
 0x9ef   :  { %v1563_v46 = vpop.f32.mrf.mxu1 }
 0x9f0   :  { %1854 = vrot.lane.b32.xlu2 %v1563_v46, %s2305_s6 }
 0xa04   :  { %v1699_v47 = vpop.f32.mrf.mxu1 }
 0xa05   :  { %1858 = vrot.lane.b32.xlu0 %v1699_v47, %s2300_s26 }
 0xa0c   :  { %v1835_v49 = vpop.f32.mrf.mxu1 }
 0xa17   :  { %v1672_v48 = vpop.f32.mrf.mxu0 }
 0xa18   :  { %1843 = vrot.lane.b32.xlu1 %v1672_v48, %s2300_s26 }
 0xa1f   :  { %v1808_v50 = vpop.f32.mrf.mxu0 }
 0xa20   :  { %1847 = vrot.lane.b32.xlu2 %v1808_v50, %s3184_s1  ;;  %1862 = vrot.lane.b32.xlu1 %v1835_v49, %s3184_s1  ;;  %v2181_v50 = vld [vmem:[%s3157_s13] ss:$0 sm:$0xff] }
 0xa2f   :  { %926 = vadd.xlane.f32.xlu0 %v925_v37 }
 0xa49   :  { %997 = vadd.xlane.f32.xlu2 %v996_v52 }
 0xa4a   :  { %v1855_v7 = vpop.permute.xlu2 %1854 }
 0xa4b   :  { %v1865_v29 = vsel %vm871_vm6, %v1427_v61, %v1855_v7 }
 0xa5f   :  { %v1840_v16 = vpop.permute.xlu1 %1839 }
 0xa60   :  { %v1850_v54 = vsel %vm871_vm6, %v1401_v60, %v1840_v16 }
 0xa77   :  { %v1859_v32 = vpop.permute.xlu0 %1858 }
 0xa78   :  { %v1866_v30 = vsel %vm312_vm3, %v1865_v29, %v1859_v32 }
 0xa7a   :  { %v1848_v17 = vpop.permute.xlu2 %1847 }
 0xa8a   :  { %v1844_v2 = vpop.permute.xlu1 %1843 }
 0xa8b   :  { %v1851_v27 = vsel %vm312_vm3, %v1850_v54, %v1844_v2 }
 0xa8c   :  { %v1852_v28 = vsel %vm874_vm7, %v1851_v27, %v1848_v17 }
 0xa8d   :  { %2159 = vmatmul.msk.f32.vlgmr.msra.gmra.mxu3 %vm103_vm0, %v1852_v28 }
 0xa92   :  { %v1863_v18 = vpop.permute.xlu1 %1862 }
 0xa93   :  { %v1867_v36 = vsel %vm874_vm7, %v1866_v30, %v1863_v18  ;;  %v2182_v30 = vld [vmem:[%s3158_s16] ss:$0 sm:$0xff] }
 0xa94   :  { %2158 = vmatmul.msk.f32.vlgmr.msra.gmra.mxu2 %vm103_vm0, %v1867_v36 }
 0xaa2   :  { %v927_v41 = vpop.xlane.xlu0 %926 }
 0xaa3   :  { %v935_v43 = vmul.f32 %v3017_v33, %v927_v41 }
 0xaa5   :  { %v936_v53 = vsub.f32 %v922_v10, %v935_v43 }
 0xaa7   :  { %v937_v55 = vmul.f32 %v936_v53, %v936_v53 }
 0xaa9   :  { %v938_v38 = vsel %vm127_vm1, %v937_v55, 0.0 }
 0xaaa   :  { %939 = vadd.xlane.f32.xlu2 %v938_v38 }
 0xabc   :  { %v998_v24 = vpop.xlane.xlu2 %997 }
 0xabd   :  { %v999_v25 = vmul.f32 %v998_v24, %v3017_v33 }
 0xabf   :  { %v1000_v4 = vsub.f32 %v993_v35, %v999_v25  ;;  %v2294_v35 = vld [vmem:[%s3180_s4] sm:$0x1f] }
 0xac1   :  { %v1001_v44 = vmul.f32 %v1000_v4, %v1000_v4 }
 0xb10   :  { %v1960_v21 = vpop.f32.mrf.mxu3 }
 0xb11   :  { %v1961_v13 = vadd.f32 %v2178_v12, %v1960_v21 }
 0xb13   :  { %v1963_v15 = vadd.f32 %v1961_v13, %v2863_v5  ;;  %v1002_v5 = vsel %vm127_vm1, %v1001_v44, 0.0 }
 0xb15   :  { %v1966_v0 = vsel %vm127_vm1, %v1963_v15, 0.0 }
 0xb16   :  { %1967 = vadd.xlane.f32.xlu0 %v1966_v0 }
 0xb17   :  { %v1896_v6 = vpop.f32.mrf.mxu2 }
 0xb18   :  { %v1897_v26 = vadd.f32 %v2179_v23, %v1896_v6 }
 0xb1a   :  { %v1899_v9 = vadd.f32 %v1897_v26, %v2872_v42 }
 0xb1c   :  { %v1902_v34 = vsel %vm127_vm1, %v1899_v9, 0.0 }
 0xb1d   :  { %1903 = vadd.xlane.f32.xlu1 %v1902_v34  ;;  %v940_v1 = vpop.xlane.xlu2 %939 }
 0xb1e   :  { %v941_v3 = vmul.f32 %v940_v1, %v3017_v33 }
 0xb20   :  { %v942_v11 = vadd.f32 1e-12, %v941_v3 }
 0xb22   :  { %2278 = vrsqrt.f32 %v942_v11  ;;  %vm949_vm10 = vweird.f32 %v942_v11 }
 0xb25   :  { %1003 = vadd.xlane.f32.xlu1 %v1002_v5 }
 0xb28   :  { %v2279_v8 = vpop.eup %2278 }
 0xb29   :  { %v944_v62 = vmul.f32 %v2279_v8, %v942_v11  ;;  %vm950_vm9 = vweird.f32 %v2279_v8 }
 0xb2a   :  { %vm951_vm11 = vmor %vm949_vm10, %vm950_vm9 }
 0xb2b   :  { %v945_v57 = vmul.f32 %v2279_v8, %v944_v62  ;;  %v2184_v62 = vld [vmem:[%s3156_s12] ss:$0 sm:$0xff] }
 0xb2d   :  { %v946_v58 = vmul.f32 0.5, %v945_v57 }
 0xb2f   :  { %v947_v59 = vsub.f32 1.5, %v946_v58 }
 0xb31   :  { %v948_v60 = vmul.f32 %v2279_v8, %v947_v59  ;;  %v2185_v59 = vld [vmem:[%s3157_s13] ss:$0 sm:$0xff] }
 0xb33   :  { %v952_v42 = vsel %vm951_vm11, %v2279_v8, %v948_v60 }
 0xb34   :  { %v953_v61 = vmul.f32 %v952_v42, %v936_v53 }
 0xb36   :  { %v957_v49 = vmul.f32 %v2180_v45, %v953_v61 }
 0xb38   :  { %v961_v37 = vadd.f32 %v2181_v50, %v957_v49 }
 0xb3a   :  { %v1060_v52 = vadd.f32 %v2294_v35, %v961_v37 }
 0xb3c   :  { %v1063_v54 = vsel %vm127_vm1, %v1060_v52, 0.0 }
 0xb89   :  { %v1968_v46 = vpop.xlane.xlu0 %1967 }
 0xb8a   :  { %v1969_v47 = vmul.f32 %v1968_v46, %v3017_v33  ;;  %v2295_v46 = vld [vmem:[%s3180_s4 + $0x8] sm:$0x1f] }
 0xb8c   :  { %v3038_v48 = vsub.f32 %v1963_v15, %v1969_v47 }
 0xb8e   :  { %v1971_v51 = vmul.f32 %v3038_v48, %v3038_v48 }
 0xb90   :  { %v1904_v63 = vpop.xlane.xlu1 %1903  ;;  %v1972_v10 = vsel %vm127_vm1, %v1971_v51, 0.0  ;;  %v2186_v51 = vld [vmem:[%s3158_s16] ss:$0 sm:$0xff] }
 0xb91   :  { %v1905_v19 = vmul.f32 %v1904_v63, %v3017_v33  ;;  %1973 = vadd.xlane.f32.xlu2 %v1972_v10 }
 0xb93   :  { %v3047_v22 = vsub.f32 %v1899_v9, %v1905_v19 }
 0xb95   :  { %v1907_v16 = vmul.f32 %v3047_v22, %v3047_v22 }
 0xb97   :  { %v1908_v7 = vsel %vm127_vm1, %v1907_v16, 0.0 }
 0xb98   :  { %1909 = vadd.xlane.f32.xlu0 %v1908_v7  ;;  %v1004_v14 = vpop.xlane.xlu1 %1003 }
 0xb99   :  { %v1005_v2 = vmul.f32 %v1004_v14, %v3017_v33  ;;  %1064 = vadd.xlane.f32.xlu2 %v1063_v54 }
 0xb9b   :  { %v1006_v17 = vadd.f32 1e-12, %v1005_v2 }
 0xb9d   :  { %2280 = vrsqrt.f32 %v1006_v17  ;;  %vm1013_vm13 = vweird.f32 %v1006_v17 }
 0xba3   :  { %v2281_v27 = vpop.eup %2280 }
 0xba4   :  { %v1008_v28 = vmul.f32 %v2281_v27, %v1006_v17  ;;  %vm1014_vm12 = vweird.f32 %v2281_v27 }
 0xba5   :  { %vm1015_vm14 = vmor %vm1013_vm13, %vm1014_vm12 }
 0xba6   :  { %v1009_v39 = vmul.f32 %v2281_v27, %v1008_v28 }
 0xba8   :  { %v1010_v32 = vmul.f32 0.5, %v1009_v39 }
 0xbaa   :  { %v1011_v56 = vsub.f32 1.5, %v1010_v32 }
 0xbac   :  { %v1012_v29 = vmul.f32 %v2281_v27, %v1011_v56 }
 0xbae   :  { %v1016_v18 = vsel %vm1015_vm14, %v2281_v27, %v1012_v29  ;;  %v2188_v29 = vld [vmem:[%s3160_s18] ss:$0 sm:$0xff] }
 0xbaf   :  { %v1017_v36 = vmul.f32 %v1016_v18, %v1000_v4  ;;  %v2189_v18 = vld [vmem:[%s3161_s19] ss:$0 sm:$0xff] }
 0xbb1   :  { %v1021_v20 = vmul.f32 %v2182_v30, %v1017_v36 }
 0xbb3   :  { %v1025_v31 = vadd.f32 %v2183_v40, %v1021_v20 }
 0xbb5   :  { %v1026_v41 = vadd.f32 %v2294_v35, %v1025_v31 }
 0xbb7   :  { %v1029_v43 = vsel %vm127_vm1, %v1026_v41, 0.0 }
 0xbb8   :  { %1030 = vadd.xlane.f32.xlu1 %v1029_v43 }
 0xc04   :  { %v1974_v53 = vpop.xlane.xlu2 %1973 }
 0xc05   :  { %v1975_v55 = vmul.f32 %v1974_v53, %v3017_v33 }
 0xc07   :  { %v1976_v38 = vadd.f32 1e-12, %v1975_v55 }
 0xc09   :  { %2282 = vrsqrt.f32 %v1976_v38  ;;  %vm1983_vm4 = vweird.f32 %v1976_v38 }
 0xc0b   :  { %v1910_v12 = vpop.xlane.xlu0 %1909 }
 0xc0c   :  { %v1911_v21 = vmul.f32 %v1910_v12, %v3017_v33  ;;  %v1065_v13 = vpop.xlane.xlu2 %1064 }
 0xc0d   :  { %v1066_v15 = vmul.f32 %v1065_v13, %v3017_v33 }
 0xc0e   :  { %v1912_v23 = vadd.f32 1e-12, %v1911_v21 }
 0xc0f   :  { %v3067_v24 = vsub.f32 %v1060_v52, %v1066_v15  ;;  %v2283_v0 = vpop.eup %2282 }
 0xc10   :  { %2284 = vrsqrt.f32 %v1912_v23  ;;  %v1978_v25 = vmul.f32 %v2283_v0, %v1976_v38  ;;  %vm1919_vm0 = vweird.f32 %v1912_v23  ;;  %vm1984_vm3 = vweird.f32 %v2283_v0 }
 0xc11   :  { %v1068_v6 = vmul.f32 %v3067_v24, %v3067_v24  ;;  %vm1985_vm5 = vmor %vm1983_vm4, %vm1984_vm3 }
 0xc12   :  { %v1979_v4 = vmul.f32 %v2283_v0, %v1978_v25 }
 0xc13   :  { %v1069_v26 = vsel %vm127_vm1, %v1068_v6, 0.0 }
 0xc14   :  { %1070 = vadd.xlane.f32.xlu1 %v1069_v26  ;;  %v1980_v5 = vmul.f32 0.5, %v1979_v4 }
 0xc16   :  { %v2285_v9 = vpop.eup %2284  ;;  %v1981_v11 = vsub.f32 1.5, %v1980_v5 }
 0xc17   :  { %v1914_v34 = vmul.f32 %v2285_v9, %v1912_v23  ;;  %vm1920_vm15 = vweird.f32 %v2285_v9 }
 0xc18   :  { %vm1921_vm2 = vmor %vm1919_vm0, %vm1920_vm15  ;;  %v1982_v60 = vmul.f32 %v2283_v0, %v1981_v11 }
 0xc19   :  { %v1915_v44 = vmul.f32 %v2285_v9, %v1914_v34 }
 0xc1a   :  { %v1986_v45 = vsel %vm1985_vm5, %v2283_v0, %v1982_v60 }
 0xc1b   :  { %v1916_v1 = vmul.f32 0.5, %v1915_v44  ;;  %v1987_v50 = vmul.f32 %v1986_v45, %v3038_v48  ;;  %v2190_v44 = vld [vmem:[%s3160_s18] ss:$0 sm:$0xff] }
 0xc1d   :  { %v1917_v3 = vsub.f32 1.5, %v1916_v1  ;;  %v1991_v19 = vmul.f32 %v2186_v51, %v1987_v50  ;;  %v2191_v1 = vld [vmem:[%s3161_s19] ss:$0 sm:$0xff] }
 0xc1e   :  { %v2192_v51 = vld [vmem:[%s3160_s18] ss:$0 sm:$0xff] }
 0xc1f   :  { %v1918_v8 = vmul.f32 %v2285_v9, %v1917_v3 }
 0xc21   :  { %v1922_v57 = vsel %vm1921_vm2, %v2285_v9, %v1918_v8 }
 0xc22   :  { %v1923_v58 = vmul.f32 %v1922_v57, %v3047_v22  ;;  %v2187_v22 = vld [vmem:[%s3159_s17] ss:$0 sm:$0xff] }
 0xc23   :  { %v1995_v16 = vadd.f32 %v2187_v22, %v1991_v19 }
 0xc24   :  { %v1927_v42 = vmul.f32 %v2184_v62, %v1923_v58 }
 0xc25   :  { %v1996_v48 = vadd.f32 %v2295_v46, %v1995_v16 }
 0xc26   :  { %v1931_v61 = vadd.f32 %v2185_v59, %v1927_v42 }
 0xc27   :  { %v1999_v7 = vsel %vm127_vm1, %v1996_v48, 0.0 }
 0xc28   :  { %v2031_v47 = vadd.f32 %v2295_v46, %v1931_v61 }
 0xc2a   :  { %v2034_v49 = vsel %vm127_vm1, %v2031_v47, 0.0 }
 0xc2b   :  { %v1031_v63 = vpop.xlane.xlu1 %1030  ;;  %2035 = vadd.xlane.f32.xlu2 %v2034_v49 }
 0xc2c   :  { %v1032_v10 = vmul.f32 %v1031_v63, %v3017_v33 }
 0xc2e   :  { %v1033_v37 = vsub.f32 %v1026_v41, %v1032_v10  ;;  %v2193_v10 = vld [vmem:[%s3161_s19] ss:$0 sm:$0xff] }
 0xc30   :  { %v1034_v35 = vmul.f32 %v1033_v37, %v1033_v37 }
 0xc32   :  { %v1035_v52 = vsel %vm127_vm1, %v1034_v35, 0.0 }
 0xc33   :  { %1036 = vadd.xlane.f32.xlu0 %v1035_v52 }
 0xc3b   :  { %2000 = vadd.xlane.f32.xlu0 %v1999_v7 }
 0xc87   :  { %v1071_v14 = vpop.xlane.xlu1 %1070 }
 0xc88   :  { %v1072_v54 = vmul.f32 %v1071_v14, %v3017_v33  ;;  %v2194_v14 = vld [vmem:[%s3160_s18] ss:$0 sm:$0xff] }
 0xc8a   :  { %v1073_v2 = vadd.f32 1e-05, %v1072_v54 }
 0xc8c   :  { %2286 = vrsqrt.f32 %v1073_v2  ;;  %vm1080_vm7 = vweird.f32 %v1073_v2 }
 0xc92   :  { %v2287_v17 = vpop.eup %2286 }
 0xc93   :  { %v1075_v27 = vmul.f32 %v2287_v17, %v1073_v2  ;;  %vm1081_vm6 = vweird.f32 %v2287_v17  ;;  %v2195_v2 = vld [vmem:[%s3161_s19] ss:$0 sm:$0xff] }
 0xc94   :  { %vm1082_vm8 = vmor %vm1080_vm7, %vm1081_vm6 }
 0xc95   :  { %v1076_v28 = vmul.f32 %v2287_v17, %v1075_v27 }
 0xc97   :  { %v1077_v39 = vmul.f32 0.5, %v1076_v28 }
 0xc99   :  { %v1078_v32 = vsub.f32 1.5, %v1077_v39 }
 0xc9b   :  { %v1079_v56 = vmul.f32 %v2287_v17, %v1078_v32 }
 0xc9d   :  { %v1083_v30 = vsel %vm1082_vm8, %v2287_v17, %v1079_v56 }
 0xc9e   :  { %v1084_v36 = vmul.f32 %v1083_v30, %v3067_v24  ;;  %v2036_v40 = vpop.xlane.xlu2 %2035 }
 0xc9f   :  { %v2037_v20 = vmul.f32 %v2036_v40, %v3017_v33 }
 0xca0   :  { %v1088_v31 = vmul.f32 %v2188_v29, %v1084_v36 }
 0xca1   :  { %v2038_v41 = vsub.f32 %v2031_v47, %v2037_v20 }
 0xca2   :  { %v1092_v43 = vadd.f32 %v2189_v18, %v1088_v31 }
 0xca3   :  { %v2039_v53 = vmul.f32 %v2038_v41, %v2038_v41 }
 0xca4   :  { %1093 = vst.msk [vmem:[%s3162_s21] sm:$0x1f] %vm127_vm1, %v1092_v43 }
 0xca5   :  { %v2040_v55 = vsel %vm127_vm1, %v2039_v53, 0.0 }
 0xca6   :  { %v1037_v38 = vpop.xlane.xlu0 %1036  ;;  %2041 = vadd.xlane.f32.xlu0 %v2040_v55 }
 0xca7   :  { %v1038_v12 = vmul.f32 %v1037_v38, %v3017_v33 }
 0xca9   :  { %v1039_v21 = vadd.f32 1e-05, %v1038_v12 }
 0xcab   :  { %2288 = vrsqrt.f32 %v1039_v21  ;;  %vm1046_vm10 = vweird.f32 %v1039_v21 }
 0xcae   :  { %v2001_v13 = vpop.xlane.xlu0 %2000 }
 0xcaf   :  { %v2002_v15 = vmul.f32 %v2001_v13, %v3017_v33 }
 0xcb1   :  { %v2289_v23 = vpop.eup %2288  ;;  %v2003_v24 = vsub.f32 %v1996_v48, %v2002_v15 }
 0xcb2   :  { %v1041_v0 = vmul.f32 %v2289_v23, %v1039_v21  ;;  %vm1047_vm9 = vweird.f32 %v2289_v23 }
 0xcb3   :  { %v2004_v6 = vmul.f32 %v2003_v24, %v2003_v24  ;;  %vm1048_vm11 = vmor %vm1046_vm10, %vm1047_vm9 }
 0xcb4   :  { %v1042_v25 = vmul.f32 %v2289_v23, %v1041_v0 }
 0xcb5   :  { %v2005_v26 = vsel %vm127_vm1, %v2004_v6, 0.0 }
 0xcb6   :  { %v1043_v9 = vmul.f32 0.5, %v1042_v25  ;;  %2006 = vadd.xlane.f32.xlu1 %v2005_v26 }
 0xcb8   :  { %v1044_v4 = vsub.f32 1.5, %v1043_v9 }
 0xcba   :  { %v1045_v34 = vmul.f32 %v2289_v23, %v1044_v4 }
 0xcbc   :  { %v1049_v5 = vsel %vm1048_vm11, %v2289_v23, %v1045_v34 }
 0xcbd   :  { %v1050_v3 = vmul.f32 %v1049_v5, %v1033_v37 }
 0xcbf   :  { %v1054_v11 = vmul.f32 %v2190_v44, %v1050_v3 }
 0xcc1   :  { %v1058_v8 = vadd.f32 %v2191_v1, %v1054_v11 }
 0xcc3   :  { %1059 = vst.msk [vmem:[%s3163_s20] sm:$0x1f] %vm127_vm1, %v1058_v8 }
 0xd19   :  { %v2042_v62 = vpop.xlane.xlu0 %2041 }
 0xd1a   :  { %v2043_v57 = vmul.f32 %v2042_v62, %v3017_v33 }
 0xd1c   :  { %v2044_v58 = vadd.f32 1e-05, %v2043_v57 }
 0xd1e   :  { %2290 = vrsqrt.f32 %v2044_v58  ;;  %vm2051_vm13 = vweird.f32 %v2044_v58 }
 0xd24   :  { %v2291_v59 = vpop.eup %2290 }
 0xd25   :  { %v2046_v60 = vmul.f32 %v2291_v59, %v2044_v58  ;;  %vm2052_vm12 = vweird.f32 %v2291_v59 }
 0xd26   :  { %vm2053_vm14 = vmor %vm2051_vm13, %vm2052_vm12 }
 0xd27   :  { %v2047_v42 = vmul.f32 %v2291_v59, %v2046_v60 }
 0xd29   :  { %v2048_v61 = vmul.f32 0.5, %v2047_v42  ;;  %v2007_v45 = vpop.xlane.xlu1 %2006 }
 0xd2a   :  { %v2008_v46 = vmul.f32 %v2007_v45, %v3017_v33 }
 0xd2b   :  { %v2049_v47 = vsub.f32 1.5, %v2048_v61 }
 0xd2c   :  { %v2009_v49 = vadd.f32 1e-05, %v2008_v46 }
 0xd2d   :  { %v2050_v50 = vmul.f32 %v2291_v59, %v2049_v47 }
 0xd2e   :  { %2292 = vrsqrt.f32 %v2009_v49  ;;  %vm2016_vm0 = vweird.f32 %v2009_v49 }
 0xd2f   :  { %v2054_v63 = vsel %vm2053_vm14, %v2291_v59, %v2050_v50 }
 0xd30   :  { %v2055_v37 = vmul.f32 %v2054_v63, %v2038_v41 }
 0xd32   :  { %v2059_v19 = vmul.f32 %v2192_v51, %v2055_v37 }
 0xd34   :  { %v2293_v22 = vpop.eup %2292  ;;  %v2063_v33 = vadd.f32 %v2193_v10, %v2059_v19 }
 0xd35   :  { %v2011_v35 = vmul.f32 %v2293_v22, %v2009_v49  ;;  %vm2017_vm15 = vweird.f32 %v2293_v22 }
 0xd36   :  { %2161 = vst.msk [vmem:[%s3162_s21 + $0x8] sm:$0x1f] %vm127_vm1, %v2063_v33  ;;  %vm2018_vm2 = vmor %vm2016_vm0, %vm2017_vm15 }
 0xd37   :  { %v2012_v52 = vmul.f32 %v2293_v22, %v2011_v35 }
 0xd39   :  { %v2013_v16 = vmul.f32 0.5, %v2012_v52 }
 0xd3b   :  { %v2014_v48 = vsub.f32 1.5, %v2013_v16 }
 0xd3d   :  { %v2015_v7 = vmul.f32 %v2293_v22, %v2014_v48 }
 0xd3f   :  { %v2019_v54 = vsel %vm2018_vm2, %v2293_v22, %v2015_v7 }
 0xd40   :  { %v2020_v17 = vmul.f32 %v2019_v54, %v2003_v24 }
 0xd42   :  { %v2024_v27 = vmul.f32 %v2194_v14, %v2020_v17 }
 0xd44   :  { %v2028_v28 = vadd.f32 %v2195_v2, %v2024_v27 }
 0xd46   :  { %2160 = vst.msk [vmem:[%s3163_s20 + $0x8] sm:$0x1f] %vm127_vm1, %v2028_v28 }

// kernel: _damt_core.16
= control target key start
LH: loop header
LB: loop body
LE: loop exit
PB: predicated region body
PF: predicated region fallthrough
CT: control target
= control target key end

     0   :  { %vm89_vm0 = vcmask 126976   ;;  %v3789_v10 = vmov 16.0   ;;  %vm59_vm2 = vcmask 261120   ;;  %s3790_s16 = smov 96   ;;  %vm130_vm12 = vcmask 130048   ;;  %s3791_s23 = smov 120   ;;  %s4796_s2 = inlined_call_operand.vmem [shape: f32[2,5,5,16], index: 2, kind: input, shape index: {}]   ;;  %s4797_s3 = inlined_call_operand.vmem [shape: f32[32,96], index: 3, kind: input, shape index: {}]   ;;  %s4798_s0 = inlined_call_operand.vmem [shape: f32[2,5,32], index: 0, kind: input, shape index: {}]   ;;  %s4799_s5 = inlined_call_operand.vmem [shape: f32[1,16], index: 5, kind: input, shape index: {}]   ;;  %s4800_s6 = inlined_call_operand.vmem [shape: f32[1,16], index: 6, kind: input, shape index: {}]   ;;  %s4801_s4 = inlined_call_operand.vmem [shape: f32[1,96], index: 4, kind: input, shape index: {}]   ;;  %s4802_s8 = inlined_call_operand.vmem [shape: f32[1,16], index: 8, kind: input, shape index: {}]   ;;  %s4803_s7 = inlined_call_operand.vmem [shape: f32[16,16], index: 7, kind: input, shape index: {}]   ;;  %s4804_s1 = inlined_call_operand.vmem [shape: f32[2,1,5], index: 1, kind: input, shape index: {}]   ;;  %s4805_s9 = inlined_call_operand.vmem [shape: f32[32,32], index: 9, kind: input, shape index: {}]   ;;  %s4806_s10 = inlined_call_operand.vmem [shape: f32[1,32], index: 10, kind: input, shape index: {}]   ;;  %s4807_s11 = inlined_call_operand.vmem [shape: f32[1,32], index: 11, kind: input, shape index: {}]   ;;  %s4808_s12 = inlined_call_operand.vmem [shape: f32[1,32], index: 12, kind: input, shape index: {}]   ;;  %s4809_s13 = inlined_call_operand.vmem [shape: f32[2,5,32], index: 13, kind: output, shape index: {}]  }
   0x1   :  { %v88_v0 = vld [vmem:[%s4796_s2 + $0x20] sm:$0x1f]  ;;  %v85_v1 = vld [vmem:[%s4796_s2 + $0x8] sm:$0x1f]  ;;  %v87_v4 = vld [vmem:[%s4796_s2 + $0x18] sm:$0x1f]  ;;  %3721 = vrcp.f32 %v3789_v10 }
   0x2   :  { %v295_v2 = vsel %vm89_vm0, %v88_v0, 0.0  ;;  %v154_v3 = vsel %vm89_vm0, %v85_v1, 0.0  ;;  %v248_v5 = vsel %vm89_vm0, %v87_v4, 0.0  ;;  %v86_v6 = vld [vmem:[%s4796_s2 + $0x10] sm:$0x1f]  ;;  %v3898_v15 = vld [vmem:[%s4797_s3 + $0x18] sm:$0xff] }
   0x3   :  { %296 = vadd.xlane.f32.xlu1 %v295_v2  ;;  %155 = vadd.xlane.f32.xlu0 %v154_v3  ;;  %v84_v7 = vld [vmem:[%s4796_s2] sm:$0x1f]  ;;  %v201_v8 = vsel %vm89_vm0, %v86_v6, 0.0  ;;  %v3903_v16 = vld [vmem:[%s4797_s3 + $0x10] sm:$0xff]  ;;  %v3909_v18 = vld [vmem:[%s4797_s3 + $0x8] sm:$0xff]  ;;  %s3792_s26 = smov 64  }
   0x4   :  { %249 = vadd.xlane.f32.xlu2 %v248_v5  ;;  %v90_v9 = vsel %vm89_vm0, %v84_v7, 0.0  ;;  %75 = vmatpush.msra.mxu0 %v3898_v15  ;;  %v3915_v19 = vld [vmem:[%s4797_s3] sm:$0xff]  ;;  %v52_v47 = vld [vmem:[%s4803_s7 + $0x8] sm:$0xff]  ;;  %s3793_s27 = smov 88   ;;  %s3794_s3 = smov 56  }
   0x5   :  { %v54_v20 = vld [vmem:[%s4798_s0] sm:$0x1f]  ;;  %195 = vmatpush.msra.mxu2 %v52_v47  ;;  %148 = vmatpush.msra.mxu1 %v52_v47  ;;  %s3795_s28 = smov 112   ;;  %s3796_s29 = smov 80  }
   0x6   :  { %76 = vmatpush.msra.mxu0 %v3903_v16  ;;  %v51_v48 = vld [vmem:[%s4803_s7] sm:$0xff]  ;;  %242 = vmatpush.msra.mxu3 %v52_v47  ;;  %s3797_s30 = smov 48   ;;  %s3798_s14 = smov 104  }
   0x7   :  { %v3722_v11 = vpop.eup %3721  ;;  %196 = vmatpush.msra.mxu2 %v51_v48  ;;  %149 = vmatpush.msra.mxu1 %v51_v48  ;;  %v3711_v2 = vld [vmem:[%s4801_s4] ss:$0 sm:$0xff]  ;;  %s3799_s15 = smov 72   ;;  %s4810_s17 = smov 40  }
   0x8   :  { %v94_v12 = vmul.f32 16.0, %v3722_v11  ;;  %vm98_vm1 = vweird.f32 %v3722_v11  ;;  %77 = vmatpush.msra.mxu0 %v3909_v18  ;;  %243 = vmatpush.msra.mxu3 %v51_v48  ;;  %s3801_s20 = smov 8  }
   0x9   :  { %336 = vmatpush.msrb.mxu2 %v52_v47  ;;  %289 = vmatpush.msrb.mxu1 %v52_v47 }
   0xa   :  { %v95_v13 = vsub.f32 1.0, %v94_v12  ;;  %78 = vmatpush.msra.mxu0 %v3915_v19 }
   0xb   :  { %202 = vadd.xlane.f32.xlu1 %v201_v8  ;;  %91 = vadd.xlane.f32.xlu0 %v90_v9 }
   0xc   :  { %v96_v14 = vmul.f32 %v3722_v11, %v95_v13  ;;  %3479 = vmatmul.msk.f32.vlgmr.msra.gmra.mxu0 %vm59_vm2, %v54_v20  ;;  %337 = vmatpush.msrb.mxu2 %v51_v48 }
   0xd   :  { %290 = vmatpush.msrb.mxu1 %v51_v48 }
   0xe   :  { %v97_v17 = vadd.f32 %v3722_v11, %v96_v14 }
  0x10   :  { %v3921_v21 = vsel %vm98_vm1, %v3722_v11, %v97_v17 }
  0x76   :  { %v297_v22 = vpop.xlane.xlu1 %296  ;;  %v156_v23 = vpop.xlane.xlu0 %155 }
  0x77   :  { %v298_v24 = vmul.f32 %v297_v22, %v3921_v21  ;;  %v157_v25 = vmul.f32 %v156_v23, %v3921_v21  ;;  %v250_v30 = vpop.xlane.xlu2 %249 }
  0x78   :  { %v251_v37 = vmul.f32 %v250_v30, %v3921_v21 }
  0x79   :  { %v3927_v26 = vsub.f32 %v88_v0, %v298_v24  ;;  %v3929_v27 = vsub.f32 %v85_v1, %v157_v25  ;;  %v3709_v25 = vld [vmem:[%s4799_s5] ss:$0 sm:$0xff] }
  0x7a   :  { %v3944_v40 = vsub.f32 %v87_v4, %v251_v37 }
  0x7b   :  { %v300_v28 = vmul.f32 %v3927_v26, %v3927_v26  ;;  %v159_v29 = vmul.f32 %v3929_v27, %v3929_v27 }
  0x7c   :  { %v253_v45 = vmul.f32 %v3944_v40, %v3944_v40 }
  0x7d   :  { %v301_v31 = vsel %vm89_vm0, %v300_v28, 0.0  ;;  %v160_v32 = vsel %vm89_vm0, %v159_v29, 0.0 }
  0x7e   :  { %302 = vadd.xlane.f32.xlu1 %v301_v31  ;;  %v203_v33 = vpop.xlane.xlu1 %202  ;;  %161 = vadd.xlane.f32.xlu2 %v160_v32  ;;  %v92_v34 = vpop.xlane.xlu0 %91  ;;  %v254_v46 = vsel %vm89_vm0, %v253_v45, 0.0  ;;  %v3710_v31 = vld [vmem:[%s4800_s6] ss:$0 sm:$0xff] }
  0x7f   :  { %v204_v35 = vmul.f32 %v203_v33, %v3921_v21  ;;  %v100_v36 = vmul.f32 %v3921_v21, %v92_v34 }
  0x81   :  { %v3940_v38 = vsub.f32 %v86_v6, %v204_v35  ;;  %v3942_v39 = vsub.f32 %v84_v7, %v100_v36 }
  0x83   :  { %v206_v41 = vmul.f32 %v3940_v38, %v3940_v38  ;;  %v102_v42 = vmul.f32 %v3942_v39, %v3942_v39 }
  0x85   :  { %v207_v43 = vsel %vm89_vm0, %v206_v41, 0.0  ;;  %v103_v44 = vsel %vm89_vm0, %v102_v42, 0.0 }
  0x86   :  { %208 = vadd.xlane.f32.xlu2 %v207_v43  ;;  %104 = vadd.xlane.f32.xlu0 %v103_v44 }
  0x89   :  { %v80_v3 = vpop.f32.mrf.mxu0 }
  0x8a   :  { %v3968_v7 = vadd.f32 %v3711_v2, %v80_v3 }
  0x8e   :  { %255 = vadd.xlane.f32.xlu0 %v254_v46 }
  0x97   :  { %494 = vrot.lane.b32.xlu1 %v3968_v7, %s3790_s16 }
  0xf1   :  { %v303_v49 = vpop.xlane.xlu1 %302  ;;  %v162_v50 = vpop.xlane.xlu2 %161 }
  0xf2   :  { %v304_v51 = vmul.f32 %v303_v49, %v3921_v21  ;;  %v163_v52 = vmul.f32 %v162_v50, %v3921_v21 }
  0xf4   :  { %v305_v53 = vadd.f32 1e-05, %v304_v51  ;;  %v164_v54 = vadd.f32 1e-05, %v163_v52 }
  0xf6   :  { %3723 = vrsqrt.f32 %v305_v53  ;;  %vm312_vm4 = vweird.f32 %v305_v53  ;;  %vm171_vm6 = vweird.f32 %v164_v54 }
  0xf7   :  { %3725 = vrsqrt.f32 %v164_v54 }
  0xf9   :  { %v209_v55 = vpop.xlane.xlu2 %208  ;;  %v105_v56 = vpop.xlane.xlu0 %104 }
  0xfa   :  { %v210_v57 = vmul.f32 %v209_v55, %v3921_v21  ;;  %v106_v58 = vmul.f32 %v105_v56, %v3921_v21 }
  0xfc   :  { %v3724_v59 = vpop.eup %3723  ;;  %v211_v60 = vadd.f32 1e-05, %v210_v57  ;;  %v107_v61 = vadd.f32 1e-05, %v106_v58 }
  0xfd   :  { %v3726_v62 = vpop.eup %3725  ;;  %v307_v63 = vmul.f32 %v3724_v59, %v305_v53  ;;  %vm313_vm5 = vweird.f32 %v3724_v59 }
  0xfe   :  { %v166_v0 = vmul.f32 %v3726_v62, %v164_v54  ;;  %3727 = vrsqrt.f32 %v211_v60  ;;  %vm172_vm3 = vweird.f32 %v3726_v62  ;;  %vm314_vm8 = vmor %vm312_vm4, %vm313_vm5  ;;  %vm218_vm9 = vweird.f32 %v211_v60 }
  0xff   :  { %v308_v1 = vmul.f32 %v3724_v59, %v307_v63  ;;  %3729 = vrsqrt.f32 %v107_v61  ;;  %vm173_vm7 = vmor %vm171_vm6, %vm172_vm3  ;;  %vm114_vm14 = vweird.f32 %v107_v61  ;;  %vm342_vm5 = vcmask 64512  }
 0x100   :  { %v167_v4 = vmul.f32 %v3726_v62, %v166_v0  ;;  %vm540_vm6 = vcmask 1044480  }
 0x101   :  { %v309_v5 = vmul.f32 0.5, %v308_v1  ;;  %v256_v6 = vpop.xlane.xlu0 %255 }
 0x102   :  { %v168_v8 = vmul.f32 0.5, %v167_v4  ;;  %v257_v9 = vmul.f32 %v256_v6, %v3921_v21 }
 0x103   :  { %v310_v10 = vsub.f32 1.5, %v309_v5 }
 0x104   :  { %v3728_v11 = vpop.eup %3727  ;;  %v169_v12 = vsub.f32 1.5, %v168_v8  ;;  %v258_v13 = vadd.f32 1e-05, %v257_v9 }
 0x105   :  { %v3730_v14 = vpop.eup %3729  ;;  %v213_v17 = vmul.f32 %v3728_v11, %v211_v60  ;;  %v311_v20 = vmul.f32 %v3724_v59, %v310_v10  ;;  %vm219_vm10 = vweird.f32 %v3728_v11 }
 0x106   :  { %v170_v22 = vmul.f32 %v3726_v62, %v169_v12  ;;  %v109_v23 = vmul.f32 %v3730_v14, %v107_v61  ;;  %3731 = vrsqrt.f32 %v258_v13  ;;  %vm115_vm11 = vweird.f32 %v3730_v14  ;;  %vm220_vm13 = vmor %vm218_vm9, %vm219_vm10  ;;  %v3712_v61 = vld [vmem:[%s4802_s8] ss:$0 sm:$0xff] }
 0x107   :  { %v214_v24 = vmul.f32 %v3728_v11, %v213_v17  ;;  %v315_v33 = vsel %vm314_vm8, %v3724_v59, %v311_v20  ;;  %vm116_vm15 = vmor %vm114_vm14, %vm115_vm11  ;;  %vm265_vm3 = vweird.f32 %v258_v13  ;;  %vm487_vm8 = vcmask 1041408  }
 0x108   :  { %v174_v28 = vsel %vm173_vm7, %v3726_v62, %v170_v22  ;;  %v110_v29 = vmul.f32 %v3730_v14, %v109_v23  ;;  %v316_v42 = vmul.f32 %v315_v33, %v3927_v26  ;;  %v3993_v62 = vmul.f32 0.35355338, %v3968_v7 }
 0x109   :  { %v215_v30 = vmul.f32 0.5, %v214_v24  ;;  %v175_v32 = vmul.f32 %v174_v28, %v3929_v27  ;;  %v495_v1 = vpop.permute.xlu1 %494  ;;  %vm485_vm7 = vcmask 1040384   ;;  %vm489_vm9 = vcmask 1042432  }
 0x10a   :  { %v111_v34 = vmul.f32 0.5, %v110_v29  ;;  %v317_v52 = vmul.f32 %v3709_v25, %v316_v42  ;;  %v4037_v12 = vrot.slane %v3993_v62, 3  ;;  %vm491_vm10 = vcmask 1043456  }
 0x10b   :  { %v216_v35 = vsub.f32 1.5, %v215_v30  ;;  %v176_v36 = vmul.f32 %v3709_v25, %v175_v32  ;;  %vm522_vm11 = vcmask 36864  }
 0x10c   :  { %v3732_v37 = vpop.eup %3731  ;;  %v112_v41 = vsub.f32 1.5, %v111_v34  ;;  %v318_v58 = vadd.f32 %v3710_v31, %v317_v52 }
 0x10d   :  { %v217_v43 = vmul.f32 %v3728_v11, %v216_v35  ;;  %v260_v44 = vmul.f32 %v3732_v37, %v258_v13  ;;  %v177_v45 = vadd.f32 %v3710_v31, %v176_v36  ;;  %vm266_vm1 = vweird.f32 %v3732_v37  ;;  %v4076_v36 = vld [vmem:[%s4804_s1] ss:$0 sm:$0xff] }
 0x10e   :  { %v113_v46 = vmul.f32 %v3730_v14, %v112_v41  ;;  %vm267_vm4 = vmor %vm265_vm3, %vm266_vm1  ;;  %v4040_v13 = vrot.slane %v3993_v62, 4 }
 0x10f   :  { %v221_v47 = vsel %vm220_vm13, %v3728_v11, %v217_v43  ;;  %v261_v27 = vmul.f32 %v3732_v37, %v260_v44  ;;  %3481 = vmatmul.msk.f32.vlgmr.msra.gmra.mxu2 %vm130_vm12, %v177_v45  ;;  %v4026_v11 = vrot.slane %v3993_v62, 2  ;;  %vm536_vm13 = vcmask 39936  }
 0x110   :  { %v117_v48 = vsel %vm116_vm15, %v3730_v14, %v113_v46  ;;  %v222_v49 = vmul.f32 %v221_v47, %v3940_v38 }
 0x111   :  { %v262_v50 = vmul.f32 0.5, %v261_v27  ;;  %v118_v51 = vmul.f32 %v117_v48, %v3942_v39 }
 0x112   :  { %v223_v53 = vmul.f32 %v3709_v25, %v222_v49 }
 0x113   :  { %v263_v26 = vsub.f32 1.5, %v262_v50  ;;  %v122_v54 = vmul.f32 %v3709_v25, %v118_v51 }
 0x114   :  { %v224_v55 = vadd.f32 %v3710_v31, %v223_v53 }
 0x115   :  { %v264_v56 = vmul.f32 %v3732_v37, %v263_v26  ;;  %v126_v57 = vadd.f32 %v3710_v31, %v122_v54 }
 0x116   :  { %3482 = vmatmul.msk.f32.vlgmr.msra.gmra.mxu3 %vm130_vm12, %v224_v55 }
 0x117   :  { %v268_v59 = vsel %vm267_vm4, %v3732_v37, %v264_v56  ;;  %3480 = vmatmul.msk.f32.vlgmr.msra.gmra.mxu1 %vm130_vm12, %v126_v57  ;;  %3484 = vmatmul.msk.f32.vlgmr.msrb.gmra.mxu2 %vm130_vm12, %v318_v58 }
 0x118   :  { %v269_v38 = vmul.f32 %v268_v59, %v3944_v40  ;;  %v4002_v40 = vrot.slane %v3993_v62, 1 }
 0x11a   :  { %v270_v39 = vmul.f32 %v3709_v25, %v269_v38 }
 0x11c   :  { %v271_v60 = vadd.f32 %v3710_v31, %v270_v39 }
 0x11f   :  { %3483 = vmatmul.msk.f32.vlgmr.msrb.gmra.mxu1 %vm130_vm12, %v271_v60 }
 0x192   :  { %v198_v63 = vpop.f32.mrf.mxu2 }
 0x193   :  { %v3995_v0 = vadd.f32 %v3712_v61, %v198_v63 }
 0x194   :  { %v151_v2 = vpop.f32.mrf.mxu1 }
 0x195   :  { %v3997_v3 = vadd.f32 %v3712_v61, %v151_v2  ;;  %3487 = vmatpush.xpose.msk.msrb.mxu0 %vm342_vm5, %v3995_v0 }
 0x197   :  { %3485 = vmatpush.xpose.msk.msrb.mxu3 %vm342_vm5, %v3997_v3  ;;  %534 = vrot.lane.b32.xlu1 %v3997_v3, %s3791_s23 }
 0x198   :  { %3488 = vmatmul.msk.f32.vlgmr.msrb.gmra.mxu0 %vm342_vm5, %v4002_v40 }
 0x199   :  { %3495 = vmatpush.xpose.msk.msra.mxu0 %vm342_vm5, %v495_v1  ;;  %v245_v4 = vpop.f32.mrf.mxu3 }
 0x19a   :  { %v4011_v5 = vadd.f32 %v3712_v61, %v245_v4  ;;  %v339_v6 = vpop.f32.mrf.mxu2  ;;  %3486 = vmatmul.msk.f32.vlgmr.msrb.gmra.mxu3 %vm342_vm5, %v3993_v62 }
 0x19b   :  { %v4015_v8 = vadd.f32 %v3712_v61, %v339_v6 }
 0x19c   :  { %v292_v9 = vpop.f32.mrf.mxu1  ;;  %591 = vrot.lane.b32.xlu0 %v4011_v5, %s3791_s23  ;;  %3489 = vmatpush.xpose.msk.msra.mxu1 %vm342_vm5, %v4011_v5 }
 0x19d   :  { %v4021_v10 = vadd.f32 %v3712_v61, %v292_v9  ;;  %3493 = vmatpush.xpose.msk.msra.mxu3 %vm342_vm5, %v4015_v8 }
 0x19f   :  { %3491 = vmatpush.xpose.msk.msra.mxu2 %vm342_vm5, %v4021_v10  ;;  %618 = vrot.lane.b32.xlu1 %v4021_v10, %s3791_s23 }
 0x1a0   :  { %3490 = vmatmul.msk.f32.vlgmr.msra.gmra.mxu1 %vm342_vm5, %v4026_v11  ;;  %3496 = vmatmul.msk.f32.vlgmr.msra.gmra.mxu0 %vm342_vm5, %v3993_v62 }
 0x1a2   :  { %3492 = vmatmul.msk.f32.vlgmr.msra.gmra.mxu2 %vm342_vm5, %v4037_v12  ;;  %3494 = vmatmul.msk.f32.vlgmr.msra.gmra.mxu3 %vm342_vm5, %v4040_v13 }
 0x1a4   :  { %711 = vrot.lane.b32.xlu0 %v3993_v62, %s3791_s23 }
 0x1a7   :  { %783 = vrot.lane.b32.xlu1 %v4037_v12, %s3791_s23 }
 0x1ac   :  { %807 = vrot.lane.b32.xlu0 %v4040_v13, %s3791_s23 }
 0x1af   :  { %759 = vrot.lane.b32.xlu1 %v4026_v11, %s3791_s23 }
 0x209   :  { %v4054_v14 = vpop.permute.xlu1 %534 }
 0x20a   :  { %3497 = vmatpush.msk.msrb.mxu1 %vm540_vm6, %v4054_v14 }
 0x20e   :  { %v4058_v17 = vpop.permute.xlu0 %591 }
 0x20f   :  { %3501 = vmatpush.msk.msrb.mxu3 %vm540_vm6, %v4058_v17 }
 0x211   :  { %3509 = vmatpush.xpose.msk.msra.mxu3 %vm342_vm5, %v3997_v3  ;;  %v4064_v20 = vpop.permute.xlu1 %618 }
 0x212   :  { %3503 = vmatpush.msk.msrb.mxu0 %vm540_vm6, %v4064_v20 }
 0x214   :  { %3511 = vmatpush.xpose.msk.msra.mxu0 %vm342_vm5, %v3995_v0 }
 0x215   :  { %v392_v23 = vpop.f32.mrf.mxu0 }
 0x216   :  { %v474_v25 = vrot.slane %v392_v23, 7  ;;  %v712_v52 = vpop.permute.xlu0 %711 }
 0x219   :  { %v784_v59 = vpop.permute.xlu1 %783 }
 0x21d   :  { %v366_v22 = vpop.f32.mrf.mxu3  ;;  %v418_v24 = vpop.f32.mrf.mxu1 }
 0x21e   :  { %v477_v28 = vrot.slane %v418_v24, 6  ;;  %v486_v29 = vsel %vm485_vm7, %v366_v22, %v474_v25  ;;  %v515_v37 = vpop.f32.mrf.mxu0  ;;  %v808_v53 = vpop.permute.xlu0 %807 }
 0x220   :  { %v488_v34 = vsel %vm487_vm8, %v486_v29, %v477_v28 }
 0x221   :  { %v760_v61 = vpop.permute.xlu1 %759 }
 0x225   :  { %v444_v30 = vpop.f32.mrf.mxu2  ;;  %v470_v31 = vpop.f32.mrf.mxu3 }
 0x226   :  { %v480_v32 = vrot.slane %v444_v30, 5  ;;  %v483_v33 = vrot.slane %v470_v31, 4 }
 0x228   :  { %v490_v35 = vsel %vm489_vm9, %v488_v34, %v480_v32 }
 0x229   :  { %v492_v41 = vsel %vm491_vm10, %v490_v35, %v483_v33 }
 0x22a   :  { %v516_v42 = vadd.f32 %v515_v37, %v492_v41 }
 0x22c   :  { %v521_v43 = vadd.f32 %v4076_v36, %v516_v42 }
 0x22e   :  { %v523_v44 = vsel %vm522_vm11, %v521_v43, -inf }
 0x22f   :  { %524 = vmax.xlane.f32.xlu2 %v523_v44 }
 0x247   :  { %564 = vrot.lane.b32.xlu2 %v3995_v0, %s3791_s23 }
 0x24f   :  { %687 = vrot.lane.b32.xlu2 %v3968_v7, %s3792_s26 }
 0x257   :  { %645 = vrot.lane.b32.xlu2 %v4015_v8, %s3791_s23 }
 0x25f   :  { %735 = vrot.lane.b32.xlu2 %v4002_v40, %s3791_s23 }
 0x2a2   :  { %v525_v45 = vpop.xlane.xlu2 %524 }
 0x2a3   :  { %v526_v46 = vsub.f32 %v521_v43, %v525_v45 }
 0x2a5   :  { %v527_v47 = vmul.f32 1.442695, %v526_v46 }
 0x2a7   :  { %3733 = vpow2.f32 %v527_v47 }
 0x2aa   :  { %v4089_v27 = vpop.permute.xlu2 %564 }
 0x2ab   :  { %3499 = vmatpush.msk.msrb.mxu2 %vm540_vm6, %v4089_v27 }
 0x2ad   :  { %v3734_v48 = vpop.eup %3733 }
 0x2ae   :  { %v529_v49 = vsel %vm522_vm11, %v3734_v48, 0.0 }
 0x2af   :  { %530 = vadd.xlane.f32.xlu0 %v529_v49 }
 0x2b2   :  { %v688_v50 = vpop.permute.xlu2 %687 }
 0x2b3   :  { %3507 = vmatpush.msk.msra.mxu2 %vm540_vm6, %v688_v50 }
 0x2ba   :  { %v4095_v51 = vpop.permute.xlu2 %645 }
 0x2bb   :  { %3505 = vmatpush.msk.msra.mxu1 %vm540_vm6, %v4095_v51 }
 0x2c2   :  { %v736_v60 = vpop.permute.xlu2 %735 }
 0x2c3   :  { %847 = vrot.lane.b32.xlu0 %v3968_v7, %s3793_s27 }
 0x2cb   :  { %1014 = vrot.lane.b32.xlu0 %v3968_v7, %s3794_s3 }
 0x2d3   :  { %1038 = vrot.lane.b32.xlu0 %v3993_v62, %s3795_s28 }
 0x2db   :  { %1110 = vrot.lane.b32.xlu0 %v4037_v12, %s3795_s28 }
 0x2e3   :  { %1134 = vrot.lane.b32.xlu0 %v4040_v13, %s3795_s28 }
 0x2eb   :  { %1062 = vrot.lane.b32.xlu0 %v4002_v40, %s3795_s28 }
 0x322   :  { %v531_v26 = vpop.xlane.xlu0 %530 }
 0x323   :  { %3735 = vrcp.f32 %v531_v26 }
 0x329   :  { %v3736_v54 = vpop.eup %3735 }
 0x32a   :  { %v533_v55 = vmul.f32 %v3736_v54, %v3734_v48 }
 0x32c   :  { %3498 = vmatmul.msk.f32.vlgmr.msrb.gmra.mxu1 %vm536_vm13, %v533_v55  ;;  %v563_v56 = vrot.slane %v533_v55, 1  ;;  %v590_v57 = vrot.slane %v533_v55, 2  ;;  %v617_v58 = vrot.slane %v533_v55, 3  ;;  %v644_v38 = vrot.slane %v533_v55, 4 }
 0x32d   :  { %3513 = vmatpush.xpose.msk.msrb.mxu1 %vm342_vm5, %v4011_v5 }
 0x32e   :  { %3500 = vmatmul.msk.f32.vlgmr.msrb.gmra.mxu2 %vm536_vm13, %v563_v56  ;;  %3502 = vmatmul.msk.f32.vlgmr.msrb.gmra.mxu3 %vm536_vm13, %v590_v57 }
 0x32f   :  { %3504 = vmatmul.msk.f32.vlgmr.msrb.gmra.mxu0 %vm536_vm13, %v617_v58  ;;  %3515 = vmatpush.xpose.msk.msrb.mxu2 %vm342_vm5, %v4021_v10 }
 0x330   :  { %3517 = vmatpush.xpose.msk.msrb.mxu3 %vm342_vm5, %v4015_v8 }
 0x334   :  { %3506 = vmatmul.msk.f32.vlgmr.msra.gmra.mxu1 %vm536_vm13, %v644_v38 }
 0x335   :  { %3521 = vmatpush.msk.msra.mxu1 %vm540_vm6, %v4054_v14  ;;  %v848_v39 = vpop.permute.xlu0 %847 }
 0x336   :  { %3508 = vmatmul.msk.f32.vlgmr.msra.gmra.mxu2 %vm536_vm13, %v533_v55  ;;  %3510 = vmatmul.msk.f32.vlgmr.msra.gmra.mxu3 %vm342_vm5, %v712_v52 }
 0x337   :  { %3512 = vmatmul.msk.f32.vlgmr.msra.gmra.mxu0 %vm342_vm5, %v736_v60  ;;  %3523 = vmatpush.msk.msra.mxu2 %vm540_vm6, %v4089_v27 }
 0x338   :  { %3519 = vmatpush.xpose.msk.msrb.mxu0 %vm342_vm5, %v848_v39  ;;  %3525 = vmatpush.msk.msra.mxu3 %vm540_vm6, %v4058_v17 }
 0x33c   :  { %3527 = vmatpush.msk.msra.mxu0 %vm540_vm6, %v4064_v20  ;;  %3514 = vmatmul.msk.f32.vlgmr.msrb.gmra.mxu1 %vm342_vm5, %v760_v61 }
 0x33d   :  { %3529 = vmatpush.msk.msrb.mxu1 %vm540_vm6, %v4095_v51  ;;  %v1015_v63 = vpop.permute.xlu0 %1014 }
 0x33e   :  { %3516 = vmatmul.msk.f32.vlgmr.msrb.gmra.mxu2 %vm342_vm5, %v784_v59  ;;  %3518 = vmatmul.msk.f32.vlgmr.msrb.gmra.mxu3 %vm342_vm5, %v808_v53 }
 0x33f   :  { %3520 = vmatmul.msk.f32.vlgmr.msrb.gmra.mxu0 %vm342_vm5, %v712_v52  ;;  %3531 = vmatpush.msk.msrb.mxu2 %vm540_vm6, %v1015_v63 }
 0x340   :  { %3533 = vmatpush.xpose.msk.msrb.mxu3 %vm342_vm5, %v3997_v3  ;;  %3535 = vmatpush.xpose.msk.msrb.mxu0 %vm342_vm5, %v3995_v0 }
 0x345   :  { %v1039_v38 = vpop.permute.xlu0 %1038 }
 0x34d   :  { %v1111_v39 = vpop.permute.xlu0 %1110 }
 0x3a9   :  { %v560_v1 = vpop.f32.mrf.mxu1 }
 0x3ac   :  { %v641_v2 = vpop.f32.mrf.mxu0 }
 0x3ad   :  { %v678_v24 = vrot.slane %v641_v2, 5 }
 0x3b1   :  { %v587_v4 = vpop.f32.mrf.mxu2  ;;  %v614_v6 = vpop.f32.mrf.mxu3 }
 0x3b2   :  { %v672_v9 = vrot.slane %v587_v4, 7  ;;  %v675_v22 = vrot.slane %v614_v6, 6  ;;  %v668_v23 = vpop.f32.mrf.mxu1 }
 0x3b3   :  { %v681_v29 = vrot.slane %v668_v23, 4 }
 0x3b4   :  { %v683_v25 = vsel %vm485_vm7, %v560_v1, %v672_v9  ;;  %v756_v35 = vpop.f32.mrf.mxu0  ;;  %v1135_v1 = vpop.permute.xlu0 %1134 }
 0x3b5   :  { %v684_v28 = vsel %vm487_vm8, %v683_v25, %v675_v22  ;;  %v832_v41 = vrot.slane %v756_v35, 7 }
 0x3b6   :  { %v685_v30 = vsel %vm489_vm9, %v684_v28, %v678_v24 }
 0x3b7   :  { %v686_v31 = vsel %vm491_vm10, %v685_v30, %v681_v29 }
 0x3b9   :  { %v708_v32 = vpop.f32.mrf.mxu2  ;;  %v732_v33 = vpop.f32.mrf.mxu3 }
 0x3ba   :  { %v4149_v34 = vadd.f32 %v708_v32, %v686_v31  ;;  %v780_v37 = vpop.f32.mrf.mxu1  ;;  %v843_v43 = vsel %vm485_vm7, %v732_v33, %v832_v41 }
 0x3bb   :  { %v835_v42 = vrot.slane %v780_v37, 6 }
 0x3bc   :  { %v868_v50 = vpop.f32.mrf.mxu0 }
 0x3bd   :  { %v844_v48 = vsel %vm487_vm8, %v843_v43, %v835_v42 }
 0x3c1   :  { %v804_v44 = vpop.f32.mrf.mxu2  ;;  %v828_v45 = vpop.f32.mrf.mxu3 }
 0x3c2   :  { %v838_v46 = vrot.slane %v804_v44, 5  ;;  %v841_v47 = vrot.slane %v828_v45, 4 }
 0x3c4   :  { %v845_v49 = vsel %vm489_vm9, %v844_v48, %v838_v46 }
 0x3c5   :  { %v846_v52 = vsel %vm491_vm10, %v845_v49, %v841_v47 }
 0x3c6   :  { %v869_v53 = vadd.f32 %v868_v50, %v846_v52 }
 0x3c8   :  { %v871_v26 = vadd.f32 %v4076_v36, %v869_v53 }
 0x3ca   :  { %v872_v54 = vsel %vm522_vm11, %v871_v26, -inf }
 0x3cb   :  { %873 = vmax.xlane.f32.xlu2 %v872_v54 }
 0x3e3   :  { %1086 = vrot.lane.b32.xlu2 %v4026_v11, %s3795_s28 }
 0x43e   :  { %v874_v55 = vpop.xlane.xlu2 %873 }
 0x43f   :  { %v875_v56 = vsub.f32 %v871_v26, %v874_v55 }
 0x441   :  { %v876_v57 = vmul.f32 1.442695, %v875_v56 }
 0x443   :  { %3737 = vpow2.f32 %v876_v57 }
 0x446   :  { %v1087_v6 = vpop.permute.xlu2 %1086 }
 0x449   :  { %v3738_v58 = vpop.eup %3737 }
 0x44a   :  { %v878_v59 = vsel %vm522_vm11, %v3738_v58, 0.0 }
 0x44b   :  { %879 = vadd.xlane.f32.xlu1 %v878_v59  ;;  %v4225_v59 = vld [vmem:[%s4796_s2 + $0x28] sm:$0x1f] }
 0x464   :  { %1174 = vrot.lane.b32.xlu1 %v3968_v7, %s3796_s29 }
 0x46c   :  { %1341 = vrot.lane.b32.xlu1 %v3968_v7, %s3797_s30 }
 0x474   :  { %1365 = vrot.lane.b32.xlu1 %v3993_v62, %s3798_s14 }
 0x47c   :  { %1437 = vrot.lane.b32.xlu1 %v4037_v12, %s3798_s14 }
 0x484   :  { %1389 = vrot.lane.b32.xlu1 %v4002_v40, %s3798_s14 }
 0x48c   :  { %1413 = vrot.lane.b32.xlu1 %v4026_v11, %s3798_s14  ;;  %v1063_v11 = vpop.permute.xlu0 %1062 }
 0x4be   :  { %v880_v60 = vpop.xlane.xlu1 %879 }
 0x4bf   :  { %3739 = vrcp.f32 %v880_v60 }
 0x4c5   :  { %v3740_v61 = vpop.eup %3739 }
 0x4c6   :  { %v882_v63 = vmul.f32 %v3740_v61, %v3738_v58 }
 0x4c8   :  { %3522 = vmatmul.msk.f32.vlgmr.msra.gmra.mxu1 %vm536_vm13, %v882_v63  ;;  %v906_v2 = vrot.slane %v882_v63, 1  ;;  %v929_v62 = vrot.slane %v882_v63, 2  ;;  %v952_v4 = vrot.slane %v882_v63, 3  ;;  %v975_v40 = vrot.slane %v882_v63, 4 }
 0x4c9   :  { %3537 = vmatpush.xpose.msk.msra.mxu1 %vm342_vm5, %v4011_v5 }
 0x4ca   :  { %3524 = vmatmul.msk.f32.vlgmr.msra.gmra.mxu2 %vm536_vm13, %v906_v2  ;;  %3526 = vmatmul.msk.f32.vlgmr.msra.gmra.mxu3 %vm536_vm13, %v929_v62 }
 0x4cb   :  { %3528 = vmatmul.msk.f32.vlgmr.msra.gmra.mxu0 %vm536_vm13, %v952_v4  ;;  %3539 = vmatpush.xpose.msk.msra.mxu2 %vm342_vm5, %v4021_v10 }
 0x4cc   :  { %3541 = vmatpush.xpose.msk.msra.mxu3 %vm342_vm5, %v4015_v8 }
 0x4d0   :  { %3530 = vmatmul.msk.f32.vlgmr.msrb.gmra.mxu1 %vm536_vm13, %v975_v40 }
 0x4d1   :  { %3545 = vmatpush.msk.msrb.mxu1 %vm540_vm6, %v4054_v14 }
 0x4d2   :  { %3532 = vmatmul.msk.f32.vlgmr.msrb.gmra.mxu2 %vm536_vm13, %v882_v63  ;;  %3534 = vmatmul.msk.f32.vlgmr.msrb.gmra.mxu3 %vm342_vm5, %v1039_v38 }
 0x4d3   :  { %3536 = vmatmul.msk.f32.vlgmr.msrb.gmra.mxu0 %vm342_vm5, %v1063_v11  ;;  %3547 = vmatpush.msk.msrb.mxu2 %vm540_vm6, %v4089_v27 }
 0x4d4   :  { %3549 = vmatpush.msk.msrb.mxu3 %vm540_vm6, %v4058_v17 }
 0x4d6   :  { %v1175_v12 = vpop.permute.xlu1 %1174 }
 0x4d7   :  { %3543 = vmatpush.xpose.msk.msra.mxu0 %vm342_vm5, %v1175_v12 }
 0x4d8   :  { %3538 = vmatmul.msk.f32.vlgmr.msra.gmra.mxu1 %vm342_vm5, %v1087_v6 }
 0x4d9   :  { %3553 = vmatpush.msk.msra.mxu1 %vm540_vm6, %v4095_v51 }
 0x4da   :  { %3540 = vmatmul.msk.f32.vlgmr.msra.gmra.mxu2 %vm342_vm5, %v1111_v39  ;;  %3542 = vmatmul.msk.f32.vlgmr.msra.gmra.mxu3 %vm342_vm5, %v1135_v1 }
 0x4db   :  { %3551 = vmatpush.msk.msrb.mxu0 %vm540_vm6, %v4064_v20  ;;  %3557 = vmatpush.xpose.msk.msra.mxu3 %vm342_vm5, %v3997_v3 }
 0x4dc   :  { %3544 = vmatmul.msk.f32.vlgmr.msra.gmra.mxu0 %vm342_vm5, %v1039_v38  ;;  %v1816_v38 = vsel %vm89_vm0, %v4225_v59, 0.0 }
 0x4dd   :  { %3559 = vmatpush.xpose.msk.msra.mxu0 %vm342_vm5, %v3995_v0 }
 0x4de   :  { %v1342_v9 = vpop.permute.xlu1 %1341 }
 0x4df   :  { %3555 = vmatpush.msk.msra.mxu2 %vm540_vm6, %v1342_v9 }
 0x545   :  { %v903_v22 = vpop.f32.mrf.mxu1 }
 0x548   :  { %v972_v23 = vpop.f32.mrf.mxu0 }
 0x549   :  { %v1005_v31 = vrot.slane %v972_v23, 5 }
 0x54d   :  { %v926_v24 = vpop.f32.mrf.mxu2  ;;  %v949_v25 = vpop.f32.mrf.mxu3 }
 0x54e   :  { %v999_v28 = vrot.slane %v926_v24, 7  ;;  %v1002_v29 = vrot.slane %v949_v25, 6  ;;  %v995_v30 = vpop.f32.mrf.mxu1 }
 0x54f   :  { %v1008_v35 = vrot.slane %v995_v30, 4 }
 0x550   :  { %v1010_v32 = vsel %vm485_vm7, %v903_v22, %v999_v28  ;;  %v1083_v43 = vpop.f32.mrf.mxu0 }
 0x551   :  { %v1011_v33 = vsel %vm487_vm8, %v1010_v32, %v1002_v29  ;;  %v1159_v45 = vrot.slane %v1083_v43, 7 }
 0x552   :  { %v1012_v3 = vsel %vm489_vm9, %v1011_v33, %v1005_v31 }
 0x553   :  { %v1013_v0 = vsel %vm491_vm10, %v1012_v3, %v1008_v35 }
 0x555   :  { %v1035_v37 = vpop.f32.mrf.mxu2  ;;  %v1059_v41 = vpop.f32.mrf.mxu3 }
 0x556   :  { %v1036_v42 = vadd.f32 %v1035_v37, %v1013_v0  ;;  %v1107_v44 = vpop.f32.mrf.mxu1  ;;  %v1170_v47 = vsel %vm485_vm7, %v1059_v41, %v1159_v45 }
 0x557   :  { %v1162_v46 = vrot.slane %v1107_v44, 6 }
 0x559   :  { %v1171_v53 = vsel %vm487_vm8, %v1170_v47, %v1162_v46  ;;  %v1195_v54 = vpop.f32.mrf.mxu0 }
 0x55d   :  { %v1131_v48 = vpop.f32.mrf.mxu2  ;;  %v1155_v49 = vpop.f32.mrf.mxu3 }
 0x55e   :  { %v1165_v50 = vrot.slane %v1131_v48, 5  ;;  %v1168_v52 = vrot.slane %v1155_v49, 4 }
 0x560   :  { %v1172_v26 = vsel %vm489_vm9, %v1171_v53, %v1165_v50 }
 0x561   :  { %v1173_v55 = vsel %vm491_vm10, %v1172_v26, %v1168_v52  ;;  %v3586_v52 = vld [vmem:[%s4796_s2 + $0x30] sm:$0x1f]  ;;  %v3587_v26 = vld [vmem:[%s4796_s2 + $0x38] sm:$0x1f] }
 0x562   :  { %v1196_v56 = vadd.f32 %v1195_v54, %v1173_v55  ;;  %v1863_v53 = vsel %vm89_vm0, %v3586_v52, 0.0  ;;  %v1910_v54 = vsel %vm89_vm0, %v3587_v26, 0.0 }
 0x564   :  { %v1198_v57 = vadd.f32 %v4076_v36, %v1196_v56  ;;  %v3588_v56 = vld [vmem:[%s4796_s2 + $0x40] sm:$0x1f] }
 0x566   :  { %v1199_v58 = vsel %vm522_vm11, %v1198_v57, -inf }
 0x567   :  { %1200 = vmax.xlane.f32.xlu0 %v1199_v58 }
 0x57b   :  { %1461 = vrot.lane.b32.xlu0 %v4040_v13, %s3798_s14 }
 0x583   :  { %1501 = vrot.lane.b32.xlu0 %v3968_v7, %s3799_s15 }
 0x58b   :  { %1668 = vrot.lane.b32.xlu0 %v3968_v7, %s4810_s17  ;;  %v1366_v7 = vpop.permute.xlu1 %1365 }
 0x593   :  { %v1438_v62 = vpop.permute.xlu1 %1437 }
 0x59b   :  { %v1390_v22 = vpop.permute.xlu1 %1389 }
 0x5b5   :  { %1817 = vadd.xlane.f32.xlu0 %v1816_v38 }
 0x5c9   :  { %1693 = vrot.lane.b32.xlu0 %v1036_v42, %s3801_s20 }
 0x5da   :  { %v1201_v13 = vpop.xlane.xlu0 %1200 }
 0x5db   :  { %v1202_v39 = vsub.f32 %v1198_v57, %v1201_v13  ;;  %v1957_v57 = vsel %vm89_vm0, %v3588_v56, 0.0 }
 0x5dd   :  { %v1203_v60 = vmul.f32 1.442695, %v1202_v39 }
 0x5df   :  { %3741 = vpow2.f32 %v1203_v60 }
 0x5e5   :  { %v3742_v61 = vpop.eup %3741 }
 0x5e6   :  { %v1205_v63 = vsel %vm522_vm11, %v3742_v61, 0.0 }
 0x5e7   :  { %1206 = vadd.xlane.f32.xlu2 %v1205_v63 }
 0x5ed   :  { %v1462_v2 = vpop.permute.xlu0 %1461 }
 0x5f5   :  { %v1502_v9 = vpop.permute.xlu0 %1501 }
 0x65a   :  { %v1207_v1 = vpop.xlane.xlu2 %1206 }
 0x65b   :  { %3743 = vrcp.f32 %v1207_v1 }
 0x661   :  { %v3744_v4 = vpop.eup %3743 }
 0x662   :  { %v1209_v40 = vmul.f32 %v3744_v4, %v3742_v61 }
 0x664   :  { %3546 = vmatmul.msk.f32.vlgmr.msrb.gmra.mxu1 %vm536_vm13, %v1209_v40  ;;  %v1233_v11 = vrot.slane %v1209_v40, 1  ;;  %v1256_v12 = vrot.slane %v1209_v40, 2  ;;  %v1279_v6 = vrot.slane %v1209_v40, 3  ;;  %v1302_v23 = vrot.slane %v1209_v40, 4 }
 0x665   :  { %3561 = vmatpush.xpose.msk.msrb.mxu1 %vm342_vm5, %v4011_v5  ;;  %v1414_v5 = vpop.permute.xlu1 %1413 }
 0x666   :  { %3548 = vmatmul.msk.f32.vlgmr.msrb.gmra.mxu2 %vm536_vm13, %v1233_v11  ;;  %3550 = vmatmul.msk.f32.vlgmr.msrb.gmra.mxu3 %vm536_vm13, %v1256_v12 }
 0x667   :  { %3552 = vmatmul.msk.f32.vlgmr.msrb.gmra.mxu0 %vm536_vm13, %v1279_v6  ;;  %3563 = vmatpush.xpose.msk.msrb.mxu2 %vm342_vm5, %v4021_v10 }
 0x668   :  { %3565 = vmatpush.xpose.msk.msrb.mxu3 %vm342_vm5, %v4015_v8  ;;  %3567 = vmatpush.xpose.msk.msrb.mxu0 %vm342_vm5, %v1502_v9  ;;  %v1669_v8 = vpop.permute.xlu0 %1668 }
 0x66c   :  { %3554 = vmatmul.msk.f32.vlgmr.msra.gmra.mxu1 %vm536_vm13, %v1302_v23 }
 0x66d   :  { %3569 = vmatpush.msk.msra.mxu1 %vm540_vm6, %v4054_v14 }
 0x66e   :  { %3556 = vmatmul.msk.f32.vlgmr.msra.gmra.mxu2 %vm536_vm13, %v1209_v40  ;;  %3558 = vmatmul.msk.f32.vlgmr.msra.gmra.mxu3 %vm342_vm5, %v1366_v7 }
 0x66f   :  { %3560 = vmatmul.msk.f32.vlgmr.msra.gmra.mxu0 %vm342_vm5, %v1390_v22  ;;  %3571 = vmatpush.msk.msra.mxu2 %vm540_vm6, %v4089_v27 }
 0x670   :  { %3573 = vmatpush.msk.msra.mxu3 %vm540_vm6, %v4058_v17  ;;  %3575 = vmatpush.msk.msra.mxu0 %vm540_vm6, %v4064_v20  ;;  %v1818_v39 = vpop.xlane.xlu0 %1817 }
 0x671   :  { %v1819_v60 = vmul.f32 %v1818_v39, %v3921_v21 }
 0x673   :  { %v4295_v63 = vsub.f32 %v4225_v59, %v1819_v60  ;;  %v4365_v60 = vld [vmem:[%s4799_s5] ss:$0 sm:$0xff] }
 0x674   :  { %3562 = vmatmul.msk.f32.vlgmr.msrb.gmra.mxu1 %vm342_vm5, %v1414_v5 }
 0x675   :  { %3577 = vmatpush.msk.msrb.mxu1 %vm540_vm6, %v4095_v51 }
 0x676   :  { %3564 = vmatmul.msk.f32.vlgmr.msrb.gmra.mxu2 %vm342_vm5, %v1438_v62  ;;  %3566 = vmatmul.msk.f32.vlgmr.msrb.gmra.mxu3 %vm342_vm5, %v1462_v2  ;;  %v1821_v2 = vmul.f32 %v4295_v63, %v4295_v63 }
 0x677   :  { %3568 = vmatmul.msk.f32.vlgmr.msrb.gmra.mxu0 %vm342_vm5, %v1366_v7  ;;  %3579 = vmatpush.msk.msrb.mxu2 %vm540_vm6, %v1669_v8 }
 0x678   :  { %1801 = vmatpush.msrb.mxu0 %v3898_v15  ;;  %v1822_v40 = vsel %vm89_vm0, %v1821_v2, 0.0 }
 0x67a   :  { %1802 = vmatpush.msrb.mxu0 %v3903_v16 }
 0x67c   :  { %1803 = vmatpush.msrb.mxu0 %v3909_v18 }
 0x67e   :  { %1804 = vmatpush.msrb.mxu0 %v3915_v19 }
 0x6e1   :  { %v1230_v10 = vpop.f32.mrf.mxu1 }
 0x6e4   :  { %v1299_v14 = vpop.f32.mrf.mxu0 }
 0x6e5   :  { %v1332_v25 = vrot.slane %v1299_v14, 5 }
 0x6e9   :  { %v1253_v17 = vpop.f32.mrf.mxu2  ;;  %v1276_v20 = vpop.f32.mrf.mxu3 }
 0x6ea   :  { %v1326_v27 = vrot.slane %v1253_v17, 7  ;;  %v1329_v51 = vrot.slane %v1276_v20, 6  ;;  %v1322_v24 = vpop.f32.mrf.mxu1 }
 0x6eb   :  { %v1335_v30 = vrot.slane %v1322_v24, 4 }
 0x6ec   :  { %v1337_v28 = vsel %vm485_vm7, %v1230_v10, %v1326_v27  ;;  %v1410_v32 = vpop.f32.mrf.mxu0 }
 0x6ed   :  { %v1338_v29 = vsel %vm487_vm8, %v1337_v28, %v1329_v51  ;;  %v1486_v35 = vrot.slane %v1410_v32, 7 }
 0x6ee   :  { %v1339_v15 = vsel %vm489_vm9, %v1338_v29, %v1332_v25 }
 0x6ef   :  { %v1340_v16 = vsel %vm491_vm10, %v1339_v15, %v1335_v30 }
 0x6f1   :  { %v1362_v18 = vpop.f32.mrf.mxu2  ;;  %v1386_v31 = vpop.f32.mrf.mxu3 }
 0x6f2   :  { %v4269_v19 = vadd.f32 %v1362_v18, %v1340_v16  ;;  %v1434_v33 = vpop.f32.mrf.mxu1  ;;  %v1497_v0 = vsel %vm485_vm7, %v1386_v31, %v1486_v35  ;;  %v4332_v35 = vld [vmem:[%s4803_s7 + $0x8] sm:$0xff] }
 0x6f3   :  { %v1489_v3 = vrot.slane %v1434_v33, 6 }
 0x6f4   :  { %v1522_v46 = vpop.f32.mrf.mxu0 }
 0x6f5   :  { %v1498_v44 = vsel %vm487_vm8, %v1497_v0, %v1489_v3 }
 0x6f9   :  { %v1458_v37 = vpop.f32.mrf.mxu2  ;;  %v1482_v41 = vpop.f32.mrf.mxu3 }
 0x6fa   :  { %v1492_v42 = vrot.slane %v1458_v37, 5  ;;  %v1495_v43 = vrot.slane %v1482_v41, 4  ;;  %v3582_v41 = vld [vmem:[%s4798_s0 + $0x8] sm:$0x1f] }
 0x6fc   :  { %v1499_v45 = vsel %vm489_vm9, %v1498_v44, %v1492_v42 }
 0x6fd   :  { %v1500_v47 = vsel %vm491_vm10, %v1499_v45, %v1495_v43 }
 0x6fe   :  { %v1523_v48 = vadd.f32 %v1522_v46, %v1500_v47 }
 0x700   :  { %v1525_v49 = vadd.f32 %v4076_v36, %v1523_v48  ;;  %v3589_v36 = vld [vmem:[%s4796_s2 + $0x48] sm:$0x1f]  ;;  %s3802_s2 = smov 16  }
 0x701   :  { %v2004_v55 = vsel %vm89_vm0, %v3589_v36, 0.0 }
 0x702   :  { %v1526_v50 = vsel %vm522_vm11, %v1525_v49, -inf }
 0x703   :  { %1527 = vmax.xlane.f32.xlu2 %v1526_v50 }
 0x70b   :  { %1864 = vadd.xlane.f32.xlu2 %v1863_v53 }
 0x713   :  { %1911 = vadd.xlane.f32.xlu2 %v1910_v54 }
 0x71b   :  { %2005 = vadd.xlane.f32.xlu2 %v2004_v55 }
 0x723   :  { %1958 = vadd.xlane.f32.xlu2 %v1957_v57 }
 0x776   :  { %v1528_v58 = vpop.xlane.xlu2 %1527 }
 0x777   :  { %v1529_v38 = vsub.f32 %v1525_v49, %v1528_v58 }
 0x779   :  { %v1530_v13 = vmul.f32 1.442695, %v1529_v38 }
 0x77b   :  { %3745 = vpow2.f32 %v1530_v13 }
 0x77e   :  { %v1865_v61 = vpop.xlane.xlu2 %1864 }
 0x77f   :  { %v1866_v4 = vmul.f32 %v1865_v61, %v3921_v21 }
 0x781   :  { %v3746_v7 = vpop.eup %3745  ;;  %v4302_v11 = vsub.f32 %v3586_v52, %v1866_v4  ;;  %v4371_v4 = vld [vmem:[%s4800_s6] ss:$0 sm:$0xff] }
 0x782   :  { %v1532_v1 = vsel %vm522_vm11, %v3746_v7, 0.0 }
 0x783   :  { %1533 = vadd.xlane.f32.xlu1 %v1532_v1  ;;  %v1868_v22 = vmul.f32 %v4302_v11, %v4302_v11 }
 0x785   :  { %v1869_v5 = vsel %vm89_vm0, %v1868_v22, 0.0 }
 0x786   :  { %v1912_v62 = vpop.xlane.xlu2 %1911  ;;  %1870 = vadd.xlane.f32.xlu2 %v1869_v5 }
 0x787   :  { %v1913_v12 = vmul.f32 %v1912_v62, %v3921_v21 }
 0x789   :  { %v4305_v59 = vsub.f32 %v3587_v26, %v1913_v12 }
 0x78b   :  { %1823 = vadd.xlane.f32.xlu1 %v1822_v40  ;;  %v1915_v10 = vmul.f32 %v4305_v59, %v4305_v59 }
 0x78d   :  { %v1916_v20 = vsel %vm89_vm0, %v1915_v10, 0.0 }
 0x78e   :  { %v2006_v6 = vpop.xlane.xlu2 %2005  ;;  %1917 = vadd.xlane.f32.xlu2 %v1916_v20 }
 0x78f   :  { %v2007_v9 = vmul.f32 %v2006_v6, %v3921_v21 }
 0x791   :  { %v4310_v23 = vsub.f32 %v3589_v36, %v2007_v9 }
 0x793   :  { %v2009_v8 = vmul.f32 %v4310_v23, %v4310_v23 }
 0x795   :  { %v2010_v14 = vsel %vm89_vm0, %v2009_v8, 0.0 }
 0x796   :  { %2011 = vadd.xlane.f32.xlu1 %v2010_v14  ;;  %v1959_v17 = vpop.xlane.xlu2 %1958 }
 0x797   :  { %v1960_v27 = vmul.f32 %v1959_v17, %v3921_v21 }
 0x799   :  { %v4320_v51 = vsub.f32 %v3588_v56, %v1960_v27 }
 0x79b   :  { %v1962_v24 = vmul.f32 %v4320_v51, %v4320_v51 }
 0x79d   :  { %v1963_v25 = vsel %vm89_vm0, %v1962_v24, 0.0 }
 0x79e   :  { %1964 = vadd.xlane.f32.xlu2 %v1963_v25 }
 0x7af   :  { %1697 = vrot.lane.b32.xlu1 %v4269_v19, %s3802_s2  ;;  %v4342_v19 = vld [vmem:[%s4803_s7] sm:$0xff] }
 0x7f6   :  { %v1534_v28 = vpop.xlane.xlu1 %1533 }
 0x7f7   :  { %3747 = vrcp.f32 %v1534_v28 }
 0x7f9   :  { %v1871_v3 = vpop.xlane.xlu2 %1870 }
 0x7fa   :  { %v1872_v37 = vmul.f32 %v1871_v3, %v3921_v21 }
 0x7fc   :  { %v1873_v42 = vadd.f32 1e-05, %v1872_v37  ;;  %v4390_v37 = vld [vmem:[%s4805_s9 + $0x18] sm:$0xff] }
 0x7fd   :  { %v3748_v29 = vpop.eup %3747  ;;  %1731 = vmatpush.msrb.mxu3 %v4390_v37 }
 0x7fe   :  { %v1536_v30 = vmul.f32 %v3748_v29, %v3746_v7  ;;  %v1824_v15 = vpop.xlane.xlu1 %1823  ;;  %vm1880_vm1 = vweird.f32 %v1873_v42 }
 0x7ff   :  { %v1825_v16 = vmul.f32 %v1824_v15, %v3921_v21 }
 0x800   :  { %3570 = vmatmul.msk.f32.vlgmr.msra.gmra.mxu1 %vm536_vm13, %v1536_v30  ;;  %v1560_v18 = vrot.slane %v1536_v30, 1  ;;  %v1583_v31 = vrot.slane %v1536_v30, 2  ;;  %v1606_v32 = vrot.slane %v1536_v30, 3  ;;  %v1629_v0 = vrot.slane %v1536_v30, 4 }
 0x801   :  { %v1826_v33 = vadd.f32 1e-05, %v1825_v16  ;;  %1857 = vmatpush.msra.mxu1 %v4332_v35  ;;  %v4358_v49 = vpop.xlane.xlu2 %1917 }
 0x802   :  { %3572 = vmatmul.msk.f32.vlgmr.msra.gmra.mxu2 %vm536_vm13, %v1560_v18  ;;  %3574 = vmatmul.msk.f32.vlgmr.msra.gmra.mxu3 %vm536_vm13, %v1583_v31 }
 0x803   :  { %3576 = vmatmul.msk.f32.vlgmr.msra.gmra.mxu0 %vm536_vm13, %v1606_v32  ;;  %3749 = vrsqrt.f32 %v1826_v33  ;;  %1904 = vmatpush.msra.mxu2 %v4332_v35  ;;  %vm1833_vm0 = vweird.f32 %v1826_v33 }
 0x804   :  { %1858 = vmatpush.msra.mxu1 %v4342_v19  ;;  %1998 = vmatpush.msra.mxu0 %v4332_v35  ;;  %3751 = vrsqrt.f32 %v1873_v42 }
 0x805   :  { %1905 = vmatpush.msra.mxu2 %v4342_v19 }
 0x806   :  { %1999 = vmatpush.msra.mxu0 %v4342_v19 }
 0x808   :  { %3578 = vmatmul.msk.f32.vlgmr.msrb.gmra.mxu1 %vm536_vm13, %v1629_v0 }
 0x809   :  { %v3750_v43 = vpop.eup %3749  ;;  %v2012_v44 = vpop.xlane.xlu1 %2011  ;;  %2045 = vmatpush.msrb.mxu1 %v4332_v35 }
 0x80a   :  { %3580 = vmatmul.msk.f32.vlgmr.msrb.gmra.mxu2 %vm536_vm13, %v1536_v30  ;;  %v1828_v45 = vmul.f32 %v3750_v43, %v1826_v33  ;;  %v2013_v46 = vmul.f32 %v2012_v44, %v3921_v21  ;;  %vm1834_vm14 = vweird.f32 %v3750_v43  ;;  %v3752_v52 = vpop.eup %3751 }
 0x80b   :  { %3584 = vmatmul.msk.f32.vlgmr.msrb.gmra.mxu0 %vm59_vm2, %v3582_v41  ;;  %2046 = vmatpush.msrb.mxu1 %v4342_v19  ;;  %vm1835_vm15 = vmor %vm1833_vm0, %vm1834_vm14  ;;  %v1875_v26 = vmul.f32 %v3752_v52, %v1873_v42  ;;  %vm1881_vm3 = vweird.f32 %v3752_v52 }
 0x80c   :  { %v1829_v47 = vmul.f32 %v3750_v43, %v1828_v45  ;;  %v2014_v48 = vadd.f32 1e-05, %v2013_v46  ;;  %vm1882_vm4 = vmor %vm1880_vm1, %vm1881_vm3  ;;  %v4402_v45 = vld [vmem:[%s4805_s9 + $0x8] sm:$0xff] }
 0x80d   :  { %v1876_v36 = vmul.f32 %v3752_v52, %v1875_v26 }
 0x80e   :  { %v1830_v50 = vmul.f32 0.5, %v1829_v47  ;;  %3753 = vrsqrt.f32 %v2014_v48  ;;  %vm2021_vm0 = vweird.f32 %v2014_v48  ;;  %v3785_v47 = vld [vmem:[%s4801_s4] ss:$0 sm:$0xff]  ;;  %s3803_s4 = smov 24  }
 0x80f   :  { %v1877_v38 = vmul.f32 0.5, %v1876_v36 }
 0x810   :  { %v1831_v53 = vsub.f32 1.5, %v1830_v50 }
 0x811   :  { %v1965_v13 = vpop.xlane.xlu2 %1964  ;;  %v1878_v1 = vsub.f32 1.5, %v1877_v38 }
 0x812   :  { %v1832_v54 = vmul.f32 %v3750_v43, %v1831_v53  ;;  %v1966_v39 = vmul.f32 %v1965_v13, %v3921_v21 }
 0x814   :  { %v3754_v55 = vpop.eup %3753  ;;  %v1836_v56 = vsel %vm1835_vm15, %v3750_v43, %v1832_v54  ;;  %v1967_v2 = vadd.f32 1e-05, %v1966_v39 }
 0x815   :  { %v1837_v57 = vmul.f32 %v1836_v56, %v4295_v63  ;;  %v2016_v58 = vmul.f32 %v3754_v55, %v2014_v48  ;;  %vm2022_vm14 = vweird.f32 %v3754_v55  ;;  %v1879_v63 = vmul.f32 %v3752_v52, %v1878_v1  ;;  %v3786_v56 = vld [vmem:[%s4802_s8] ss:$0 sm:$0xff] }
 0x816   :  { %3755 = vrsqrt.f32 %v1967_v2  ;;  %vm2023_vm15 = vmor %vm2021_vm0, %vm2022_vm14  ;;  %vm1974_vm1 = vweird.f32 %v1967_v2 }
 0x817   :  { %v1838_v61 = vmul.f32 %v4365_v60, %v1837_v57  ;;  %v2017_v7 = vmul.f32 %v3754_v55, %v2016_v58  ;;  %v1883_v6 = vsel %vm1882_vm4, %v3752_v52, %v1879_v63  ;;  %v4415_v52 = vld [vmem:[%s4805_s9] sm:$0xff] }
 0x818   :  { %v1884_v9 = vmul.f32 %v1883_v6, %v4302_v11  ;;  %v1694_v6 = vpop.permute.xlu0 %1693 }
 0x819   :  { %v2018_v62 = vmul.f32 0.5, %v2017_v7  ;;  %v1839_v40 = vadd.f32 %v4371_v4, %v1838_v61 }
 0x81a   :  { %v1885_v5 = vmul.f32 %v4365_v60, %v1884_v9 }
 0x81b   :  { %v2019_v12 = vsub.f32 1.5, %v2018_v62  ;;  %3590 = vmatmul.msk.f32.vlgmr.msra.gmra.mxu1 %vm130_vm12, %v1839_v40 }
 0x81c   :  { %v3756_v10 = vpop.eup %3755  ;;  %v1886_v17 = vadd.f32 %v4371_v4, %v1885_v5 }
 0x81d   :  { %v2020_v22 = vmul.f32 %v3754_v55, %v2019_v12  ;;  %v1969_v20 = vmul.f32 %v3756_v10, %v1967_v2  ;;  %vm1975_vm3 = vweird.f32 %v3756_v10 }
 0x81e   :  { %3591 = vmatmul.msk.f32.vlgmr.msra.gmra.mxu2 %vm130_vm12, %v1886_v17  ;;  %vm1976_vm4 = vmor %vm1974_vm1, %vm1975_vm3  ;;  %vm1706_vm1 = vcmask 195584   ;;  %vm1743_vm3 = vcmask 258048  }
 0x81f   :  { %v2024_v8 = vsel %vm2023_vm15, %v3754_v55, %v2020_v22  ;;  %v1970_v24 = vmul.f32 %v3756_v10, %v1969_v20 }
 0x820   :  { %v2025_v14 = vmul.f32 %v2024_v8, %v4310_v23  ;;  %v1704_v8 = vsel %vm342_vm5, %v4149_v34, %v1694_v6 }
 0x821   :  { %v1971_v11 = vmul.f32 0.5, %v1970_v24  ;;  %v1698_v9 = vpop.permute.xlu1 %1697 }
 0x822   :  { %v2026_v27 = vmul.f32 %v4365_v60, %v2025_v14 }
 0x823   :  { %v1972_v28 = vsub.f32 1.5, %v1971_v11 }
 0x824   :  { %v2027_v25 = vadd.f32 %v4371_v4, %v2026_v27 }
 0x825   :  { %v1973_v29 = vmul.f32 %v3756_v10, %v1972_v28 }
 0x826   :  { %3594 = vmatmul.msk.f32.vlgmr.msrb.gmra.mxu1 %vm130_vm12, %v2027_v25 }
 0x827   :  { %v1977_v30 = vsel %vm1976_vm4, %v3756_v10, %v1973_v29  ;;  %v1705_v10 = vsel %vm130_vm12, %v1704_v8, %v1698_v9 }
 0x828   :  { %v1978_v23 = vmul.f32 %v1977_v30, %v4320_v51  ;;  %v4395_v51 = vld [vmem:[%s4805_s9 + $0x10] sm:$0xff] }
 0x829   :  { %1732 = vmatpush.msrb.mxu3 %v4395_v51 }
 0x82a   :  { %v1979_v15 = vmul.f32 %v4365_v60, %v1978_v23 }
 0x82b   :  { %1733 = vmatpush.msrb.mxu3 %v4402_v45 }
 0x82c   :  { %v1980_v16 = vadd.f32 %v4371_v4, %v1979_v15 }
 0x82d   :  { %1734 = vmatpush.msrb.mxu3 %v4415_v52 }
 0x82e   :  { %3593 = vmatmul.msk.f32.vlgmr.msra.gmra.mxu0 %vm130_vm12, %v1980_v16 }
 0x82f   :  { %1951 = vmatpush.msra.mxu3 %v4332_v35 }
 0x831   :  { %1952 = vmatpush.msra.mxu3 %v4342_v19  ;;  %v1919_v19 = vmul.f32 %v4358_v49, %v3921_v21 }
 0x833   :  { %v1920_v13 = vadd.f32 1e-05, %v1919_v19 }
 0x835   :  { %3757 = vrsqrt.f32 %v1920_v13  ;;  %vm1927_vm0 = vweird.f32 %v1920_v13 }
 0x83b   :  { %v3758_v7 = vpop.eup %3757 }
 0x83c   :  { %v1922_v1 = vmul.f32 %v3758_v7, %v1920_v13  ;;  %vm1928_vm14 = vweird.f32 %v3758_v7 }
 0x83d   :  { %vm1929_vm15 = vmor %vm1927_vm0, %vm1928_vm14 }
 0x83e   :  { %v1923_v62 = vmul.f32 %v3758_v7, %v1922_v1 }
 0x840   :  { %v1924_v63 = vmul.f32 0.5, %v1923_v62 }
 0x842   :  { %v1925_v40 = vsub.f32 1.5, %v1924_v63 }
 0x844   :  { %v1926_v21 = vmul.f32 %v3758_v7, %v1925_v40 }
 0x846   :  { %v1930_v22 = vsel %vm1929_vm15, %v3758_v7, %v1926_v21 }
 0x847   :  { %v1931_v14 = vmul.f32 %v1930_v22, %v4305_v59 }
 0x849   :  { %v1932_v24 = vmul.f32 %v4365_v60, %v1931_v14 }
 0x84b   :  { %v1933_v25 = vadd.f32 %v4371_v4, %v1932_v24 }
 0x87d   :  { %v1557_v18 = vpop.f32.mrf.mxu1 }
 0x880   :  { %v1626_v31 = vpop.f32.mrf.mxu0 }
 0x881   :  { %v1659_v41 = vrot.slane %v1626_v31, 5 }
 0x885   :  { %v1580_v32 = vpop.f32.mrf.mxu2  ;;  %v1603_v33 = vpop.f32.mrf.mxu3 }
 0x886   :  { %v1653_v3 = vrot.slane %v1580_v32, 7  ;;  %v1656_v0 = vrot.slane %v1603_v33, 6  ;;  %v1649_v43 = vpop.f32.mrf.mxu1 }
 0x887   :  { %v1662_v53 = vrot.slane %v1649_v43, 4 }
 0x888   :  { %v1664_v42 = vsel %vm485_vm7, %v1557_v18, %v1653_v3  ;;  %v1806_v44 = vpop.f32.mrf.mxu0 }
 0x889   :  { %v1665_v46 = vsel %vm487_vm8, %v1664_v42, %v1656_v0  ;;  %v4408_v48 = vadd.f32 %v3785_v47, %v1806_v44 }
 0x88a   :  { %v1666_v50 = vsel %vm489_vm9, %v1665_v46, %v1659_v41 }
 0x88b   :  { %2198 = vrot.lane.b32.xlu0 %v4408_v48, %s3790_s16  ;;  %v1667_v26 = vsel %vm491_vm10, %v1666_v50, %v1662_v53  ;;  %v4433_v58 = vmul.f32 0.35355338, %v4408_v48  ;;  %v4536_v50 = vld [vmem:[%s4804_s1 + $0x1] ss:$0 sm:$0xff]  ;;  %s4811_s1 = smov 40  }
 0x88d   :  { %v1689_v54 = vpop.f32.mrf.mxu2  ;;  %v4448_v2 = vrot.slane %v4433_v58, 1  ;;  %v4453_v49 = vrot.slane %v4433_v58, 3  ;;  %v4456_v12 = vrot.slane %v4433_v58, 4  ;;  %v4489_v60 = vrot.slane %v4433_v58, 2 }
 0x88e   :  { %v1690_v36 = vadd.f32 %v1689_v54, %v1667_v26 }
 0x890   :  { %1701 = vrot.lane.b32.xlu2 %v1690_v36, %s3803_s4 }
 0x893   :  { %2436 = vrot.lane.b32.xlu0 %v4448_v2, %s3791_s23 }
 0x898   :  { %v1860_v55 = vpop.f32.mrf.mxu1 }
 0x899   :  { %v4428_v57 = vadd.f32 %v3786_v56, %v1860_v55 }
 0x89b   :  { %3595 = vmatpush.xpose.msk.msrb.mxu2 %vm342_vm5, %v4428_v57 }
 0x89e   :  { %3596 = vmatmul.msk.f32.vlgmr.msrb.gmra.mxu2 %vm342_vm5, %v4433_v58 }
 0x8a1   :  { %v1907_v5 = vpop.f32.mrf.mxu2 }
 0x8a2   :  { %v4466_v20 = vadd.f32 %v3786_v56, %v1907_v5 }
 0x8a3   :  { %v2048_v35 = vpop.f32.mrf.mxu1 }
 0x8a4   :  { %v4437_v38 = vadd.f32 %v3786_v56, %v2048_v35 }
 0x8a6   :  { %3603 = vmatpush.xpose.msk.msra.mxu2 %vm342_vm5, %v4437_v38 }
 0x8a9   :  { %3604 = vmatmul.msk.f32.vlgmr.msra.gmra.mxu2 %vm342_vm5, %v4456_v12 }
 0x8ab   :  { %v2001_v39 = vpop.f32.mrf.mxu0 }
 0x8ac   :  { %v4443_v61 = vadd.f32 %v3786_v56, %v2001_v39 }
 0x8ae   :  { %3601 = vmatpush.xpose.msk.msra.mxu1 %vm342_vm5, %v4443_v61 }
 0x8b1   :  { %3602 = vmatmul.msk.f32.vlgmr.msra.gmra.mxu1 %vm342_vm5, %v4453_v49 }
 0x8ea   :  { %v1702_v17 = vpop.permute.xlu2 %1701 }
 0x8eb   :  { %v1707_v27 = vsel %vm1706_vm1, %v1705_v10, %v1702_v17 }
 0x8ec   :  { %3581 = vmatmul.msk.f32.vlgmr.msrb.gmra.mxu3 %vm59_vm2, %v1707_v27 }
 0x8ed   :  { %3597 = vmatpush.xpose.msk.msrb.mxu3 %vm342_vm5, %v4466_v20 }
 0x8f4   :  { %3592 = vmatmul.msk.f32.vlgmr.msra.gmra.mxu3 %vm130_vm12, %v1933_v25 }
 0x8fc   :  { %3598 = vmatmul.msk.f32.vlgmr.msrb.gmra.mxu3 %vm342_vm5, %v4448_v2 }
 0x8fd   :  { %v2199_v34 = vpop.permute.xlu0 %2198 }
 0x8fe   :  { %3605 = vmatpush.xpose.msk.msra.mxu3 %vm342_vm5, %v2199_v34 }
 0x904   :  { %3606 = vmatmul.msk.f32.vlgmr.msra.gmra.mxu3 %vm342_vm5, %v4433_v58 }
 0x905   :  { %v2437_v1 = vpop.permute.xlu0 %2436 }
 0x921   :  { %v2074_v15 = vpop.f32.mrf.mxu2 }
 0x92c   :  { %v2178_v33 = vpop.f32.mrf.mxu2 }
 0x92d   :  { %v2191_v44 = vrot.slane %v2178_v33, 4 }
 0x92e   :  { %v2152_v32 = vpop.f32.mrf.mxu1 }
 0x92f   :  { %v2188_v42 = vrot.slane %v2152_v32, 5 }
 0x96f   :  { %v4480_v59 = vpop.f32.mrf.mxu3 }
 0x977   :  { %v1954_v11 = vpop.f32.mrf.mxu3 }
 0x978   :  { %v4482_v28 = vadd.f32 %v3786_v56, %v1954_v11 }
 0x97a   :  { %2292 = vrot.lane.b32.xlu2 %v4482_v28, %s3791_s23  ;;  %3599 = vmatpush.xpose.msk.msrb.mxu0 %vm342_vm5, %v4482_v28 }
 0x97d   :  { %3600 = vmatmul.msk.f32.vlgmr.msrb.gmra.mxu0 %vm342_vm5, %v4489_v60 }
 0x97f   :  { %v2100_v18 = vpop.f32.mrf.mxu3 }
 0x980   :  { %v2182_v31 = vrot.slane %v2100_v18, 7 }
 0x982   :  { %2319 = vrot.lane.b32.xlu2 %v4443_v61, %s3791_s23  ;;  %v2193_v41 = vsel %vm485_vm7, %v2074_v15, %v2182_v31 }
 0x987   :  { %v2219_v53 = vpop.f32.mrf.mxu3 }
 0x98a   :  { %2237 = vrot.lane.b32.xlu2 %v4428_v57, %s3791_s23 }
 0x992   :  { %2265 = vrot.lane.b32.xlu2 %v4466_v20, %s3791_s23 }
 0x99a   :  { %2412 = vrot.lane.b32.xlu2 %v4433_v58, %s3791_s23 }
 0x9a2   :  { %2388 = vrot.lane.b32.xlu2 %v4408_v48, %s3792_s26 }
 0x9aa   :  { %2508 = vrot.lane.b32.xlu2 %v4456_v12, %s3791_s23 }
 0x9b2   :  { %2548 = vrot.lane.b32.xlu2 %v4408_v48, %s3793_s27 }
 0x9d4   :  { %v4507_v4 = vpop.permute.xlu2 %2292 }
 0x9d5   :  { %3611 = vmatpush.msk.msrb.mxu2 %vm540_vm6, %v4507_v4 }
 0x9d7   :  { %3619 = vmatpush.xpose.msk.msra.mxu2 %vm342_vm5, %v4428_v57 }
 0x9dc   :  { %v4513_v29 = vpop.permute.xlu2 %2319 }
 0x9dd   :  { %3613 = vmatpush.msk.msrb.mxu3 %vm540_vm6, %v4513_v29 }
 0x9df   :  { %3621 = vmatpush.xpose.msk.msra.mxu3 %vm342_vm5, %v4466_v20 }
 0x9e4   :  { %v4519_v30 = vpop.permute.xlu2 %2237 }
 0x9e5   :  { %3607 = vmatpush.msk.msra.mxu0 %vm540_vm6, %v4519_v30 }
 0x9ec   :  { %v4523_v23 = vpop.permute.xlu2 %2265 }
 0x9ed   :  { %3609 = vmatpush.msk.msrb.mxu1 %vm540_vm6, %v4523_v23 }
 0x9f4   :  { %v4527_v16 = vpop.permute.xlu2 %2412 }
 0x9fa   :  { %v2126_v3 = vpop.f32.mrf.mxu0 }
 0x9fb   :  { %v2185_v0 = vrot.slane %v2126_v3, 6 }
 0x9fc   :  { %v2389_v43 = vpop.permute.xlu2 %2388 }
 0x9fd   :  { %v2194_v46 = vsel %vm487_vm8, %v2193_v41, %v2185_v0  ;;  %3617 = vmatpush.msk.msra.mxu1 %vm540_vm6, %v2389_v43 }
 0x9fe   :  { %v2195_v47 = vsel %vm489_vm9, %v2194_v46, %v2188_v42 }
 0x9ff   :  { %v2196_v26 = vsel %vm491_vm10, %v2195_v47, %v2191_v44 }
 0xa00   :  { %v2220_v54 = vadd.f32 %v2219_v53, %v2196_v26 }
 0xa02   :  { %v2225_v36 = vadd.f32 %v4536_v50, %v2220_v54 }
 0xa04   :  { %v2226_v55 = vsel %vm522_vm11, %v2225_v36, -inf  ;;  %v2509_v40 = vpop.permute.xlu2 %2508 }
 0xa05   :  { %2227 = vmax.xlane.f32.xlu1 %v2226_v55 }
 0xa0c   :  { %v2549_v10 = vpop.permute.xlu2 %2548 }
 0xa1e   :  { %2346 = vrot.lane.b32.xlu1 %v4437_v38, %s3791_s23 }
 0xa26   :  { %2484 = vrot.lane.b32.xlu1 %v4453_v49, %s3791_s23 }
 0xa2e   :  { %2739 = vrot.lane.b32.xlu1 %v4433_v58, %s3795_s28 }
 0xa36   :  { %2763 = vrot.lane.b32.xlu1 %v4448_v2, %s3795_s28 }
 0xa3e   :  { %2715 = vrot.lane.b32.xlu1 %v4408_v48, %s3794_s3 }
 0xa46   :  { %2835 = vrot.lane.b32.xlu1 %v4456_v12, %s3795_s28 }
 0xa4e   :  { %2875 = vrot.lane.b32.xlu1 %v4408_v48, %s3796_s29 }
 0xa78   :  { %v2228_v56 = vpop.xlane.xlu1 %2227 }
 0xa79   :  { %v2229_v35 = vsub.f32 %v2225_v36, %v2228_v56 }
 0xa7b   :  { %v2230_v19 = vmul.f32 1.442695, %v2229_v35 }
 0xa7d   :  { %3759 = vpow2.f32 %v2230_v19 }
 0xa83   :  { %v3760_v13 = vpop.eup %3759 }
 0xa84   :  { %v2232_v39 = vsel %vm522_vm11, %v3760_v13, 0.0 }
 0xa85   :  { %2233 = vadd.xlane.f32.xlu0 %v2232_v39 }
 0xa90   :  { %v4556_v7 = vpop.permute.xlu1 %2346 }
 0xa91   :  { %3615 = vmatpush.msk.msrb.mxu0 %vm540_vm6, %v4556_v7 }
 0xa98   :  { %v2485_v62 = vpop.permute.xlu1 %2484 }
 0xa99   :  { %2460 = vrot.lane.b32.xlu0 %v4489_v60, %s3791_s23 }
 0xaa0   :  { %v4562_v6 = vpop.permute.xlu1 %2739 }
 0xaa8   :  { %v4575_v17 = vpop.permute.xlu1 %2763 }
 0xab0   :  { %v2716_v24 = vpop.permute.xlu1 %2715 }
 0xaf8   :  { %v2234_v63 = vpop.xlane.xlu0 %2233 }
 0xaf9   :  { %3761 = vrcp.f32 %v2234_v63 }
 0xaff   :  { %v3762_v21 = vpop.eup %3761 }
 0xb00   :  { %v2236_v9 = vmul.f32 %v3762_v21, %v3760_v13 }
 0xb02   :  { %3608 = vmatmul.msk.f32.vlgmr.msra.gmra.mxu0 %vm536_vm13, %v2236_v9  ;;  %v2264_v22 = vrot.slane %v2236_v9, 1  ;;  %v2291_v5 = vrot.slane %v2236_v9, 2  ;;  %v2318_v8 = vrot.slane %v2236_v9, 3  ;;  %v2345_v14 = vrot.slane %v2236_v9, 4 }
 0xb03   :  { %3623 = vmatpush.xpose.msk.msra.mxu0 %vm342_vm5, %v4482_v28 }
 0xb04   :  { %3610 = vmatmul.msk.f32.vlgmr.msrb.gmra.mxu1 %vm536_vm13, %v2264_v22  ;;  %3612 = vmatmul.msk.f32.vlgmr.msrb.gmra.mxu2 %vm536_vm13, %v2291_v5 }
 0xb05   :  { %3614 = vmatmul.msk.f32.vlgmr.msrb.gmra.mxu3 %vm536_vm13, %v2318_v8  ;;  %3625 = vmatpush.xpose.msk.msrb.mxu1 %vm342_vm5, %v4443_v61 }
 0xb06   :  { %3627 = vmatpush.xpose.msk.msrb.mxu2 %vm342_vm5, %v4437_v38  ;;  %3629 = vmatpush.xpose.msk.msrb.mxu3 %vm342_vm5, %v2549_v10 }
 0xb0a   :  { %3616 = vmatmul.msk.f32.vlgmr.msrb.gmra.mxu0 %vm536_vm13, %v2345_v14 }
 0xb0b   :  { %3631 = vmatpush.msk.msrb.mxu0 %vm540_vm6, %v4519_v30  ;;  %v2461_v27 = vpop.permute.xlu0 %2460 }
 0xb0c   :  { %3618 = vmatmul.msk.f32.vlgmr.msra.gmra.mxu1 %vm536_vm13, %v2236_v9  ;;  %3620 = vmatmul.msk.f32.vlgmr.msra.gmra.mxu2 %vm342_vm5, %v4527_v16 }
 0xb0d   :  { %3622 = vmatmul.msk.f32.vlgmr.msra.gmra.mxu3 %vm342_vm5, %v2437_v1  ;;  %3633 = vmatpush.msk.msra.mxu1 %vm540_vm6, %v4523_v23 }
 0xb0e   :  { %3635 = vmatpush.msk.msra.mxu2 %vm540_vm6, %v4507_v4  ;;  %3637 = vmatpush.msk.msra.mxu3 %vm540_vm6, %v4513_v29 }
 0xb12   :  { %3624 = vmatmul.msk.f32.vlgmr.msra.gmra.mxu0 %vm342_vm5, %v2461_v27  ;;  %v2836_v27 = vpop.permute.xlu1 %2835 }
 0xb13   :  { %3639 = vmatpush.msk.msra.mxu0 %vm540_vm6, %v4556_v7 }
 0xb14   :  { %3626 = vmatmul.msk.f32.vlgmr.msrb.gmra.mxu1 %vm342_vm5, %v2485_v62  ;;  %3628 = vmatmul.msk.f32.vlgmr.msrb.gmra.mxu2 %vm342_vm5, %v2509_v40 }
 0xb15   :  { %3630 = vmatmul.msk.f32.vlgmr.msrb.gmra.mxu3 %vm342_vm5, %v4527_v16  ;;  %3641 = vmatpush.msk.msrb.mxu1 %vm540_vm6, %v2716_v24 }
 0xb16   :  { %3643 = vmatpush.xpose.msk.msrb.mxu2 %vm342_vm5, %v4428_v57  ;;  %3645 = vmatpush.xpose.msk.msrb.mxu3 %vm342_vm5, %v4466_v20 }
 0xb7f   :  { %v2261_v25 = vpop.f32.mrf.mxu0 }
 0xb81   :  { %v2288_v34 = vpop.f32.mrf.mxu1 }
 0xb82   :  { %v2373_v11 = vrot.slane %v2288_v34, 7 }
 0xb84   :  { %v2384_v15 = vsel %vm485_vm7, %v2261_v25, %v2373_v11 }
 0xb87   :  { %v2315_v18 = vpop.f32.mrf.mxu2  ;;  %v2369_v31 = vpop.f32.mrf.mxu0 }
 0xb88   :  { %v2376_v32 = vrot.slane %v2315_v18, 6  ;;  %v2342_v33 = vpop.f32.mrf.mxu3  ;;  %v2382_v41 = vrot.slane %v2369_v31, 4 }
 0xb89   :  { %v2379_v3 = vrot.slane %v2342_v33, 5  ;;  %v2409_v0 = vpop.f32.mrf.mxu1 }
 0xb8a   :  { %v2385_v16 = vsel %vm487_vm8, %v2384_v15, %v2376_v32 }
 0xb8b   :  { %v2386_v42 = vsel %vm489_vm9, %v2385_v16, %v2379_v3 }
 0xb8c   :  { %v2387_v43 = vsel %vm491_vm10, %v2386_v42, %v2382_v41 }
 0xb8d   :  { %v4606_v44 = vadd.f32 %v2409_v0, %v2387_v43 }
 0xb8f   :  { %v2433_v46 = vpop.f32.mrf.mxu2  ;;  %v2481_v47 = vpop.f32.mrf.mxu0 }
 0xb90   :  { %v2457_v53 = vpop.f32.mrf.mxu3  ;;  %v2536_v54 = vrot.slane %v2481_v47, 6 }
 0xb91   :  { %v2533_v26 = vrot.slane %v2457_v53, 7  ;;  %v2505_v36 = vpop.f32.mrf.mxu1 }
 0xb92   :  { %v2539_v56 = vrot.slane %v2505_v36, 5 }
 0xb93   :  { %v2544_v55 = vsel %vm485_vm7, %v2433_v46, %v2533_v26 }
 0xb94   :  { %v2545_v35 = vsel %vm487_vm8, %v2544_v55, %v2536_v54 }
 0xb95   :  { %v2546_v39 = vsel %vm489_vm9, %v2545_v35, %v2539_v56 }
 0xb97   :  { %v2529_v19 = vpop.f32.mrf.mxu2 }
 0xb98   :  { %v2542_v13 = vrot.slane %v2529_v19, 4  ;;  %v2569_v62 = vpop.f32.mrf.mxu3 }
 0xb9a   :  { %v2547_v1 = vsel %vm491_vm10, %v2546_v39, %v2542_v13 }
 0xb9b   :  { %v2570_v63 = vadd.f32 %v2569_v62, %v2547_v1 }
 0xb9d   :  { %v2572_v40 = vadd.f32 %v4536_v50, %v2570_v63 }
 0xb9f   :  { %v2573_v21 = vsel %vm522_vm11, %v2572_v40, -inf }
 0xba0   :  { %2574 = vmax.xlane.f32.xlu2 %v2573_v21 }
 0xbb8   :  { %2787 = vrot.lane.b32.xlu2 %v4489_v60, %s3795_s28 }
 0xc13   :  { %v2575_v9 = vpop.xlane.xlu2 %2574 }
 0xc14   :  { %v2576_v22 = vsub.f32 %v2572_v40, %v2575_v9 }
 0xc16   :  { %v2577_v5 = vmul.f32 1.442695, %v2576_v22 }
 0xc18   :  { %3763 = vpow2.f32 %v2577_v5 }
 0xc1b   :  { %v2788_v11 = vpop.permute.xlu2 %2787 }
 0xc1e   :  { %v3764_v8 = vpop.eup %3763 }
 0xc1f   :  { %v2579_v10 = vsel %vm522_vm11, %v3764_v8, 0.0 }
 0xc20   :  { %2580 = vadd.xlane.f32.xlu0 %v2579_v10 }
 0xc34   :  { %2811 = vrot.lane.b32.xlu0 %v4453_v49, %s3795_s28 }
 0xc3c   :  { %3066 = vrot.lane.b32.xlu0 %v4433_v58, %s3798_s14 }
 0xc44   :  { %3090 = vrot.lane.b32.xlu0 %v4448_v2, %s3798_s14 }
 0xc4c   :  { %3042 = vrot.lane.b32.xlu0 %v4408_v48, %s3797_s30 }
 0xc54   :  { %3162 = vrot.lane.b32.xlu0 %v4456_v12, %s3798_s14  ;;  %v2876_v12 = vpop.permute.xlu1 %2875 }
 0xc5c   :  { %3114 = vrot.lane.b32.xlu0 %v4489_v60, %s3798_s14 }
 0xc64   :  { %3138 = vrot.lane.b32.xlu0 %v4453_v49, %s3798_s14 }
 0xc93   :  { %v2581_v14 = vpop.xlane.xlu0 %2580 }
 0xc94   :  { %3765 = vrcp.f32 %v2581_v14 }
 0xc9a   :  { %v3766_v24 = vpop.eup %3765 }
 0xc9b   :  { %v2583_v58 = vmul.f32 %v3766_v24, %v3764_v8 }
 0xc9d   :  { %3632 = vmatmul.msk.f32.vlgmr.msrb.gmra.mxu0 %vm536_vm13, %v2583_v58  ;;  %v2607_v2 = vrot.slane %v2583_v58, 1  ;;  %v2630_v25 = vrot.slane %v2583_v58, 2  ;;  %v2653_v34 = vrot.slane %v2583_v58, 3  ;;  %v2676_v49 = vrot.slane %v2583_v58, 4 }
 0xc9e   :  { %3647 = vmatpush.xpose.msk.msrb.mxu0 %vm342_vm5, %v4482_v28 }
 0xc9f   :  { %3634 = vmatmul.msk.f32.vlgmr.msra.gmra.mxu1 %vm536_vm13, %v2607_v2  ;;  %3636 = vmatmul.msk.f32.vlgmr.msra.gmra.mxu2 %vm536_vm13, %v2630_v25 }
 0xca0   :  { %3638 = vmatmul.msk.f32.vlgmr.msra.gmra.mxu3 %vm536_vm13, %v2653_v34  ;;  %3649 = vmatpush.xpose.msk.msra.mxu1 %vm342_vm5, %v4443_v61 }
 0xca1   :  { %3651 = vmatpush.xpose.msk.msra.mxu2 %vm342_vm5, %v4437_v38  ;;  %3653 = vmatpush.xpose.msk.msra.mxu3 %vm342_vm5, %v2876_v12 }
 0xca5   :  { %3640 = vmatmul.msk.f32.vlgmr.msra.gmra.mxu0 %vm536_vm13, %v2676_v49 }
 0xca6   :  { %3655 = vmatpush.msk.msra.mxu0 %vm540_vm6, %v4519_v30  ;;  %v2812_v60 = vpop.permute.xlu0 %2811 }
 0xca7   :  { %3642 = vmatmul.msk.f32.vlgmr.msrb.gmra.mxu1 %vm536_vm13, %v2583_v58  ;;  %3644 = vmatmul.msk.f32.vlgmr.msrb.gmra.mxu2 %vm342_vm5, %v4562_v6 }
 0xca8   :  { %3646 = vmatmul.msk.f32.vlgmr.msrb.gmra.mxu3 %vm342_vm5, %v4575_v17  ;;  %3657 = vmatpush.msk.msrb.mxu1 %vm540_vm6, %v4523_v23 }
 0xca9   :  { %3659 = vmatpush.msk.msrb.mxu2 %vm540_vm6, %v4507_v4  ;;  %3661 = vmatpush.msk.msrb.mxu3 %vm540_vm6, %v4513_v29 }
 0xcad   :  { %3648 = vmatmul.msk.f32.vlgmr.msrb.gmra.mxu0 %vm342_vm5, %v2788_v11 }
 0xcae   :  { %3663 = vmatpush.msk.msrb.mxu0 %vm540_vm6, %v4556_v7  ;;  %v4659_v15 = vpop.permute.xlu0 %3066 }
 0xcaf   :  { %3650 = vmatmul.msk.f32.vlgmr.msra.gmra.mxu1 %vm342_vm5, %v2812_v60  ;;  %3652 = vmatmul.msk.f32.vlgmr.msra.gmra.mxu2 %vm342_vm5, %v2836_v27 }
 0xcb0   :  { %3654 = vmatmul.msk.f32.vlgmr.msra.gmra.mxu3 %vm342_vm5, %v4562_v6  ;;  %3667 = vmatpush.xpose.msk.msra.mxu2 %vm342_vm5, %v4428_v57 }
 0xcb1   :  { %3669 = vmatpush.xpose.msk.msra.mxu3 %vm342_vm5, %v4466_v20 }
 0xcb6   :  { %v4669_v17 = vpop.permute.xlu0 %3090 }
 0xcbe   :  { %v3043_v18 = vpop.permute.xlu0 %3042 }
 0xcbf   :  { %3665 = vmatpush.msk.msra.mxu1 %vm540_vm6, %v3043_v18 }
 0xcc6   :  { %v3163_v25 = vpop.permute.xlu0 %3162 }
 0xd1a   :  { %v2604_v31 = vpop.f32.mrf.mxu0 }
 0xd1c   :  { %v2627_v32 = vpop.f32.mrf.mxu1 }
 0xd1d   :  { %v2700_v39 = vrot.slane %v2627_v32, 7 }
 0xd1f   :  { %v2711_v62 = vsel %vm485_vm7, %v2604_v31, %v2700_v39  ;;  %v3115_v31 = vpop.permute.xlu0 %3114  ;;  %v3787_v39 = vld [vmem:[%s4798_s0] sm:$0x1f] }
 0xd22   :  { %v2650_v33 = vpop.f32.mrf.mxu2  ;;  %v2696_v3 = vpop.f32.mrf.mxu0 }
 0xd23   :  { %v2673_v0 = vpop.f32.mrf.mxu3  ;;  %v2703_v1 = vrot.slane %v2650_v33, 6  ;;  %v2709_v9 = vrot.slane %v2696_v3, 4 }
 0xd24   :  { %v2736_v16 = vpop.f32.mrf.mxu1  ;;  %v2706_v63 = vrot.slane %v2673_v0, 5 }
 0xd25   :  { %v2712_v40 = vsel %vm487_vm8, %v2711_v62, %v2703_v1 }
 0xd26   :  { %v2713_v21 = vsel %vm489_vm9, %v2712_v40, %v2706_v63 }
 0xd27   :  { %v2714_v22 = vsel %vm491_vm10, %v2713_v21, %v2709_v9  ;;  %v3804_v9 = vmov 32.0  }
 0xd28   :  { %v2737_v5 = vadd.f32 %v2736_v16, %v2714_v22 }
 0xd2a   :  { %v2760_v41 = vpop.f32.mrf.mxu2  ;;  %v2808_v42 = vpop.f32.mrf.mxu0 }
 0xd2b   :  { %v2784_v6 = vpop.f32.mrf.mxu3  ;;  %v2863_v46 = vrot.slane %v2808_v42, 6 }
 0xd2c   :  { %v2860_v43 = vrot.slane %v2784_v6, 7  ;;  %v2832_v57 = vpop.f32.mrf.mxu1 }
 0xd2d   :  { %v2866_v20 = vrot.slane %v2832_v57, 5 }
 0xd2e   :  { %v2871_v47 = vsel %vm485_vm7, %v2760_v41, %v2860_v43 }
 0xd2f   :  { %v2872_v53 = vsel %vm487_vm8, %v2871_v47, %v2863_v46 }
 0xd30   :  { %v2873_v36 = vsel %vm489_vm9, %v2872_v53, %v2866_v20 }
 0xd32   :  { %v2856_v26 = vpop.f32.mrf.mxu2 }
 0xd33   :  { %v2869_v54 = vrot.slane %v2856_v26, 4  ;;  %v2896_v56 = vpop.f32.mrf.mxu3 }
 0xd35   :  { %v2874_v55 = vsel %vm491_vm10, %v2873_v36, %v2869_v54 }
 0xd36   :  { %v2897_v35 = vadd.f32 %v2896_v56, %v2874_v55 }
 0xd38   :  { %v2899_v19 = vadd.f32 %v4536_v50, %v2897_v35  ;;  %v3714_v35 = vld [vmem:[%s4806_s10] ss:$0 sm:$0xff] }
 0xd3a   :  { %v2900_v13 = vsel %vm522_vm11, %v2899_v19, -inf }
 0xd3b   :  { %2901 = vmax.xlane.f32.xlu1 %v2900_v13 }
 0xd54   :  { %3202 = vrot.lane.b32.xlu1 %v4408_v48, %s3799_s15 }
 0xd5c   :  { %3394 = vrot.lane.b32.xlu1 %v2737_v5, %s3801_s20 }
 0xdae   :  { %v2902_v8 = vpop.xlane.xlu1 %2901 }
 0xdaf   :  { %v2903_v10 = vsub.f32 %v2899_v19, %v2902_v8  ;;  %v1737_v19 = vadd.f32 %v3714_v35, %v4480_v59 }
 0xdb1   :  { %v2904_v14 = vmul.f32 1.442695, %v2903_v10  ;;  %v1739_v13 = vmax.f32 %v1737_v19, 0.0 }
 0xdb3   :  { %3767 = vpow2.f32 %v2904_v14  ;;  %v1740_v1 = vadd.f32 %v3787_v39, %v1739_v13 }
 0xdb9   :  { %v3768_v27 = vpop.eup %3767 }
 0xdba   :  { %v2906_v24 = vsel %vm522_vm11, %v3768_v27, 0.0 }
 0xdbb   :  { %2907 = vadd.xlane.f32.xlu2 %v2906_v24 }
 0xdc6   :  { %v3203_v11 = vpop.permute.xlu1 %3202 }
 0xe2e   :  { %v2908_v58 = vpop.xlane.xlu2 %2907 }
 0xe2f   :  { %3769 = vrcp.f32 %v2908_v58 }
 0xe35   :  { %v3770_v2 = vpop.eup %3769 }
 0xe36   :  { %v2910_v34 = vmul.f32 %v3770_v2, %v3768_v27 }
 0xe38   :  { %3656 = vmatmul.msk.f32.vlgmr.msra.gmra.mxu0 %vm536_vm13, %v2910_v34  ;;  %v2934_v12 = vrot.slane %v2910_v34, 1  ;;  %v2957_v49 = vrot.slane %v2910_v34, 2  ;;  %v2980_v60 = vrot.slane %v2910_v34, 3  ;;  %v3003_v18 = vrot.slane %v2910_v34, 4 }
 0xe39   :  { %3671 = vmatpush.xpose.msk.msra.mxu0 %vm342_vm5, %v4482_v28 }
 0xe3a   :  { %3658 = vmatmul.msk.f32.vlgmr.msrb.gmra.mxu1 %vm536_vm13, %v2934_v12  ;;  %3660 = vmatmul.msk.f32.vlgmr.msrb.gmra.mxu2 %vm536_vm13, %v2957_v49 }
 0xe3b   :  { %3662 = vmatmul.msk.f32.vlgmr.msrb.gmra.mxu3 %vm536_vm13, %v2980_v60  ;;  %3673 = vmatpush.xpose.msk.msrb.mxu1 %vm342_vm5, %v4443_v61 }
 0xe3c   :  { %3675 = vmatpush.xpose.msk.msrb.mxu2 %vm342_vm5, %v4437_v38  ;;  %3677 = vmatpush.xpose.msk.msrb.mxu3 %vm342_vm5, %v3203_v11  ;;  %v3139_v38 = vpop.permute.xlu0 %3138 }
 0xe40   :  { %3664 = vmatmul.msk.f32.vlgmr.msrb.gmra.mxu0 %vm536_vm13, %v3003_v18 }
 0xe41   :  { %3679 = vmatpush.msk.msrb.mxu0 %vm540_vm6, %v4519_v30 }
 0xe42   :  { %3666 = vmatmul.msk.f32.vlgmr.msra.gmra.mxu1 %vm536_vm13, %v2910_v34  ;;  %3668 = vmatmul.msk.f32.vlgmr.msra.gmra.mxu2 %vm342_vm5, %v4659_v15 }
 0xe43   :  { %3670 = vmatmul.msk.f32.vlgmr.msra.gmra.mxu3 %vm342_vm5, %v4669_v17  ;;  %3681 = vmatpush.msk.msra.mxu1 %vm540_vm6, %v4523_v23 }
 0xe44   :  { %3683 = vmatpush.msk.msra.mxu2 %vm540_vm6, %v4507_v4  ;;  %3685 = vmatpush.msk.msra.mxu3 %vm540_vm6, %v4513_v29 }
 0xe48   :  { %3672 = vmatmul.msk.f32.vlgmr.msra.gmra.mxu0 %vm342_vm5, %v3115_v31 }
 0xe49   :  { %3687 = vmatpush.msk.msra.mxu0 %vm540_vm6, %v4556_v7 }
 0xe4a   :  { %3674 = vmatmul.msk.f32.vlgmr.msrb.gmra.mxu1 %vm342_vm5, %v3139_v38  ;;  %3676 = vmatmul.msk.f32.vlgmr.msrb.gmra.mxu2 %vm342_vm5, %v3163_v25 }
 0xe4b   :  { %3678 = vmatmul.msk.f32.vlgmr.msrb.gmra.mxu3 %vm342_vm5, %v4659_v15  ;;  %3431 = vmatpush.msrb.mxu2 %v4390_v37 }
 0xe4d   :  { %3432 = vmatpush.msrb.mxu2 %v4395_v51 }
 0xe4f   :  { %3433 = vmatpush.msrb.mxu2 %v4402_v45 }
 0xe51   :  { %3434 = vmatpush.msrb.mxu2 %v4415_v52 }
 0xeb5   :  { %v2931_v61 = vpop.f32.mrf.mxu0 }
 0xeb7   :  { %v2954_v28 = vpop.f32.mrf.mxu1 }
 0xeb8   :  { %v3027_v4 = vrot.slane %v2954_v28, 7 }
 0xeba   :  { %v3038_v17 = vsel %vm485_vm7, %v2931_v61, %v3027_v4 }
 0xebd   :  { %v2977_v29 = vpop.f32.mrf.mxu2  ;;  %v3023_v30 = vpop.f32.mrf.mxu0 }
 0xebe   :  { %v3030_v23 = vrot.slane %v2977_v29, 6  ;;  %v3000_v7 = vpop.f32.mrf.mxu3  ;;  %v3036_v37 = vrot.slane %v3023_v30, 4 }
 0xebf   :  { %v3033_v32 = vrot.slane %v3000_v7, 5  ;;  %v3063_v33 = vpop.f32.mrf.mxu1 }
 0xec0   :  { %v3039_v15 = vsel %vm487_vm8, %v3038_v17, %v3030_v23 }
 0xec1   :  { %v3040_v51 = vsel %vm489_vm9, %v3039_v15, %v3033_v32 }
 0xec2   :  { %v3041_v45 = vsel %vm491_vm10, %v3040_v51, %v3036_v37  ;;  %v3717_v37 = vld [vmem:[%s4808_s12] ss:$0 sm:$0xff] }
 0xec3   :  { %v3064_v3 = vadd.f32 %v3063_v33, %v3041_v45  ;;  %v3716_v33 = vld [vmem:[%s4807_s11] ss:$0 sm:$0xff] }
 0xec5   :  { %v3087_v52 = vpop.f32.mrf.mxu2  ;;  %v3135_v0 = vpop.f32.mrf.mxu0  ;;  %3398 = vrot.lane.b32.xlu1 %v3064_v3, %s3802_s2 }
 0xec6   :  { %v3111_v16 = vpop.f32.mrf.mxu3  ;;  %v3190_v42 = vrot.slane %v3135_v0, 6 }
 0xec7   :  { %v3187_v41 = vrot.slane %v3111_v16, 7  ;;  %v3159_v6 = vpop.f32.mrf.mxu1 }
 0xec8   :  { %v3193_v46 = vrot.slane %v3159_v6, 5 }
 0xec9   :  { %v3198_v43 = vsel %vm485_vm7, %v3087_v52, %v3187_v41 }
 0xeca   :  { %v3199_v57 = vsel %vm487_vm8, %v3198_v43, %v3190_v42 }
 0xecb   :  { %v3200_v53 = vsel %vm489_vm9, %v3199_v57, %v3193_v46 }
 0xecd   :  { %v3183_v47 = vpop.f32.mrf.mxu2 }
 0xece   :  { %v3196_v20 = vrot.slane %v3183_v47, 4  ;;  %v3223_v54 = vpop.f32.mrf.mxu3 }
 0xed0   :  { %v3201_v26 = vsel %vm491_vm10, %v3200_v53, %v3196_v20 }
 0xed1   :  { %v3224_v36 = vadd.f32 %v3223_v54, %v3201_v26 }
 0xed3   :  { %v3226_v55 = vadd.f32 %v4536_v50, %v3224_v36  ;;  %v1744_v50 = vsel %vm1743_vm3, %v1740_v1, 0.0 }
 0xed5   :  { %v3227_v56 = vsel %vm522_vm11, %v3226_v55, -inf }
 0xed6   :  { %3228 = vmax.xlane.f32.xlu2 %v3227_v56 }
 0xeee   :  { %3369 = vrot.lane.b32.xlu2 %v4408_v48, %s4811_s1 }
 0xf17   :  { %1745 = vadd.xlane.f32.xlu2 %v1744_v50 }
 0xf49   :  { %v3229_v62 = vpop.xlane.xlu2 %3228 }
 0xf4a   :  { %v3230_v63 = vsub.f32 %v3226_v55, %v3229_v62  ;;  %v3395_v55 = vpop.permute.xlu1 %3394 }
 0xf4b   :  { %v3405_v35 = vsel %vm342_vm5, %v4606_v44, %v3395_v55 }
 0xf4c   :  { %v3231_v40 = vmul.f32 1.442695, %v3230_v63 }
 0xf4e   :  { %3771 = vpow2.f32 %v3231_v40  ;;  %v3788_v40 = vld [vmem:[%s4798_s0 + $0x8] sm:$0x1f] }
 0xf4f   :  { %3773 = vrcp.f32 %v3804_v9 }
 0xf51   :  { %v3370_v48 = vpop.permute.xlu2 %3369 }
 0xf52   :  { %3689 = vmatpush.msk.msrb.mxu1 %vm540_vm6, %v3370_v48  ;;  %v3399_v56 = vpop.permute.xlu1 %3398 }
 0xf53   :  { %v3406_v19 = vsel %vm130_vm12, %v3405_v35, %v3399_v56 }
 0xf54   :  { %v3772_v21 = vpop.eup %3771 }
 0xf55   :  { %v3233_v59 = vsel %vm522_vm11, %v3772_v21, 0.0  ;;  %v3774_v22 = vpop.eup %3773 }
 0xf56   :  { %3234 = vadd.xlane.f32.xlu0 %v3233_v59  ;;  %v1748_v5 = vmul.f32 32.0, %v3774_v22  ;;  %vm1752_vm4 = vweird.f32 %v3774_v22 }
 0xf58   :  { %v1749_v8 = vsub.f32 1.0, %v1748_v5 }
 0xf5a   :  { %v1750_v10 = vmul.f32 %v3774_v22, %v1749_v8 }
 0xf5c   :  { %v1751_v14 = vadd.f32 %v3774_v22, %v1750_v10 }
 0xf5e   :  { %v4745_v27 = vsel %vm1752_vm4, %v3774_v22, %v1751_v14 }
 0xf8a   :  { %v1746_v24 = vpop.xlane.xlu2 %1745 }
 0xf8b   :  { %v1754_v58 = vmul.f32 %v4745_v27, %v1746_v24 }
 0xf8d   :  { %v1755_v2 = vsub.f32 %v1740_v1, %v1754_v58  ;;  %v3718_v1 = vld [vmem:[%s4806_s10] ss:$0 sm:$0xff] }
 0xf8f   :  { %v1756_v25 = vmul.f32 %v1755_v2, %v1755_v2 }
 0xf91   :  { %v1757_v34 = vsel %vm1743_vm3, %v1756_v25, 0.0 }
 0xf92   :  { %1758 = vadd.xlane.f32.xlu0 %v1757_v34 }
 0xfc9   :  { %v3235_v12 = vpop.xlane.xlu0 %3234 }
 0xfca   :  { %3775 = vrcp.f32 %v3235_v12 }
 0xfd0   :  { %v3776_v49 = vpop.eup %3775 }
 0xfd1   :  { %v3237_v60 = vmul.f32 %v3776_v49, %v3772_v21  ;;  %v3719_v49 = vld [vmem:[%s4807_s11] ss:$0 sm:$0xff] }
 0xfd3   :  { %3680 = vmatmul.msk.f32.vlgmr.msrb.gmra.mxu0 %vm536_vm13, %v3237_v60  ;;  %v3261_v11 = vrot.slane %v3237_v60, 1  ;;  %v3284_v18 = vrot.slane %v3237_v60, 2  ;;  %v3307_v31 = vrot.slane %v3237_v60, 3  ;;  %v3330_v38 = vrot.slane %v3237_v60, 4 }
 0xfd5   :  { %3682 = vmatmul.msk.f32.vlgmr.msra.gmra.mxu1 %vm536_vm13, %v3261_v11  ;;  %3684 = vmatmul.msk.f32.vlgmr.msra.gmra.mxu2 %vm536_vm13, %v3284_v18 }
 0xfd6   :  { %3686 = vmatmul.msk.f32.vlgmr.msra.gmra.mxu3 %vm536_vm13, %v3307_v31 }
 0xfdb   :  { %3688 = vmatmul.msk.f32.vlgmr.msra.gmra.mxu0 %vm536_vm13, %v3330_v38 }
 0xfdd   :  { %3690 = vmatmul.msk.f32.vlgmr.msrb.gmra.mxu1 %vm536_vm13, %v3237_v60 }
0x1005   :  { %v1759_v61 = vpop.xlane.xlu0 %1758 }
0x1006   :  { %v1760_v28 = vmul.f32 %v1759_v61, %v4745_v27 }
0x1008   :  { %v1761_v4 = vadd.f32 1e-05, %v1760_v28 }
0x100a   :  { %3777 = vrsqrt.f32 %v1761_v4  ;;  %vm1768_vm11 = vweird.f32 %v1761_v4 }
0x1010   :  { %v3778_v29 = vpop.eup %3777 }
0x1011   :  { %v1763_v30 = vmul.f32 %v3778_v29, %v1761_v4  ;;  %vm1769_vm6 = vweird.f32 %v3778_v29 }
0x1012   :  { %vm1770_vm0 = vmor %vm1768_vm11, %vm1769_vm6 }
0x1013   :  { %v1764_v23 = vmul.f32 %v3778_v29, %v1763_v30 }
0x1015   :  { %v1765_v7 = vmul.f32 0.5, %v1764_v23 }
0x1017   :  { %v1766_v17 = vsub.f32 1.5, %v1765_v7 }
0x1019   :  { %v1767_v32 = vmul.f32 %v3778_v29, %v1766_v17 }
0x101b   :  { %v1771_v15 = vsel %vm1770_vm0, %v3778_v29, %v1767_v32 }
0x101c   :  { %v1772_v51 = vmul.f32 %v1771_v15, %v1755_v2 }
0x101e   :  { %v1776_v45 = vmul.f32 %v3716_v33, %v1772_v51 }
0x1020   :  { %v1780_v3 = vadd.f32 %v3717_v37, %v1776_v45 }
0x1022   :  { %1781 = vst.msk [vmem:[%s4809_s13] sm:$0x1f] %vm1743_vm3, %v1780_v3 }
0x1050   :  { %v3258_v52 = vpop.f32.mrf.mxu0 }
0x1052   :  { %v3281_v0 = vpop.f32.mrf.mxu1 }
0x1053   :  { %v3354_v16 = vrot.slane %v3281_v0, 7 }
0x1055   :  { %v3365_v46 = vsel %vm485_vm7, %v3258_v52, %v3354_v16 }
0x1058   :  { %v3304_v41 = vpop.f32.mrf.mxu2  ;;  %v3350_v42 = vpop.f32.mrf.mxu0 }
0x1059   :  { %v3357_v6 = vrot.slane %v3304_v41, 6  ;;  %v3327_v43 = vpop.f32.mrf.mxu3  ;;  %v3363_v20 = vrot.slane %v3350_v42, 4 }
0x105a   :  { %v3360_v57 = vrot.slane %v3327_v43, 5  ;;  %v3390_v54 = vpop.f32.mrf.mxu1 }
0x105b   :  { %v3366_v47 = vsel %vm487_vm8, %v3365_v46, %v3357_v6 }
0x105c   :  { %v3367_v53 = vsel %vm489_vm9, %v3366_v47, %v3360_v57 }
0x105d   :  { %v3368_v26 = vsel %vm491_vm10, %v3367_v53, %v3363_v20 }
0x105e   :  { %v3391_v36 = vadd.f32 %v3390_v54, %v3368_v26 }
0x1060   :  { %3402 = vrot.lane.b32.xlu1 %v3391_v36, %s3803_s4 }
0x10d2   :  { %v3403_v13 = vpop.permute.xlu1 %3402 }
0x10d3   :  { %v3407_v39 = vsel %vm1706_vm1, %v3406_v19, %v3403_v13 }
0x10d4   :  { %3691 = vmatmul.msk.f32.vlgmr.msrb.gmra.mxu2 %vm59_vm2, %v3407_v39 }
0x1157   :  { %v3436_v50 = vpop.f32.mrf.mxu2 }
0x1158   :  { %v3437_v62 = vadd.f32 %v3718_v1, %v3436_v50 }
0x115a   :  { %v3439_v63 = vmax.f32 %v3437_v62, 0.0 }
0x115c   :  { %v3440_v48 = vadd.f32 %v3788_v40, %v3439_v63 }
0x115e   :  { %v3443_v44 = vsel %vm1743_vm3, %v3440_v48, 0.0 }
0x115f   :  { %3444 = vadd.xlane.f32.xlu1 %v3443_v44 }
0x11d2   :  { %v3445_v21 = vpop.xlane.xlu1 %3444 }
0x11d3   :  { %v3446_v59 = vmul.f32 %v3445_v21, %v4745_v27 }
0x11d5   :  { %v3447_v9 = vsub.f32 %v3440_v48, %v3446_v59 }
0x11d7   :  { %v3448_v22 = vmul.f32 %v3447_v9, %v3447_v9 }
0x11d9   :  { %v3449_v5 = vsel %vm1743_vm3, %v3448_v22, 0.0 }
0x11da   :  { %3450 = vadd.xlane.f32.xlu0 %v3449_v5 }
0x124d   :  { %v3451_v8 = vpop.xlane.xlu0 %3450 }
0x124e   :  { %v3452_v10 = vmul.f32 %v3451_v8, %v4745_v27  ;;  %v3720_v27 = vld [vmem:[%s4808_s12] ss:$0 sm:$0xff] }
0x1250   :  { %v3453_v14 = vadd.f32 1e-05, %v3452_v10 }
0x1252   :  { %3779 = vrsqrt.f32 %v3453_v14  ;;  %vm3460_vm12 = vweird.f32 %v3453_v14 }
0x1258   :  { %v3780_v24 = vpop.eup %3779 }
0x1259   :  { %v3455_v58 = vmul.f32 %v3780_v24, %v3453_v14  ;;  %vm3461_vm2 = vweird.f32 %v3780_v24 }
0x125a   :  { %vm3462_vm5 = vmor %vm3460_vm12, %vm3461_vm2 }
0x125b   :  { %v3456_v2 = vmul.f32 %v3780_v24, %v3455_v58 }
0x125d   :  { %v3457_v25 = vmul.f32 0.5, %v3456_v2 }
0x125f   :  { %v3458_v34 = vsub.f32 1.5, %v3457_v25 }
0x1261   :  { %v3459_v12 = vmul.f32 %v3780_v24, %v3458_v34 }
0x1263   :  { %v3463_v60 = vsel %vm3462_vm5, %v3780_v24, %v3459_v12 }
0x1264   :  { %v3464_v11 = vmul.f32 %v3463_v60, %v3447_v9 }
0x1266   :  { %v3468_v18 = vmul.f32 %v3719_v49, %v3464_v11 }
0x1268   :  { %v3472_v31 = vadd.f32 %v3720_v27, %v3468_v18 }
0x126a   :  { %3692 = vst.msk [vmem:[%s4809_s13 + $0x8] sm:$0x1f] %vm1743_vm3, %v3472_v31 }

</bundles_post_ra>
